<compile_context>
chip_gen: v6e
topology: v6e:2x2x1
jax: 0.10.0
libtpu: 0.0.40
codegen_flags: <defaults>
</compile_context>

<pallas_src>
import functools

import numpy as np
import jax
import jax.numpy as jnp
from jax import lax
from jax.experimental import pallas as pl
from jax.experimental.pallas import tpu as pltpu

EPS = 1e-5

CONFIG = {
    'model': {'input_channels': 3, 'num_classes': 2, 'image_shape': [64, 64, 3]},
    'backbone': {
        'conv1': {'out_channels': 16, 'kernel_size': 3, 'stride': 2, 'padding': 1},
        'layer1': {'in_channels': 16, 'out_channels': 16, 'blocks': 2},
        'layer2': {'in_channels': 16, 'out_channels': 32, 'blocks': 1, 'stride': 2},
        'layer3': {'in_channels': 32, 'out_channels': 48, 'blocks': 1, 'stride': 2},
        'layer4': {'in_channels': 48, 'out_channels': 64, 'blocks': 1, 'stride': 2},
    },
    'fpn': {
        'lateral': {'out_channels': 32},
        'smooth': {'out_channels': 32, 'kernel_size': 3, 'padding': 1},
    },
    'roi_align': {'output_size': 7},
    'semantic_lane_head': {
        'in_channels': 32,
        'conv': {'out_channels': 32, 'kernel_size': 3, 'padding': 1},
        'deconv': {'out_channels': 32, 'kernel_size': 2, 'stride': 2},
        'mask_fcn_logits': {'kernel_size': 1},
    },
}


def _round_up(x, m):
    return (x + m - 1) // m * m


# ---------------------------------------------------------------------------
# Pallas fused matmul kernels: out = maybe_relu(A @ B + shift [+ residual])
# A, B are bf16; accumulation / epilogue in f32.
# ---------------------------------------------------------------------------
def _mm_bias_kernel(a_ref, b_ref, t_ref, o_ref, *, relu):
    acc = jnp.dot(a_ref[...], b_ref[...], preferred_element_type=jnp.float32)
    acc = acc + t_ref[...]
    if relu:
        acc = jnp.maximum(acc, 0.0)
    o_ref[...] = acc


def _mm_bias_res_kernel(a_ref, b_ref, t_ref, r_ref, o_ref, *, relu):
    acc = jnp.dot(a_ref[...], b_ref[...], preferred_element_type=jnp.float32)
    acc = acc + t_ref[...] + r_ref[...]
    if relu:
        acc = jnp.maximum(acc, 0.0)
    o_ref[...] = acc


def _choose_tm(M):
    if M > 1024:
        return 512
    if M > 256:
        return 256
    return 128


def fused_matmul(a, b, shift, *, relu=False, residual=None):
    """a: (M, K) any float. b: prepped bf16 (Kp, N), Kp >= K. shift: f32 (1, N).
    residual: optional f32 (M, N) added in the epilogue."""
    M, K = a.shape
    Kp, N = b.shape
    TM = _choose_tm(M)
    Mp = _round_up(M, TM)

    a = a.astype(jnp.bfloat16)
    if Mp != M or Kp != K:
        a = jnp.pad(a, ((0, Mp - M), (0, Kp - K)))

    args = [a, b, shift]
    in_specs = [
        pl.BlockSpec((TM, Kp), lambda i: (i, 0)),
        pl.BlockSpec((Kp, N), lambda i: (0, 0)),
        pl.BlockSpec((1, N), lambda i: (0, 0)),
    ]
    if residual is not None:
        r = residual.astype(jnp.float32)
        if Mp != M:
            r = jnp.pad(r, ((0, Mp - M), (0, 0)))
        args.append(r)
        in_specs.append(pl.BlockSpec((TM, N), lambda i: (i, 0)))
        kernel = functools.partial(_mm_bias_res_kernel, relu=relu)
    else:
        kernel = functools.partial(_mm_bias_kernel, relu=relu)

    out = pl.pallas_call(
        kernel,
        out_shape=jax.ShapeDtypeStruct((Mp, N), jnp.float32),
        grid_spec=pltpu.PrefetchScalarGridSpec(
            num_scalar_prefetch=0,
            grid=(Mp // TM,),
            in_specs=in_specs,
            out_specs=pl.BlockSpec((TM, N), lambda i: (i, 0)),
        ),
        compiler_params=pltpu.CompilerParams(dimension_semantics=("parallel",)),
    )(*args)
    if Mp != M:
        out = out[:M]
    return out


# ---------------------------------------------------------------------------
# Conv / deconv / pooling wrappers (conv math runs inside the Pallas kernel)
# ---------------------------------------------------------------------------
def conv2d(x, prep, *, stride=1, padding=0, relu=False, residual=None):
    """x: (N,H,W,Cin) NHWC. prep: {'w': (Kp,Cout) bf16, 't': (1,Cout) f32, 'kh', 'kw'}."""
    kh, kw = prep['kh'], prep['kw']
    N, H, W, Cin = x.shape
    Cout = prep['w'].shape[1]
    if padding > 0:
        x = jnp.pad(x, ((0, 0), (padding, padding), (padding, padding), (0, 0)))
    Ho = (H + 2 * padding - kh) // stride + 1
    Wo = (W + 2 * padding - kw) // stride + 1
    if kh == 1 and kw == 1 and stride == 1:
        cols = x.reshape(N * Ho * Wo, Cin)
    else:
        patches = []
        for i in range(kh):
            for j in range(kw):
                patches.append(x[:, i::stride, j::stride, :][:, :Ho, :Wo, :])
        cols = jnp.concatenate(patches, axis=-1).reshape(N * Ho * Wo, kh * kw * Cin)
    res = None
    if residual is not None:
        res = residual.reshape(N * Ho * Wo, Cout)
    out = fused_matmul(cols, prep['w'], prep['t'], relu=relu, residual=res)
    return out.reshape(N, Ho, Wo, Cout)


def deconv2x2_s2(x, prep, relu=True):
    """ConvTranspose2d(k=2, s=2): all 4 taps merged into one matmul (N=4*Cout=128)."""
    N, H, W, Cin = x.shape
    Cout = prep['cout']
    out = fused_matmul(x.reshape(N * H * W, Cin), prep['w'], prep['t'], relu=relu)
    out = out.reshape(N, H, W, 2, 2, Cout)
    out = jnp.transpose(out, (0, 1, 3, 2, 4, 5)).reshape(N, 2 * H, 2 * W, Cout)
    return out


def maxpool_3x3_s2_p1(x):
    return lax.reduce_window(
        x, -jnp.inf, lax.max,
        window_dimensions=(1, 3, 3, 1),
        window_strides=(1, 2, 2, 1),
        padding=((0, 0), (1, 1), (1, 1), (0, 0)))


def upsample_nearest_2x(x):
    return jnp.repeat(jnp.repeat(x, 2, axis=1), 2, axis=2)


# ---------------------------------------------------------------------------
# Device-side PyramidRoIAlign (vectorized; torchvision RoIAlign semantics:
# sampling_ratio=0, aligned=False). Keeps the reference's roi column handling:
# routing reads cols 1..4 as (y1,x1,y2,x2); sampling reads them as (x1,y1,x2,y2).
# ---------------------------------------------------------------------------
_MAX_GRID = 4  # TODO(synk): exact as long as ceil(roi_dim/pool) <= 4 per axis.


def roi_align_dev(feat, rois, P, spatial_scale, G=_MAX_GRID):
    """feat: (N,H,W,C) NHWC f32. rois: (R,5) = [batch, x1, y1, x2, y2]."""
    N, H, W, C = feat.shape
    R = rois.shape[0]
    b = rois[:, 0].astype(jnp.int32)
    sw = rois[:, 1] * spatial_scale
    sh = rois[:, 2] * spatial_scale
    ew = rois[:, 3] * spatial_scale
    eh = rois[:, 4] * spatial_scale
    roi_w = jnp.maximum(ew - sw, 1.0)
    roi_h = jnp.maximum(eh - sh, 1.0)
    bw = roi_w / P
    bh = roi_h / P
    gh = jnp.maximum(jnp.ceil(roi_h / P), 1.0)
    gw = jnp.maximum(jnp.ceil(roi_w / P), 1.0)

    pidx = jnp.arange(P, dtype=jnp.float32)
    gidx = jnp.arange(G, dtype=jnp.float32)
    # sample coordinates: (R, P, G)
    y = (sh[:, None, None] + pidx[None, :, None] * bh[:, None, None]
         + (gidx[None, None, :] + 0.5) * bh[:, None, None] / gh[:, None, None])
    x = (sw[:, None, None] + pidx[None, :, None] * bw[:, None, None]
         + (gidx[None, None, :] + 0.5) * bw[:, None, None] / gw[:, None, None])

    my = ((gidx[None, None, :] < gh[:, None, None]) & (y >= -1.0) & (y <= H)).astype(jnp.float32)
    mx = ((gidx[None, None, :] < gw[:, None, None]) & (x >= -1.0) & (x <= W)).astype(jnp.float32)

    yc = jnp.clip(y, 0.0, H - 1.0)
    xc = jnp.clip(x, 0.0, W - 1.0)
    y0 = jnp.floor(yc).astype(jnp.int32)
    x0 = jnp.floor(xc).astype(jnp.int32)
    y1 = jnp.minimum(y0 + 1, H - 1)
    x1 = jnp.minimum(x0 + 1, W - 1)
    ly = yc - y0.astype(jnp.float32)
    lx = xc - x0.astype(jnp.float32)
    hy = 1.0 - ly
    hx = 1.0 - lx

    wy0 = hy * my
    wy1 = ly * my
    wx0 = hx * mx
    wx1 = lx * mx

    ridx = b[:, None, None, None, None]  # (R,1,1,1,1)

    def gather(yi, xi):
        return feat[ridx, yi[:, :, :, None, None], xi[:, None, None, :, :], :]

    c00 = gather(y0, x0)
    c01 = gather(y0, x1)
    c10 = gather(y1, x0)
    c11 = gather(y1, x1)

    wy0e = wy0[:, :, :, None, None, None]
    wy1e = wy1[:, :, :, None, None, None]
    wx0e = wx0[:, None, None, :, :, None]
    wx1e = wx1[:, None, None, :, :, None]

    val = wy0e * (wx0e * c00 + wx1e * c01) + wy1e * (wx0e * c10 + wx1e * c11)
    acc = val.sum(axis=(2, 4))                          # (R, P, P, C)
    count = (gh * gw)[:, None, None, None]
    return acc / count


def pyramid_roi_align_dev(rois, feats, pool_size, image_shape):
    if rois.shape[1] != 5:
        raise ValueError('RoIs should be in the format [batch_index, x1, y1, x2, y2]')
    y1, x1, y2, x2 = rois[:, 1], rois[:, 2], rois[:, 3], rois[:, 4]
    h = y2 - y1
    w = x2 - x1
    image_area = float(image_shape[0] * image_shape[1])
    roi_level = 4.0 + jnp.log2(jnp.sqrt(h * w) / (224.0 / np.sqrt(image_area)))
    roi_level = jnp.clip(jnp.round(roi_level), 2, 5).astype(jnp.int32)
    R = rois.shape[0]
    C = feats[0].shape[-1]
    out = jnp.zeros((R, pool_size, pool_size, C), jnp.float32)
    for i, level in enumerate(range(2, 6)):
        pooled = roi_align_dev(feats[i], rois, pool_size, 1.0 / (2 ** level))
        out = jnp.where((roi_level == level)[:, None, None, None], pooled, out)
    return out


# ---------------------------------------------------------------------------
# Parameters: deterministic init (PyTorch-layout weights), then one-time prep.
# ---------------------------------------------------------------------------
def init_params(config, key):
    keys = iter(jax.random.split(key, 96))

    def conv_p(cout, cin, k):
        w = jax.random.normal(next(keys), (cout, cin, k, k), jnp.float32) / np.sqrt(cin * k * k)
        b = 0.01 * jax.random.normal(next(keys), (cout,), jnp.float32)
        return (w, b)

    def bn_p(c):
        gamma = 1.0 + 0.1 * jax.random.normal(next(keys), (c,), jnp.float32)
        beta = 0.1 * jax.random.normal(next(keys), (c,), jnp.float32)
        mean = 0.05 * jax.random.normal(next(keys), (c,), jnp.float32)
        var = jnp.ones((c,), jnp.float32)
        return (gamma, beta, mean, var)

    bb = config['backbone']
    P = {}
    P['conv1'] = conv_p(bb['conv1']['out_channels'], config['model']['input_channels'],
                        bb['conv1']['kernel_size'])
    P['bn1'] = bn_p(bb['conv1']['out_channels'])

    def make_layer(cin, cout, blocks):
        layers = [(conv_p(cout, cin, 3), bn_p(cout))]
        for _ in range(1, blocks):
            layers.append((conv_p(cout, cout, 3), bn_p(cout)))
        return layers

    for name in ('layer1', 'layer2', 'layer3', 'layer4'):
        lc = bb[name]
        P[name] = make_layer(lc['in_channels'], lc['out_channels'], lc['blocks'])

    lat_out = config['fpn']['lateral']['out_channels']
    sm = config['fpn']['smooth']
    bouts = [bb['layer1']['out_channels'], bb['layer2']['out_channels'],
             bb['layer3']['out_channels'], bb['layer4']['out_channels']]
    P['lateral4'] = conv_p(lat_out, bouts[3], 1)
    P['lateral3'] = conv_p(lat_out, bouts[2], 1)
    P['lateral2'] = conv_p(lat_out, bouts[1], 1)
    P['lateral1'] = conv_p(lat_out, bouts[0], 1)
    for n in ('smooth1', 'smooth2', 'smooth3', 'smooth4'):
        P[n] = conv_p(sm['out_channels'], lat_out, sm['kernel_size'])

    mh = config['semantic_lane_head']
    cmid = mh['conv']['out_channels']
    P['mh_conv1'] = conv_p(cmid, mh['in_channels'], mh['conv']['kernel_size'])
    P['mh_conv2'] = conv_p(cmid, cmid, mh['conv']['kernel_size'])
    P['mh_conv3'] = conv_p(cmid, cmid, mh['conv']['kernel_size'])
    P['mh_conv4'] = conv_p(cmid, cmid, mh['conv']['kernel_size'])
    dk = mh['deconv']['kernel_size']
    dout = mh['deconv']['out_channels']
    wdec = jax.random.normal(next(keys), (cmid, dout, dk, dk), jnp.float32) / np.sqrt(cmid * dk * dk)
    bdec = 0.01 * jax.random.normal(next(keys), (dout,), jnp.float32)
    P['mh_deconv'] = (wdec, bdec)
    P['mh_logits'] = conv_p(config['model']['num_classes'], dout,
                            mh['mask_fcn_logits']['kernel_size'])
    return P


def _prep_conv(conv, bn=None):
    """Fold BN scale into weight columns, bias/BN shift into `t`; bf16 weights."""
    w, b = conv
    Cout, Cin, kh, kw = w.shape
    if bn is not None:
        gamma, beta, mean, var = bn
        s = gamma / jnp.sqrt(var + EPS)
        t = (b - mean) * s + beta
    else:
        s = jnp.ones((Cout,), jnp.float32)
        t = b
    K = kh * kw * Cin
    w_mat = jnp.transpose(w, (2, 3, 1, 0)).reshape(K, Cout) * s[None, :]
    Kp = _round_up(K, 8)
    if Kp != K:
        w_mat = jnp.pad(w_mat, ((0, Kp - K), (0, 0)))
    return {'w': w_mat.astype(jnp.bfloat16),
            't': t.reshape(1, Cout).astype(jnp.float32),
            'kh': kh, 'kw': kw}


def _prep_deconv(wd, bd):
    """Merge the 4 ConvTranspose2d(k=2,s=2) taps into one (Cin, 4*Cout) matrix."""
    Cin, Cout, _, _ = wd.shape
    w_mat = jnp.concatenate([wd[:, :, 0, 0], wd[:, :, 0, 1],
                             wd[:, :, 1, 0], wd[:, :, 1, 1]], axis=1)
    t = jnp.tile(bd, 4).reshape(1, 4 * Cout)
    return {'w': w_mat.astype(jnp.bfloat16), 't': t.astype(jnp.float32), 'cout': Cout}


def prep_params(P):
    PP = {'conv1': _prep_conv(P['conv1'], P['bn1'])}
    for name in ('layer1', 'layer2', 'layer3', 'layer4'):
        PP[name] = [_prep_conv(conv, bn) for conv, bn in P[name]]
    for n in ('lateral1', 'lateral2', 'lateral3', 'lateral4',
              'smooth1', 'smooth2', 'smooth3', 'smooth4',
              'mh_conv1', 'mh_conv2', 'mh_conv3', 'mh_conv4', 'mh_logits'):
        PP[n] = _prep_conv(P[n])
    PP['mh_deconv'] = _prep_deconv(*P['mh_deconv'])
    return PP


# ---------------------------------------------------------------------------
# Forward pass (all on device, one jit)
# ---------------------------------------------------------------------------
def backbone_forward(x, PP, cfg):
    bb = cfg['backbone']
    x = conv2d(x, PP['conv1'], stride=bb['conv1']['stride'],
               padding=bb['conv1']['padding'], relu=True)
    c1 = maxpool_3x3_s2_p1(x)

    def layer(xin, name):
        lc = bb[name]
        entries = PP[name]
        out = conv2d(xin, entries[0], stride=lc.get('stride', 1), padding=1, relu=True)
        for e in entries[1:]:
            out = conv2d(out, e, stride=1, padding=1, relu=True)
        return out

    c2 = layer(c1, 'layer1')
    c3 = layer(c2, 'layer2')
    c4 = layer(c3, 'layer3')
    c5 = layer(c4, 'layer4')
    return c2, c3, c4, c5


def fpn_forward(feats, PP, cfg):
    c1, c2, c3, c4 = feats  # = backbone (c2, c3, c4, c5)
    pad = cfg['fpn']['smooth']['padding']
    # Lateral 1x1 convs with the nearest-upsampled add fused into the epilogue.
    p4 = conv2d(c4, PP['lateral4'])
    p3 = conv2d(c3, PP['lateral3'], residual=upsample_nearest_2x(p4))
    p2 = conv2d(c2, PP['lateral2'], residual=upsample_nearest_2x(p3))
    p1 = conv2d(c1, PP['lateral1'], residual=upsample_nearest_2x(p2))
    p4 = conv2d(p4, PP['smooth4'], padding=pad)
    p3 = conv2d(p3, PP['smooth3'], padding=pad)
    p2 = conv2d(p2, PP['smooth2'], padding=pad)
    p1 = conv2d(p1, PP['smooth1'], padding=pad)
    return p1, p2, p3, p4


def mask_head_forward(x, PP, cfg):
    pad = cfg['semantic_lane_head']['conv']['padding']
    for n in ('mh_conv1', 'mh_conv2', 'mh_conv3', 'mh_conv4'):
        x = conv2d(x, PP[n], padding=pad, relu=True)
    x = deconv2x2_s2(x, PP['mh_deconv'], relu=True)
    x = conv2d(x, PP['mh_logits'])
    return x


def make_forward(PP, cfg):
    pool = cfg['roi_align']['output_size']
    img_shape = cfg['model']['image_shape']

    @jax.jit
    def fwd(images_nchw, rois):
        x = jnp.transpose(images_nchw, (0, 2, 3, 1)).astype(jnp.float32)  # NCHW -> NHWC
        feats = backbone_forward(x, PP, cfg)
        p1, p2, p3, p4 = fpn_forward(feats, PP, cfg)
        aligned = pyramid_roi_align_dev(rois, (p1, p2, p3, p4), pool, img_shape)  # (R,P,P,C)
        logits = mask_head_forward(aligned, PP, cfg)
        return jnp.transpose(logits, (0, 3, 1, 2))                         # NHWC -> NCHW

    return fwd


# ---------------------------------------------------------------------------
if __name__ == "__main__":
    key = jax.random.PRNGKey(0)
    k_img, k_roi, k_par = jax.random.split(key, 3)

    B = 2
    Cin = CONFIG['model']['input_channels']
    H = W = CONFIG['model']['image_shape'][0]          # 64
    images = jax.random.normal(k_img, (B, Cin, H, W), jnp.float32)         # NCHW

    # rois: [batch_index, c1, c2, c3, c4]; sizes chosen so all 4 FPN levels are hit.
    R = 6
    sizes = jnp.array([0.8, 2.0, 3.5, 8.0, 20.0, 1.2], jnp.float32)
    centers = 12.0 + 40.0 * jax.random.uniform(k_roi, (R, 2), jnp.float32)
    batch_idx = jnp.array([0., 1., 0., 1., 0., 1.], jnp.float32)
    y1 = centers[:, 0] - sizes / 2
    y2 = centers[:, 0] + sizes / 2
    x1 = centers[:, 1] - sizes / 2
    x2 = centers[:, 1] + sizes / 2
    rois = jnp.stack([batch_idx, y1, x1, y2, x2], axis=1)

    params = init_params(CONFIG, k_par)
    prepped = prep_params(params)          # one-time weight prep (fold BN, bf16, reshape)
    forward = make_forward(prepped, CONFIG)

    out = jax.block_until_ready(forward(images, rois))

    P = CONFIG['roi_align']['output_size']
    assert out.shape == (R, CONFIG['model']['num_classes'], 2 * P, 2 * P), out.shape
    assert np.isfinite(np.asarray(out)).all()
    print("KERNEL_OK")
</pallas_src>

<mosaic_0001>
module attributes {stable_mosaic.version = 11 : i64} {
  func.func @_mm_bias_kernel(%arg0: i32, %arg1: memref<512x32xbf16, #tpu.memory_space<vmem>>, %arg2: memref<32x16xbf16, #tpu.memory_space<vmem>>, %arg3: memref<1x16xf32, #tpu.memory_space<vmem>>, %arg4: memref<512x16xf32, #tpu.memory_space<vmem>>) attributes {dimension_semantics = [#tpu.dimension_semantics<parallel>], iteration_bounds = array<i64: 4>, scalar_prefetch = 0 : i64, scratch_operands = 0 : i64, tpu.core_type = #tpu.core_type<tc>, window_params = [{transform_indices = @transform_0, window_bounds = array<i64: 512, 32>}, {pipeline_mode = #tpu.pipeline_mode<synchronous>, transform_indices = @transform_1, window_bounds = array<i64: 32, 16>}, {pipeline_mode = #tpu.pipeline_mode<synchronous>, transform_indices = @transform_2, window_bounds = array<i64: 1, 16>}, {transform_indices = @transform_3, window_bounds = array<i64: 512, 16>}]} {
    %c0 = arith.constant 0 : index
    %c0_0 = arith.constant 0 : index
    %0 = vector.load %arg1[%c0, %c0_0] : memref<512x32xbf16, #tpu.memory_space<vmem>>, vector<512x32xbf16>
    %c0_1 = arith.constant 0 : index
    %c0_2 = arith.constant 0 : index
    %1 = vector.load %arg2[%c0_1, %c0_2] : memref<32x16xbf16, #tpu.memory_space<vmem>>, vector<32x16xbf16>
    %cst = arith.constant dense<0.000000e+00> : vector<512x16xf32>
    %2 = tpu.matmul %0, %1, %cst {dimension_numbers = #tpu.dot_dimension_numbers<[1], [0], [0], [1], [0, 0, 1, 1], [], []>} : vector<512x32xbf16>, vector<32x16xbf16>, vector<512x16xf32> -> vector<512x16xf32>
    %c0_3 = arith.constant 0 : index
    %c0_4 = arith.constant 0 : index
    %3 = vector.load %arg3[%c0_3, %c0_4] : memref<1x16xf32, #tpu.memory_space<vmem>>, vector<1x16xf32>
    %4 = vector.broadcast %3 : vector<1x16xf32> to vector<512x16xf32>
    %5 = arith.addf %2, %4 : vector<512x16xf32>
    %cst_5 = arith.constant 0.000000e+00 : f32
    %6 = vector.broadcast %cst_5 : f32 to vector<512x16xf32>
    %7 = arith.maximumf %5, %6 : vector<512x16xf32>
    %c0_6 = arith.constant 0 : index
    %c0_7 = arith.constant 0 : index
    %8 = vector.load %arg4[%c0_6, %c0_7] : memref<512x16xf32, #tpu.memory_space<vmem>>, vector<512x16xf32>
    tpu.vector_store %arg4[%c0_6, %c0_7], %7 {strides = array<i32>} : memref<512x16xf32, #tpu.memory_space<vmem>>, vector<512x16xf32>,
    return
  }
  func.func @transform_0(%arg0: i32) -> (i32, i32) {
    %c0_i32 = arith.constant 0 : i32
    %c0_i32_0 = arith.constant 0 : i32
    return %arg0, %c0_i32 : i32, i32
  }
  func.func @transform_1(%arg0: i32) -> (i32, i32) {
    %c0_i32 = arith.constant 0 : i32
    %c0_i32_0 = arith.constant 0 : i32
    %c0_i32_1 = arith.constant 0 : i32
    return %c0_i32, %c0_i32_0 : i32, i32
  }
  func.func @transform_2(%arg0: i32) -> (i32, i32) {
    %c0_i32 = arith.constant 0 : i32
    %c0_i32_0 = arith.constant 0 : i32
    %c0_i32_1 = arith.constant 0 : i32
    return %c0_i32, %c0_i32_0 : i32, i32
  }
  func.func @transform_3(%arg0: i32) -> (i32, i32) {
    %c0_i32 = arith.constant 0 : i32
    %c0_i32_0 = arith.constant 0 : i32
    return %arg0, %c0_i32 : i32, i32
  }
}

module attributes {stable_mosaic.version = 11 : i64} {
  func.func @_mm_bias_kernel(%arg0: i32, %arg1: memref<256x144xbf16, #tpu.memory_space<vmem>>, %arg2: memref<144x16xbf16, #tpu.memory_space<vmem>>, %arg3: memref<1x16xf32, #tpu.memory_space<vmem>>, %arg4: memref<256x16xf32, #tpu.memory_space<vmem>>) attributes {dimension_semantics = [#tpu.dimension_semantics<parallel>], iteration_bounds = array<i64: 2>, scalar_prefetch = 0 : i64, scratch_operands = 0 : i64, tpu.core_type = #tpu.core_type<tc>, window_params = [{transform_indices = @transform_0, window_bounds = array<i64: 256, 144>}, {pipeline_mode = #tpu.pipeline_mode<synchronous>, transform_indices = @transform_1, window_bounds = array<i64: 144, 16>}, {pipeline_mode = #tpu.pipeline_mode<synchronous>, transform_indices = @transform_2, window_bounds = array<i64: 1, 16>}, {transform_indices = @transform_3, window_bounds = array<i64: 256, 16>}]} {
    %c0 = arith.constant 0 : index
    %c0_0 = arith.constant 0 : index
    %0 = vector.load %arg1[%c0, %c0_0] : memref<256x144xbf16, #tpu.memory_space<vmem>>, vector<256x144xbf16>
    %c0_1 = arith.constant 0 : index
    %c0_2 = arith.constant 0 : index
    %1 = vector.load %arg2[%c0_1, %c0_2] : memref<144x16xbf16, #tpu.memory_space<vmem>>, vector<144x16xbf16>
    %cst = arith.constant dense<0.000000e+00> : vector<256x16xf32>
    %2 = tpu.matmul %0, %1, %cst {dimension_numbers = #tpu.dot_dimension_numbers<[1], [0], [0], [1], [0, 0, 1, 1], [], []>} : vector<256x144xbf16>, vector<144x16xbf16>, vector<256x16xf32> -> vector<256x16xf32>
    %c0_3 = arith.constant 0 : index
    %c0_4 = arith.constant 0 : index
    %3 = vector.load %arg3[%c0_3, %c0_4] : memref<1x16xf32, #tpu.memory_space<vmem>>, vector<1x16xf32>
    %4 = vector.broadcast %3 : vector<1x16xf32> to vector<256x16xf32>
    %5 = arith.addf %2, %4 : vector<256x16xf32>
    %cst_5 = arith.constant 0.000000e+00 : f32
    %6 = vector.broadcast %cst_5 : f32 to vector<256x16xf32>
    %7 = arith.maximumf %5, %6 : vector<256x16xf32>
    %c0_6 = arith.constant 0 : index
    %c0_7 = arith.constant 0 : index
    %8 = vector.load %arg4[%c0_6, %c0_7] : memref<256x16xf32, #tpu.memory_space<vmem>>, vector<256x16xf32>
    tpu.vector_store %arg4[%c0_6, %c0_7], %7 {strides = array<i32>} : memref<256x16xf32, #tpu.memory_space<vmem>>, vector<256x16xf32>,
    return
  }
  func.func @transform_0(%arg0: i32) -> (i32, i32) {
    %c0_i32 = arith.constant 0 : i32
    %c0_i32_0 = arith.constant 0 : i32
    return %arg0, %c0_i32 : i32, i32
  }
  func.func @transform_1(%arg0: i32) -> (i32, i32) {
    %c0_i32 = arith.constant 0 : i32
    %c0_i32_0 = arith.constant 0 : i32
    %c0_i32_1 = arith.constant 0 : i32
    return %c0_i32, %c0_i32_0 : i32, i32
  }
  func.func @transform_2(%arg0: i32) -> (i32, i32) {
    %c0_i32 = arith.constant 0 : i32
    %c0_i32_0 = arith.constant 0 : i32
    %c0_i32_1 = arith.constant 0 : i32
    return %c0_i32, %c0_i32_0 : i32, i32
  }
  func.func @transform_3(%arg0: i32) -> (i32, i32) {
    %c0_i32 = arith.constant 0 : i32
    %c0_i32_0 = arith.constant 0 : i32
    return %arg0, %c0_i32 : i32, i32
  }
}

module attributes {stable_mosaic.version = 11 : i64} {
  func.func @_mm_bias_kernel(%arg0: i32, %arg1: memref<128x144xbf16, #tpu.memory_space<vmem>>, %arg2: memref<144x32xbf16, #tpu.memory_space<vmem>>, %arg3: memref<1x32xf32, #tpu.memory_space<vmem>>, %arg4: memref<128x32xf32, #tpu.memory_space<vmem>>) attributes {dimension_semantics = [#tpu.dimension_semantics<parallel>], iteration_bounds = array<i64: 1>, scalar_prefetch = 0 : i64, scratch_operands = 0 : i64, tpu.core_type = #tpu.core_type<tc>, window_params = [{transform_indices = @transform_0, window_bounds = array<i64: 128, 144>}, {pipeline_mode = #tpu.pipeline_mode<synchronous>, transform_indices = @transform_1, window_bounds = array<i64: 144, 32>}, {pipeline_mode = #tpu.pipeline_mode<synchronous>, transform_indices = @transform_2, window_bounds = array<i64: 1, 32>}, {transform_indices = @transform_3, window_bounds = array<i64: 128, 32>}]} {
    %c0 = arith.constant 0 : index
    %c0_0 = arith.constant 0 : index
    %0 = vector.load %arg1[%c0, %c0_0] : memref<128x144xbf16, #tpu.memory_space<vmem>>, vector<128x144xbf16>
    %c0_1 = arith.constant 0 : index
    %c0_2 = arith.constant 0 : index
    %1 = vector.load %arg2[%c0_1, %c0_2] : memref<144x32xbf16, #tpu.memory_space<vmem>>, vector<144x32xbf16>
    %cst = arith.constant dense<0.000000e+00> : vector<128x32xf32>
    %2 = tpu.matmul %0, %1, %cst {dimension_numbers = #tpu.dot_dimension_numbers<[1], [0], [0], [1], [0, 0, 1, 1], [], []>} : vector<128x144xbf16>, vector<144x32xbf16>, vector<128x32xf32> -> vector<128x32xf32>
    %c0_3 = arith.constant 0 : index
    %c0_4 = arith.constant 0 : index
    %3 = vector.load %arg3[%c0_3, %c0_4] : memref<1x32xf32, #tpu.memory_space<vmem>>, vector<1x32xf32>
    %4 = vector.broadcast %3 : vector<1x32xf32> to vector<128x32xf32>
    %5 = arith.addf %2, %4 : vector<128x32xf32>
    %cst_5 = arith.constant 0.000000e+00 : f32
    %6 = vector.broadcast %cst_5 : f32 to vector<128x32xf32>
    %7 = arith.maximumf %5, %6 : vector<128x32xf32>
    %c0_6 = arith.constant 0 : index
    %c0_7 = arith.constant 0 : index
    %8 = vector.load %arg4[%c0_6, %c0_7] : memref<128x32xf32, #tpu.memory_space<vmem>>, vector<128x32xf32>
    tpu.vector_store %arg4[%c0_6, %c0_7], %7 {strides = array<i32>} : memref<128x32xf32, #tpu.memory_space<vmem>>, vector<128x32xf32>,
    return
  }
  func.func @transform_0(%arg0: i32) -> (i32, i32) {
    %c0_i32 = arith.constant 0 : i32
    %c0_i32_0 = arith.constant 0 : i32
    return %arg0, %c0_i32 : i32, i32
  }
  func.func @transform_1(%arg0: i32) -> (i32, i32) {
    %c0_i32 = arith.constant 0 : i32
    %c0_i32_0 = arith.constant 0 : i32
    %c0_i32_1 = arith.constant 0 : i32
    return %c0_i32, %c0_i32_0 : i32, i32
  }
  func.func @transform_2(%arg0: i32) -> (i32, i32) {
    %c0_i32 = arith.constant 0 : i32
    %c0_i32_0 = arith.constant 0 : i32
    %c0_i32_1 = arith.constant 0 : i32
    return %c0_i32, %c0_i32_0 : i32, i32
  }
  func.func @transform_3(%arg0: i32) -> (i32, i32) {
    %c0_i32 = arith.constant 0 : i32
    %c0_i32_0 = arith.constant 0 : i32
    return %arg0, %c0_i32 : i32, i32
  }
}

module attributes {stable_mosaic.version = 11 : i64} {
  func.func @_mm_bias_kernel(%arg0: i32, %arg1: memref<128x288xbf16, #tpu.memory_space<vmem>>, %arg2: memref<288x48xbf16, #tpu.memory_space<vmem>>, %arg3: memref<1x48xf32, #tpu.memory_space<vmem>>, %arg4: memref<128x48xf32, #tpu.memory_space<vmem>>) attributes {dimension_semantics = [#tpu.dimension_semantics<parallel>], iteration_bounds = array<i64: 1>, scalar_prefetch = 0 : i64, scratch_operands = 0 : i64, tpu.core_type = #tpu.core_type<tc>, window_params = [{transform_indices = @transform_0, window_bounds = array<i64: 128, 288>}, {pipeline_mode = #tpu.pipeline_mode<synchronous>, transform_indices = @transform_1, window_bounds = array<i64: 288, 48>}, {pipeline_mode = #tpu.pipeline_mode<synchronous>, transform_indices = @transform_2, window_bounds = array<i64: 1, 48>}, {transform_indices = @transform_3, window_bounds = array<i64: 128, 48>}]} {
    %c0 = arith.constant 0 : index
    %c0_0 = arith.constant 0 : index
    %0 = vector.load %arg1[%c0, %c0_0] : memref<128x288xbf16, #tpu.memory_space<vmem>>, vector<128x288xbf16>
    %c0_1 = arith.constant 0 : index
    %c0_2 = arith.constant 0 : index
    %1 = vector.load %arg2[%c0_1, %c0_2] : memref<288x48xbf16, #tpu.memory_space<vmem>>, vector<288x48xbf16>
    %cst = arith.constant dense<0.000000e+00> : vector<128x48xf32>
    %2 = tpu.matmul %0, %1, %cst {dimension_numbers = #tpu.dot_dimension_numbers<[1], [0], [0], [1], [0, 0, 1, 1], [], []>} : vector<128x288xbf16>, vector<288x48xbf16>, vector<128x48xf32> -> vector<128x48xf32>
    %c0_3 = arith.constant 0 : index
    %c0_4 = arith.constant 0 : index
    %3 = vector.load %arg3[%c0_3, %c0_4] : memref<1x48xf32, #tpu.memory_space<vmem>>, vector<1x48xf32>
    %4 = vector.broadcast %3 : vector<1x48xf32> to vector<128x48xf32>
    %5 = arith.addf %2, %4 : vector<128x48xf32>
    %cst_5 = arith.constant 0.000000e+00 : f32
    %6 = vector.broadcast %cst_5 : f32 to vector<128x48xf32>
    %7 = arith.maximumf %5, %6 : vector<128x48xf32>
    %c0_6 = arith.constant 0 : index
    %c0_7 = arith.constant 0 : index
    %8 = vector.load %arg4[%c0_6, %c0_7] : memref<128x48xf32, #tpu.memory_space<vmem>>, vector<128x48xf32>
    tpu.vector_store %arg4[%c0_6, %c0_7], %7 {strides = array<i32>} : memref<128x48xf32, #tpu.memory_space<vmem>>, vector<128x48xf32>,
    return
  }
  func.func @transform_0(%arg0: i32) -> (i32, i32) {
    %c0_i32 = arith.constant 0 : i32
    %c0_i32_0 = arith.constant 0 : i32
    return %arg0, %c0_i32 : i32, i32
  }
  func.func @transform_1(%arg0: i32) -> (i32, i32) {
    %c0_i32 = arith.constant 0 : i32
    %c0_i32_0 = arith.constant 0 : i32
    %c0_i32_1 = arith.constant 0 : i32
    return %c0_i32, %c0_i32_0 : i32, i32
  }
  func.func @transform_2(%arg0: i32) -> (i32, i32) {
    %c0_i32 = arith.constant 0 : i32
    %c0_i32_0 = arith.constant 0 : i32
    %c0_i32_1 = arith.constant 0 : i32
    return %c0_i32, %c0_i32_0 : i32, i32
  }
  func.func @transform_3(%arg0: i32) -> (i32, i32) {
    %c0_i32 = arith.constant 0 : i32
    %c0_i32_0 = arith.constant 0 : i32
    return %arg0, %c0_i32 : i32, i32
  }
}

module attributes {stable_mosaic.version = 11 : i64} {
  func.func @_mm_bias_kernel(%arg0: i32, %arg1: memref<128x432xbf16, #tpu.memory_space<vmem>>, %arg2: memref<432x64xbf16, #tpu.memory_space<vmem>>, %arg3: memref<1x64xf32, #tpu.memory_space<vmem>>, %arg4: memref<128x64xf32, #tpu.memory_space<vmem>>) attributes {dimension_semantics = [#tpu.dimension_semantics<parallel>], iteration_bounds = array<i64: 1>, scalar_prefetch = 0 : i64, scratch_operands = 0 : i64, tpu.core_type = #tpu.core_type<tc>, window_params = [{transform_indices = @transform_0, window_bounds = array<i64: 128, 432>}, {pipeline_mode = #tpu.pipeline_mode<synchronous>, transform_indices = @transform_1, window_bounds = array<i64: 432, 64>}, {pipeline_mode = #tpu.pipeline_mode<synchronous>, transform_indices = @transform_2, window_bounds = array<i64: 1, 64>}, {transform_indices = @transform_3, window_bounds = array<i64: 128, 64>}]} {
    %c0 = arith.constant 0 : index
    %c0_0 = arith.constant 0 : index
    %0 = vector.load %arg1[%c0, %c0_0] : memref<128x432xbf16, #tpu.memory_space<vmem>>, vector<128x432xbf16>
    %c0_1 = arith.constant 0 : index
    %c0_2 = arith.constant 0 : index
    %1 = vector.load %arg2[%c0_1, %c0_2] : memref<432x64xbf16, #tpu.memory_space<vmem>>, vector<432x64xbf16>
    %cst = arith.constant dense<0.000000e+00> : vector<128x64xf32>
    %2 = tpu.matmul %0, %1, %cst {dimension_numbers = #tpu.dot_dimension_numbers<[1], [0], [0], [1], [0, 0, 1, 1], [], []>} : vector<128x432xbf16>, vector<432x64xbf16>, vector<128x64xf32> -> vector<128x64xf32>
    %c0_3 = arith.constant 0 : index
    %c0_4 = arith.constant 0 : index
    %3 = vector.load %arg3[%c0_3, %c0_4] : memref<1x64xf32, #tpu.memory_space<vmem>>, vector<1x64xf32>
    %4 = vector.broadcast %3 : vector<1x64xf32> to vector<128x64xf32>
    %5 = arith.addf %2, %4 : vector<128x64xf32>
    %cst_5 = arith.constant 0.000000e+00 : f32
    %6 = vector.broadcast %cst_5 : f32 to vector<128x64xf32>
    %7 = arith.maximumf %5, %6 : vector<128x64xf32>
    %c0_6 = arith.constant 0 : index
    %c0_7 = arith.constant 0 : index
    %8 = vector.load %arg4[%c0_6, %c0_7] : memref<128x64xf32, #tpu.memory_space<vmem>>, vector<128x64xf32>
    tpu.vector_store %arg4[%c0_6, %c0_7], %7 {strides = array<i32>} : memref<128x64xf32, #tpu.memory_space<vmem>>, vector<128x64xf32>,
    return
  }
  func.func @transform_0(%arg0: i32) -> (i32, i32) {
    %c0_i32 = arith.constant 0 : i32
    %c0_i32_0 = arith.constant 0 : i32
    return %arg0, %c0_i32 : i32, i32
  }
  func.func @transform_1(%arg0: i32) -> (i32, i32) {
    %c0_i32 = arith.constant 0 : i32
    %c0_i32_0 = arith.constant 0 : i32
    %c0_i32_1 = arith.constant 0 : i32
    return %c0_i32, %c0_i32_0 : i32, i32
  }
  func.func @transform_2(%arg0: i32) -> (i32, i32) {
    %c0_i32 = arith.constant 0 : i32
    %c0_i32_0 = arith.constant 0 : i32
    %c0_i32_1 = arith.constant 0 : i32
    return %c0_i32, %c0_i32_0 : i32, i32
  }
  func.func @transform_3(%arg0: i32) -> (i32, i32) {
    %c0_i32 = arith.constant 0 : i32
    %c0_i32_0 = arith.constant 0 : i32
    return %arg0, %c0_i32 : i32, i32
  }
}

module attributes {stable_mosaic.version = 11 : i64} {
  func.func @_mm_bias_kernel(%arg0: i32, %arg1: memref<128x64xbf16, #tpu.memory_space<vmem>>, %arg2: memref<64x32xbf16, #tpu.memory_space<vmem>>, %arg3: memref<1x32xf32, #tpu.memory_space<vmem>>, %arg4: memref<128x32xf32, #tpu.memory_space<vmem>>) attributes {dimension_semantics = [#tpu.dimension_semantics<parallel>], iteration_bounds = array<i64: 1>, scalar_prefetch = 0 : i64, scratch_operands = 0 : i64, tpu.core_type = #tpu.core_type<tc>, window_params = [{transform_indices = @transform_0, window_bounds = array<i64: 128, 64>}, {pipeline_mode = #tpu.pipeline_mode<synchronous>, transform_indices = @transform_1, window_bounds = array<i64: 64, 32>}, {pipeline_mode = #tpu.pipeline_mode<synchronous>, transform_indices = @transform_2, window_bounds = array<i64: 1, 32>}, {transform_indices = @transform_3, window_bounds = array<i64: 128, 32>}]} {
    %c0 = arith.constant 0 : index
    %c0_0 = arith.constant 0 : index
    %0 = vector.load %arg1[%c0, %c0_0] : memref<128x64xbf16, #tpu.memory_space<vmem>>, vector<128x64xbf16>
    %c0_1 = arith.constant 0 : index
    %c0_2 = arith.constant 0 : index
    %1 = vector.load %arg2[%c0_1, %c0_2] : memref<64x32xbf16, #tpu.memory_space<vmem>>, vector<64x32xbf16>
    %cst = arith.constant dense<0.000000e+00> : vector<128x32xf32>
    %2 = tpu.matmul %0, %1, %cst {dimension_numbers = #tpu.dot_dimension_numbers<[1], [0], [0], [1], [0, 0, 1, 1], [], []>} : vector<128x64xbf16>, vector<64x32xbf16>, vector<128x32xf32> -> vector<128x32xf32>
    %c0_3 = arith.constant 0 : index
    %c0_4 = arith.constant 0 : index
    %3 = vector.load %arg3[%c0_3, %c0_4] : memref<1x32xf32, #tpu.memory_space<vmem>>, vector<1x32xf32>
    %4 = vector.broadcast %3 : vector<1x32xf32> to vector<128x32xf32>
    %5 = arith.addf %2, %4 : vector<128x32xf32>
    %c0_5 = arith.constant 0 : index
    %c0_6 = arith.constant 0 : index
    %6 = vector.load %arg4[%c0_5, %c0_6] : memref<128x32xf32, #tpu.memory_space<vmem>>, vector<128x32xf32>
    tpu.vector_store %arg4[%c0_5, %c0_6], %5 {strides = array<i32>} : memref<128x32xf32, #tpu.memory_space<vmem>>, vector<128x32xf32>,
    return
  }
  func.func @transform_0(%arg0: i32) -> (i32, i32) {
    %c0_i32 = arith.constant 0 : i32
    %c0_i32_0 = arith.constant 0 : i32
    return %arg0, %c0_i32 : i32, i32
  }
  func.func @transform_1(%arg0: i32) -> (i32, i32) {
    %c0_i32 = arith.constant 0 : i32
    %c0_i32_0 = arith.constant 0 : i32
    %c0_i32_1 = arith.constant 0 : i32
    return %c0_i32, %c0_i32_0 : i32, i32
  }
  func.func @transform_2(%arg0: i32) -> (i32, i32) {
    %c0_i32 = arith.constant 0 : i32
    %c0_i32_0 = arith.constant 0 : i32
    %c0_i32_1 = arith.constant 0 : i32
    return %c0_i32, %c0_i32_0 : i32, i32
  }
  func.func @transform_3(%arg0: i32) -> (i32, i32) {
    %c0_i32 = arith.constant 0 : i32
    %c0_i32_0 = arith.constant 0 : i32
    return %arg0, %c0_i32 : i32, i32
  }
}

module attributes {stable_mosaic.version = 11 : i64} {
  func.func @_mm_bias_res_kernel(%arg0: i32, %arg1: memref<128x48xbf16, #tpu.memory_space<vmem>>, %arg2: memref<48x32xbf16, #tpu.memory_space<vmem>>, %arg3: memref<1x32xf32, #tpu.memory_space<vmem>>, %arg4: memref<128x32xf32, #tpu.memory_space<vmem>>, %arg5: memref<128x32xf32, #tpu.memory_space<vmem>>) attributes {dimension_semantics = [#tpu.dimension_semantics<parallel>], iteration_bounds = array<i64: 1>, scalar_prefetch = 0 : i64, scratch_operands = 0 : i64, tpu.core_type = #tpu.core_type<tc>, window_params = [{transform_indices = @transform_0, window_bounds = array<i64: 128, 48>}, {pipeline_mode = #tpu.pipeline_mode<synchronous>, transform_indices = @transform_1, window_bounds = array<i64: 48, 32>}, {pipeline_mode = #tpu.pipeline_mode<synchronous>, transform_indices = @transform_2, window_bounds = array<i64: 1, 32>}, {transform_indices = @transform_3, window_bounds = array<i64: 128, 32>}, {transform_indices = @transform_4, window_bounds = array<i64: 128, 32>}]} {
    %c0 = arith.constant 0 : index
    %c0_0 = arith.constant 0 : index
    %0 = vector.load %arg1[%c0, %c0_0] : memref<128x48xbf16, #tpu.memory_space<vmem>>, vector<128x48xbf16>
    %c0_1 = arith.constant 0 : index
    %c0_2 = arith.constant 0 : index
    %1 = vector.load %arg2[%c0_1, %c0_2] : memref<48x32xbf16, #tpu.memory_space<vmem>>, vector<48x32xbf16>
    %cst = arith.constant dense<0.000000e+00> : vector<128x32xf32>
    %2 = tpu.matmul %0, %1, %cst {dimension_numbers = #tpu.dot_dimension_numbers<[1], [0], [0], [1], [0, 0, 1, 1], [], []>} : vector<128x48xbf16>, vector<48x32xbf16>, vector<128x32xf32> -> vector<128x32xf32>
    %c0_3 = arith.constant 0 : index
    %c0_4 = arith.constant 0 : index
    %3 = vector.load %arg3[%c0_3, %c0_4] : memref<1x32xf32, #tpu.memory_space<vmem>>, vector<1x32xf32>
    %4 = vector.broadcast %3 : vector<1x32xf32> to vector<128x32xf32>
    %5 = arith.addf %2, %4 : vector<128x32xf32>
    %c0_5 = arith.constant 0 : index
    %c0_6 = arith.constant 0 : index
    %6 = vector.load %arg4[%c0_5, %c0_6] : memref<128x32xf32, #tpu.memory_space<vmem>>, vector<128x32xf32>
    %7 = arith.addf %5, %6 : vector<128x32xf32>
    %c0_7 = arith.constant 0 : index
    %c0_8 = arith.constant 0 : index
    %8 = vector.load %arg5[%c0_7, %c0_8] : memref<128x32xf32, #tpu.memory_space<vmem>>, vector<128x32xf32>
    tpu.vector_store %arg5[%c0_7, %c0_8], %7 {strides = array<i32>} : memref<128x32xf32, #tpu.memory_space<vmem>>, vector<128x32xf32>,
    return
  }
  func.func @transform_0(%arg0: i32) -> (i32, i32) {
    %c0_i32 = arith.constant 0 : i32
    %c0_i32_0 = arith.constant 0 : i32
    return %arg0, %c0_i32 : i32, i32
  }
  func.func @transform_1(%arg0: i32) -> (i32, i32) {
    %c0_i32 = arith.constant 0 : i32
    %c0_i32_0 = arith.constant 0 : i32
    %c0_i32_1 = arith.constant 0 : i32
    return %c0_i32, %c0_i32_0 : i32, i32
  }
  func.func @transform_2(%arg0: i32) -> (i32, i32) {
    %c0_i32 = arith.constant 0 : i32
    %c0_i32_0 = arith.constant 0 : i32
    %c0_i32_1 = arith.constant 0 : i32
    return %c0_i32, %c0_i32_0 : i32, i32
  }
  func.func @transform_3(%arg0: i32) -> (i32, i32) {
    %c0_i32 = arith.constant 0 : i32
    %c0_i32_0 = arith.constant 0 : i32
    return %arg0, %c0_i32 : i32, i32
  }
  func.func @transform_4(%arg0: i32) -> (i32, i32) {
    %c0_i32 = arith.constant 0 : i32
    %c0_i32_0 = arith.constant 0 : i32
    return %arg0, %c0_i32 : i32, i32
  }
}

module attributes {stable_mosaic.version = 11 : i64} {
  func.func @_mm_bias_res_kernel(%arg0: i32, %arg1: memref<128x32xbf16, #tpu.memory_space<vmem>>, %arg2: memref<32x32xbf16, #tpu.memory_space<vmem>>, %arg3: memref<1x32xf32, #tpu.memory_space<vmem>>, %arg4: memref<128x32xf32, #tpu.memory_space<vmem>>, %arg5: memref<128x32xf32, #tpu.memory_space<vmem>>) attributes {dimension_semantics = [#tpu.dimension_semantics<parallel>], iteration_bounds = array<i64: 1>, scalar_prefetch = 0 : i64, scratch_operands = 0 : i64, tpu.core_type = #tpu.core_type<tc>, window_params = [{transform_indices = @transform_0, window_bounds = array<i64: 128, 32>}, {pipeline_mode = #tpu.pipeline_mode<synchronous>, transform_indices = @transform_1, window_bounds = array<i64: 32, 32>}, {pipeline_mode = #tpu.pipeline_mode<synchronous>, transform_indices = @transform_2, window_bounds = array<i64: 1, 32>}, {transform_indices = @transform_3, window_bounds = array<i64: 128, 32>}, {transform_indices = @transform_4, window_bounds = array<i64: 128, 32>}]} {
    %c0 = arith.constant 0 : index
    %c0_0 = arith.constant 0 : index
    %0 = vector.load %arg1[%c0, %c0_0] : memref<128x32xbf16, #tpu.memory_space<vmem>>, vector<128x32xbf16>
    %c0_1 = arith.constant 0 : index
    %c0_2 = arith.constant 0 : index
    %1 = vector.load %arg2[%c0_1, %c0_2] : memref<32x32xbf16, #tpu.memory_space<vmem>>, vector<32x32xbf16>
    %cst = arith.constant dense<0.000000e+00> : vector<128x32xf32>
    %2 = tpu.matmul %0, %1, %cst {dimension_numbers = #tpu.dot_dimension_numbers<[1], [0], [0], [1], [0, 0, 1, 1], [], []>} : vector<128x32xbf16>, vector<32x32xbf16>, vector<128x32xf32> -> vector<128x32xf32>
    %c0_3 = arith.constant 0 : index
    %c0_4 = arith.constant 0 : index
    %3 = vector.load %arg3[%c0_3, %c0_4] : memref<1x32xf32, #tpu.memory_space<vmem>>, vector<1x32xf32>
    %4 = vector.broadcast %3 : vector<1x32xf32> to vector<128x32xf32>
    %5 = arith.addf %2, %4 : vector<128x32xf32>
    %c0_5 = arith.constant 0 : index
    %c0_6 = arith.constant 0 : index
    %6 = vector.load %arg4[%c0_5, %c0_6] : memref<128x32xf32, #tpu.memory_space<vmem>>, vector<128x32xf32>
    %7 = arith.addf %5, %6 : vector<128x32xf32>
    %c0_7 = arith.constant 0 : index
    %c0_8 = arith.constant 0 : index
    %8 = vector.load %arg5[%c0_7, %c0_8] : memref<128x32xf32, #tpu.memory_space<vmem>>, vector<128x32xf32>
    tpu.vector_store %arg5[%c0_7, %c0_8], %7 {strides = array<i32>} : memref<128x32xf32, #tpu.memory_space<vmem>>, vector<128x32xf32>,
    return
  }
  func.func @transform_0(%arg0: i32) -> (i32, i32) {
    %c0_i32 = arith.constant 0 : i32
    %c0_i32_0 = arith.constant 0 : i32
    return %arg0, %c0_i32 : i32, i32
  }
  func.func @transform_1(%arg0: i32) -> (i32, i32) {
    %c0_i32 = arith.constant 0 : i32
    %c0_i32_0 = arith.constant 0 : i32
    %c0_i32_1 = arith.constant 0 : i32
    return %c0_i32, %c0_i32_0 : i32, i32
  }
  func.func @transform_2(%arg0: i32) -> (i32, i32) {
    %c0_i32 = arith.constant 0 : i32
    %c0_i32_0 = arith.constant 0 : i32
    %c0_i32_1 = arith.constant 0 : i32
    return %c0_i32, %c0_i32_0 : i32, i32
  }
  func.func @transform_3(%arg0: i32) -> (i32, i32) {
    %c0_i32 = arith.constant 0 : i32
    %c0_i32_0 = arith.constant 0 : i32
    return %arg0, %c0_i32 : i32, i32
  }
  func.func @transform_4(%arg0: i32) -> (i32, i32) {
    %c0_i32 = arith.constant 0 : i32
    %c0_i32_0 = arith.constant 0 : i32
    return %arg0, %c0_i32 : i32, i32
  }
}

module attributes {stable_mosaic.version = 11 : i64} {
  func.func @_mm_bias_kernel(%arg0: i32, %arg1: memref<128x288xbf16, #tpu.memory_space<vmem>>, %arg2: memref<288x32xbf16, #tpu.memory_space<vmem>>, %arg3: memref<1x32xf32, #tpu.memory_space<vmem>>, %arg4: memref<128x32xf32, #tpu.memory_space<vmem>>) attributes {dimension_semantics = [#tpu.dimension_semantics<parallel>], iteration_bounds = array<i64: 1>, scalar_prefetch = 0 : i64, scratch_operands = 0 : i64, tpu.core_type = #tpu.core_type<tc>, window_params = [{transform_indices = @transform_0, window_bounds = array<i64: 128, 288>}, {pipeline_mode = #tpu.pipeline_mode<synchronous>, transform_indices = @transform_1, window_bounds = array<i64: 288, 32>}, {pipeline_mode = #tpu.pipeline_mode<synchronous>, transform_indices = @transform_2, window_bounds = array<i64: 1, 32>}, {transform_indices = @transform_3, window_bounds = array<i64: 128, 32>}]} {
    %c0 = arith.constant 0 : index
    %c0_0 = arith.constant 0 : index
    %0 = vector.load %arg1[%c0, %c0_0] : memref<128x288xbf16, #tpu.memory_space<vmem>>, vector<128x288xbf16>
    %c0_1 = arith.constant 0 : index
    %c0_2 = arith.constant 0 : index
    %1 = vector.load %arg2[%c0_1, %c0_2] : memref<288x32xbf16, #tpu.memory_space<vmem>>, vector<288x32xbf16>
    %cst = arith.constant dense<0.000000e+00> : vector<128x32xf32>
    %2 = tpu.matmul %0, %1, %cst {dimension_numbers = #tpu.dot_dimension_numbers<[1], [0], [0], [1], [0, 0, 1, 1], [], []>} : vector<128x288xbf16>, vector<288x32xbf16>, vector<128x32xf32> -> vector<128x32xf32>
    %c0_3 = arith.constant 0 : index
    %c0_4 = arith.constant 0 : index
    %3 = vector.load %arg3[%c0_3, %c0_4] : memref<1x32xf32, #tpu.memory_space<vmem>>, vector<1x32xf32>
    %4 = vector.broadcast %3 : vector<1x32xf32> to vector<128x32xf32>
    %5 = arith.addf %2, %4 : vector<128x32xf32>
    %c0_5 = arith.constant 0 : index
    %c0_6 = arith.constant 0 : index
    %6 = vector.load %arg4[%c0_5, %c0_6] : memref<128x32xf32, #tpu.memory_space<vmem>>, vector<128x32xf32>
    tpu.vector_store %arg4[%c0_5, %c0_6], %5 {strides = array<i32>} : memref<128x32xf32, #tpu.memory_space<vmem>>, vector<128x32xf32>,
    return
  }
  func.func @transform_0(%arg0: i32) -> (i32, i32) {
    %c0_i32 = arith.constant 0 : i32
    %c0_i32_0 = arith.constant 0 : i32
    return %arg0, %c0_i32 : i32, i32
  }
  func.func @transform_1(%arg0: i32) -> (i32, i32) {
    %c0_i32 = arith.constant 0 : i32
    %c0_i32_0 = arith.constant 0 : i32
    %c0_i32_1 = arith.constant 0 : i32
    return %c0_i32, %c0_i32_0 : i32, i32
  }
  func.func @transform_2(%arg0: i32) -> (i32, i32) {
    %c0_i32 = arith.constant 0 : i32
    %c0_i32_0 = arith.constant 0 : i32
    %c0_i32_1 = arith.constant 0 : i32
    return %c0_i32, %c0_i32_0 : i32, i32
  }
  func.func @transform_3(%arg0: i32) -> (i32, i32) {
    %c0_i32 = arith.constant 0 : i32
    %c0_i32_0 = arith.constant 0 : i32
    return %arg0, %c0_i32 : i32, i32
  }
}

module attributes {stable_mosaic.version = 11 : i64} {
  func.func @_mm_bias_res_kernel(%arg0: i32, %arg1: memref<256x16xbf16, #tpu.memory_space<vmem>>, %arg2: memref<16x32xbf16, #tpu.memory_space<vmem>>, %arg3: memref<1x32xf32, #tpu.memory_space<vmem>>, %arg4: memref<256x32xf32, #tpu.memory_space<vmem>>, %arg5: memref<256x32xf32, #tpu.memory_space<vmem>>) attributes {dimension_semantics = [#tpu.dimension_semantics<parallel>], iteration_bounds = array<i64: 2>, scalar_prefetch = 0 : i64, scratch_operands = 0 : i64, tpu.core_type = #tpu.core_type<tc>, window_params = [{transform_indices = @transform_0, window_bounds = array<i64: 256, 16>}, {pipeline_mode = #tpu.pipeline_mode<synchronous>, transform_indices = @transform_1, window_bounds = array<i64: 16, 32>}, {pipeline_mode = #tpu.pipeline_mode<synchronous>, transform_indices = @transform_2, window_bounds = array<i64: 1, 32>}, {transform_indices = @transform_3, window_bounds = array<i64: 256, 32>}, {transform_indices = @transform_4, window_bounds = array<i64: 256, 32>}]} {
    %c0 = arith.constant 0 : index
    %c0_0 = arith.constant 0 : index
    %0 = vector.load %arg1[%c0, %c0_0] : memref<256x16xbf16, #tpu.memory_space<vmem>>, vector<256x16xbf16>
    %c0_1 = arith.constant 0 : index
    %c0_2 = arith.constant 0 : index
    %1 = vector.load %arg2[%c0_1, %c0_2] : memref<16x32xbf16, #tpu.memory_space<vmem>>, vector<16x32xbf16>
    %cst = arith.constant dense<0.000000e+00> : vector<256x32xf32>
    %2 = tpu.matmul %0, %1, %cst {dimension_numbers = #tpu.dot_dimension_numbers<[1], [0], [0], [1], [0, 0, 1, 1], [], []>} : vector<256x16xbf16>, vector<16x32xbf16>, vector<256x32xf32> -> vector<256x32xf32>
    %c0_3 = arith.constant 0 : index
    %c0_4 = arith.constant 0 : index
    %3 = vector.load %arg3[%c0_3, %c0_4] : memref<1x32xf32, #tpu.memory_space<vmem>>, vector<1x32xf32>
    %4 = vector.broadcast %3 : vector<1x32xf32> to vector<256x32xf32>
    %5 = arith.addf %2, %4 : vector<256x32xf32>
    %c0_5 = arith.constant 0 : index
    %c0_6 = arith.constant 0 : index
    %6 = vector.load %arg4[%c0_5, %c0_6] : memref<256x32xf32, #tpu.memory_space<vmem>>, vector<256x32xf32>
    %7 = arith.addf %5, %6 : vector<256x32xf32>
    %c0_7 = arith.constant 0 : index
    %c0_8 = arith.constant 0 : index
    %8 = vector.load %arg5[%c0_7, %c0_8] : memref<256x32xf32, #tpu.memory_space<vmem>>, vector<256x32xf32>
    tpu.vector_store %arg5[%c0_7, %c0_8], %7 {strides = array<i32>} : memref<256x32xf32, #tpu.memory_space<vmem>>, vector<256x32xf32>,
    return
  }
  func.func @transform_0(%arg0: i32) -> (i32, i32) {
    %c0_i32 = arith.constant 0 : i32
    %c0_i32_0 = arith.constant 0 : i32
    return %arg0, %c0_i32 : i32, i32
  }
  func.func @transform_1(%arg0: i32) -> (i32, i32) {
    %c0_i32 = arith.constant 0 : i32
    %c0_i32_0 = arith.constant 0 : i32
    %c0_i32_1 = arith.constant 0 : i32
    return %c0_i32, %c0_i32_0 : i32, i32
  }
  func.func @transform_2(%arg0: i32) -> (i32, i32) {
    %c0_i32 = arith.constant 0 : i32
    %c0_i32_0 = arith.constant 0 : i32
    %c0_i32_1 = arith.constant 0 : i32
    return %c0_i32, %c0_i32_0 : i32, i32
  }
  func.func @transform_3(%arg0: i32) -> (i32, i32) {
    %c0_i32 = arith.constant 0 : i32
    %c0_i32_0 = arith.constant 0 : i32
    return %arg0, %c0_i32 : i32, i32
  }
  func.func @transform_4(%arg0: i32) -> (i32, i32) {
    %c0_i32 = arith.constant 0 : i32
    %c0_i32_0 = arith.constant 0 : i32
    return %arg0, %c0_i32 : i32, i32
  }
}

module attributes {stable_mosaic.version = 11 : i64} {
  func.func @_mm_bias_kernel(%arg0: i32, %arg1: memref<256x288xbf16, #tpu.memory_space<vmem>>, %arg2: memref<288x32xbf16, #tpu.memory_space<vmem>>, %arg3: memref<1x32xf32, #tpu.memory_space<vmem>>, %arg4: memref<256x32xf32, #tpu.memory_space<vmem>>) attributes {dimension_semantics = [#tpu.dimension_semantics<parallel>], iteration_bounds = array<i64: 2>, scalar_prefetch = 0 : i64, scratch_operands = 0 : i64, tpu.core_type = #tpu.core_type<tc>, window_params = [{transform_indices = @transform_0, window_bounds = array<i64: 256, 288>}, {pipeline_mode = #tpu.pipeline_mode<synchronous>, transform_indices = @transform_1, window_bounds = array<i64: 288, 32>}, {pipeline_mode = #tpu.pipeline_mode<synchronous>, transform_indices = @transform_2, window_bounds = array<i64: 1, 32>}, {transform_indices = @transform_3, window_bounds = array<i64: 256, 32>}]} {
    %c0 = arith.constant 0 : index
    %c0_0 = arith.constant 0 : index
    %0 = vector.load %arg1[%c0, %c0_0] : memref<256x288xbf16, #tpu.memory_space<vmem>>, vector<256x288xbf16>
    %c0_1 = arith.constant 0 : index
    %c0_2 = arith.constant 0 : index
    %1 = vector.load %arg2[%c0_1, %c0_2] : memref<288x32xbf16, #tpu.memory_space<vmem>>, vector<288x32xbf16>
    %cst = arith.constant dense<0.000000e+00> : vector<256x32xf32>
    %2 = tpu.matmul %0, %1, %cst {dimension_numbers = #tpu.dot_dimension_numbers<[1], [0], [0], [1], [0, 0, 1, 1], [], []>} : vector<256x288xbf16>, vector<288x32xbf16>, vector<256x32xf32> -> vector<256x32xf32>
    %c0_3 = arith.constant 0 : index
    %c0_4 = arith.constant 0 : index
    %3 = vector.load %arg3[%c0_3, %c0_4] : memref<1x32xf32, #tpu.memory_space<vmem>>, vector<1x32xf32>
    %4 = vector.broadcast %3 : vector<1x32xf32> to vector<256x32xf32>
    %5 = arith.addf %2, %4 : vector<256x32xf32>
    %c0_5 = arith.constant 0 : index
    %c0_6 = arith.constant 0 : index
    %6 = vector.load %arg4[%c0_5, %c0_6] : memref<256x32xf32, #tpu.memory_space<vmem>>, vector<256x32xf32>
    tpu.vector_store %arg4[%c0_5, %c0_6], %5 {strides = array<i32>} : memref<256x32xf32, #tpu.memory_space<vmem>>, vector<256x32xf32>,
    return
  }
  func.func @transform_0(%arg0: i32) -> (i32, i32) {
    %c0_i32 = arith.constant 0 : i32
    %c0_i32_0 = arith.constant 0 : i32
    return %arg0, %c0_i32 : i32, i32
  }
  func.func @transform_1(%arg0: i32) -> (i32, i32) {
    %c0_i32 = arith.constant 0 : i32
    %c0_i32_0 = arith.constant 0 : i32
    %c0_i32_1 = arith.constant 0 : i32
    return %c0_i32, %c0_i32_0 : i32, i32
  }
  func.func @transform_2(%arg0: i32) -> (i32, i32) {
    %c0_i32 = arith.constant 0 : i32
    %c0_i32_0 = arith.constant 0 : i32
    %c0_i32_1 = arith.constant 0 : i32
    return %c0_i32, %c0_i32_0 : i32, i32
  }
  func.func @transform_3(%arg0: i32) -> (i32, i32) {
    %c0_i32 = arith.constant 0 : i32
    %c0_i32_0 = arith.constant 0 : i32
    return %arg0, %c0_i32 : i32, i32
  }
}

module attributes {stable_mosaic.version = 11 : i64} {
  func.func @_mm_bias_kernel(%arg0: i32, %arg1: memref<256x288xbf16, #tpu.memory_space<vmem>>, %arg2: memref<288x32xbf16, #tpu.memory_space<vmem>>, %arg3: memref<1x32xf32, #tpu.memory_space<vmem>>, %arg4: memref<256x32xf32, #tpu.memory_space<vmem>>) attributes {dimension_semantics = [#tpu.dimension_semantics<parallel>], iteration_bounds = array<i64: 2>, scalar_prefetch = 0 : i64, scratch_operands = 0 : i64, tpu.core_type = #tpu.core_type<tc>, window_params = [{transform_indices = @transform_0, window_bounds = array<i64: 256, 288>}, {pipeline_mode = #tpu.pipeline_mode<synchronous>, transform_indices = @transform_1, window_bounds = array<i64: 288, 32>}, {pipeline_mode = #tpu.pipeline_mode<synchronous>, transform_indices = @transform_2, window_bounds = array<i64: 1, 32>}, {transform_indices = @transform_3, window_bounds = array<i64: 256, 32>}]} {
    %c0 = arith.constant 0 : index
    %c0_0 = arith.constant 0 : index
    %0 = vector.load %arg1[%c0, %c0_0] : memref<256x288xbf16, #tpu.memory_space<vmem>>, vector<256x288xbf16>
    %c0_1 = arith.constant 0 : index
    %c0_2 = arith.constant 0 : index
    %1 = vector.load %arg2[%c0_1, %c0_2] : memref<288x32xbf16, #tpu.memory_space<vmem>>, vector<288x32xbf16>
    %cst = arith.constant dense<0.000000e+00> : vector<256x32xf32>
    %2 = tpu.matmul %0, %1, %cst {dimension_numbers = #tpu.dot_dimension_numbers<[1], [0], [0], [1], [0, 0, 1, 1], [], []>} : vector<256x288xbf16>, vector<288x32xbf16>, vector<256x32xf32> -> vector<256x32xf32>
    %c0_3 = arith.constant 0 : index
    %c0_4 = arith.constant 0 : index
    %3 = vector.load %arg3[%c0_3, %c0_4] : memref<1x32xf32, #tpu.memory_space<vmem>>, vector<1x32xf32>
    %4 = vector.broadcast %3 : vector<1x32xf32> to vector<256x32xf32>
    %5 = arith.addf %2, %4 : vector<256x32xf32>
    %cst_5 = arith.constant 0.000000e+00 : f32
    %6 = vector.broadcast %cst_5 : f32 to vector<256x32xf32>
    %7 = arith.maximumf %5, %6 : vector<256x32xf32>
    %c0_6 = arith.constant 0 : index
    %c0_7 = arith.constant 0 : index
    %8 = vector.load %arg4[%c0_6, %c0_7] : memref<256x32xf32, #tpu.memory_space<vmem>>, vector<256x32xf32>
    tpu.vector_store %arg4[%c0_6, %c0_7], %7 {strides = array<i32>} : memref<256x32xf32, #tpu.memory_space<vmem>>, vector<256x32xf32>,
    return
  }
  func.func @transform_0(%arg0: i32) -> (i32, i32) {
    %c0_i32 = arith.constant 0 : i32
    %c0_i32_0 = arith.constant 0 : i32
    return %arg0, %c0_i32 : i32, i32
  }
  func.func @transform_1(%arg0: i32) -> (i32, i32) {
    %c0_i32 = arith.constant 0 : i32
    %c0_i32_0 = arith.constant 0 : i32
    %c0_i32_1 = arith.constant 0 : i32
    return %c0_i32, %c0_i32_0 : i32, i32
  }
  func.func @transform_2(%arg0: i32) -> (i32, i32) {
    %c0_i32 = arith.constant 0 : i32
    %c0_i32_0 = arith.constant 0 : i32
    %c0_i32_1 = arith.constant 0 : i32
    return %c0_i32, %c0_i32_0 : i32, i32
  }
  func.func @transform_3(%arg0: i32) -> (i32, i32) {
    %c0_i32 = arith.constant 0 : i32
    %c0_i32_0 = arith.constant 0 : i32
    return %arg0, %c0_i32 : i32, i32
  }
}

module attributes {stable_mosaic.version = 11 : i64} {
  func.func @_mm_bias_kernel(%arg0: i32, %arg1: memref<256x32xbf16, #tpu.memory_space<vmem>>, %arg2: memref<32x128xbf16, #tpu.memory_space<vmem>>, %arg3: memref<1x128xf32, #tpu.memory_space<vmem>>, %arg4: memref<256x128xf32, #tpu.memory_space<vmem>>) attributes {dimension_semantics = [#tpu.dimension_semantics<parallel>], iteration_bounds = array<i64: 2>, scalar_prefetch = 0 : i64, scratch_operands = 0 : i64, tpu.core_type = #tpu.core_type<tc>, window_params = [{transform_indices = @transform_0, window_bounds = array<i64: 256, 32>}, {pipeline_mode = #tpu.pipeline_mode<synchronous>, transform_indices = @transform_1, window_bounds = array<i64: 32, 128>}, {pipeline_mode = #tpu.pipeline_mode<synchronous>, transform_indices = @transform_2, window_bounds = array<i64: 1, 128>}, {transform_indices = @transform_3, window_bounds = array<i64: 256, 128>}]} {
    %c0 = arith.constant 0 : index
    %c0_0 = arith.constant 0 : index
    %0 = vector.load %arg1[%c0, %c0_0] : memref<256x32xbf16, #tpu.memory_space<vmem>>, vector<256x32xbf16>
    %c0_1 = arith.constant 0 : index
    %c0_2 = arith.constant 0 : index
    %1 = vector.load %arg2[%c0_1, %c0_2] : memref<32x128xbf16, #tpu.memory_space<vmem>>, vector<32x128xbf16>
    %cst = arith.constant dense<0.000000e+00> : vector<256x128xf32>
    %2 = tpu.matmul %0, %1, %cst {dimension_numbers = #tpu.dot_dimension_numbers<[1], [0], [0], [1], [0, 0, 1, 1], [], []>} : vector<256x32xbf16>, vector<32x128xbf16>, vector<256x128xf32> -> vector<256x128xf32>
    %c0_3 = arith.constant 0 : index
    %c0_4 = arith.constant 0 : index
    %3 = vector.load %arg3[%c0_3, %c0_4] : memref<1x128xf32, #tpu.memory_space<vmem>>, vector<1x128xf32>
    %4 = vector.broadcast %3 : vector<1x128xf32> to vector<256x128xf32>
    %5 = arith.addf %2, %4 : vector<256x128xf32>
    %cst_5 = arith.constant 0.000000e+00 : f32
    %6 = vector.broadcast %cst_5 : f32 to vector<256x128xf32>
    %7 = arith.maximumf %5, %6 : vector<256x128xf32>
    %c0_6 = arith.constant 0 : index
    %c0_7 = arith.constant 0 : index
    %8 = vector.load %arg4[%c0_6, %c0_7] : memref<256x128xf32, #tpu.memory_space<vmem>>, vector<256x128xf32>
    tpu.vector_store %arg4[%c0_6, %c0_7], %7 {strides = array<i32>} : memref<256x128xf32, #tpu.memory_space<vmem>>, vector<256x128xf32>,
    return
  }
  func.func @transform_0(%arg0: i32) -> (i32, i32) {
    %c0_i32 = arith.constant 0 : i32
    %c0_i32_0 = arith.constant 0 : i32
    return %arg0, %c0_i32 : i32, i32
  }
  func.func @transform_1(%arg0: i32) -> (i32, i32) {
    %c0_i32 = arith.constant 0 : i32
    %c0_i32_0 = arith.constant 0 : i32
    %c0_i32_1 = arith.constant 0 : i32
    return %c0_i32, %c0_i32_0 : i32, i32
  }
  func.func @transform_2(%arg0: i32) -> (i32, i32) {
    %c0_i32 = arith.constant 0 : i32
    %c0_i32_0 = arith.constant 0 : i32
    %c0_i32_1 = arith.constant 0 : i32
    return %c0_i32, %c0_i32_0 : i32, i32
  }
  func.func @transform_3(%arg0: i32) -> (i32, i32) {
    %c0_i32 = arith.constant 0 : i32
    %c0_i32_0 = arith.constant 0 : i32
    return %arg0, %c0_i32 : i32, i32
  }
}

module attributes {stable_mosaic.version = 11 : i64} {
  func.func @_mm_bias_kernel(%arg0: i32, %arg1: memref<512x32xbf16, #tpu.memory_space<vmem>>, %arg2: memref<32x2xbf16, #tpu.memory_space<vmem>>, %arg3: memref<1x2xf32, #tpu.memory_space<vmem>>, %arg4: memref<512x2xf32, #tpu.memory_space<vmem>>) attributes {dimension_semantics = [#tpu.dimension_semantics<parallel>], iteration_bounds = array<i64: 3>, scalar_prefetch = 0 : i64, scratch_operands = 0 : i64, tpu.core_type = #tpu.core_type<tc>, window_params = [{transform_indices = @transform_0, window_bounds = array<i64: 512, 32>}, {pipeline_mode = #tpu.pipeline_mode<synchronous>, transform_indices = @transform_1, window_bounds = array<i64: 32, 2>}, {pipeline_mode = #tpu.pipeline_mode<synchronous>, transform_indices = @transform_2, window_bounds = array<i64: 1, 2>}, {transform_indices = @transform_3, window_bounds = array<i64: 512, 2>}]} {
    %c0 = arith.constant 0 : index
    %c0_0 = arith.constant 0 : index
    %0 = vector.load %arg1[%c0, %c0_0] : memref<512x32xbf16, #tpu.memory_space<vmem>>, vector<512x32xbf16>
    %c0_1 = arith.constant 0 : index
    %c0_2 = arith.constant 0 : index
    %1 = vector.load %arg2[%c0_1, %c0_2] : memref<32x2xbf16, #tpu.memory_space<vmem>>, vector<32x2xbf16>
    %cst = arith.constant dense<0.000000e+00> : vector<512x2xf32>
    %2 = tpu.matmul %0, %1, %cst {dimension_numbers = #tpu.dot_dimension_numbers<[1], [0], [0], [1], [0, 0, 1, 1], [], []>} : vector<512x32xbf16>, vector<32x2xbf16>, vector<512x2xf32> -> vector<512x2xf32>
    %c0_3 = arith.constant 0 : index
    %c0_4 = arith.constant 0 : index
    %3 = vector.load %arg3[%c0_3, %c0_4] : memref<1x2xf32, #tpu.memory_space<vmem>>, vector<1x2xf32>
    %4 = vector.broadcast %3 : vector<1x2xf32> to vector<512x2xf32>
    %5 = arith.addf %2, %4 : vector<512x2xf32>
    %c0_5 = arith.constant 0 : index
    %c0_6 = arith.constant 0 : index
    %6 = vector.load %arg4[%c0_5, %c0_6] : memref<512x2xf32, #tpu.memory_space<vmem>>, vector<512x2xf32>
    tpu.vector_store %arg4[%c0_5, %c0_6], %5 {strides = array<i32>} : memref<512x2xf32, #tpu.memory_space<vmem>>, vector<512x2xf32>,
    return
  }
  func.func @transform_0(%arg0: i32) -> (i32, i32) {
    %c0_i32 = arith.constant 0 : i32
    %c0_i32_0 = arith.constant 0 : i32
    return %arg0, %c0_i32 : i32, i32
  }
  func.func @transform_1(%arg0: i32) -> (i32, i32) {
    %c0_i32 = arith.constant 0 : i32
    %c0_i32_0 = arith.constant 0 : i32
    %c0_i32_1 = arith.constant 0 : i32
    return %c0_i32, %c0_i32_0 : i32, i32
  }
  func.func @transform_2(%arg0: i32) -> (i32, i32) {
    %c0_i32 = arith.constant 0 : i32
    %c0_i32_0 = arith.constant 0 : i32
    %c0_i32_1 = arith.constant 0 : i32
    return %c0_i32, %c0_i32_0 : i32, i32
  }
  func.func @transform_3(%arg0: i32) -> (i32, i32) {
    %c0_i32 = arith.constant 0 : i32
    %c0_i32_0 = arith.constant 0 : i32
    return %arg0, %c0_i32 : i32, i32
  }
}

</mosaic_0001>

<bundles_post_ra>
// kernel: fwd.20
= control target key start
LH: loop header
LB: loop body
LE: loop exit
PB: predicated region body
PF: predicated region fallthrough
CT: control target
= control target key end

     0   :  { %s1247_s12 = smov 0   ;;  %s1539_s0 = inlined_call_operand.vmem [shape: bf16[2048,32], index: 0, kind: input, shape index: {}]   ;;  %s1540_s1 = inlined_call_operand.vmem [shape: bf16[32,16], index: 1, kind: input, shape index: {}]   ;;  %s1541_s2 = inlined_call_operand.vmem [shape: f32[1,16], index: 2, kind: input, shape index: {}]   ;;  %s1542_s3 = inlined_call_operand.vmem [shape: f32[2048,16], index: 3, kind: output, shape index: {}]  }
   0x1 LB: > { %s993_s13 = sadd.s32 4294967295, %s1225_s12   ;;  %p997_p0 = scmp.ge.s32.totalorder %s1225_s12, 1  ;;  %s1225_s12 = sphi %s1247_s12, %s13_s12  }
   0x2   : > { %p138_p1 = scmp.lt.s32.totalorder %s1225_s12, 5 }
   0x4   : > { %p139_p2 = pnand %p997_p0, %p138_p1 }
   0x5   : > { %s998_s16 = sshll.u32 (!%p139_p2), %s993_s13, 6 }
   0x6   : > { %142 = sbr.rel (%p139_p2) target bundleno = 280 (0x118), region = 32  ;;  %p163_p3 = scmp.lt.s32.totalorder (!%p139_p2), %s998_s16, 255 }
   0xb   : > { %v1185_v0 = vld [vmem:[%s1540_s1 + $0x8] sm:$0xff]   ;;  %v1186_v1 = vld [vmem:[%s1540_s1] sm:$0xff]   ;;  %s1544_s16 = smov (!%p163_p3, %s998_s16), 255  ;;  %vm422_vm0 = vcmask 261120   ;;  %vm872_vm1 = vcmask 130048  }
   0xc   : > { %1105 = vmatprep.subr.bf16.mxu0 %v1185_v0  ;;  %1173 = vmatprep.subr.bf16.mxu1 %v1185_v0  ;;  %s999_s19 = sshll.u32 %s1544_s16, 2  ;;  %v1336_v34 = vld [vmem:[%s1541_s2] ss:$0 sm:$0xff]  ;;  %s1001_s25 = sshll.u32 %s1544_s16, 3 }
   0xd   : > { %1106 = vmatpush3.bf16.msra.mxu0 %v1185_v0  ;;  %1175 = vmatpush3.bf16.msra.mxu1 %v1185_v0  ;;  %s1267_s22 = scalar_lea.vmem %s1539_s0, %s999_s19  ;;  %s1343_s28 = scalar_lea.vmem %s1542_s3, %s1001_s25 }
   0xe   : > { %1107 = vmatprep.subr.bf16.mxu0 %v1186_v1  ;;  %1174 = vmatprep.subr.bf16.mxu1 %v1186_v1  ;;  %v1187_v2 = vld [vmem:[%s1267_s22] sm:$0xff]   ;;  %v1189_v4 = vld [vmem:[%s1267_s22 + $0x8] sm:$0xff]   ;;  %v1191_v6 = vld [vmem:[%s1267_s22 + $0x10] sm:$0xff]  }
   0xf   : > { %v1188_v3 = vld [vmem:[%s1267_s22 + $0x80] sm:$0xff]   ;;  %1109 = vmatprep.mubr.msk.bf16.mxu0 %vm422_vm0, %v1187_v2  ;;  %v1190_v5 = vld [vmem:[%s1267_s22 + $0x88] sm:$0xff]   ;;  %v1192_v7 = vld [vmem:[%s1267_s22 + $0x90] sm:$0xff]  }
  0x10   : > { %1141 = vmatprep.mubr.msk.bf16.mxu1 %vm422_vm0, %v1188_v3  ;;  %v1193_v8 = vld [vmem:[%s1267_s22 + $0x18] sm:$0xff]   ;;  %v1195_v10 = vld [vmem:[%s1267_s22 + $0x20] sm:$0xff]   ;;  %v1197_v12 = vld [vmem:[%s1267_s22 + $0x28] sm:$0xff]  }
  0x11   : > { %1108 = vmatpush3.bf16.msra.mxu0 %v1186_v1  ;;  %1176 = vmatpush3.bf16.msra.mxu1 %v1186_v1  ;;  %v1194_v9 = vld [vmem:[%s1267_s22 + $0x98] sm:$0xff]   ;;  %v1196_v11 = vld [vmem:[%s1267_s22 + $0xa0] sm:$0xff]   ;;  %v1198_v13 = vld [vmem:[%s1267_s22 + $0xa8] sm:$0xff]  }
  0x12   : > { %v1199_v14 = vld [vmem:[%s1267_s22 + $0x30] sm:$0xff]   ;;  %v1201_v16 = vld [vmem:[%s1267_s22 + $0x38] sm:$0xff]   ;;  %v1203_v18 = vld [vmem:[%s1267_s22 + $0x40] sm:$0xff]  }
  0x13   : > { %v1200_v15 = vld [vmem:[%s1267_s22 + $0xb0] sm:$0xff]   ;;  %v1202_v17 = vld [vmem:[%s1267_s22 + $0xb8] sm:$0xff]   ;;  %v1204_v19 = vld [vmem:[%s1267_s22 + $0xc0] sm:$0xff]  }
  0x14   : > { %1110 = vmatmul.mubr.msk.bf16.vlgmr.msra.gmra.mxu0 %vm422_vm0, %v1189_v4  ;;  %1142 = vmatmul.mubr.msk.bf16.vlgmr.msra.gmra.mxu1 %vm422_vm0, %v1190_v5  ;;  %v1205_v20 = vld [vmem:[%s1267_s22 + $0x48] sm:$0xff]   ;;  %v1207_v22 = vld [vmem:[%s1267_s22 + $0x50] sm:$0xff]   ;;  %v1209_v24 = vld [vmem:[%s1267_s22 + $0x58] sm:$0xff]  }
  0x15   : > { %1113 = vmatprep.mubr.msk.bf16.mxu0 %vm422_vm0, %v1191_v6  ;;  %1145 = vmatprep.mubr.msk.bf16.mxu1 %vm422_vm0, %v1192_v7  ;;  %v1206_v21 = vld [vmem:[%s1267_s22 + $0xc8] sm:$0xff]   ;;  %v1208_v23 = vld [vmem:[%s1267_s22 + $0xd0] sm:$0xff]   ;;  %v1210_v25 = vld [vmem:[%s1267_s22 + $0xd8] sm:$0xff]  }
  0x16   : > { %v1211_v26 = vld [vmem:[%s1267_s22 + $0x60] sm:$0xff]   ;;  %v1213_v28 = vld [vmem:[%s1267_s22 + $0x68] sm:$0xff]   ;;  %v1215_v30 = vld [vmem:[%s1267_s22 + $0x70] sm:$0xff]  }
  0x17   : > { %v1212_v27 = vld [vmem:[%s1267_s22 + $0xe0] sm:$0xff]   ;;  %v1214_v29 = vld [vmem:[%s1267_s22 + $0xe8] sm:$0xff]   ;;  %v1216_v31 = vld [vmem:[%s1267_s22 + $0xf0] sm:$0xff]  }
  0x18   : > { %v1217_v32 = vld [vmem:[%s1267_s22 + $0x78] sm:$0xff]  }
  0x19   : > { %v1218_v33 = vld [vmem:[%s1267_s22 + $0xf8] sm:$0xff]  }
  0x1c   : > { %1114 = vmatmul.mubr.msk.bf16.gmra.mxu0 %vm422_vm0, %v1193_v8  ;;  %1146 = vmatmul.mubr.msk.bf16.gmra.mxu1 %vm422_vm0, %v1194_v9 }
  0x1d   : > { %1117 = vmatprep.mubr.msk.bf16.mxu0 %vm422_vm0, %v1195_v10  ;;  %1149 = vmatprep.mubr.msk.bf16.mxu1 %vm422_vm0, %v1196_v11 }
  0x24   : > { %1118 = vmatmul.mubr.msk.bf16.gmra.mxu0 %vm422_vm0, %v1197_v12  ;;  %1150 = vmatmul.mubr.msk.bf16.gmra.mxu1 %vm422_vm0, %v1198_v13 }
  0x25   : > { %1121 = vmatprep.mubr.msk.bf16.mxu0 %vm422_vm0, %v1199_v14  ;;  %1153 = vmatprep.mubr.msk.bf16.mxu1 %vm422_vm0, %v1200_v15 }
  0x2c   : > { %1122 = vmatmul.mubr.msk.bf16.gmra.mxu0 %vm422_vm0, %v1201_v16  ;;  %1154 = vmatmul.mubr.msk.bf16.gmra.mxu1 %vm422_vm0, %v1202_v17 }
  0x2d   : > { %1125 = vmatprep.mubr.msk.bf16.mxu0 %vm422_vm0, %v1203_v18  ;;  %1157 = vmatprep.mubr.msk.bf16.mxu1 %vm422_vm0, %v1204_v19 }
  0x34   : > { %1126 = vmatmul.mubr.msk.bf16.gmra.mxu0 %vm422_vm0, %v1205_v20  ;;  %1158 = vmatmul.mubr.msk.bf16.gmra.mxu1 %vm422_vm0, %v1206_v21 }
  0x35   : > { %1129 = vmatprep.mubr.msk.bf16.mxu0 %vm422_vm0, %v1207_v22  ;;  %1161 = vmatprep.mubr.msk.bf16.mxu1 %vm422_vm0, %v1208_v23 }
  0x3c   : > { %1130 = vmatmul.mubr.msk.bf16.gmra.mxu0 %vm422_vm0, %v1209_v24  ;;  %1162 = vmatmul.mubr.msk.bf16.gmra.mxu1 %vm422_vm0, %v1210_v25 }
  0x3d   : > { %1133 = vmatprep.mubr.msk.bf16.mxu0 %vm422_vm0, %v1211_v26  ;;  %1165 = vmatprep.mubr.msk.bf16.mxu1 %vm422_vm0, %v1212_v27 }
  0x44   : > { %1134 = vmatmul.mubr.msk.bf16.gmra.mxu0 %vm422_vm0, %v1213_v28  ;;  %1166 = vmatmul.mubr.msk.bf16.gmra.mxu1 %vm422_vm0, %v1214_v29 }
  0x45   : > { %1137 = vmatprep.mubr.msk.bf16.mxu0 %vm422_vm0, %v1215_v30  ;;  %1169 = vmatprep.mubr.msk.bf16.mxu1 %vm422_vm0, %v1216_v31 }
  0x4c   : > { %1138 = vmatmul.mubr.msk.bf16.gmra.mxu0 %vm422_vm0, %v1217_v32  ;;  %1170 = vmatmul.mubr.msk.bf16.gmra.mxu1 %vm422_vm0, %v1218_v33 }
  0xd4   : > { %v1111_v35 = vpop.f32.mrf.mxu0  ;;  %v1143_v37 = vpop.f32.mrf.mxu1 }
  0xd5   : > { %v562_v36 = vadd.f32 %v1111_v35, %v1336_v34  ;;  %v690_v38 = vadd.f32 %v1143_v37, %v1336_v34 }
  0xd6   : > { %v553_v39 = vpop.f32.mrf.mxu0  ;;  %v681_v42 = vpop.f32.mrf.mxu1 }
  0xd7   : > { %v810_v40 = vmax.f32 %v562_v36, 0.0  ;;  %v554_v41 = vadd.f32 %v1336_v34, %v553_v39  ;;  %v842_v43 = vmax.f32 %v690_v38, 0.0  ;;  %v682_v44 = vadd.f32 %v1336_v34, %v681_v42 }
  0xd8   : > { %v1112_v45 = vpop.f32.mrf.mxu0  ;;  %v1144_v48 = vpop.f32.mrf.mxu1 }
  0xd9   : > { %875 = vst.msk [vmem:[%s1343_s28 + $0x10] sm:$0xff] %vm872_vm1, %v810_v40  ;;  %v808_v46 = vmax.f32 %v554_v41, 0.0  ;;  %v565_v47 = vadd.f32 %v1112_v45, %v1336_v34  ;;  %907 = vst.msk [vmem:[%s1343_s28 + $0x110] sm:$0xff] %vm872_vm1, %v842_v43  ;;  %v840_v49 = vmax.f32 %v682_v44, 0.0  ;;  %v693_v50 = vadd.f32 %v1144_v48, %v1336_v34 }
  0xda   : > { %v556_v51 = vpop.f32.mrf.mxu0  ;;  %v684_v54 = vpop.f32.mrf.mxu1 }
  0xdb   : > { %873 = vst.msk [vmem:[%s1343_s28] sm:$0xff] %vm872_vm1, %v808_v46  ;;  %v811_v52 = vmax.f32 %v565_v47, 0.0  ;;  %v557_v53 = vadd.f32 %v1336_v34, %v556_v51  ;;  %905 = vst.msk [vmem:[%s1343_s28 + $0x100] sm:$0xff] %vm872_vm1, %v840_v49  ;;  %v843_v55 = vmax.f32 %v693_v50, 0.0  ;;  %v685_v56 = vadd.f32 %v1336_v34, %v684_v54 }
  0xdc   : > { %v1115_v57 = vpop.f32.mrf.mxu0  ;;  %v1147_v60 = vpop.f32.mrf.mxu1 }
  0xdd   : > { %876 = vst.msk [vmem:[%s1343_s28 + $0x18] sm:$0xff] %vm872_vm1, %v811_v52  ;;  %v809_v58 = vmax.f32 %v557_v53, 0.0  ;;  %v578_v59 = vadd.f32 %v1115_v57, %v1336_v34  ;;  %908 = vst.msk [vmem:[%s1343_s28 + $0x118] sm:$0xff] %vm872_vm1, %v843_v55  ;;  %v841_v61 = vmax.f32 %v685_v56, 0.0  ;;  %v706_v62 = vadd.f32 %v1147_v60, %v1336_v34 }
  0xde   : > { %v569_v63 = vpop.f32.mrf.mxu0  ;;  %v697_v2 = vpop.f32.mrf.mxu1 }
  0xdf   : > { %874 = vst.msk [vmem:[%s1343_s28 + $0x8] sm:$0xff] %vm872_vm1, %v809_v58  ;;  %v814_v0 = vmax.f32 %v578_v59, 0.0  ;;  %v570_v1 = vadd.f32 %v1336_v34, %v569_v63  ;;  %906 = vst.msk [vmem:[%s1343_s28 + $0x108] sm:$0xff] %vm872_vm1, %v841_v61  ;;  %v846_v3 = vmax.f32 %v706_v62, 0.0  ;;  %v698_v4 = vadd.f32 %v1336_v34, %v697_v2 }
  0xe0   : > { %v1116_v5 = vpop.f32.mrf.mxu0  ;;  %v1148_v8 = vpop.f32.mrf.mxu1 }
  0xe1   : > { %879 = vst.msk [vmem:[%s1343_s28 + $0x30] sm:$0xff] %vm872_vm1, %v814_v0  ;;  %v812_v6 = vmax.f32 %v570_v1, 0.0  ;;  %v581_v7 = vadd.f32 %v1116_v5, %v1336_v34  ;;  %911 = vst.msk [vmem:[%s1343_s28 + $0x130] sm:$0xff] %vm872_vm1, %v846_v3  ;;  %v844_v9 = vmax.f32 %v698_v4, 0.0  ;;  %v709_v10 = vadd.f32 %v1148_v8, %v1336_v34 }
  0xe2   : > { %v572_v11 = vpop.f32.mrf.mxu0  ;;  %v700_v14 = vpop.f32.mrf.mxu1 }
  0xe3   : > { %877 = vst.msk [vmem:[%s1343_s28 + $0x20] sm:$0xff] %vm872_vm1, %v812_v6  ;;  %v815_v12 = vmax.f32 %v581_v7, 0.0  ;;  %v573_v13 = vadd.f32 %v1336_v34, %v572_v11  ;;  %909 = vst.msk [vmem:[%s1343_s28 + $0x120] sm:$0xff] %vm872_vm1, %v844_v9  ;;  %v847_v15 = vmax.f32 %v709_v10, 0.0  ;;  %v701_v16 = vadd.f32 %v1336_v34, %v700_v14 }
  0xe4   : > { %v1119_v17 = vpop.f32.mrf.mxu0  ;;  %v1151_v20 = vpop.f32.mrf.mxu1 }
  0xe5   : > { %880 = vst.msk [vmem:[%s1343_s28 + $0x38] sm:$0xff] %vm872_vm1, %v815_v12  ;;  %v813_v18 = vmax.f32 %v573_v13, 0.0  ;;  %v594_v19 = vadd.f32 %v1119_v17, %v1336_v34  ;;  %912 = vst.msk [vmem:[%s1343_s28 + $0x138] sm:$0xff] %vm872_vm1, %v847_v15  ;;  %v845_v21 = vmax.f32 %v701_v16, 0.0  ;;  %v722_v22 = vadd.f32 %v1151_v20, %v1336_v34 }
  0xe6   : > { %v585_v23 = vpop.f32.mrf.mxu0  ;;  %v713_v26 = vpop.f32.mrf.mxu1 }
  0xe7   : > { %878 = vst.msk [vmem:[%s1343_s28 + $0x28] sm:$0xff] %vm872_vm1, %v813_v18  ;;  %v818_v24 = vmax.f32 %v594_v19, 0.0  ;;  %v586_v25 = vadd.f32 %v1336_v34, %v585_v23  ;;  %910 = vst.msk [vmem:[%s1343_s28 + $0x128] sm:$0xff] %vm872_vm1, %v845_v21  ;;  %v850_v27 = vmax.f32 %v722_v22, 0.0  ;;  %v714_v28 = vadd.f32 %v1336_v34, %v713_v26 }
  0xe8   : > { %v1120_v29 = vpop.f32.mrf.mxu0  ;;  %v1152_v32 = vpop.f32.mrf.mxu1 }
  0xe9   : > { %883 = vst.msk [vmem:[%s1343_s28 + $0x50] sm:$0xff] %vm872_vm1, %v818_v24  ;;  %v816_v30 = vmax.f32 %v586_v25, 0.0  ;;  %v597_v31 = vadd.f32 %v1120_v29, %v1336_v34  ;;  %915 = vst.msk [vmem:[%s1343_s28 + $0x150] sm:$0xff] %vm872_vm1, %v850_v27  ;;  %v848_v33 = vmax.f32 %v714_v28, 0.0  ;;  %v725_v35 = vadd.f32 %v1152_v32, %v1336_v34 }
  0xea   : > { %v588_v36 = vpop.f32.mrf.mxu0  ;;  %v716_v39 = vpop.f32.mrf.mxu1 }
  0xeb   : > { %881 = vst.msk [vmem:[%s1343_s28 + $0x40] sm:$0xff] %vm872_vm1, %v816_v30  ;;  %v819_v37 = vmax.f32 %v597_v31, 0.0  ;;  %v589_v38 = vadd.f32 %v1336_v34, %v588_v36  ;;  %913 = vst.msk [vmem:[%s1343_s28 + $0x140] sm:$0xff] %vm872_vm1, %v848_v33  ;;  %v851_v40 = vmax.f32 %v725_v35, 0.0  ;;  %v717_v41 = vadd.f32 %v1336_v34, %v716_v39 }
  0xec   : > { %v1123_v42 = vpop.f32.mrf.mxu0  ;;  %v1155_v45 = vpop.f32.mrf.mxu1 }
  0xed   : > { %884 = vst.msk [vmem:[%s1343_s28 + $0x58] sm:$0xff] %vm872_vm1, %v819_v37  ;;  %v817_v43 = vmax.f32 %v589_v38, 0.0  ;;  %v610_v44 = vadd.f32 %v1123_v42, %v1336_v34  ;;  %916 = vst.msk [vmem:[%s1343_s28 + $0x158] sm:$0xff] %vm872_vm1, %v851_v40  ;;  %v849_v46 = vmax.f32 %v717_v41, 0.0  ;;  %v738_v47 = vadd.f32 %v1155_v45, %v1336_v34 }
  0xee   : > { %v601_v48 = vpop.f32.mrf.mxu0  ;;  %v729_v51 = vpop.f32.mrf.mxu1 }
  0xef   : > { %882 = vst.msk [vmem:[%s1343_s28 + $0x48] sm:$0xff] %vm872_vm1, %v817_v43  ;;  %v822_v49 = vmax.f32 %v610_v44, 0.0  ;;  %v602_v50 = vadd.f32 %v1336_v34, %v601_v48  ;;  %914 = vst.msk [vmem:[%s1343_s28 + $0x148] sm:$0xff] %vm872_vm1, %v849_v46  ;;  %v854_v52 = vmax.f32 %v738_v47, 0.0  ;;  %v730_v53 = vadd.f32 %v1336_v34, %v729_v51 }
  0xf0   : > { %v1124_v54 = vpop.f32.mrf.mxu0  ;;  %v1156_v57 = vpop.f32.mrf.mxu1 }
  0xf1   : > { %887 = vst.msk [vmem:[%s1343_s28 + $0x70] sm:$0xff] %vm872_vm1, %v822_v49  ;;  %v820_v55 = vmax.f32 %v602_v50, 0.0  ;;  %v613_v56 = vadd.f32 %v1124_v54, %v1336_v34  ;;  %919 = vst.msk [vmem:[%s1343_s28 + $0x170] sm:$0xff] %vm872_vm1, %v854_v52  ;;  %v852_v58 = vmax.f32 %v730_v53, 0.0  ;;  %v741_v59 = vadd.f32 %v1156_v57, %v1336_v34 }
  0xf2   : > { %v604_v60 = vpop.f32.mrf.mxu0  ;;  %v732_v63 = vpop.f32.mrf.mxu1 }
  0xf3   : > { %885 = vst.msk [vmem:[%s1343_s28 + $0x60] sm:$0xff] %vm872_vm1, %v820_v55  ;;  %v823_v61 = vmax.f32 %v613_v56, 0.0  ;;  %v605_v62 = vadd.f32 %v1336_v34, %v604_v60  ;;  %917 = vst.msk [vmem:[%s1343_s28 + $0x160] sm:$0xff] %vm872_vm1, %v852_v58  ;;  %v855_v0 = vmax.f32 %v741_v59, 0.0  ;;  %v733_v1 = vadd.f32 %v1336_v34, %v732_v63 }
  0xf4   : > { %v1127_v2 = vpop.f32.mrf.mxu0  ;;  %v1159_v5 = vpop.f32.mrf.mxu1 }
  0xf5   : > { %888 = vst.msk [vmem:[%s1343_s28 + $0x78] sm:$0xff] %vm872_vm1, %v823_v61  ;;  %v821_v3 = vmax.f32 %v605_v62, 0.0  ;;  %v626_v4 = vadd.f32 %v1127_v2, %v1336_v34  ;;  %920 = vst.msk [vmem:[%s1343_s28 + $0x178] sm:$0xff] %vm872_vm1, %v855_v0  ;;  %v853_v6 = vmax.f32 %v733_v1, 0.0  ;;  %v754_v7 = vadd.f32 %v1159_v5, %v1336_v34 }
  0xf6   : > { %v617_v8 = vpop.f32.mrf.mxu0  ;;  %v745_v11 = vpop.f32.mrf.mxu1 }
  0xf7   : > { %886 = vst.msk [vmem:[%s1343_s28 + $0x68] sm:$0xff] %vm872_vm1, %v821_v3  ;;  %v826_v9 = vmax.f32 %v626_v4, 0.0  ;;  %v618_v10 = vadd.f32 %v1336_v34, %v617_v8  ;;  %918 = vst.msk [vmem:[%s1343_s28 + $0x168] sm:$0xff] %vm872_vm1, %v853_v6  ;;  %v858_v12 = vmax.f32 %v754_v7, 0.0  ;;  %v746_v13 = vadd.f32 %v1336_v34, %v745_v11 }
  0xf8   : > { %v1128_v14 = vpop.f32.mrf.mxu0  ;;  %v1160_v17 = vpop.f32.mrf.mxu1 }
  0xf9   : > { %891 = vst.msk [vmem:[%s1343_s28 + $0x90] sm:$0xff] %vm872_vm1, %v826_v9  ;;  %v824_v15 = vmax.f32 %v618_v10, 0.0  ;;  %v629_v16 = vadd.f32 %v1128_v14, %v1336_v34  ;;  %923 = vst.msk [vmem:[%s1343_s28 + $0x190] sm:$0xff] %vm872_vm1, %v858_v12  ;;  %v856_v18 = vmax.f32 %v746_v13, 0.0  ;;  %v757_v19 = vadd.f32 %v1160_v17, %v1336_v34 }
  0xfa   : > { %v620_v20 = vpop.f32.mrf.mxu0  ;;  %v748_v23 = vpop.f32.mrf.mxu1 }
  0xfb   : > { %889 = vst.msk [vmem:[%s1343_s28 + $0x80] sm:$0xff] %vm872_vm1, %v824_v15  ;;  %v827_v21 = vmax.f32 %v629_v16, 0.0  ;;  %v621_v22 = vadd.f32 %v1336_v34, %v620_v20  ;;  %921 = vst.msk [vmem:[%s1343_s28 + $0x180] sm:$0xff] %vm872_vm1, %v856_v18  ;;  %v859_v24 = vmax.f32 %v757_v19, 0.0  ;;  %v749_v25 = vadd.f32 %v1336_v34, %v748_v23 }
  0xfc   : > { %v1131_v26 = vpop.f32.mrf.mxu0  ;;  %v1163_v29 = vpop.f32.mrf.mxu1 }
  0xfd   : > { %892 = vst.msk [vmem:[%s1343_s28 + $0x98] sm:$0xff] %vm872_vm1, %v827_v21  ;;  %v825_v27 = vmax.f32 %v621_v22, 0.0  ;;  %v642_v28 = vadd.f32 %v1131_v26, %v1336_v34  ;;  %924 = vst.msk [vmem:[%s1343_s28 + $0x198] sm:$0xff] %vm872_vm1, %v859_v24  ;;  %v857_v30 = vmax.f32 %v749_v25, 0.0  ;;  %v770_v31 = vadd.f32 %v1163_v29, %v1336_v34 }
  0xfe   : > { %v633_v32 = vpop.f32.mrf.mxu0  ;;  %v761_v36 = vpop.f32.mrf.mxu1 }
  0xff   : > { %890 = vst.msk [vmem:[%s1343_s28 + $0x88] sm:$0xff] %vm872_vm1, %v825_v27  ;;  %v830_v33 = vmax.f32 %v642_v28, 0.0  ;;  %v634_v35 = vadd.f32 %v1336_v34, %v633_v32  ;;  %922 = vst.msk [vmem:[%s1343_s28 + $0x188] sm:$0xff] %vm872_vm1, %v857_v30  ;;  %v862_v37 = vmax.f32 %v770_v31, 0.0  ;;  %v762_v38 = vadd.f32 %v1336_v34, %v761_v36 }
 0x100   : > { %v1132_v39 = vpop.f32.mrf.mxu0  ;;  %v1164_v42 = vpop.f32.mrf.mxu1 }
 0x101   : > { %895 = vst.msk [vmem:[%s1343_s28 + $0xb0] sm:$0xff] %vm872_vm1, %v830_v33  ;;  %v828_v40 = vmax.f32 %v634_v35, 0.0  ;;  %v645_v41 = vadd.f32 %v1132_v39, %v1336_v34  ;;  %927 = vst.msk [vmem:[%s1343_s28 + $0x1b0] sm:$0xff] %vm872_vm1, %v862_v37  ;;  %v860_v43 = vmax.f32 %v762_v38, 0.0  ;;  %v773_v44 = vadd.f32 %v1164_v42, %v1336_v34 }
 0x102   : > { %v636_v45 = vpop.f32.mrf.mxu0  ;;  %v764_v48 = vpop.f32.mrf.mxu1 }
 0x103   : > { %893 = vst.msk [vmem:[%s1343_s28 + $0xa0] sm:$0xff] %vm872_vm1, %v828_v40  ;;  %v831_v46 = vmax.f32 %v645_v41, 0.0  ;;  %v637_v47 = vadd.f32 %v1336_v34, %v636_v45  ;;  %925 = vst.msk [vmem:[%s1343_s28 + $0x1a0] sm:$0xff] %vm872_vm1, %v860_v43  ;;  %v863_v49 = vmax.f32 %v773_v44, 0.0  ;;  %v765_v50 = vadd.f32 %v1336_v34, %v764_v48 }
 0x104   : > { %v1135_v51 = vpop.f32.mrf.mxu0  ;;  %v1167_v54 = vpop.f32.mrf.mxu1 }
 0x105   : > { %896 = vst.msk [vmem:[%s1343_s28 + $0xb8] sm:$0xff] %vm872_vm1, %v831_v46  ;;  %v829_v52 = vmax.f32 %v637_v47, 0.0  ;;  %v658_v53 = vadd.f32 %v1135_v51, %v1336_v34  ;;  %928 = vst.msk [vmem:[%s1343_s28 + $0x1b8] sm:$0xff] %vm872_vm1, %v863_v49  ;;  %v861_v55 = vmax.f32 %v765_v50, 0.0  ;;  %v786_v56 = vadd.f32 %v1167_v54, %v1336_v34 }
 0x106   : > { %v649_v57 = vpop.f32.mrf.mxu0  ;;  %v777_v60 = vpop.f32.mrf.mxu1 }
 0x107   : > { %894 = vst.msk [vmem:[%s1343_s28 + $0xa8] sm:$0xff] %vm872_vm1, %v829_v52  ;;  %v834_v58 = vmax.f32 %v658_v53, 0.0  ;;  %v650_v59 = vadd.f32 %v1336_v34, %v649_v57  ;;  %926 = vst.msk [vmem:[%s1343_s28 + $0x1a8] sm:$0xff] %vm872_vm1, %v861_v55  ;;  %v866_v61 = vmax.f32 %v786_v56, 0.0  ;;  %v778_v62 = vadd.f32 %v1336_v34, %v777_v60 }
 0x108   : > { %v1136_v63 = vpop.f32.mrf.mxu0  ;;  %v1168_v2 = vpop.f32.mrf.mxu1 }
 0x109   : > { %899 = vst.msk [vmem:[%s1343_s28 + $0xd0] sm:$0xff] %vm872_vm1, %v834_v58  ;;  %v832_v0 = vmax.f32 %v650_v59, 0.0  ;;  %v661_v1 = vadd.f32 %v1136_v63, %v1336_v34  ;;  %931 = vst.msk [vmem:[%s1343_s28 + $0x1d0] sm:$0xff] %vm872_vm1, %v866_v61  ;;  %v864_v3 = vmax.f32 %v778_v62, 0.0  ;;  %v789_v4 = vadd.f32 %v1168_v2, %v1336_v34 }
 0x10a   : > { %v652_v5 = vpop.f32.mrf.mxu0  ;;  %v780_v8 = vpop.f32.mrf.mxu1 }
 0x10b   : > { %897 = vst.msk [vmem:[%s1343_s28 + $0xc0] sm:$0xff] %vm872_vm1, %v832_v0  ;;  %v835_v6 = vmax.f32 %v661_v1, 0.0  ;;  %v653_v7 = vadd.f32 %v1336_v34, %v652_v5  ;;  %929 = vst.msk [vmem:[%s1343_s28 + $0x1c0] sm:$0xff] %vm872_vm1, %v864_v3  ;;  %v867_v9 = vmax.f32 %v789_v4, 0.0  ;;  %v781_v10 = vadd.f32 %v1336_v34, %v780_v8 }
 0x10c   : > { %v1139_v11 = vpop.f32.mrf.mxu0  ;;  %v1171_v14 = vpop.f32.mrf.mxu1 }
 0x10d   : > { %900 = vst.msk [vmem:[%s1343_s28 + $0xd8] sm:$0xff] %vm872_vm1, %v835_v6  ;;  %v833_v12 = vmax.f32 %v653_v7, 0.0  ;;  %v674_v13 = vadd.f32 %v1139_v11, %v1336_v34  ;;  %932 = vst.msk [vmem:[%s1343_s28 + $0x1d8] sm:$0xff] %vm872_vm1, %v867_v9  ;;  %v865_v15 = vmax.f32 %v781_v10, 0.0  ;;  %v802_v16 = vadd.f32 %v1171_v14, %v1336_v34 }
 0x10e   : > { %v665_v17 = vpop.f32.mrf.mxu0  ;;  %v793_v20 = vpop.f32.mrf.mxu1 }
 0x10f   : > { %898 = vst.msk [vmem:[%s1343_s28 + $0xc8] sm:$0xff] %vm872_vm1, %v833_v12  ;;  %v838_v18 = vmax.f32 %v674_v13, 0.0  ;;  %v666_v19 = vadd.f32 %v1336_v34, %v665_v17  ;;  %930 = vst.msk [vmem:[%s1343_s28 + $0x1c8] sm:$0xff] %vm872_vm1, %v865_v15  ;;  %v870_v21 = vmax.f32 %v802_v16, 0.0  ;;  %v794_v22 = vadd.f32 %v1336_v34, %v793_v20 }
 0x110   : > { %v1140_v23 = vpop.f32.mrf.mxu0  ;;  %v1172_v26 = vpop.f32.mrf.mxu1 }
 0x111   : > { %903 = vst.msk [vmem:[%s1343_s28 + $0xf0] sm:$0xff] %vm872_vm1, %v838_v18  ;;  %v836_v24 = vmax.f32 %v666_v19, 0.0  ;;  %v677_v25 = vadd.f32 %v1140_v23, %v1336_v34  ;;  %935 = vst.msk [vmem:[%s1343_s28 + $0x1f0] sm:$0xff] %vm872_vm1, %v870_v21  ;;  %v868_v27 = vmax.f32 %v794_v22, 0.0  ;;  %v805_v28 = vadd.f32 %v1172_v26, %v1336_v34 }
 0x112   : > { %v668_v29 = vpop.f32.mrf.mxu0  ;;  %v796_v32 = vpop.f32.mrf.mxu1 }
 0x113   : > { %901 = vst.msk [vmem:[%s1343_s28 + $0xe0] sm:$0xff] %vm872_vm1, %v836_v24  ;;  %v839_v30 = vmax.f32 %v677_v25, 0.0  ;;  %v669_v31 = vadd.f32 %v1336_v34, %v668_v29  ;;  %933 = vst.msk [vmem:[%s1343_s28 + $0x1e0] sm:$0xff] %vm872_vm1, %v868_v27  ;;  %v871_v33 = vmax.f32 %v805_v28, 0.0  ;;  %v797_v35 = vadd.f32 %v1336_v34, %v796_v32 }
 0x115   : > { %904 = vst.msk [vmem:[%s1343_s28 + $0xf8] sm:$0xff] %vm872_vm1, %v839_v30  ;;  %v837_v36 = vmax.f32 %v669_v31, 0.0  ;;  %936 = vst.msk [vmem:[%s1343_s28 + $0x1f8] sm:$0xff] %vm872_vm1, %v871_v33  ;;  %v869_v37 = vmax.f32 %v797_v35, 0.0 }
 0x117   : > { %902 = vst.msk [vmem:[%s1343_s28 + $0xe8] sm:$0xff] %vm872_vm1, %v837_v36  ;;  %934 = vst.msk [vmem:[%s1343_s28 + $0x1e8] sm:$0xff] %vm872_vm1, %v869_v37 }
 0x118 PF: > { %s13_s12 = sadd.s32 1, %s1225_s12  }
 0x119   : > { %p10_p4 = scmp.ge.s32.totalorder %s13_s12, 6  }
 0x11b   :  { %12 = sbr.rel (!%p10_p4) target bundleno = 1 (0x1), region = 62 }

// kernel: fwd.21
= control target key start
LH: loop header
LB: loop body
LE: loop exit
PB: predicated region body
PF: predicated region fallthrough
CT: control target
= control target key end

     0   :  { %s947_s12 = smov 0   ;;  %s1151_s0 = inlined_call_operand.vmem [shape: bf16[512,144], index: 0, kind: input, shape index: {}]   ;;  %s1152_s1 = inlined_call_operand.vmem [shape: bf16[144,16], index: 1, kind: input, shape index: {}]   ;;  %s1153_s2 = inlined_call_operand.vmem [shape: f32[1,16], index: 2, kind: input, shape index: {}]   ;;  %s1154_s3 = inlined_call_operand.vmem [shape: f32[512,16], index: 3, kind: output, shape index: {}]  }
   0x1 LB: > { %s763_s13 = sadd.s32 4294967295, %s924_s12   ;;  %p767_p0 = scmp.ge.s32.totalorder %s924_s12, 1  ;;  %s924_s12 = sphi %s947_s12, %s13_s12  }
   0x2   : > { %p139_p1 = scmp.lt.s32.totalorder %s924_s12, 3 }
   0x4   : > { %p140_p2 = pnand %p767_p0, %p139_p1 }
   0x5   : > { %s768_s16 = sshll.u32 (!%p140_p2), %s763_s13, 5 }
   0x6   : > { %143 = sbr.rel (%p140_p2) target bundleno = 306 (0x132), region = 32  ;;  %p165_p3 = scmp.lt.s32.totalorder (!%p140_p2), %s768_s16, 63 }
   0xb   : > { %v861_v0 = vld [vmem:[%s1152_s1 + $0x38] sm:$0xff]   ;;  %v926_v1 = vmov 0   ;;  %v862_v2 = vld [vmem:[%s1152_s1 + $0x30] sm:$0xff]   ;;  %s1156_s16 = smov (!%p165_p3, %s768_s16), 63  ;;  %v863_v3 = vld [vmem:[%s1152_s1 + $0x28] sm:$0xff]   ;;  %vm433_vm0 = vcmask 130048  }
   0xc   : > { %482 = vmatprep.subr.bf16.mxu0 %v926_v1  ;;  %834 = vmatprep.subr.bf16.mxu1 %v926_v1  ;;  %s833_s21 = sshll.u32 %s1156_s16, 3  ;;  %v864_v4 = vld [vmem:[%s1152_s1 + $0x20] sm:$0xff]   ;;  %v865_v7 = vld [vmem:[%s1152_s1 + $0x18] sm:$0xff]   ;;  %v866_v8 = vld [vmem:[%s1152_s1 + $0x10] sm:$0xff]  }
   0xd   : > { %483 = vmatpush1.bf16.msra.mxu0 %v861_v0  ;;  %843 = vmatpush1.bf16.msra.mxu1 %v861_v0  ;;  %s972_s24 = scalar_lea.vmem %s1151_s0, %s833_s21  ;;  %v867_v9 = vld [vmem:[%s1152_s1 + $0x8] sm:$0xff]   ;;  %v868_v10 = vld [vmem:[%s1152_s1] sm:$0xff]   ;;  %s1052_s15 = scalar_lea.vmem %s1154_s3, %s833_s21 }
   0xe   : > { %484 = vmatprep.subr.bf16.mxu0 %v926_v1  ;;  %835 = vmatprep.subr.bf16.mxu1 %v926_v1  ;;  %v872_v5 = vld [vmem:[%s972_s24 + $0x4] ss:$8 sps:$4 sm:$0xff]   ;;  %v870_v12 = vld [vmem:[%s972_s24] ss:$8 sps:$4 sm:$0xff]   ;;  %v876_v14 = vld [vmem:[%s972_s24 + $0x14] ss:$8 sps:$4 sm:$0xff]  }
   0xf   : > { %v875_v6 = vld [vmem:[%s972_s24 + $0x84] ss:$8 sps:$4 sm:$0xff]   ;;  %815 = vmatprep.mubr.msk.bf16.mxu0 %vm433_vm0, %v872_v5  ;;  %v873_v13 = vld [vmem:[%s972_s24 + $0x80] ss:$8 sps:$4 sm:$0xff]   ;;  %v878_v15 = vld [vmem:[%s972_s24 + $0x94] ss:$8 sps:$4 sm:$0xff]  }
  0x10   : > { %823 = vmatprep.mubr.msk.bf16.mxu1 %vm433_vm0, %v875_v6  ;;  %v869_v11 = vld [vmem:[%s1152_s1 + $0x40] sm:$0xff]   ;;  %v880_v16 = vld [vmem:[%s972_s24 + $0x10] ss:$8 sps:$4 sm:$0xff]   ;;  %v888_v22 = vld [vmem:[%s972_s24 + $0x34] ss:$8 sps:$4 sm:$0xff]  }
  0x11   : > { %485 = vmatpush1.bf16.msra.mxu0 %v862_v2  ;;  %844 = vmatpush1.bf16.msra.mxu1 %v862_v2  ;;  %v881_v17 = vld [vmem:[%s972_s24 + $0x90] ss:$8 sps:$4 sm:$0xff]   ;;  %v882_v18 = vld [vmem:[%s972_s24 + $0x24] ss:$8 sps:$4 sm:$0xff]   ;;  %v886_v20 = vld [vmem:[%s972_s24 + $0x20] ss:$8 sps:$4 sm:$0xff]  }
  0x12   : > { %486 = vmatprep.subr.bf16.mxu0 %v926_v1  ;;  %836 = vmatprep.subr.bf16.mxu1 %v926_v1  ;;  %v884_v19 = vld [vmem:[%s972_s24 + $0xa4] ss:$8 sps:$4 sm:$0xff]   ;;  %v887_v21 = vld [vmem:[%s972_s24 + $0xa0] ss:$8 sps:$4 sm:$0xff]   ;;  %v890_v23 = vld [vmem:[%s972_s24 + $0xb4] ss:$8 sps:$4 sm:$0xff]  }
  0x13   : > { %v892_v24 = vld [vmem:[%s972_s24 + $0x30] ss:$8 sps:$4 sm:$0xff]   ;;  %v894_v26 = vld [vmem:[%s972_s24 + $0x44] ss:$8 sps:$4 sm:$0xff]   ;;  %v898_v28 = vld [vmem:[%s972_s24 + $0x40] ss:$8 sps:$4 sm:$0xff]  }
  0x14   : > { %v893_v25 = vld [vmem:[%s972_s24 + $0xb0] ss:$8 sps:$4 sm:$0xff]   ;;  %v896_v27 = vld [vmem:[%s972_s24 + $0xc4] ss:$8 sps:$4 sm:$0xff]   ;;  %v899_v29 = vld [vmem:[%s972_s24 + $0xc0] ss:$8 sps:$4 sm:$0xff]  }
  0x15   : > { %487 = vmatpush1.bf16.msra.mxu0 %v863_v3  ;;  %845 = vmatpush1.bf16.msra.mxu1 %v863_v3  ;;  %v900_v30 = vld [vmem:[%s972_s24 + $0x54] ss:$8 sps:$4 sm:$0xff]   ;;  %v904_v32 = vld [vmem:[%s972_s24 + $0x50] ss:$8 sps:$4 sm:$0xff]   ;;  %v906_v34 = vld [vmem:[%s972_s24 + $0x64] ss:$8 sps:$4 sm:$0xff]  }
  0x16   : > { %488 = vmatprep.subr.bf16.mxu0 %v926_v1  ;;  %837 = vmatprep.subr.bf16.mxu1 %v926_v1  ;;  %v902_v31 = vld [vmem:[%s972_s24 + $0xd4] ss:$8 sps:$4 sm:$0xff]   ;;  %v905_v33 = vld [vmem:[%s972_s24 + $0xd0] ss:$8 sps:$4 sm:$0xff]   ;;  %v908_v35 = vld [vmem:[%s972_s24 + $0xe4] ss:$8 sps:$4 sm:$0xff]  }
  0x17   : > { %v910_v36 = vld [vmem:[%s972_s24 + $0x60] ss:$8 sps:$4 sm:$0xff]   ;;  %v912_v38 = vld [vmem:[%s972_s24 + $0x74] ss:$8 sps:$4 sm:$0xff]   ;;  %v916_v40 = vld [vmem:[%s972_s24 + $0x70] ss:$8 sps:$4 sm:$0xff]  }
  0x18   : > { %v911_v37 = vld [vmem:[%s972_s24 + $0xe0] ss:$8 sps:$4 sm:$0xff]   ;;  %v914_v39 = vld [vmem:[%s972_s24 + $0xf4] ss:$8 sps:$4 sm:$0xff]   ;;  %v917_v41 = vld [vmem:[%s972_s24 + $0xf0] ss:$8 sps:$4 sm:$0xff]  }
  0x19   : > { %489 = vmatpush1.bf16.msra.mxu0 %v864_v4  ;;  %846 = vmatpush1.bf16.msra.mxu1 %v864_v4  ;;  %v1043_v42 = vld [vmem:[%s1153_s2] ss:$0 sm:$0xff] }
  0x1a   : > { %490 = vmatprep.subr.bf16.mxu0 %v926_v1  ;;  %838 = vmatprep.subr.bf16.mxu1 %v926_v1 }
  0x1d   : > { %491 = vmatpush1.bf16.msra.mxu0 %v865_v7  ;;  %847 = vmatpush1.bf16.msra.mxu1 %v865_v7 }
  0x1e   : > { %492 = vmatprep.subr.bf16.mxu0 %v926_v1  ;;  %839 = vmatprep.subr.bf16.mxu1 %v926_v1 }
  0x21   : > { %493 = vmatpush1.bf16.msra.mxu0 %v866_v8  ;;  %848 = vmatpush1.bf16.msra.mxu1 %v866_v8 }
  0x22   : > { %494 = vmatprep.subr.bf16.mxu0 %v926_v1  ;;  %840 = vmatprep.subr.bf16.mxu1 %v926_v1 }
  0x25   : > { %495 = vmatpush1.bf16.msra.mxu0 %v867_v9  ;;  %849 = vmatpush1.bf16.msra.mxu1 %v867_v9 }
  0x26   : > { %496 = vmatprep.subr.bf16.mxu0 %v926_v1  ;;  %841 = vmatprep.subr.bf16.mxu1 %v926_v1 }
  0x29   : > { %497 = vmatpush1.bf16.msra.mxu0 %v868_v10  ;;  %850 = vmatpush1.bf16.msra.mxu1 %v868_v10 }
  0x2a   : > { %512 = vmatprep.subr.bf16.mxu0 %v926_v1  ;;  %842 = vmatprep.subr.bf16.mxu1 %v926_v1 }
  0x2d   : > { %513 = vmatpush2.bf16.msra.mxu0 %v869_v11  ;;  %851 = vmatpush2.bf16.msra.mxu1 %v869_v11 }
  0x30   : > { %515 = vmatmul.mubr.bf16.vlgmr.msra.gmra.mxu0 %v870_v12  ;;  %579 = vmatmul.mubr.bf16.vlgmr.msra.gmra.mxu1 %v873_v13 }
  0x31   : > { %816 = vmatprep.mubr.msk.bf16.mxu0 %vm433_vm0, %v876_v14  ;;  %824 = vmatprep.mubr.msk.bf16.mxu1 %vm433_vm0, %v878_v15 }
  0x38   : > { %523 = vmatmul.mubr.bf16.gmra.mxu0 %v880_v16  ;;  %587 = vmatmul.mubr.bf16.gmra.mxu1 %v881_v17 }
  0x39   : > { %817 = vmatprep.mubr.msk.bf16.mxu0 %vm433_vm0, %v882_v18  ;;  %825 = vmatprep.mubr.msk.bf16.mxu1 %vm433_vm0, %v884_v19 }
  0x40   : > { %531 = vmatmul.mubr.bf16.gmra.mxu0 %v886_v20  ;;  %595 = vmatmul.mubr.bf16.gmra.mxu1 %v887_v21 }
  0x41   : > { %818 = vmatprep.mubr.msk.bf16.mxu0 %vm433_vm0, %v888_v22  ;;  %826 = vmatprep.mubr.msk.bf16.mxu1 %vm433_vm0, %v890_v23 }
  0x48   : > { %539 = vmatmul.mubr.bf16.gmra.mxu0 %v892_v24  ;;  %603 = vmatmul.mubr.bf16.gmra.mxu1 %v893_v25 }
  0x49   : > { %819 = vmatprep.mubr.msk.bf16.mxu0 %vm433_vm0, %v894_v26  ;;  %827 = vmatprep.mubr.msk.bf16.mxu1 %vm433_vm0, %v896_v27 }
  0x50   : > { %547 = vmatmul.mubr.bf16.gmra.mxu0 %v898_v28  ;;  %611 = vmatmul.mubr.bf16.gmra.mxu1 %v899_v29 }
  0x51   : > { %820 = vmatprep.mubr.msk.bf16.mxu0 %vm433_vm0, %v900_v30  ;;  %828 = vmatprep.mubr.msk.bf16.mxu1 %vm433_vm0, %v902_v31 }
  0x58   : > { %555 = vmatmul.mubr.bf16.gmra.mxu0 %v904_v32  ;;  %619 = vmatmul.mubr.bf16.gmra.mxu1 %v905_v33 }
  0x59   : > { %821 = vmatprep.mubr.msk.bf16.mxu0 %vm433_vm0, %v906_v34  ;;  %829 = vmatprep.mubr.msk.bf16.mxu1 %vm433_vm0, %v908_v35 }
  0x60   : > { %563 = vmatmul.mubr.bf16.gmra.mxu0 %v910_v36  ;;  %627 = vmatmul.mubr.bf16.gmra.mxu1 %v911_v37 }
  0x61   : > { %822 = vmatprep.mubr.msk.bf16.mxu0 %vm433_vm0, %v912_v38  ;;  %830 = vmatprep.mubr.msk.bf16.mxu1 %vm433_vm0, %v914_v39 }
  0x68   : > { %571 = vmatmul.mubr.bf16.gmra.mxu0 %v916_v40  ;;  %635 = vmatmul.mubr.bf16.gmra.mxu1 %v917_v41 }
  0xf0   : > { %v516_v43 = vpop.f32.mrf.mxu0  ;;  %v580_v44 = vpop.f32.mrf.mxu1 }
  0xf1   : > { %v517_v45 = vadd.f32 %v1043_v42, %v516_v43  ;;  %v581_v46 = vadd.f32 %v1043_v42, %v580_v44 }
  0xf2   : > { %v518_v47 = vpop.f32.mrf.mxu0  ;;  %v582_v48 = vpop.f32.mrf.mxu1 }
  0xf3   : > { %v643_v49 = vmax.f32 %v517_v45, 0.0  ;;  %v659_v50 = vmax.f32 %v581_v46, 0.0 }
  0xf4   : > { %v519_v51 = vpop.f32.mrf.mxu0  ;;  %v583_v52 = vpop.f32.mrf.mxu1 }
  0xf5   : > { %675 = vst.msk [vmem:[%s1052_s15] sm:$0xff] %vm433_vm0, %v643_v49  ;;  %691 = vst.msk [vmem:[%s1052_s15 + $0x80] sm:$0xff] %vm433_vm0, %v659_v50  ;;  %v520_v53 = vadd.f32 %v1043_v42, %v519_v51  ;;  %v584_v54 = vadd.f32 %v1043_v42, %v583_v52 }
  0xf6   : > { %v521_v55 = vpop.f32.mrf.mxu0  ;;  %v585_v56 = vpop.f32.mrf.mxu1 }
  0xf7   : > { %v644_v57 = vmax.f32 %v520_v53, 0.0  ;;  %v660_v58 = vmax.f32 %v584_v54, 0.0 }
  0xf8   : > { %v524_v59 = vpop.f32.mrf.mxu0  ;;  %v588_v60 = vpop.f32.mrf.mxu1 }
  0xf9   : > { %676 = vst.msk [vmem:[%s1052_s15 + $0x8] sm:$0xff] %vm433_vm0, %v644_v57  ;;  %692 = vst.msk [vmem:[%s1052_s15 + $0x88] sm:$0xff] %vm433_vm0, %v660_v58  ;;  %v525_v61 = vadd.f32 %v1043_v42, %v524_v59  ;;  %v589_v62 = vadd.f32 %v1043_v42, %v588_v60 }
  0xfa   : > { %v526_v63 = vpop.f32.mrf.mxu0  ;;  %v590_v0 = vpop.f32.mrf.mxu1 }
  0xfb   : > { %v645_v1 = vmax.f32 %v525_v61, 0.0  ;;  %v661_v2 = vmax.f32 %v589_v62, 0.0 }
  0xfc   : > { %v527_v3 = vpop.f32.mrf.mxu0  ;;  %v591_v4 = vpop.f32.mrf.mxu1 }
  0xfd   : > { %677 = vst.msk [vmem:[%s1052_s15 + $0x10] sm:$0xff] %vm433_vm0, %v645_v1  ;;  %693 = vst.msk [vmem:[%s1052_s15 + $0x90] sm:$0xff] %vm433_vm0, %v661_v2  ;;  %v528_v5 = vadd.f32 %v1043_v42, %v527_v3  ;;  %v592_v6 = vadd.f32 %v1043_v42, %v591_v4 }
  0xfe   : > { %v529_v7 = vpop.f32.mrf.mxu0  ;;  %v593_v8 = vpop.f32.mrf.mxu1 }
  0xff   : > { %v646_v9 = vmax.f32 %v528_v5, 0.0  ;;  %v662_v10 = vmax.f32 %v592_v6, 0.0 }
 0x100   : > { %v532_v11 = vpop.f32.mrf.mxu0  ;;  %v596_v12 = vpop.f32.mrf.mxu1 }
 0x101   : > { %678 = vst.msk [vmem:[%s1052_s15 + $0x18] sm:$0xff] %vm433_vm0, %v646_v9  ;;  %694 = vst.msk [vmem:[%s1052_s15 + $0x98] sm:$0xff] %vm433_vm0, %v662_v10  ;;  %v533_v13 = vadd.f32 %v1043_v42, %v532_v11  ;;  %v597_v14 = vadd.f32 %v1043_v42, %v596_v12 }
 0x102   : > { %v534_v15 = vpop.f32.mrf.mxu0  ;;  %v598_v16 = vpop.f32.mrf.mxu1 }
 0x103   : > { %v647_v17 = vmax.f32 %v533_v13, 0.0  ;;  %v663_v18 = vmax.f32 %v597_v14, 0.0 }
 0x104   : > { %v535_v19 = vpop.f32.mrf.mxu0  ;;  %v599_v20 = vpop.f32.mrf.mxu1 }
 0x105   : > { %679 = vst.msk [vmem:[%s1052_s15 + $0x20] sm:$0xff] %vm433_vm0, %v647_v17  ;;  %695 = vst.msk [vmem:[%s1052_s15 + $0xa0] sm:$0xff] %vm433_vm0, %v663_v18  ;;  %v536_v21 = vadd.f32 %v1043_v42, %v535_v19  ;;  %v600_v22 = vadd.f32 %v1043_v42, %v599_v20 }
 0x106   : > { %v537_v23 = vpop.f32.mrf.mxu0  ;;  %v601_v24 = vpop.f32.mrf.mxu1 }
 0x107   : > { %v648_v25 = vmax.f32 %v536_v21, 0.0  ;;  %v664_v26 = vmax.f32 %v600_v22, 0.0 }
 0x108   : > { %v540_v27 = vpop.f32.mrf.mxu0  ;;  %v604_v28 = vpop.f32.mrf.mxu1 }
 0x109   : > { %680 = vst.msk [vmem:[%s1052_s15 + $0x28] sm:$0xff] %vm433_vm0, %v648_v25  ;;  %696 = vst.msk [vmem:[%s1052_s15 + $0xa8] sm:$0xff] %vm433_vm0, %v664_v26  ;;  %v541_v29 = vadd.f32 %v1043_v42, %v540_v27  ;;  %v605_v30 = vadd.f32 %v1043_v42, %v604_v28 }
 0x10a   : > { %v542_v31 = vpop.f32.mrf.mxu0  ;;  %v606_v32 = vpop.f32.mrf.mxu1 }
 0x10b   : > { %v649_v33 = vmax.f32 %v541_v29, 0.0  ;;  %v665_v34 = vmax.f32 %v605_v30, 0.0 }
 0x10c   : > { %v543_v35 = vpop.f32.mrf.mxu0  ;;  %v607_v36 = vpop.f32.mrf.mxu1 }
 0x10d   : > { %681 = vst.msk [vmem:[%s1052_s15 + $0x30] sm:$0xff] %vm433_vm0, %v649_v33  ;;  %697 = vst.msk [vmem:[%s1052_s15 + $0xb0] sm:$0xff] %vm433_vm0, %v665_v34  ;;  %v544_v37 = vadd.f32 %v1043_v42, %v543_v35  ;;  %v608_v38 = vadd.f32 %v1043_v42, %v607_v36 }
 0x10e   : > { %v545_v39 = vpop.f32.mrf.mxu0  ;;  %v609_v40 = vpop.f32.mrf.mxu1 }
 0x10f   : > { %v650_v41 = vmax.f32 %v544_v37, 0.0  ;;  %v666_v43 = vmax.f32 %v608_v38, 0.0 }
 0x110   : > { %v548_v44 = vpop.f32.mrf.mxu0  ;;  %v612_v45 = vpop.f32.mrf.mxu1 }
 0x111   : > { %682 = vst.msk [vmem:[%s1052_s15 + $0x38] sm:$0xff] %vm433_vm0, %v650_v41  ;;  %698 = vst.msk [vmem:[%s1052_s15 + $0xb8] sm:$0xff] %vm433_vm0, %v666_v43  ;;  %v549_v46 = vadd.f32 %v1043_v42, %v548_v44  ;;  %v613_v47 = vadd.f32 %v1043_v42, %v612_v45 }
 0x112   : > { %v550_v48 = vpop.f32.mrf.mxu0  ;;  %v614_v49 = vpop.f32.mrf.mxu1 }
 0x113   : > { %v651_v50 = vmax.f32 %v549_v46, 0.0  ;;  %v667_v51 = vmax.f32 %v613_v47, 0.0 }
 0x114   : > { %v551_v52 = vpop.f32.mrf.mxu0  ;;  %v615_v53 = vpop.f32.mrf.mxu1 }
 0x115   : > { %683 = vst.msk [vmem:[%s1052_s15 + $0x40] sm:$0xff] %vm433_vm0, %v651_v50  ;;  %699 = vst.msk [vmem:[%s1052_s15 + $0xc0] sm:$0xff] %vm433_vm0, %v667_v51  ;;  %v552_v54 = vadd.f32 %v1043_v42, %v551_v52  ;;  %v616_v55 = vadd.f32 %v1043_v42, %v615_v53 }
 0x116   : > { %v553_v56 = vpop.f32.mrf.mxu0  ;;  %v617_v57 = vpop.f32.mrf.mxu1 }
 0x117   : > { %v652_v58 = vmax.f32 %v552_v54, 0.0  ;;  %v668_v59 = vmax.f32 %v616_v55, 0.0 }
 0x118   : > { %v556_v60 = vpop.f32.mrf.mxu0  ;;  %v620_v61 = vpop.f32.mrf.mxu1 }
 0x119   : > { %684 = vst.msk [vmem:[%s1052_s15 + $0x48] sm:$0xff] %vm433_vm0, %v652_v58  ;;  %700 = vst.msk [vmem:[%s1052_s15 + $0xc8] sm:$0xff] %vm433_vm0, %v668_v59  ;;  %v557_v62 = vadd.f32 %v1043_v42, %v556_v60  ;;  %v621_v63 = vadd.f32 %v1043_v42, %v620_v61 }
 0x11a   : > { %v558_v0 = vpop.f32.mrf.mxu0  ;;  %v622_v1 = vpop.f32.mrf.mxu1 }
 0x11b   : > { %v653_v2 = vmax.f32 %v557_v62, 0.0  ;;  %v669_v3 = vmax.f32 %v621_v63, 0.0 }
 0x11c   : > { %v559_v4 = vpop.f32.mrf.mxu0  ;;  %v623_v5 = vpop.f32.mrf.mxu1 }
 0x11d   : > { %685 = vst.msk [vmem:[%s1052_s15 + $0x50] sm:$0xff] %vm433_vm0, %v653_v2  ;;  %701 = vst.msk [vmem:[%s1052_s15 + $0xd0] sm:$0xff] %vm433_vm0, %v669_v3  ;;  %v560_v6 = vadd.f32 %v1043_v42, %v559_v4  ;;  %v624_v7 = vadd.f32 %v1043_v42, %v623_v5 }
 0x11e   : > { %v561_v8 = vpop.f32.mrf.mxu0  ;;  %v625_v9 = vpop.f32.mrf.mxu1 }
 0x11f   : > { %v654_v10 = vmax.f32 %v560_v6, 0.0  ;;  %v670_v11 = vmax.f32 %v624_v7, 0.0 }
 0x120   : > { %v564_v12 = vpop.f32.mrf.mxu0  ;;  %v628_v13 = vpop.f32.mrf.mxu1 }
 0x121   : > { %686 = vst.msk [vmem:[%s1052_s15 + $0x58] sm:$0xff] %vm433_vm0, %v654_v10  ;;  %702 = vst.msk [vmem:[%s1052_s15 + $0xd8] sm:$0xff] %vm433_vm0, %v670_v11  ;;  %v565_v14 = vadd.f32 %v1043_v42, %v564_v12  ;;  %v629_v15 = vadd.f32 %v1043_v42, %v628_v13 }
 0x122   : > { %v566_v16 = vpop.f32.mrf.mxu0  ;;  %v630_v17 = vpop.f32.mrf.mxu1 }
 0x123   : > { %v655_v18 = vmax.f32 %v565_v14, 0.0  ;;  %v671_v19 = vmax.f32 %v629_v15, 0.0 }
 0x124   : > { %v567_v20 = vpop.f32.mrf.mxu0  ;;  %v631_v21 = vpop.f32.mrf.mxu1 }
 0x125   : > { %687 = vst.msk [vmem:[%s1052_s15 + $0x60] sm:$0xff] %vm433_vm0, %v655_v18  ;;  %703 = vst.msk [vmem:[%s1052_s15 + $0xe0] sm:$0xff] %vm433_vm0, %v671_v19  ;;  %v568_v22 = vadd.f32 %v1043_v42, %v567_v20  ;;  %v632_v23 = vadd.f32 %v1043_v42, %v631_v21 }
 0x126   : > { %v569_v24 = vpop.f32.mrf.mxu0  ;;  %v633_v25 = vpop.f32.mrf.mxu1 }
 0x127   : > { %v656_v26 = vmax.f32 %v568_v22, 0.0  ;;  %v672_v27 = vmax.f32 %v632_v23, 0.0 }
 0x128   : > { %v572_v28 = vpop.f32.mrf.mxu0  ;;  %v636_v29 = vpop.f32.mrf.mxu1 }
 0x129   : > { %688 = vst.msk [vmem:[%s1052_s15 + $0x68] sm:$0xff] %vm433_vm0, %v656_v26  ;;  %704 = vst.msk [vmem:[%s1052_s15 + $0xe8] sm:$0xff] %vm433_vm0, %v672_v27  ;;  %v573_v30 = vadd.f32 %v1043_v42, %v572_v28  ;;  %v637_v31 = vadd.f32 %v1043_v42, %v636_v29 }
 0x12a   : > { %v574_v32 = vpop.f32.mrf.mxu0  ;;  %v638_v33 = vpop.f32.mrf.mxu1 }
 0x12b   : > { %v657_v34 = vmax.f32 %v573_v30, 0.0  ;;  %v673_v35 = vmax.f32 %v637_v31, 0.0 }
 0x12c   : > { %v575_v36 = vpop.f32.mrf.mxu0  ;;  %v639_v37 = vpop.f32.mrf.mxu1 }
 0x12d   : > { %689 = vst.msk [vmem:[%s1052_s15 + $0x70] sm:$0xff] %vm433_vm0, %v657_v34  ;;  %705 = vst.msk [vmem:[%s1052_s15 + $0xf0] sm:$0xff] %vm433_vm0, %v673_v35  ;;  %v576_v38 = vadd.f32 %v1043_v42, %v575_v36  ;;  %v640_v39 = vadd.f32 %v1043_v42, %v639_v37 }
 0x12e   : > { %v577_v40 = vpop.f32.mrf.mxu0  ;;  %v641_v41 = vpop.f32.mrf.mxu1 }
 0x12f   : > { %v658_v43 = vmax.f32 %v576_v38, 0.0  ;;  %v674_v44 = vmax.f32 %v640_v39, 0.0 }
 0x131   : > { %690 = vst.msk [vmem:[%s1052_s15 + $0x78] sm:$0xff] %vm433_vm0, %v658_v43  ;;  %706 = vst.msk [vmem:[%s1052_s15 + $0xf8] sm:$0xff] %vm433_vm0, %v674_v44 }
 0x132 PF: > { %s13_s12 = sadd.s32 1, %s924_s12  }
 0x133   : > { %p10_p4 = scmp.ge.s32.totalorder %s13_s12, 4  }
 0x135   :  { %12 = sbr.rel (!%p10_p4) target bundleno = 1 (0x1), region = 62 }

// kernel: fwd.23
= control target key start
LH: loop header
LB: loop body
LE: loop exit
PB: predicated region body
PF: predicated region fallthrough
CT: control target
= control target key end

     0   :  { %v427_v0 = vmov 0   ;;  %vm182_vm0 = vcmask 130048   ;;  %vm320_vm1 = vcmask 261120   ;;  %s616_s1 = inlined_call_operand.vmem [shape: bf16[144,32], index: 1, kind: input, shape index: {}]   ;;  %s617_s0 = inlined_call_operand.vmem [shape: bf16[128,144], index: 0, kind: input, shape index: {}]   ;;  %s618_s2 = inlined_call_operand.vmem [shape: f32[1,32], index: 2, kind: input, shape index: {}]   ;;  %s619_s3 = inlined_call_operand.vmem [shape: f32[128,32], index: 3, kind: output, shape index: {}]  }
   0x1   :  { %207 = vmatprep.subr.bf16.mxu0 %v427_v0  ;;  %375 = vmatprep.subr.bf16.mxu1 %v427_v0  ;;  %v394_v1 = vld [vmem:[%s616_s1 + $0x38] sm:$0xff]   ;;  %v395_v2 = vld [vmem:[%s616_s1 + $0x30] sm:$0xff]   ;;  %v396_v3 = vld [vmem:[%s616_s1 + $0x28] sm:$0xff]  }
   0x2   :  { %208 = vmatpush1.bf16.msra.mxu0 %v394_v1  ;;  %384 = vmatpush1.bf16.msra.mxu1 %v394_v1  ;;  %v397_v4 = vld [vmem:[%s616_s1 + $0x20] sm:$0xff]   ;;  %v398_v7 = vld [vmem:[%s616_s1 + $0x18] sm:$0xff]   ;;  %v399_v8 = vld [vmem:[%s616_s1 + $0x10] sm:$0xff]  }
   0x3   :  { %209 = vmatprep.subr.bf16.mxu0 %v427_v0  ;;  %376 = vmatprep.subr.bf16.mxu1 %v427_v0  ;;  %v405_v5 = vld [vmem:[%s617_s0 + $0x4] ss:$8 sps:$4 sm:$0xff]   ;;  %v403_v12 = vld [vmem:[%s617_s0] ss:$8 sps:$4 sm:$0xff]   ;;  %v409_v14 = vld [vmem:[%s617_s0 + $0x14] ss:$8 sps:$4 sm:$0xff]  }
   0x4   :  { %v408_v6 = vld [vmem:[%s617_s0 + $0x44] ss:$8 sps:$4 sm:$0xff]   ;;  %367 = vmatprep.mubr.msk.bf16.mxu0 %vm182_vm0, %v405_v5  ;;  %v406_v13 = vld [vmem:[%s617_s0 + $0x40] ss:$8 sps:$4 sm:$0xff]   ;;  %v411_v15 = vld [vmem:[%s617_s0 + $0x54] ss:$8 sps:$4 sm:$0xff]  }
   0x5   :  { %371 = vmatprep.mubr.msk.bf16.mxu1 %vm182_vm0, %v408_v6  ;;  %v400_v9 = vld [vmem:[%s616_s1 + $0x8] sm:$0xff]   ;;  %v401_v10 = vld [vmem:[%s616_s1] sm:$0xff]   ;;  %v413_v16 = vld [vmem:[%s617_s0 + $0x10] ss:$8 sps:$4 sm:$0xff]  }
   0x6   :  { %210 = vmatpush1.bf16.msra.mxu0 %v395_v2  ;;  %385 = vmatpush1.bf16.msra.mxu1 %v395_v2  ;;  %v402_v11 = vld [vmem:[%s616_s1 + $0x40] sm:$0xff]   ;;  %v414_v17 = vld [vmem:[%s617_s0 + $0x50] ss:$8 sps:$4 sm:$0xff]   ;;  %v421_v22 = vld [vmem:[%s617_s0 + $0x34] ss:$8 sps:$4 sm:$0xff]  }
   0x7   :  { %211 = vmatprep.subr.bf16.mxu0 %v427_v0  ;;  %377 = vmatprep.subr.bf16.mxu1 %v427_v0  ;;  %v415_v18 = vld [vmem:[%s617_s0 + $0x24] ss:$8 sps:$4 sm:$0xff]   ;;  %v419_v20 = vld [vmem:[%s617_s0 + $0x20] ss:$8 sps:$4 sm:$0xff]   ;;  %v423_v23 = vld [vmem:[%s617_s0 + $0x74] ss:$8 sps:$4 sm:$0xff]  }
   0x8   :  { %v417_v19 = vld [vmem:[%s617_s0 + $0x64] ss:$8 sps:$4 sm:$0xff]   ;;  %v420_v21 = vld [vmem:[%s617_s0 + $0x60] ss:$8 sps:$4 sm:$0xff]   ;;  %v425_v24 = vld [vmem:[%s617_s0 + $0x30] ss:$8 sps:$4 sm:$0xff]  }
   0x9   :  { %v426_v25 = vld [vmem:[%s617_s0 + $0x70] ss:$8 sps:$4 sm:$0xff]   ;;  %v534_v26 = vld [vmem:[%s618_s2] ss:$0 sm:$0xff] }
   0xa   :  { %212 = vmatpush1.bf16.msra.mxu0 %v396_v3  ;;  %386 = vmatpush1.bf16.msra.mxu1 %v396_v3 }
   0xb   :  { %213 = vmatprep.subr.bf16.mxu0 %v427_v0  ;;  %378 = vmatprep.subr.bf16.mxu1 %v427_v0 }
   0xe   :  { %214 = vmatpush1.bf16.msra.mxu0 %v397_v4  ;;  %387 = vmatpush1.bf16.msra.mxu1 %v397_v4 }
   0xf   :  { %215 = vmatprep.subr.bf16.mxu0 %v427_v0  ;;  %379 = vmatprep.subr.bf16.mxu1 %v427_v0 }
  0x12   :  { %216 = vmatpush1.bf16.msra.mxu0 %v398_v7  ;;  %388 = vmatpush1.bf16.msra.mxu1 %v398_v7 }
  0x13   :  { %217 = vmatprep.subr.bf16.mxu0 %v427_v0  ;;  %380 = vmatprep.subr.bf16.mxu1 %v427_v0 }
  0x16   :  { %218 = vmatpush1.bf16.msra.mxu0 %v399_v8  ;;  %389 = vmatpush1.bf16.msra.mxu1 %v399_v8 }
  0x17   :  { %219 = vmatprep.subr.bf16.mxu0 %v427_v0  ;;  %381 = vmatprep.subr.bf16.mxu1 %v427_v0 }
  0x1a   :  { %220 = vmatpush1.bf16.msra.mxu0 %v400_v9  ;;  %390 = vmatpush1.bf16.msra.mxu1 %v400_v9 }
  0x1b   :  { %221 = vmatprep.subr.bf16.mxu0 %v427_v0  ;;  %382 = vmatprep.subr.bf16.mxu1 %v427_v0 }
  0x1e   :  { %222 = vmatpush1.bf16.msra.mxu0 %v401_v10  ;;  %391 = vmatpush1.bf16.msra.mxu1 %v401_v10 }
  0x1f   :  { %237 = vmatprep.subr.bf16.mxu0 %v427_v0  ;;  %383 = vmatprep.subr.bf16.mxu1 %v427_v0 }
  0x22   :  { %238 = vmatpush2.bf16.msra.mxu0 %v402_v11  ;;  %392 = vmatpush2.bf16.msra.mxu1 %v402_v11 }
  0x25   :  { %240 = vmatmul.mubr.bf16.vlgmr.msra.gmra.mxu0 %v403_v12  ;;  %272 = vmatmul.mubr.bf16.vlgmr.msra.gmra.mxu1 %v406_v13 }
  0x26   :  { %368 = vmatprep.mubr.msk.bf16.mxu0 %vm182_vm0, %v409_v14  ;;  %372 = vmatprep.mubr.msk.bf16.mxu1 %vm182_vm0, %v411_v15 }
  0x2d   :  { %248 = vmatmul.mubr.bf16.gmra.mxu0 %v413_v16  ;;  %280 = vmatmul.mubr.bf16.gmra.mxu1 %v414_v17 }
  0x2e   :  { %369 = vmatprep.mubr.msk.bf16.mxu0 %vm182_vm0, %v415_v18  ;;  %373 = vmatprep.mubr.msk.bf16.mxu1 %vm182_vm0, %v417_v19 }
  0x35   :  { %256 = vmatmul.mubr.bf16.gmra.mxu0 %v419_v20  ;;  %288 = vmatmul.mubr.bf16.gmra.mxu1 %v420_v21 }
  0x36   :  { %370 = vmatprep.mubr.msk.bf16.mxu0 %vm182_vm0, %v421_v22  ;;  %374 = vmatprep.mubr.msk.bf16.mxu1 %vm182_vm0, %v423_v23 }
  0x3d   :  { %264 = vmatmul.mubr.bf16.gmra.mxu0 %v425_v24  ;;  %296 = vmatmul.mubr.bf16.gmra.mxu1 %v426_v25 }
  0xe5   :  { %v241_v27 = vpop.f32.mrf.mxu0  ;;  %v273_v28 = vpop.f32.mrf.mxu1 }
  0xe6   :  { %v242_v29 = vadd.f32 %v534_v26, %v241_v27  ;;  %v274_v30 = vadd.f32 %v534_v26, %v273_v28 }
  0xe7   :  { %v243_v31 = vpop.f32.mrf.mxu0  ;;  %v275_v32 = vpop.f32.mrf.mxu1 }
  0xe8   :  { %v304_v33 = vmax.f32 %v242_v29, 0.0  ;;  %v312_v34 = vmax.f32 %v274_v30, 0.0 }
  0xe9   :  { %v244_v35 = vpop.f32.mrf.mxu0  ;;  %v276_v36 = vpop.f32.mrf.mxu1 }
  0xea   :  { %321 = vst.msk [vmem:[%s619_s3] sm:$0xff] %vm320_vm1, %v304_v33  ;;  %329 = vst.msk [vmem:[%s619_s3 + $0x40] sm:$0xff] %vm320_vm1, %v312_v34  ;;  %v245_v37 = vadd.f32 %v534_v26, %v244_v35  ;;  %v277_v38 = vadd.f32 %v534_v26, %v276_v36 }
  0xeb   :  { %v246_v39 = vpop.f32.mrf.mxu0  ;;  %v278_v40 = vpop.f32.mrf.mxu1 }
  0xec   :  { %v305_v41 = vmax.f32 %v245_v37, 0.0  ;;  %v313_v42 = vmax.f32 %v277_v38, 0.0 }
  0xed   :  { %v249_v43 = vpop.f32.mrf.mxu0  ;;  %v281_v44 = vpop.f32.mrf.mxu1 }
  0xee   :  { %322 = vst.msk [vmem:[%s619_s3 + $0x8] sm:$0xff] %vm320_vm1, %v305_v41  ;;  %330 = vst.msk [vmem:[%s619_s3 + $0x48] sm:$0xff] %vm320_vm1, %v313_v42  ;;  %v250_v45 = vadd.f32 %v534_v26, %v249_v43  ;;  %v282_v46 = vadd.f32 %v534_v26, %v281_v44 }
  0xef   :  { %v251_v47 = vpop.f32.mrf.mxu0  ;;  %v283_v48 = vpop.f32.mrf.mxu1 }
  0xf0   :  { %v306_v49 = vmax.f32 %v250_v45, 0.0  ;;  %v314_v50 = vmax.f32 %v282_v46, 0.0 }
  0xf1   :  { %v252_v51 = vpop.f32.mrf.mxu0  ;;  %v284_v52 = vpop.f32.mrf.mxu1 }
  0xf2   :  { %323 = vst.msk [vmem:[%s619_s3 + $0x10] sm:$0xff] %vm320_vm1, %v306_v49  ;;  %331 = vst.msk [vmem:[%s619_s3 + $0x50] sm:$0xff] %vm320_vm1, %v314_v50  ;;  %v253_v53 = vadd.f32 %v534_v26, %v252_v51  ;;  %v285_v54 = vadd.f32 %v534_v26, %v284_v52 }
  0xf3   :  { %v254_v55 = vpop.f32.mrf.mxu0  ;;  %v286_v56 = vpop.f32.mrf.mxu1 }
  0xf4   :  { %v307_v57 = vmax.f32 %v253_v53, 0.0  ;;  %v315_v58 = vmax.f32 %v285_v54, 0.0 }
  0xf5   :  { %v257_v59 = vpop.f32.mrf.mxu0  ;;  %v289_v60 = vpop.f32.mrf.mxu1 }
  0xf6   :  { %324 = vst.msk [vmem:[%s619_s3 + $0x18] sm:$0xff] %vm320_vm1, %v307_v57  ;;  %332 = vst.msk [vmem:[%s619_s3 + $0x58] sm:$0xff] %vm320_vm1, %v315_v58  ;;  %v258_v61 = vadd.f32 %v534_v26, %v257_v59  ;;  %v290_v62 = vadd.f32 %v534_v26, %v289_v60 }
  0xf7   :  { %v259_v63 = vpop.f32.mrf.mxu0  ;;  %v291_v0 = vpop.f32.mrf.mxu1 }
  0xf8   :  { %v308_v1 = vmax.f32 %v258_v61, 0.0  ;;  %v316_v2 = vmax.f32 %v290_v62, 0.0 }
  0xf9   :  { %v260_v3 = vpop.f32.mrf.mxu0  ;;  %v292_v4 = vpop.f32.mrf.mxu1 }
  0xfa   :  { %325 = vst.msk [vmem:[%s619_s3 + $0x20] sm:$0xff] %vm320_vm1, %v308_v1  ;;  %333 = vst.msk [vmem:[%s619_s3 + $0x60] sm:$0xff] %vm320_vm1, %v316_v2  ;;  %v261_v5 = vadd.f32 %v534_v26, %v260_v3  ;;  %v293_v6 = vadd.f32 %v534_v26, %v292_v4 }
  0xfb   :  { %v262_v7 = vpop.f32.mrf.mxu0  ;;  %v294_v8 = vpop.f32.mrf.mxu1 }
  0xfc   :  { %v309_v9 = vmax.f32 %v261_v5, 0.0  ;;  %v317_v10 = vmax.f32 %v293_v6, 0.0 }
  0xfd   :  { %v265_v11 = vpop.f32.mrf.mxu0  ;;  %v297_v12 = vpop.f32.mrf.mxu1 }
  0xfe   :  { %326 = vst.msk [vmem:[%s619_s3 + $0x28] sm:$0xff] %vm320_vm1, %v309_v9  ;;  %334 = vst.msk [vmem:[%s619_s3 + $0x68] sm:$0xff] %vm320_vm1, %v317_v10  ;;  %v266_v13 = vadd.f32 %v534_v26, %v265_v11  ;;  %v298_v14 = vadd.f32 %v534_v26, %v297_v12 }
  0xff   :  { %v267_v15 = vpop.f32.mrf.mxu0  ;;  %v299_v16 = vpop.f32.mrf.mxu1 }
 0x100   :  { %v310_v17 = vmax.f32 %v266_v13, 0.0  ;;  %v318_v18 = vmax.f32 %v298_v14, 0.0 }
 0x101   :  { %v268_v19 = vpop.f32.mrf.mxu0  ;;  %v300_v20 = vpop.f32.mrf.mxu1 }
 0x102   :  { %327 = vst.msk [vmem:[%s619_s3 + $0x30] sm:$0xff] %vm320_vm1, %v310_v17  ;;  %335 = vst.msk [vmem:[%s619_s3 + $0x70] sm:$0xff] %vm320_vm1, %v318_v18  ;;  %v269_v21 = vadd.f32 %v534_v26, %v268_v19  ;;  %v301_v22 = vadd.f32 %v534_v26, %v300_v20 }
 0x103   :  { %v270_v23 = vpop.f32.mrf.mxu0  ;;  %v302_v24 = vpop.f32.mrf.mxu1 }
 0x104   :  { %v311_v25 = vmax.f32 %v269_v21, 0.0  ;;  %v319_v27 = vmax.f32 %v301_v22, 0.0 }
 0x106   :  { %328 = vst.msk [vmem:[%s619_s3 + $0x38] sm:$0xff] %vm320_vm1, %v311_v25  ;;  %336 = vst.msk [vmem:[%s619_s3 + $0x78] sm:$0xff] %vm320_vm1, %v319_v27 }

// kernel: fwd.24
= control target key start
LH: loop header
LB: loop body
LE: loop exit
PB: predicated region body
PF: predicated region fallthrough
CT: control target
= control target key end

     0   :  { %vm318_vm0 = vcmask 261120   ;;  %vm553_vm1 = vcmask 392192   ;;  %s1048_s1 = inlined_call_operand.vmem [shape: bf16[288,48], index: 1, kind: input, shape index: {}]   ;;  %s1049_s0 = inlined_call_operand.vmem [shape: bf16[128,288], index: 0, kind: input, shape index: {}]   ;;  %s1050_s2 = inlined_call_operand.vmem [shape: f32[1,48], index: 2, kind: input, shape index: {}]   ;;  %s1051_s3 = inlined_call_operand.vmem [shape: f32[128,48], index: 3, kind: output, shape index: {}]  }
   0x1   :  { %v735_v0 = vld [vmem:[%s1048_s1 + $0x78] sm:$0xff]   ;;  %v737_v2 = vld [vmem:[%s1048_s1 + $0x70] sm:$0xff]   ;;  %v739_v4 = vld [vmem:[%s1048_s1 + $0x68] sm:$0xff]  }
   0x2   :  { %v736_v1 = vld [vmem:[%s1048_s1 + $0x38] sm:$0xff]   ;;  %625 = vmatprep.subr.bf16.mxu0 %v735_v0  ;;  %719 = vmatprep.subr.bf16.mxu1 %v735_v0  ;;  %v738_v3 = vld [vmem:[%s1048_s1 + $0x30] sm:$0xff]   ;;  %v740_v5 = vld [vmem:[%s1048_s1 + $0x28] sm:$0xff]  }
   0x3   :  { %626 = vmatpush3.bf16.msra.mxu0 %v736_v1  ;;  %727 = vmatpush3.bf16.msra.mxu1 %v736_v1  ;;  %v741_v6 = vld [vmem:[%s1048_s1 + $0x60] sm:$0xff]   ;;  %v743_v8 = vld [vmem:[%s1048_s1 + $0x58] sm:$0xff]   ;;  %v745_v10 = vld [vmem:[%s1048_s1 + $0x50] sm:$0xff]  }
   0x4   :  { %627 = vmatprep.subr.bf16.mxu0 %v737_v2  ;;  %720 = vmatprep.subr.bf16.mxu1 %v737_v2  ;;  %v742_v7 = vld [vmem:[%s1048_s1 + $0x20] sm:$0xff]   ;;  %v744_v9 = vld [vmem:[%s1048_s1 + $0x18] sm:$0xff]   ;;  %v746_v13 = vld [vmem:[%s1048_s1 + $0x10] sm:$0xff]  }
   0x5   :  { %v753_v11 = vld [vmem:[%s1049_s0 + $0x4] ss:$12 sps:$4 sm:$0xff]   ;;  %v756_v12 = vld [vmem:[%s1049_s0 + $0x94] ss:$12 sps:$4 sm:$0xff]   ;;  %v747_v14 = vld [vmem:[%s1048_s1 + $0x48] sm:$0xff]  }
   0x6   :  { %375 = vmatprep.mubr.bf16.mxu0 %v753_v11  ;;  %423 = vmatprep.mubr.bf16.mxu1 %v756_v12  ;;  %v748_v15 = vld [vmem:[%s1048_s1 + $0x8] sm:$0xff]   ;;  %v749_v16 = vld [vmem:[%s1048_s1 + $0x40] sm:$0xff]   ;;  %v754_v20 = vld [vmem:[%s1049_s0 + $0x90] ss:$12 sps:$4 sm:$0xff]  }
   0x7   :  { %628 = vmatpush3.bf16.msra.mxu0 %v738_v3  ;;  %728 = vmatpush3.bf16.msra.mxu1 %v738_v3  ;;  %v750_v17 = vld [vmem:[%s1048_s1] sm:$0xff]   ;;  %v757_v19 = vld [vmem:[%s1048_s1 + $0x88] sm:$0xff]   ;;  %v768_v28 = vld [vmem:[%s1049_s0 + $0x30] ss:$12 sps:$4 sm:$0xff]  }
   0x8   :  { %629 = vmatprep.subr.bf16.mxu0 %v739_v4  ;;  %721 = vmatprep.subr.bf16.mxu1 %v739_v4  ;;  %v751_v18 = vld [vmem:[%s1049_s0] ss:$12 sps:$4 sm:$0xff]   ;;  %v758_v21 = vld [vmem:[%s1049_s0 + $0x1c] ss:$12 sps:$4 sm:$0xff]   ;;  %v762_v24 = vld [vmem:[%s1049_s0 + $0x18] ss:$12 sps:$4 sm:$0xff]  }
   0x9   :  { %v760_v22 = vld [vmem:[%s1049_s0 + $0xac] ss:$12 sps:$4 sm:$0xff]   ;;  %v764_v23 = vld [vmem:[%s1048_s1 + $0x80] sm:$0xff]   ;;  %v763_v25 = vld [vmem:[%s1049_s0 + $0xa8] ss:$12 sps:$4 sm:$0xff]  }
   0xa   :  { %v765_v26 = vld [vmem:[%s1049_s0 + $0x34] ss:$12 sps:$4 sm:$0xff]   ;;  %v770_v30 = vld [vmem:[%s1049_s0 + $0x4c] ss:$12 sps:$4 sm:$0xff]   ;;  %v774_v33 = vld [vmem:[%s1049_s0 + $0x50] ss:$12 sps:$4 sm:$0xff]  }
   0xb   :  { %630 = vmatpush3.bf16.msra.mxu0 %v740_v5  ;;  %729 = vmatpush3.bf16.msra.mxu1 %v740_v5  ;;  %v767_v27 = vld [vmem:[%s1049_s0 + $0x8] ss:$12 sps:$4 sm:$0xff]   ;;  %v769_v29 = vld [vmem:[%s1049_s0 + $0x20] ss:$12 sps:$4 sm:$0xff]   ;;  %v772_v31 = vld [vmem:[%s1049_s0 + $0x38] ss:$12 sps:$4 sm:$0xff]  }
   0xc   :  { %631 = vmatprep.subr.bf16.mxu0 %v741_v6  ;;  %722 = vmatprep.subr.bf16.mxu1 %v741_v6  ;;  %v773_v32 = vld [vmem:[%s1049_s0 + $0x48] ss:$12 sps:$4 sm:$0xff]   ;;  %v775_v34 = vld [vmem:[%s1049_s0 + $0x64] ss:$12 sps:$4 sm:$0xff]   ;;  %v778_v36 = vld [vmem:[%s1049_s0 + $0x60] ss:$12 sps:$4 sm:$0xff]  }
   0xd   :  { %v777_v35 = vld [vmem:[%s1049_s0 + $0x68] ss:$12 sps:$4 sm:$0xff]   ;;  %v779_v37 = vld [vmem:[%s1049_s0 + $0x80] ss:$12 sps:$4 sm:$0xff]   ;;  %v782_v39 = vld [vmem:[%s1049_s0 + $0x98] ss:$12 sps:$4 sm:$0xff]  }
   0xe   :  { %v780_v38 = vld [vmem:[%s1049_s0 + $0x7c] ss:$12 sps:$4 sm:$0xff]   ;;  %v783_v40 = vld [vmem:[%s1049_s0 + $0x78] ss:$12 sps:$4 sm:$0xff]   ;;  %v958_v60 = vld [vmem:[%s1050_s2] ss:$0 sm:$0xff] }
   0xf   :  { %632 = vmatpush3.bf16.msra.mxu0 %v742_v7  ;;  %730 = vmatpush3.bf16.msra.mxu1 %v742_v7  ;;  %v784_v41 = vld [vmem:[%s1049_s0 + $0xb0] ss:$12 sps:$4 sm:$0xff]  }
  0x10   :  { %633 = vmatprep.subr.bf16.mxu0 %v743_v8  ;;  %723 = vmatprep.subr.bf16.mxu1 %v743_v8 }
  0x13   :  { %634 = vmatpush3.bf16.msra.mxu0 %v744_v9  ;;  %731 = vmatpush3.bf16.msra.mxu1 %v744_v9 }
  0x14   :  { %635 = vmatprep.subr.bf16.mxu0 %v745_v10  ;;  %724 = vmatprep.subr.bf16.mxu1 %v745_v10 }
  0x17   :  { %636 = vmatpush3.bf16.msra.mxu0 %v746_v13  ;;  %732 = vmatpush3.bf16.msra.mxu1 %v746_v13 }
  0x18   :  { %637 = vmatprep.subr.bf16.mxu0 %v747_v14  ;;  %725 = vmatprep.subr.bf16.mxu1 %v747_v14 }
  0x1b   :  { %638 = vmatpush3.bf16.msra.mxu0 %v748_v15  ;;  %733 = vmatpush3.bf16.msra.mxu1 %v748_v15 }
  0x1c   :  { %639 = vmatprep.subr.bf16.mxu0 %v749_v16  ;;  %726 = vmatprep.subr.bf16.mxu1 %v749_v16 }
  0x1f   :  { %640 = vmatpush3.bf16.msra.mxu0 %v750_v17  ;;  %734 = vmatpush3.bf16.msra.mxu1 %v750_v17 }
  0x20   :  { %699 = vmatprep.subr.bf16.mxu1 %v757_v19 }
  0x22   :  { %376 = vmatmul.mubr.bf16.vlgmr.msra.gmra.mxu0 %v751_v18  ;;  %424 = vmatmul.mubr.bf16.vlgmr.msra.gmra.mxu1 %v754_v20 }
  0x23   :  { %700 = vmatpush3.bf16.msra.mxu1 %v757_v19  ;;  %383 = vmatprep.mubr.bf16.mxu0 %v758_v21 }
  0x24   :  { %431 = vmatprep.mubr.bf16.mxu1 %v760_v22  ;;  %701 = vmatprep.subr.bf16.mxu1 %v764_v23 }
  0x27   :  { %702 = vmatpush3.bf16.msra.mxu1 %v764_v23 }
  0x2a   :  { %384 = vmatmul.mubr.bf16.gmra.mxu0 %v762_v24  ;;  %432 = vmatmul.mubr.bf16.gmra.mxu1 %v763_v25 }
  0x2b   :  { %391 = vmatprep.mubr.bf16.mxu0 %v765_v26  ;;  %703 = vmatprep.mubr.msk.bf16.mxu1 %vm318_vm0, %v767_v27 }
  0x32   :  { %392 = vmatmul.mubr.bf16.gmra.mxu0 %v768_v28  ;;  %704 = vmatmul.mubr.msk.bf16.vlgmr.msra.gmra.mxu1 %vm318_vm0, %v769_v29 }
  0x33   :  { %399 = vmatprep.mubr.bf16.mxu0 %v770_v30  ;;  %707 = vmatprep.mubr.msk.bf16.mxu1 %vm318_vm0, %v772_v31 }
  0x3a   :  { %400 = vmatmul.mubr.bf16.gmra.mxu0 %v773_v32  ;;  %708 = vmatmul.mubr.msk.bf16.gmra.mxu1 %vm318_vm0, %v774_v33 }
  0x3b   :  { %407 = vmatprep.mubr.bf16.mxu0 %v775_v34  ;;  %711 = vmatprep.mubr.msk.bf16.mxu1 %vm318_vm0, %v777_v35 }
  0x42   :  { %408 = vmatmul.mubr.bf16.gmra.mxu0 %v778_v36  ;;  %712 = vmatmul.mubr.msk.bf16.gmra.mxu1 %vm318_vm0, %v779_v37 }
  0x43   :  { %415 = vmatprep.mubr.bf16.mxu0 %v780_v38  ;;  %715 = vmatprep.mubr.msk.bf16.mxu1 %vm318_vm0, %v782_v39 }
  0x4a   :  { %416 = vmatmul.mubr.bf16.gmra.mxu0 %v783_v40  ;;  %716 = vmatmul.mubr.msk.bf16.gmra.mxu1 %vm318_vm0, %v784_v41 }
  0xe2   :  { %v641_v42 = vpop.f32.mrf.mxu0  ;;  %v939_v43 = vpop.f32.mrf.mxu1 }
  0xe4   :  { %v642_v44 = vpop.f32.mrf.mxu0  ;;  %v941_v45 = vpop.f32.mrf.mxu1 }
  0xe5   :  { %v643_v57 = vadd.f32 %v642_v44, %v641_v42 }
  0xe6   :  { %v644_v46 = vpop.f32.mrf.mxu0  ;;  %v943_v47 = vpop.f32.mrf.mxu1 }
  0xe7   :  { %v378_v3 = vadd.f32 %v643_v57, %v958_v60  ;;  %v679_v57 = vadd.f32 %v941_v45, %v939_v43 }
  0xe8   :  { %v645_v48 = vpop.f32.mrf.mxu0  ;;  %v945_v49 = vpop.f32.mrf.mxu1 }
  0xe9   :  { %v646_v1 = vadd.f32 %v645_v48, %v644_v46  ;;  %v682_v43 = vadd.f32 %v945_v49, %v943_v47 }
  0xea   :  { %v647_v50 = vpop.f32.mrf.mxu0  ;;  %v947_v51 = vpop.f32.mrf.mxu1 }
  0xeb   :  { %v381_v14 = vadd.f32 %v646_v1, %v958_v60 }
  0xec   :  { %v648_v52 = vpop.f32.mrf.mxu0  ;;  %v949_v53 = vpop.f32.mrf.mxu1 }
  0xed   :  { %v649_v54 = vadd.f32 %v648_v52, %v647_v50  ;;  %v685_v48 = vadd.f32 %v949_v53, %v947_v51 }
  0xee   :  { %v650_v55 = vpop.f32.mrf.mxu0  ;;  %v951_v56 = vpop.f32.mrf.mxu1 }
  0xef   :  { %v386_v62 = vadd.f32 %v649_v54, %v958_v60  ;;  %v434_v1 = vadd.f32 %v685_v48, %v958_v60 }
  0xf0   :  { %v651_v58 = vpop.f32.mrf.mxu0  ;;  %v953_v59 = vpop.f32.mrf.mxu1 }
  0xf1   :  { %v652_v61 = vadd.f32 %v651_v58, %v650_v55  ;;  %v688_v53 = vadd.f32 %v953_v59, %v951_v56  ;;  %v426_v59 = vadd.f32 %v679_v57, %v958_v60 }
  0xf2   :  { %v653_v63 = vpop.f32.mrf.mxu0  ;;  %v705_v0 = vpop.f32.mrf.mxu1 }
  0xf3   :  { %v483_v2 = vadd.f32 %v705_v0, %v386_v62  ;;  %v389_v8 = vadd.f32 %v652_v61, %v958_v60 }
  0xf4   :  { %v654_v4 = vpop.f32.mrf.mxu0  ;;  %v474_v5 = vpop.f32.mrf.mxu1 }
  0xf5   :  { %v539_v6 = vmax.f32 %v483_v2, 0.0  ;;  %v475_v7 = vadd.f32 %v474_v5, %v378_v3  ;;  %v655_v11 = vadd.f32 %v654_v4, %v653_v63 }
  0xf6   :  { %v656_v9 = vpop.f32.mrf.mxu0  ;;  %v706_v10 = vpop.f32.mrf.mxu1 }
  0xf7   :  { %556 = vst.msk [vmem:[%s1051_s3 + $0x10] sm:$0xff] %vm553_vm1, %v539_v6  ;;  %v537_v12 = vmax.f32 %v475_v7, 0.0  ;;  %v486_v13 = vadd.f32 %v706_v10, %v389_v8  ;;  %v394_v23 = vadd.f32 %v655_v11, %v958_v60  ;;  %v437_v7 = vadd.f32 %v688_v53, %v958_v60 }
  0xf8   :  { %v657_v15 = vpop.f32.mrf.mxu0  ;;  %v477_v16 = vpop.f32.mrf.mxu1 }
  0xf9   :  { %554 = vst.msk [vmem:[%s1051_s3] sm:$0xff] %vm553_vm1, %v537_v12  ;;  %v540_v17 = vmax.f32 %v486_v13, 0.0  ;;  %v478_v18 = vadd.f32 %v477_v16, %v381_v14  ;;  %v658_v21 = vadd.f32 %v657_v15, %v656_v9  ;;  %v429_v12 = vadd.f32 %v682_v43, %v958_v60 }
  0xfa   :  { %v659_v19 = vpop.f32.mrf.mxu0  ;;  %v709_v20 = vpop.f32.mrf.mxu1 }
  0xfb   :  { %557 = vst.msk [vmem:[%s1051_s3 + $0x18] sm:$0xff] %vm553_vm1, %v540_v17  ;;  %v538_v22 = vmax.f32 %v478_v18, 0.0  ;;  %v397_v32 = vadd.f32 %v658_v21, %v958_v60 }
  0xfc   :  { %v660_v24 = vpop.f32.mrf.mxu0  ;;  %v490_v25 = vpop.f32.mrf.mxu1 }
  0xfd   :  { %555 = vst.msk [vmem:[%s1051_s3 + $0x8] sm:$0xff] %vm553_vm1, %v538_v22  ;;  %v661_v26 = vadd.f32 %v660_v24, %v659_v19  ;;  %v491_v27 = vadd.f32 %v490_v25, %v394_v23 }
  0xfe   :  { %v662_v28 = vpop.f32.mrf.mxu0  ;;  %v710_v29 = vpop.f32.mrf.mxu1 }
  0xff   :  { %v402_v30 = vadd.f32 %v661_v26, %v958_v60  ;;  %v541_v31 = vmax.f32 %v491_v27, 0.0 }
 0x100   :  { %v663_v33 = vpop.f32.mrf.mxu0  ;;  %v493_v34 = vpop.f32.mrf.mxu1 }
 0x101   :  { %v499_v35 = vadd.f32 %v709_v20, %v402_v30  ;;  %558 = vst.msk [vmem:[%s1051_s3 + $0x20] sm:$0xff] %vm553_vm1, %v541_v31  ;;  %v664_v36 = vadd.f32 %v663_v33, %v662_v28  ;;  %v494_v37 = vadd.f32 %v493_v34, %v397_v32 }
 0x102   :  { %v665_v38 = vpop.f32.mrf.mxu0  ;;  %v713_v39 = vpop.f32.mrf.mxu1 }
 0x103   :  { %v543_v40 = vmax.f32 %v499_v35, 0.0  ;;  %v405_v41 = vadd.f32 %v664_v36, %v958_v60  ;;  %v542_v42 = vmax.f32 %v494_v37, 0.0 }
 0x104   :  { %v666_v44 = vpop.f32.mrf.mxu0  ;;  %v506_v46 = vpop.f32.mrf.mxu1 }
 0x105   :  { %560 = vst.msk [vmem:[%s1051_s3 + $0x30] sm:$0xff] %vm553_vm1, %v543_v40  ;;  %v502_v50 = vadd.f32 %v710_v29, %v405_v41  ;;  %559 = vst.msk [vmem:[%s1051_s3 + $0x28] sm:$0xff] %vm553_vm1, %v542_v42  ;;  %v667_v52 = vadd.f32 %v666_v44, %v665_v38 }
 0x106   :  { %v668_v54 = vpop.f32.mrf.mxu0  ;;  %v714_v55 = vpop.f32.mrf.mxu1 }
 0x107   :  { %v544_v58 = vmax.f32 %v502_v50, 0.0  ;;  %v410_v51 = vadd.f32 %v667_v52, %v958_v60 }
 0x108   :  { %v669_v61 = vpop.f32.mrf.mxu0  ;;  %v509_v62 = vpop.f32.mrf.mxu1 }
 0x109   :  { %561 = vst.msk [vmem:[%s1051_s3 + $0x38] sm:$0xff] %vm553_vm1, %v544_v58  ;;  %v507_v63 = vadd.f32 %v506_v46, %v410_v51  ;;  %v670_v0 = vadd.f32 %v669_v61, %v668_v54 }
 0x10a   :  { %v671_v45 = vpop.f32.mrf.mxu0  ;;  %v717_v2 = vpop.f32.mrf.mxu1 }
 0x10b   :  { %v545_v3 = vmax.f32 %v507_v63, 0.0  ;;  %v413_v4 = vadd.f32 %v670_v0, %v958_v60  ;;  %v531_v56 = vadd.f32 %v717_v2, %v434_v1 }
 0x10c   :  { %v672_v5 = vpop.f32.mrf.mxu0  ;;  %v522_v6 = vpop.f32.mrf.mxu1 }
 0x10d   :  { %562 = vst.msk [vmem:[%s1051_s3 + $0x40] sm:$0xff] %vm553_vm1, %v545_v3  ;;  %v510_v8 = vadd.f32 %v509_v62, %v413_v4  ;;  %v551_v9 = vmax.f32 %v531_v56, 0.0  ;;  %v673_v47 = vadd.f32 %v672_v5, %v671_v45  ;;  %v523_v49 = vadd.f32 %v522_v6, %v426_v59 }
 0x10e   :  { %v674_v10 = vpop.f32.mrf.mxu0  ;;  %v718_v11 = vpop.f32.mrf.mxu1 }
 0x10f   :  { %v546_v13 = vmax.f32 %v510_v8, 0.0  ;;  %568 = vst.msk [vmem:[%s1051_s3 + $0x70] sm:$0xff] %vm553_vm1, %v551_v9  ;;  %v418_v14 = vadd.f32 %v673_v47, %v958_v60  ;;  %v549_v15 = vmax.f32 %v523_v49, 0.0  ;;  %v534_v16 = vadd.f32 %v718_v11, %v437_v7 }
 0x110   :  { %v675_v17 = vpop.f32.mrf.mxu0  ;;  %v525_v18 = vpop.f32.mrf.mxu1 }
 0x111   :  { %563 = vst.msk [vmem:[%s1051_s3 + $0x48] sm:$0xff] %vm553_vm1, %v546_v13  ;;  %v515_v19 = vadd.f32 %v713_v39, %v418_v14  ;;  %566 = vst.msk [vmem:[%s1051_s3 + $0x60] sm:$0xff] %vm553_vm1, %v549_v15  ;;  %v552_v20 = vmax.f32 %v534_v16, 0.0  ;;  %v676_v21 = vadd.f32 %v675_v17, %v674_v10  ;;  %v526_v22 = vadd.f32 %v525_v18, %v429_v12 }
 0x113   :  { %v547_v23 = vmax.f32 %v515_v19, 0.0  ;;  %569 = vst.msk [vmem:[%s1051_s3 + $0x78] sm:$0xff] %vm553_vm1, %v552_v20  ;;  %v421_v24 = vadd.f32 %v676_v21, %v958_v60  ;;  %v550_v25 = vmax.f32 %v526_v22, 0.0 }
 0x115   :  { %564 = vst.msk [vmem:[%s1051_s3 + $0x50] sm:$0xff] %vm553_vm1, %v547_v23  ;;  %v518_v26 = vadd.f32 %v714_v55, %v421_v24  ;;  %567 = vst.msk [vmem:[%s1051_s3 + $0x68] sm:$0xff] %vm553_vm1, %v550_v25 }
 0x117   :  { %v548_v27 = vmax.f32 %v518_v26, 0.0 }
 0x119   :  { %565 = vst.msk [vmem:[%s1051_s3 + $0x58] sm:$0xff] %vm553_vm1, %v548_v27 }

// kernel: fwd.26
= control target key start
LH: loop header
LB: loop body
LE: loop exit
PB: predicated region body
PF: predicated region fallthrough
CT: control target
= control target key end

     0   :  { %vm110_vm0 = vcmask 523264   ;;  %vm232_vm1 = vcmask 261120   ;;  %s461_s1 = inlined_call_operand.vmem [shape: bf16[64,32], index: 1, kind: input, shape index: {}]   ;;  %s462_s0 = inlined_call_operand.vmem [shape: bf16[128,64], index: 0, kind: input, shape index: {}]   ;;  %s463_s2 = inlined_call_operand.vmem [shape: f32[1,32], index: 2, kind: input, shape index: {}]   ;;  %s464_s3 = inlined_call_operand.vmem [shape: f32[128,32], index: 3, kind: output, shape index: {}]  }
   0x1   :  { %v318_v0 = vld [vmem:[%s461_s1 + $0x18] sm:$0xff]   ;;  %v319_v1 = vld [vmem:[%s461_s1 + $0x10] sm:$0xff]   ;;  %v320_v2 = vld [vmem:[%s461_s1 + $0x8] sm:$0xff]  }
   0x2   :  { %286 = vmatprep.subr.bf16.mxu0 %v318_v0  ;;  %310 = vmatprep.subr.bf16.mxu1 %v318_v0  ;;  %v322_v3 = vld [vmem:[%s462_s0] sm:$0xff]   ;;  %v324_v6 = vld [vmem:[%s462_s0 + $0x8] sm:$0xff]   ;;  %v326_v8 = vld [vmem:[%s462_s0 + $0x10] sm:$0xff]  }
   0x3   :  { %287 = vmatpush3.bf16.msra.mxu0 %v318_v0  ;;  %314 = vmatpush3.bf16.msra.mxu1 %v318_v0  ;;  %v323_v4 = vld [vmem:[%s462_s0 + $0x20] sm:$0xff]   ;;  %v325_v7 = vld [vmem:[%s462_s0 + $0x28] sm:$0xff]   ;;  %v327_v9 = vld [vmem:[%s462_s0 + $0x30] sm:$0xff]  }
   0x4   :  { %288 = vmatprep.subr.bf16.mxu0 %v319_v1  ;;  %311 = vmatprep.subr.bf16.mxu1 %v319_v1  ;;  %v321_v5 = vld [vmem:[%s461_s1] sm:$0xff]   ;;  %v328_v10 = vld [vmem:[%s462_s0 + $0x18] sm:$0xff]  }
   0x5   :  { %294 = vmatprep.mubr.msk.bf16.mxu0 %vm110_vm0, %v322_v3  ;;  %302 = vmatprep.mubr.msk.bf16.mxu1 %vm110_vm0, %v323_v4  ;;  %v329_v11 = vld [vmem:[%s462_s0 + $0x38] sm:$0xff]   ;;  %v253_v12 = vld [vmem:[%s463_s2] ss:$0 sm:$0xff] }
   0x7   :  { %289 = vmatpush3.bf16.msra.mxu0 %v319_v1  ;;  %315 = vmatpush3.bf16.msra.mxu1 %v319_v1 }
   0x8   :  { %290 = vmatprep.subr.bf16.mxu0 %v320_v2  ;;  %312 = vmatprep.subr.bf16.mxu1 %v320_v2 }
   0xb   :  { %291 = vmatpush3.bf16.msra.mxu0 %v320_v2  ;;  %316 = vmatpush3.bf16.msra.mxu1 %v320_v2 }
   0xc   :  { %292 = vmatprep.subr.bf16.mxu0 %v321_v5  ;;  %313 = vmatprep.subr.bf16.mxu1 %v321_v5 }
   0xf   :  { %293 = vmatpush3.bf16.msra.mxu0 %v321_v5  ;;  %317 = vmatpush3.bf16.msra.mxu1 %v321_v5 }
  0x12   :  { %295 = vmatmul.mubr.msk.bf16.vlgmr.msra.gmra.mxu0 %vm110_vm0, %v324_v6  ;;  %303 = vmatmul.mubr.msk.bf16.vlgmr.msra.gmra.mxu1 %vm110_vm0, %v325_v7 }
  0x13   :  { %298 = vmatprep.mubr.msk.bf16.mxu0 %vm110_vm0, %v326_v8  ;;  %306 = vmatprep.mubr.msk.bf16.mxu1 %vm110_vm0, %v327_v9 }
  0x1a   :  { %299 = vmatmul.mubr.msk.bf16.gmra.mxu0 %vm110_vm0, %v328_v10  ;;  %307 = vmatmul.mubr.msk.bf16.gmra.mxu1 %vm110_vm0, %v329_v11 }
  0xd2   :  { %v296_v13 = vpop.f32.mrf.mxu0  ;;  %v304_v14 = vpop.f32.mrf.mxu1 }
  0xd3   :  { %v178_v15 = vadd.f32 %v296_v13, %v253_v12  ;;  %v210_v16 = vadd.f32 %v304_v14, %v253_v12 }
  0xd4   :  { %v169_v17 = vpop.f32.mrf.mxu0  ;;  %v201_v18 = vpop.f32.mrf.mxu1 }
  0xd5   :  { %235 = vst.msk [vmem:[%s464_s3 + $0x10] sm:$0xff] %vm232_vm1, %v178_v15  ;;  %243 = vst.msk [vmem:[%s464_s3 + $0x50] sm:$0xff] %vm232_vm1, %v210_v16  ;;  %v170_v19 = vadd.f32 %v253_v12, %v169_v17  ;;  %v202_v20 = vadd.f32 %v253_v12, %v201_v18 }
  0xd6   :  { %v297_v21 = vpop.f32.mrf.mxu0  ;;  %v305_v22 = vpop.f32.mrf.mxu1 }
  0xd7   :  { %233 = vst.msk [vmem:[%s464_s3] sm:$0xff] %vm232_vm1, %v170_v19  ;;  %241 = vst.msk [vmem:[%s464_s3 + $0x40] sm:$0xff] %vm232_vm1, %v202_v20  ;;  %v181_v23 = vadd.f32 %v297_v21, %v253_v12  ;;  %v213_v24 = vadd.f32 %v305_v22, %v253_v12 }
  0xd8   :  { %v172_v25 = vpop.f32.mrf.mxu0  ;;  %v204_v26 = vpop.f32.mrf.mxu1 }
  0xd9   :  { %236 = vst.msk [vmem:[%s464_s3 + $0x18] sm:$0xff] %vm232_vm1, %v181_v23  ;;  %244 = vst.msk [vmem:[%s464_s3 + $0x58] sm:$0xff] %vm232_vm1, %v213_v24  ;;  %v173_v27 = vadd.f32 %v253_v12, %v172_v25  ;;  %v205_v28 = vadd.f32 %v253_v12, %v204_v26 }
  0xda   :  { %v300_v29 = vpop.f32.mrf.mxu0  ;;  %v308_v30 = vpop.f32.mrf.mxu1 }
  0xdb   :  { %234 = vst.msk [vmem:[%s464_s3 + $0x8] sm:$0xff] %vm232_vm1, %v173_v27  ;;  %242 = vst.msk [vmem:[%s464_s3 + $0x48] sm:$0xff] %vm232_vm1, %v205_v28  ;;  %v194_v31 = vadd.f32 %v300_v29, %v253_v12  ;;  %v226_v32 = vadd.f32 %v308_v30, %v253_v12 }
  0xdc   :  { %v185_v33 = vpop.f32.mrf.mxu0  ;;  %v217_v34 = vpop.f32.mrf.mxu1 }
  0xdd   :  { %239 = vst.msk [vmem:[%s464_s3 + $0x30] sm:$0xff] %vm232_vm1, %v194_v31  ;;  %247 = vst.msk [vmem:[%s464_s3 + $0x70] sm:$0xff] %vm232_vm1, %v226_v32  ;;  %v186_v35 = vadd.f32 %v253_v12, %v185_v33  ;;  %v218_v36 = vadd.f32 %v253_v12, %v217_v34 }
  0xde   :  { %v301_v37 = vpop.f32.mrf.mxu0  ;;  %v309_v38 = vpop.f32.mrf.mxu1 }
  0xdf   :  { %237 = vst.msk [vmem:[%s464_s3 + $0x20] sm:$0xff] %vm232_vm1, %v186_v35  ;;  %245 = vst.msk [vmem:[%s464_s3 + $0x60] sm:$0xff] %vm232_vm1, %v218_v36  ;;  %v197_v39 = vadd.f32 %v301_v37, %v253_v12  ;;  %v229_v40 = vadd.f32 %v309_v38, %v253_v12 }
  0xe0   :  { %v188_v41 = vpop.f32.mrf.mxu0  ;;  %v220_v42 = vpop.f32.mrf.mxu1 }
  0xe1   :  { %240 = vst.msk [vmem:[%s464_s3 + $0x38] sm:$0xff] %vm232_vm1, %v197_v39  ;;  %248 = vst.msk [vmem:[%s464_s3 + $0x78] sm:$0xff] %vm232_vm1, %v229_v40  ;;  %v189_v43 = vadd.f32 %v253_v12, %v188_v41  ;;  %v221_v44 = vadd.f32 %v253_v12, %v220_v42 }
  0xe3   :  { %238 = vst.msk [vmem:[%s464_s3 + $0x28] sm:$0xff] %vm232_vm1, %v189_v43  ;;  %246 = vst.msk [vmem:[%s464_s3 + $0x68] sm:$0xff] %vm232_vm1, %v221_v44 }

// kernel: fwd.25
= control target key start
LH: loop header
LB: loop body
LE: loop exit
PB: predicated region body
PF: predicated region fallthrough
CT: control target
= control target key end

     0   :  { %v886_v0 = vmov 0   ;;  %vm422_vm0 = vcmask 392192   ;;  %vm657_vm1 = vcmask 523264   ;;  %s1188_s1 = inlined_call_operand.vmem [shape: bf16[432,64], index: 1, kind: input, shape index: {}]   ;;  %s1189_s0 = inlined_call_operand.vmem [shape: bf16[128,432], index: 0, kind: input, shape index: {}]   ;;  %s1190_s2 = inlined_call_operand.vmem [shape: f32[1,64], index: 2, kind: input, shape index: {}]   ;;  %s1191_s3 = inlined_call_operand.vmem [shape: f32[128,64], index: 3, kind: output, shape index: {}]  }
   0x1   :  { %544 = vmatprep.subr.bf16.mxu1 %v886_v0  ;;  %v811_v1 = vld [vmem:[%s1188_s1 + $0x78] sm:$0xff]   ;;  %v814_v4 = vld [vmem:[%s1188_s1 + $0x70] sm:$0xff]   ;;  %v817_v7 = vld [vmem:[%s1188_s1 + $0x68] sm:$0xff]  }
   0x2   :  { %v812_v2 = vld [vmem:[%s1188_s1 + $0xb8] sm:$0xff]   ;;  %746 = vmatprep.subr.bf16.mxu0 %v811_v1  ;;  %v815_v5 = vld [vmem:[%s1188_s1 + $0xb0] sm:$0xff]   ;;  %v818_v8 = vld [vmem:[%s1188_s1 + $0xa8] sm:$0xff]  }
   0x3   :  { %v813_v3 = vld [vmem:[%s1188_s1 + $0x38] sm:$0xff]   ;;  %545 = vmatpush1.bf16.msra.mxu1 %v812_v2  ;;  %v816_v6 = vld [vmem:[%s1188_s1 + $0x30] sm:$0xff]   ;;  %v819_v9 = vld [vmem:[%s1188_s1 + $0x28] sm:$0xff]  }
   0x4   :  { %747 = vmatpush3.bf16.msra.mxu0 %v813_v3  ;;  %546 = vmatprep.subr.bf16.mxu1 %v886_v0  ;;  %v820_v10 = vld [vmem:[%s1188_s1 + $0x60] sm:$0xff]   ;;  %v823_v13 = vld [vmem:[%s1188_s1 + $0x58] sm:$0xff]   ;;  %v826_v16 = vld [vmem:[%s1188_s1 + $0x50] sm:$0xff]  }
   0x5   :  { %748 = vmatprep.subr.bf16.mxu0 %v814_v4  ;;  %v821_v11 = vld [vmem:[%s1188_s1 + $0xa0] sm:$0xff]   ;;  %v824_v14 = vld [vmem:[%s1188_s1 + $0x98] sm:$0xff]   ;;  %v827_v17 = vld [vmem:[%s1188_s1 + $0x90] sm:$0xff]  }
   0x6   :  { %v822_v12 = vld [vmem:[%s1188_s1 + $0x20] sm:$0xff]   ;;  %v825_v15 = vld [vmem:[%s1188_s1 + $0x18] sm:$0xff]   ;;  %v828_v18 = vld [vmem:[%s1188_s1 + $0x10] sm:$0xff]  }
   0x7   :  { %547 = vmatpush1.bf16.msra.mxu1 %v815_v5  ;;  %v829_v19 = vld [vmem:[%s1188_s1 + $0x48] sm:$0xff]   ;;  %v832_v22 = vld [vmem:[%s1188_s1 + $0x40] sm:$0xff]   ;;  %v838_v28 = vld [vmem:[%s1188_s1 + $0xd0] sm:$0xff]  }
   0x8   :  { %749 = vmatpush3.bf16.msra.mxu0 %v816_v6  ;;  %548 = vmatprep.subr.bf16.mxu1 %v886_v0  ;;  %v830_v20 = vld [vmem:[%s1188_s1 + $0x88] sm:$0xff]   ;;  %v837_v23 = vld [vmem:[%s1189_s0 + $0x4] ss:$16 sps:$4 sm:$0xff]   ;;  %v835_v26 = vld [vmem:[%s1189_s0] ss:$16 sps:$4 sm:$0xff]  }
   0x9   :  { %750 = vmatprep.subr.bf16.mxu0 %v817_v7  ;;  %v831_v21 = vld [vmem:[%s1188_s1 + $0x8] sm:$0xff]   ;;  %v833_v24 = vld [vmem:[%s1188_s1 + $0x80] sm:$0xff]   ;;  %479 = vmatprep.mubr.bf16.mxu0 %v837_v23 }
   0xa   :  { %v834_v25 = vld [vmem:[%s1188_s1] sm:$0xff]   ;;  %v846_v27 = vld [vmem:[%s1189_s0 + $0xc] ss:$16 sps:$4 sm:$0xff]   ;;  %v844_v34 = vld [vmem:[%s1189_s0 + $0x8] ss:$16 sps:$4 sm:$0xff]  }
   0xb   :  { %549 = vmatpush1.bf16.msra.mxu1 %v818_v8  ;;  %v840_v29 = vld [vmem:[%s1189_s0 + $0x24] ss:$16 sps:$4 sm:$0xff]   ;;  %738 = vmatprep.mubr.msk.bf16.mxu1 %vm422_vm0, %v846_v27  ;;  %v839_v30 = vld [vmem:[%s1188_s1 + $0xc8] sm:$0xff]   ;;  %v842_v31 = vld [vmem:[%s1189_s0 + $0x20] ss:$16 sps:$4 sm:$0xff]  }
   0xc   :  { %751 = vmatpush3.bf16.msra.mxu0 %v819_v9  ;;  %550 = vmatprep.subr.bf16.mxu1 %v886_v0  ;;  %v843_v32 = vld [vmem:[%s1188_s1 + $0xc0] sm:$0xff]   ;;  %v850_v35 = vld [vmem:[%s1189_s0 + $0x2c] ss:$16 sps:$4 sm:$0xff]   ;;  %v852_v38 = vld [vmem:[%s1189_s0 + $0x28] ss:$16 sps:$4 sm:$0xff]  }
   0xd   :  { %752 = vmatprep.subr.bf16.mxu0 %v820_v10  ;;  %v847_v33 = vld [vmem:[%s1189_s0 + $0x44] ss:$16 sps:$4 sm:$0xff]   ;;  %v849_v36 = vld [vmem:[%s1189_s0 + $0x40] ss:$16 sps:$4 sm:$0xff]   ;;  %v856_v39 = vld [vmem:[%s1189_s0 + $0x4c] ss:$16 sps:$4 sm:$0xff]  }
   0xe   :  { %v853_v37 = vld [vmem:[%s1189_s0 + $0x64] ss:$16 sps:$4 sm:$0xff]   ;;  %v855_v40 = vld [vmem:[%s1189_s0 + $0x60] ss:$16 sps:$4 sm:$0xff]   ;;  %v858_v42 = vld [vmem:[%s1189_s0 + $0x48] ss:$16 sps:$4 sm:$0xff]  }
   0xf   :  { %551 = vmatpush1.bf16.msra.mxu1 %v821_v11  ;;  %v859_v41 = vld [vmem:[%s1189_s0 + $0x84] ss:$16 sps:$4 sm:$0xff]   ;;  %v862_v43 = vld [vmem:[%s1189_s0 + $0x6c] ss:$16 sps:$4 sm:$0xff]   ;;  %v861_v44 = vld [vmem:[%s1189_s0 + $0x80] ss:$16 sps:$4 sm:$0xff]  }
  0x10   :  { %753 = vmatpush3.bf16.msra.mxu0 %v822_v12  ;;  %552 = vmatprep.subr.bf16.mxu1 %v886_v0  ;;  %v865_v45 = vld [vmem:[%s1189_s0 + $0xa4] ss:$16 sps:$4 sm:$0xff]   ;;  %v864_v46 = vld [vmem:[%s1189_s0 + $0x68] ss:$16 sps:$4 sm:$0xff]   ;;  %v868_v47 = vld [vmem:[%s1189_s0 + $0x8c] ss:$16 sps:$4 sm:$0xff]  }
  0x11   :  { %754 = vmatprep.subr.bf16.mxu0 %v823_v13  ;;  %v867_v48 = vld [vmem:[%s1189_s0 + $0xa0] ss:$16 sps:$4 sm:$0xff]   ;;  %v871_v49 = vld [vmem:[%s1189_s0 + $0xc4] ss:$16 sps:$4 sm:$0xff]   ;;  %v870_v50 = vld [vmem:[%s1189_s0 + $0x88] ss:$16 sps:$4 sm:$0xff]  }
  0x12   :  { %v874_v51 = vld [vmem:[%s1189_s0 + $0xac] ss:$16 sps:$4 sm:$0xff]   ;;  %v873_v52 = vld [vmem:[%s1189_s0 + $0xc0] ss:$16 sps:$4 sm:$0xff]   ;;  %v877_v53 = vld [vmem:[%s1189_s0 + $0xe4] ss:$16 sps:$4 sm:$0xff]  }
  0x13   :  { %553 = vmatpush1.bf16.msra.mxu1 %v824_v14  ;;  %v876_v54 = vld [vmem:[%s1189_s0 + $0xa8] ss:$16 sps:$4 sm:$0xff]   ;;  %v880_v55 = vld [vmem:[%s1189_s0 + $0xcc] ss:$16 sps:$4 sm:$0xff]   ;;  %v879_v56 = vld [vmem:[%s1189_s0 + $0xe0] ss:$16 sps:$4 sm:$0xff]  }
  0x14   :  { %755 = vmatpush3.bf16.msra.mxu0 %v825_v15  ;;  %554 = vmatprep.subr.bf16.mxu1 %v886_v0  ;;  %v882_v57 = vld [vmem:[%s1189_s0 + $0xc8] ss:$16 sps:$4 sm:$0xff]   ;;  %v883_v58 = vld [vmem:[%s1189_s0 + $0xec] ss:$16 sps:$4 sm:$0xff]   ;;  %v1106_v1 = vld [vmem:[%s1190_s2] ss:$0 sm:$0xff] }
  0x15   :  { %756 = vmatprep.subr.bf16.mxu0 %v826_v16  ;;  %v885_v59 = vld [vmem:[%s1189_s0 + $0xe8] ss:$16 sps:$4 sm:$0xff]  }
  0x17   :  { %555 = vmatpush1.bf16.msra.mxu1 %v827_v17 }
  0x18   :  { %757 = vmatpush3.bf16.msra.mxu0 %v828_v18  ;;  %556 = vmatprep.subr.bf16.mxu1 %v886_v0 }
  0x19   :  { %758 = vmatprep.subr.bf16.mxu0 %v829_v19 }
  0x1b   :  { %557 = vmatpush1.bf16.msra.mxu1 %v830_v20 }
  0x1c   :  { %759 = vmatpush3.bf16.msra.mxu0 %v831_v21  ;;  %558 = vmatprep.subr.bf16.mxu1 %v886_v0 }
  0x1d   :  { %760 = vmatprep.subr.bf16.mxu0 %v832_v22 }
  0x1f   :  { %559 = vmatpush1.bf16.msra.mxu1 %v833_v24 }
  0x20   :  { %761 = vmatpush3.bf16.msra.mxu0 %v834_v25  ;;  %570 = vmatprep.subr.bf16.mxu1 %v886_v0 }
  0x23   :  { %480 = vmatmul.mubr.bf16.vlgmr.msra.gmra.mxu0 %v835_v26  ;;  %571 = vmatpush2.bf16.msra.mxu1 %v838_v28 }
  0x24   :  { %572 = vmatprep.subr.bf16.mxu1 %v886_v0  ;;  %487 = vmatprep.mubr.bf16.mxu0 %v840_v29 }
  0x27   :  { %573 = vmatpush2.bf16.msra.mxu1 %v839_v30 }
  0x28   :  { %574 = vmatprep.subr.bf16.mxu1 %v886_v0 }
  0x2b   :  { %488 = vmatmul.mubr.bf16.gmra.mxu0 %v842_v31  ;;  %575 = vmatpush2.bf16.msra.mxu1 %v843_v32 }
  0x2c   :  { %495 = vmatprep.mubr.bf16.mxu0 %v847_v33 }
  0x2e   :  { %577 = vmatmul.mubr.bf16.vlgmr.msra.gmra.mxu1 %v844_v34 }
  0x2f   :  { %739 = vmatprep.mubr.msk.bf16.mxu1 %vm422_vm0, %v850_v35 }
  0x33   :  { %496 = vmatmul.mubr.bf16.gmra.mxu0 %v849_v36 }
  0x34   :  { %503 = vmatprep.mubr.bf16.mxu0 %v853_v37 }
  0x36   :  { %585 = vmatmul.mubr.bf16.gmra.mxu1 %v852_v38 }
  0x37   :  { %740 = vmatprep.mubr.msk.bf16.mxu1 %vm422_vm0, %v856_v39 }
  0x3b   :  { %504 = vmatmul.mubr.bf16.gmra.mxu0 %v855_v40 }
  0x3c   :  { %511 = vmatprep.mubr.bf16.mxu0 %v859_v41 }
  0x3e   :  { %593 = vmatmul.mubr.bf16.gmra.mxu1 %v858_v42 }
  0x3f   :  { %741 = vmatprep.mubr.msk.bf16.mxu1 %vm422_vm0, %v862_v43 }
  0x43   :  { %512 = vmatmul.mubr.bf16.gmra.mxu0 %v861_v44 }
  0x44   :  { %519 = vmatprep.mubr.bf16.mxu0 %v865_v45 }
  0x46   :  { %601 = vmatmul.mubr.bf16.gmra.mxu1 %v864_v46 }
  0x47   :  { %742 = vmatprep.mubr.msk.bf16.mxu1 %vm422_vm0, %v868_v47 }
  0x4b   :  { %520 = vmatmul.mubr.bf16.gmra.mxu0 %v867_v48 }
  0x4c   :  { %527 = vmatprep.mubr.bf16.mxu0 %v871_v49 }
  0x4e   :  { %609 = vmatmul.mubr.bf16.gmra.mxu1 %v870_v50 }
  0x4f   :  { %743 = vmatprep.mubr.msk.bf16.mxu1 %vm422_vm0, %v874_v51 }
  0x53   :  { %528 = vmatmul.mubr.bf16.gmra.mxu0 %v873_v52 }
  0x54   :  { %535 = vmatprep.mubr.bf16.mxu0 %v877_v53 }
  0x56   :  { %617 = vmatmul.mubr.bf16.gmra.mxu1 %v876_v54 }
  0x57   :  { %744 = vmatprep.mubr.msk.bf16.mxu1 %vm422_vm0, %v880_v55 }
  0x5b   :  { %536 = vmatmul.mubr.bf16.gmra.mxu0 %v879_v56 }
  0x5e   :  { %625 = vmatmul.mubr.bf16.gmra.mxu1 %v882_v57 }
  0x5f   :  { %745 = vmatprep.mubr.msk.bf16.mxu1 %vm422_vm0, %v883_v58 }
  0x66   :  { %633 = vmatmul.mubr.bf16.gmra.mxu1 %v885_v59 }
  0xe3   :  { %v762_v60 = vpop.f32.mrf.mxu0 }
  0xe5   :  { %v763_v61 = vpop.f32.mrf.mxu0 }
  0xe6   :  { %v764_v63 = vadd.f32 %v763_v61, %v762_v60 }
  0xe7   :  { %v765_v62 = vpop.f32.mrf.mxu0 }
  0xe8   :  { %v482_v5 = vadd.f32 %v764_v63, %v1106_v1 }
  0xe9   :  { %v766_v0 = vpop.f32.mrf.mxu0 }
  0xea   :  { %v767_v3 = vadd.f32 %v766_v0, %v765_v62 }
  0xeb   :  { %v768_v2 = vpop.f32.mrf.mxu0 }
  0xec   :  { %v485_v13 = vadd.f32 %v767_v3, %v1106_v1 }
  0xed   :  { %v769_v4 = vpop.f32.mrf.mxu0 }
  0xee   :  { %v578_v6 = vpop.f32.mrf.mxu1  ;;  %v770_v10 = vadd.f32 %v769_v4, %v768_v2 }
  0xef   :  { %v579_v7 = vadd.f32 %v578_v6, %v482_v5  ;;  %v771_v8 = vpop.f32.mrf.mxu0 }
  0xf0   :  { %v580_v9 = vpop.f32.mrf.mxu1  ;;  %v490_v21 = vadd.f32 %v770_v10, %v1106_v1 }
  0xf1   :  { %v641_v11 = vmax.f32 %v579_v7, 0.0  ;;  %v772_v12 = vpop.f32.mrf.mxu0 }
  0xf2   :  { %v581_v14 = vpop.f32.mrf.mxu1  ;;  %v773_v18 = vadd.f32 %v772_v12, %v771_v8 }
  0xf3   :  { %658 = vst.msk [vmem:[%s1191_s3] sm:$0xff] %vm657_vm1, %v641_v11  ;;  %v582_v15 = vadd.f32 %v581_v14, %v485_v13  ;;  %v774_v16 = vpop.f32.mrf.mxu0 }
  0xf4   :  { %v583_v17 = vpop.f32.mrf.mxu1  ;;  %v493_v29 = vadd.f32 %v773_v18, %v1106_v1 }
  0xf5   :  { %v642_v19 = vmax.f32 %v582_v15, 0.0  ;;  %v775_v20 = vpop.f32.mrf.mxu0 }
  0xf6   :  { %v586_v22 = vpop.f32.mrf.mxu1  ;;  %v776_v26 = vadd.f32 %v775_v20, %v774_v16 }
  0xf7   :  { %659 = vst.msk [vmem:[%s1191_s3 + $0x8] sm:$0xff] %vm657_vm1, %v642_v19  ;;  %v587_v23 = vadd.f32 %v586_v22, %v490_v21  ;;  %v777_v24 = vpop.f32.mrf.mxu0 }
  0xf8   :  { %v588_v25 = vpop.f32.mrf.mxu1  ;;  %v498_v37 = vadd.f32 %v776_v26, %v1106_v1 }
  0xf9   :  { %v643_v27 = vmax.f32 %v587_v23, 0.0  ;;  %v778_v28 = vpop.f32.mrf.mxu0 }
  0xfa   :  { %v589_v30 = vpop.f32.mrf.mxu1  ;;  %v779_v34 = vadd.f32 %v778_v28, %v777_v24 }
  0xfb   :  { %660 = vst.msk [vmem:[%s1191_s3 + $0x10] sm:$0xff] %vm657_vm1, %v643_v27  ;;  %v590_v31 = vadd.f32 %v589_v30, %v493_v29  ;;  %v780_v32 = vpop.f32.mrf.mxu0 }
  0xfc   :  { %v591_v33 = vpop.f32.mrf.mxu1  ;;  %v501_v45 = vadd.f32 %v779_v34, %v1106_v1 }
  0xfd   :  { %v644_v35 = vmax.f32 %v590_v31, 0.0  ;;  %v781_v36 = vpop.f32.mrf.mxu0 }
  0xfe   :  { %v594_v38 = vpop.f32.mrf.mxu1  ;;  %v782_v42 = vadd.f32 %v781_v36, %v780_v32 }
  0xff   :  { %661 = vst.msk [vmem:[%s1191_s3 + $0x18] sm:$0xff] %vm657_vm1, %v644_v35  ;;  %v595_v39 = vadd.f32 %v594_v38, %v498_v37  ;;  %v783_v40 = vpop.f32.mrf.mxu0 }
 0x100   :  { %v596_v41 = vpop.f32.mrf.mxu1  ;;  %v506_v53 = vadd.f32 %v782_v42, %v1106_v1 }
 0x101   :  { %v645_v43 = vmax.f32 %v595_v39, 0.0  ;;  %v784_v44 = vpop.f32.mrf.mxu0 }
 0x102   :  { %v597_v46 = vpop.f32.mrf.mxu1  ;;  %v785_v50 = vadd.f32 %v784_v44, %v783_v40 }
 0x103   :  { %662 = vst.msk [vmem:[%s1191_s3 + $0x20] sm:$0xff] %vm657_vm1, %v645_v43  ;;  %v598_v47 = vadd.f32 %v597_v46, %v501_v45  ;;  %v786_v48 = vpop.f32.mrf.mxu0 }
 0x104   :  { %v599_v49 = vpop.f32.mrf.mxu1  ;;  %v509_v61 = vadd.f32 %v785_v50, %v1106_v1 }
 0x105   :  { %v646_v51 = vmax.f32 %v598_v47, 0.0  ;;  %v787_v52 = vpop.f32.mrf.mxu0 }
 0x106   :  { %v602_v54 = vpop.f32.mrf.mxu1  ;;  %v788_v58 = vadd.f32 %v787_v52, %v786_v48 }
 0x107   :  { %663 = vst.msk [vmem:[%s1191_s3 + $0x28] sm:$0xff] %vm657_vm1, %v646_v51  ;;  %v603_v55 = vadd.f32 %v602_v54, %v506_v53  ;;  %v789_v56 = vpop.f32.mrf.mxu0 }
 0x108   :  { %v604_v57 = vpop.f32.mrf.mxu1  ;;  %v514_v6 = vadd.f32 %v788_v58, %v1106_v1 }
 0x109   :  { %v647_v59 = vmax.f32 %v603_v55, 0.0  ;;  %v790_v60 = vpop.f32.mrf.mxu0 }
 0x10a   :  { %v605_v62 = vpop.f32.mrf.mxu1  ;;  %v791_v3 = vadd.f32 %v790_v60, %v789_v56 }
 0x10b   :  { %664 = vst.msk [vmem:[%s1191_s3 + $0x30] sm:$0xff] %vm657_vm1, %v647_v59  ;;  %v606_v63 = vadd.f32 %v605_v62, %v509_v61  ;;  %v792_v0 = vpop.f32.mrf.mxu0 }
 0x10c   :  { %v607_v2 = vpop.f32.mrf.mxu1  ;;  %v517_v14 = vadd.f32 %v791_v3, %v1106_v1 }
 0x10d   :  { %v648_v4 = vmax.f32 %v606_v63, 0.0  ;;  %v793_v5 = vpop.f32.mrf.mxu0 }
 0x10e   :  { %v610_v7 = vpop.f32.mrf.mxu1  ;;  %v794_v11 = vadd.f32 %v793_v5, %v792_v0 }
 0x10f   :  { %665 = vst.msk [vmem:[%s1191_s3 + $0x38] sm:$0xff] %vm657_vm1, %v648_v4  ;;  %v611_v8 = vadd.f32 %v610_v7, %v514_v6  ;;  %v795_v9 = vpop.f32.mrf.mxu0 }
 0x110   :  { %v612_v10 = vpop.f32.mrf.mxu1  ;;  %v522_v22 = vadd.f32 %v794_v11, %v1106_v1 }
 0x111   :  { %v649_v12 = vmax.f32 %v611_v8, 0.0  ;;  %v796_v13 = vpop.f32.mrf.mxu0 }
 0x112   :  { %v613_v15 = vpop.f32.mrf.mxu1  ;;  %v797_v19 = vadd.f32 %v796_v13, %v795_v9 }
 0x113   :  { %666 = vst.msk [vmem:[%s1191_s3 + $0x40] sm:$0xff] %vm657_vm1, %v649_v12  ;;  %v614_v16 = vadd.f32 %v613_v15, %v517_v14  ;;  %v798_v17 = vpop.f32.mrf.mxu0 }
 0x114   :  { %v615_v18 = vpop.f32.mrf.mxu1  ;;  %v525_v30 = vadd.f32 %v797_v19, %v1106_v1 }
 0x115   :  { %v650_v20 = vmax.f32 %v614_v16, 0.0  ;;  %v799_v21 = vpop.f32.mrf.mxu0 }
 0x116   :  { %v618_v23 = vpop.f32.mrf.mxu1  ;;  %v800_v27 = vadd.f32 %v799_v21, %v798_v17 }
 0x117   :  { %667 = vst.msk [vmem:[%s1191_s3 + $0x48] sm:$0xff] %vm657_vm1, %v650_v20  ;;  %v619_v24 = vadd.f32 %v618_v23, %v522_v22  ;;  %v801_v25 = vpop.f32.mrf.mxu0 }
 0x118   :  { %v620_v26 = vpop.f32.mrf.mxu1  ;;  %v530_v38 = vadd.f32 %v800_v27, %v1106_v1 }
 0x119   :  { %v651_v28 = vmax.f32 %v619_v24, 0.0  ;;  %v802_v29 = vpop.f32.mrf.mxu0 }
 0x11a   :  { %v621_v31 = vpop.f32.mrf.mxu1  ;;  %v803_v35 = vadd.f32 %v802_v29, %v801_v25 }
 0x11b   :  { %668 = vst.msk [vmem:[%s1191_s3 + $0x50] sm:$0xff] %vm657_vm1, %v651_v28  ;;  %v622_v32 = vadd.f32 %v621_v31, %v525_v30  ;;  %v804_v33 = vpop.f32.mrf.mxu0 }
 0x11c   :  { %v623_v34 = vpop.f32.mrf.mxu1  ;;  %v533_v45 = vadd.f32 %v803_v35, %v1106_v1 }
 0x11d   :  { %v652_v36 = vmax.f32 %v622_v32, 0.0  ;;  %v805_v37 = vpop.f32.mrf.mxu0 }
 0x11e   :  { %v626_v39 = vpop.f32.mrf.mxu1  ;;  %v806_v43 = vadd.f32 %v805_v37, %v804_v33 }
 0x11f   :  { %669 = vst.msk [vmem:[%s1191_s3 + $0x58] sm:$0xff] %vm657_vm1, %v652_v36  ;;  %v627_v40 = vadd.f32 %v626_v39, %v530_v38  ;;  %v807_v41 = vpop.f32.mrf.mxu0 }
 0x120   :  { %v628_v42 = vpop.f32.mrf.mxu1  ;;  %v538_v52 = vadd.f32 %v806_v43, %v1106_v1 }
 0x121   :  { %v653_v44 = vmax.f32 %v627_v40, 0.0  ;;  %v808_v46 = vpop.f32.mrf.mxu0 }
 0x122   :  { %v629_v47 = vpop.f32.mrf.mxu1  ;;  %v809_v50 = vadd.f32 %v808_v46, %v807_v41 }
 0x123   :  { %670 = vst.msk [vmem:[%s1191_s3 + $0x60] sm:$0xff] %vm657_vm1, %v653_v44  ;;  %v630_v48 = vadd.f32 %v629_v47, %v533_v45 }
 0x124   :  { %v631_v49 = vpop.f32.mrf.mxu1  ;;  %v541_v57 = vadd.f32 %v809_v50, %v1106_v1 }
 0x125   :  { %v654_v51 = vmax.f32 %v630_v48, 0.0 }
 0x126   :  { %v634_v53 = vpop.f32.mrf.mxu1 }
 0x127   :  { %671 = vst.msk [vmem:[%s1191_s3 + $0x68] sm:$0xff] %vm657_vm1, %v654_v51  ;;  %v635_v54 = vadd.f32 %v634_v53, %v538_v52 }
 0x128   :  { %v636_v55 = vpop.f32.mrf.mxu1 }
 0x129   :  { %v655_v56 = vmax.f32 %v635_v54, 0.0 }
 0x12a   :  { %v637_v58 = vpop.f32.mrf.mxu1 }
 0x12b   :  { %672 = vst.msk [vmem:[%s1191_s3 + $0x70] sm:$0xff] %vm657_vm1, %v655_v56  ;;  %v638_v59 = vadd.f32 %v637_v58, %v541_v57 }
 0x12c   :  { %v639_v60 = vpop.f32.mrf.mxu1 }
 0x12d   :  { %v656_v61 = vmax.f32 %v638_v59, 0.0 }
 0x12f   :  { %673 = vst.msk [vmem:[%s1191_s3 + $0x78] sm:$0xff] %vm657_vm1, %v656_v61 }

// kernel: fwd.27
= control target key start
LH: loop header
LB: loop body
LE: loop exit
PB: predicated region body
PF: predicated region fallthrough
CT: control target
= control target key end

     0   :  { %vm105_vm0 = vcmask 392192   ;;  %vm259_vm1 = vcmask 261120   ;;  %s549_s1 = inlined_call_operand.vmem [shape: bf16[48,32], index: 1, kind: input, shape index: {}]   ;;  %s550_s0 = inlined_call_operand.vmem [shape: bf16[128,48], index: 0, kind: input, shape index: {}]   ;;  %s551_s2 = inlined_call_operand.vmem [shape: f32[1,32], index: 2, kind: input, shape index: {}]   ;;  %s552_s3 = inlined_call_operand.vmem [shape: f32[128,32], index: 3, kind: input, shape index: {}]   ;;  %s553_s4 = inlined_call_operand.vmem [shape: f32[128,32], index: 4, kind: output, shape index: {}]  }
   0x1   :  { %v339_v0 = vld [vmem:[%s549_s1 + $0x10] sm:$0xff]   ;;  %v340_v1 = vld [vmem:[%s549_s1 + $0x8] sm:$0xff]   ;;  %v341_v2 = vld [vmem:[%s549_s1] sm:$0xff]  }
   0x2   :  { %311 = vmatprep.subr.bf16.mxu0 %v339_v0  ;;  %333 = vmatprep.subr.bf16.mxu1 %v339_v0  ;;  %v342_v3 = vld [vmem:[%s550_s0] sm:$0xff]   ;;  %v344_v5 = vld [vmem:[%s550_s0 + $0x8] sm:$0xff]   ;;  %v346_v7 = vld [vmem:[%s550_s0 + $0x10] sm:$0xff]  }
   0x3   :  { %312 = vmatpush3.bf16.msra.mxu0 %v339_v0  ;;  %336 = vmatpush3.bf16.msra.mxu1 %v339_v0  ;;  %v343_v4 = vld [vmem:[%s550_s0 + $0x20] sm:$0xff]   ;;  %v345_v6 = vld [vmem:[%s550_s0 + $0x28] sm:$0xff]   ;;  %v347_v8 = vld [vmem:[%s550_s0 + $0x30] sm:$0xff]  }
   0x4   :  { %313 = vmatprep.subr.bf16.mxu0 %v340_v1  ;;  %334 = vmatprep.subr.bf16.mxu1 %v340_v1  ;;  %v348_v9 = vld [vmem:[%s550_s0 + $0x18] sm:$0xff]   ;;  %v419_v11 = vld [vmem:[%s551_s2] ss:$0 sm:$0xff]  ;;  %v229_v13 = vld [vmem:[%s552_s3 + $0x10] sm:$0xff] }
   0x5   :  { %317 = vmatprep.mubr.msk.bf16.mxu0 %vm105_vm0, %v342_v3  ;;  %325 = vmatprep.mubr.msk.bf16.mxu1 %vm105_vm0, %v343_v4  ;;  %v349_v10 = vld [vmem:[%s550_s0 + $0x38] sm:$0xff]   ;;  %v237_v15 = vld [vmem:[%s552_s3 + $0x50] sm:$0xff]  ;;  %v227_v19 = vld [vmem:[%s552_s3] sm:$0xff] }
   0x6   :  { %v235_v21 = vld [vmem:[%s552_s3 + $0x40] sm:$0xff]  ;;  %v230_v27 = vld [vmem:[%s552_s3 + $0x18] sm:$0xff]  ;;  %v228_v35 = vld [vmem:[%s552_s3 + $0x8] sm:$0xff] }
   0x7   :  { %314 = vmatpush3.bf16.msra.mxu0 %v340_v1  ;;  %337 = vmatpush3.bf16.msra.mxu1 %v340_v1  ;;  %v238_v29 = vld [vmem:[%s552_s3 + $0x58] sm:$0xff]  ;;  %v236_v37 = vld [vmem:[%s552_s3 + $0x48] sm:$0xff]  ;;  %v233_v43 = vld [vmem:[%s552_s3 + $0x30] sm:$0xff] }
   0x8   :  { %315 = vmatprep.subr.bf16.mxu0 %v341_v2  ;;  %335 = vmatprep.subr.bf16.mxu1 %v341_v2  ;;  %v241_v45 = vld [vmem:[%s552_s3 + $0x70] sm:$0xff]  ;;  %v231_v51 = vld [vmem:[%s552_s3 + $0x20] sm:$0xff]  ;;  %v234_v59 = vld [vmem:[%s552_s3 + $0x38] sm:$0xff] }
   0x9   :  { %v239_v53 = vld [vmem:[%s552_s3 + $0x60] sm:$0xff]  ;;  %v242_v61 = vld [vmem:[%s552_s3 + $0x78] sm:$0xff]  ;;  %v232_v3 = vld [vmem:[%s552_s3 + $0x28] sm:$0xff] }
   0xb   :  { %316 = vmatpush3.bf16.msra.mxu0 %v341_v2  ;;  %338 = vmatpush3.bf16.msra.mxu1 %v341_v2 }
   0xe   :  { %318 = vmatmul.mubr.msk.bf16.vlgmr.msra.gmra.mxu0 %vm105_vm0, %v344_v5  ;;  %326 = vmatmul.mubr.msk.bf16.vlgmr.msra.gmra.mxu1 %vm105_vm0, %v345_v6  ;;  %v240_v5 = vld [vmem:[%s552_s3 + $0x68] sm:$0xff] }
   0xf   :  { %321 = vmatprep.mubr.msk.bf16.mxu0 %vm105_vm0, %v346_v7  ;;  %329 = vmatprep.mubr.msk.bf16.mxu1 %vm105_vm0, %v347_v8 }
  0x16   :  { %322 = vmatmul.mubr.msk.bf16.gmra.mxu0 %vm105_vm0, %v348_v9  ;;  %330 = vmatmul.mubr.msk.bf16.gmra.mxu1 %vm105_vm0, %v349_v10 }
  0xce   :  { %v319_v12 = vpop.f32.mrf.mxu0  ;;  %v327_v14 = vpop.f32.mrf.mxu1 }
  0xcf   :  { %v173_v16 = vadd.f32 %v319_v12, %v419_v11  ;;  %v205_v17 = vadd.f32 %v327_v14, %v419_v11 }
  0xd0   :  { %v164_v18 = vpop.f32.mrf.mxu0  ;;  %v196_v20 = vpop.f32.mrf.mxu1 }
  0xd1   :  { %v245_v22 = vadd.f32 %v229_v13, %v173_v16  ;;  %v253_v23 = vadd.f32 %v237_v15, %v205_v17  ;;  %v165_v24 = vadd.f32 %v419_v11, %v164_v18  ;;  %v197_v25 = vadd.f32 %v419_v11, %v196_v20 }
  0xd2   :  { %v320_v26 = vpop.f32.mrf.mxu0  ;;  %v328_v28 = vpop.f32.mrf.mxu1 }
  0xd3   :  { %262 = vst.msk [vmem:[%s553_s4 + $0x10] sm:$0xff] %vm259_vm1, %v245_v22  ;;  %270 = vst.msk [vmem:[%s553_s4 + $0x50] sm:$0xff] %vm259_vm1, %v253_v23  ;;  %v243_v30 = vadd.f32 %v227_v19, %v165_v24  ;;  %v251_v31 = vadd.f32 %v235_v21, %v197_v25  ;;  %v176_v32 = vadd.f32 %v320_v26, %v419_v11 }
  0xd4   :  { %v208_v33 = vadd.f32 %v328_v28, %v419_v11  ;;  %v167_v34 = vpop.f32.mrf.mxu0  ;;  %v199_v36 = vpop.f32.mrf.mxu1 }
  0xd5   :  { %260 = vst.msk [vmem:[%s553_s4] sm:$0xff] %vm259_vm1, %v243_v30  ;;  %268 = vst.msk [vmem:[%s553_s4 + $0x40] sm:$0xff] %vm259_vm1, %v251_v31  ;;  %v246_v38 = vadd.f32 %v230_v27, %v176_v32  ;;  %v168_v40 = vadd.f32 %v419_v11, %v167_v34  ;;  %v200_v41 = vadd.f32 %v419_v11, %v199_v36 }
  0xd6   :  { %v254_v39 = vadd.f32 %v238_v29, %v208_v33  ;;  %v323_v42 = vpop.f32.mrf.mxu0  ;;  %v331_v44 = vpop.f32.mrf.mxu1 }
  0xd7   :  { %263 = vst.msk [vmem:[%s553_s4 + $0x18] sm:$0xff] %vm259_vm1, %v246_v38  ;;  %v244_v46 = vadd.f32 %v228_v35, %v168_v40  ;;  %v252_v47 = vadd.f32 %v236_v37, %v200_v41  ;;  %v189_v48 = vadd.f32 %v323_v42, %v419_v11  ;;  %v221_v49 = vadd.f32 %v331_v44, %v419_v11 }
  0xd8   :  { %271 = vst.msk [vmem:[%s553_s4 + $0x58] sm:$0xff] %vm259_vm1, %v254_v39  ;;  %v180_v50 = vpop.f32.mrf.mxu0  ;;  %v212_v52 = vpop.f32.mrf.mxu1 }
  0xd9   :  { %261 = vst.msk [vmem:[%s553_s4 + $0x8] sm:$0xff] %vm259_vm1, %v244_v46  ;;  %269 = vst.msk [vmem:[%s553_s4 + $0x48] sm:$0xff] %vm259_vm1, %v252_v47  ;;  %v249_v54 = vadd.f32 %v233_v43, %v189_v48  ;;  %v257_v55 = vadd.f32 %v241_v45, %v221_v49  ;;  %v181_v56 = vadd.f32 %v419_v11, %v180_v50 }
  0xda   :  { %v213_v57 = vadd.f32 %v419_v11, %v212_v52  ;;  %v324_v58 = vpop.f32.mrf.mxu0  ;;  %v332_v60 = vpop.f32.mrf.mxu1 }
  0xdb   :  { %266 = vst.msk [vmem:[%s553_s4 + $0x30] sm:$0xff] %vm259_vm1, %v249_v54  ;;  %274 = vst.msk [vmem:[%s553_s4 + $0x70] sm:$0xff] %vm259_vm1, %v257_v55  ;;  %v247_v62 = vadd.f32 %v231_v51, %v181_v56  ;;  %v192_v0 = vadd.f32 %v324_v58, %v419_v11  ;;  %v224_v1 = vadd.f32 %v332_v60, %v419_v11 }
  0xdc   :  { %v255_v63 = vadd.f32 %v239_v53, %v213_v57  ;;  %v183_v2 = vpop.f32.mrf.mxu0  ;;  %v215_v4 = vpop.f32.mrf.mxu1 }
  0xdd   :  { %264 = vst.msk [vmem:[%s553_s4 + $0x20] sm:$0xff] %vm259_vm1, %v247_v62  ;;  %v250_v6 = vadd.f32 %v234_v59, %v192_v0  ;;  %v258_v7 = vadd.f32 %v242_v61, %v224_v1  ;;  %v184_v8 = vadd.f32 %v419_v11, %v183_v2  ;;  %v216_v9 = vadd.f32 %v419_v11, %v215_v4 }
  0xde   :  { %272 = vst.msk [vmem:[%s553_s4 + $0x60] sm:$0xff] %vm259_vm1, %v255_v63 }
  0xdf   :  { %267 = vst.msk [vmem:[%s553_s4 + $0x38] sm:$0xff] %vm259_vm1, %v250_v6  ;;  %275 = vst.msk [vmem:[%s553_s4 + $0x78] sm:$0xff] %vm259_vm1, %v258_v7  ;;  %v248_v10 = vadd.f32 %v232_v3, %v184_v8  ;;  %v256_v12 = vadd.f32 %v240_v5, %v216_v9 }
  0xe1   :  { %265 = vst.msk [vmem:[%s553_s4 + $0x28] sm:$0xff] %vm259_vm1, %v248_v10  ;;  %273 = vst.msk [vmem:[%s553_s4 + $0x68] sm:$0xff] %vm259_vm1, %v256_v12 }

// kernel: fwd.28
= control target key start
LH: loop header
LB: loop body
LE: loop exit
PB: predicated region body
PF: predicated region fallthrough
CT: control target
= control target key end

     0   :  { %vm97_vm0 = vcmask 261120   ;;  %s530_s1 = inlined_call_operand.vmem [shape: bf16[32,32], index: 1, kind: input, shape index: {}]   ;;  %s531_s0 = inlined_call_operand.vmem [shape: bf16[128,32], index: 0, kind: input, shape index: {}]   ;;  %s532_s2 = inlined_call_operand.vmem [shape: f32[1,32], index: 2, kind: input, shape index: {}]   ;;  %s533_s3 = inlined_call_operand.vmem [shape: f32[128,32], index: 3, kind: input, shape index: {}]   ;;  %s534_s4 = inlined_call_operand.vmem [shape: f32[128,32], index: 4, kind: output, shape index: {}]  }
   0x1   :  { %v324_v0 = vld [vmem:[%s530_s1 + $0x8] sm:$0xff]   ;;  %v325_v1 = vld [vmem:[%s530_s1] sm:$0xff]   ;;  %v330_v6 = vld [vmem:[%s531_s0 + $0x10] sm:$0xff]  }
   0x2   :  { %300 = vmatprep.subr.bf16.mxu0 %v324_v0  ;;  %320 = vmatprep.subr.bf16.mxu1 %v324_v0  ;;  %v326_v2 = vld [vmem:[%s531_s0] sm:$0xff]   ;;  %v328_v4 = vld [vmem:[%s531_s0 + $0x8] sm:$0xff]   ;;  %v331_v7 = vld [vmem:[%s531_s0 + $0x30] sm:$0xff]  }
   0x3   :  { %301 = vmatpush3.bf16.msra.mxu0 %v324_v0  ;;  %322 = vmatpush3.bf16.msra.mxu1 %v324_v0  ;;  %v327_v3 = vld [vmem:[%s531_s0 + $0x20] sm:$0xff]   ;;  %v329_v5 = vld [vmem:[%s531_s0 + $0x28] sm:$0xff]   ;;  %v332_v8 = vld [vmem:[%s531_s0 + $0x18] sm:$0xff]  }
   0x4   :  { %302 = vmatprep.subr.bf16.mxu0 %v325_v1  ;;  %321 = vmatprep.subr.bf16.mxu1 %v325_v1  ;;  %v333_v9 = vld [vmem:[%s531_s0 + $0x38] sm:$0xff]   ;;  %v400_v10 = vld [vmem:[%s532_s2] ss:$0 sm:$0xff]  ;;  %v221_v12 = vld [vmem:[%s533_s3 + $0x10] sm:$0xff] }
   0x5   :  { %304 = vmatprep.mubr.msk.bf16.mxu0 %vm97_vm0, %v326_v2  ;;  %312 = vmatprep.mubr.msk.bf16.mxu1 %vm97_vm0, %v327_v3  ;;  %v229_v14 = vld [vmem:[%s533_s3 + $0x50] sm:$0xff]  ;;  %v219_v18 = vld [vmem:[%s533_s3] sm:$0xff]  ;;  %v222_v26 = vld [vmem:[%s533_s3 + $0x18] sm:$0xff] }
   0x6   :  { %v227_v20 = vld [vmem:[%s533_s3 + $0x40] sm:$0xff]  ;;  %v230_v28 = vld [vmem:[%s533_s3 + $0x58] sm:$0xff]  ;;  %v220_v34 = vld [vmem:[%s533_s3 + $0x8] sm:$0xff] }
   0x7   :  { %303 = vmatpush3.bf16.msra.mxu0 %v325_v1  ;;  %323 = vmatpush3.bf16.msra.mxu1 %v325_v1  ;;  %v228_v36 = vld [vmem:[%s533_s3 + $0x48] sm:$0xff]  ;;  %v225_v42 = vld [vmem:[%s533_s3 + $0x30] sm:$0xff]  ;;  %v223_v50 = vld [vmem:[%s533_s3 + $0x20] sm:$0xff] }
   0x8   :  { %v233_v44 = vld [vmem:[%s533_s3 + $0x70] sm:$0xff]  ;;  %v231_v52 = vld [vmem:[%s533_s3 + $0x60] sm:$0xff]  ;;  %v226_v58 = vld [vmem:[%s533_s3 + $0x38] sm:$0xff] }
   0x9   :  { %v234_v60 = vld [vmem:[%s533_s3 + $0x78] sm:$0xff]  ;;  %v224_v2 = vld [vmem:[%s533_s3 + $0x28] sm:$0xff] }
   0xa   :  { %305 = vmatmul.mubr.msk.bf16.vlgmr.msra.gmra.mxu0 %vm97_vm0, %v328_v4  ;;  %313 = vmatmul.mubr.msk.bf16.vlgmr.msra.gmra.mxu1 %vm97_vm0, %v329_v5  ;;  %v232_v4 = vld [vmem:[%s533_s3 + $0x68] sm:$0xff] }
   0xb   :  { %308 = vmatprep.mubr.msk.bf16.mxu0 %vm97_vm0, %v330_v6  ;;  %316 = vmatprep.mubr.msk.bf16.mxu1 %vm97_vm0, %v331_v7 }
  0x12   :  { %309 = vmatmul.mubr.msk.bf16.gmra.mxu0 %vm97_vm0, %v332_v8  ;;  %317 = vmatmul.mubr.msk.bf16.gmra.mxu1 %vm97_vm0, %v333_v9 }
  0xca   :  { %v306_v11 = vpop.f32.mrf.mxu0  ;;  %v314_v13 = vpop.f32.mrf.mxu1 }
  0xcb   :  { %v165_v15 = vadd.f32 %v306_v11, %v400_v10  ;;  %v197_v16 = vadd.f32 %v314_v13, %v400_v10 }
  0xcc   :  { %v156_v17 = vpop.f32.mrf.mxu0  ;;  %v188_v19 = vpop.f32.mrf.mxu1 }
  0xcd   :  { %v237_v21 = vadd.f32 %v221_v12, %v165_v15  ;;  %v245_v22 = vadd.f32 %v229_v14, %v197_v16  ;;  %v157_v23 = vadd.f32 %v400_v10, %v156_v17  ;;  %v189_v24 = vadd.f32 %v400_v10, %v188_v19 }
  0xce   :  { %v307_v25 = vpop.f32.mrf.mxu0  ;;  %v315_v27 = vpop.f32.mrf.mxu1 }
  0xcf   :  { %253 = vst.msk [vmem:[%s534_s4 + $0x10] sm:$0xff] %vm97_vm0, %v237_v21  ;;  %261 = vst.msk [vmem:[%s534_s4 + $0x50] sm:$0xff] %vm97_vm0, %v245_v22  ;;  %v235_v29 = vadd.f32 %v219_v18, %v157_v23  ;;  %v243_v30 = vadd.f32 %v227_v20, %v189_v24  ;;  %v168_v31 = vadd.f32 %v307_v25, %v400_v10 }
  0xd0   :  { %v200_v32 = vadd.f32 %v315_v27, %v400_v10  ;;  %v159_v33 = vpop.f32.mrf.mxu0  ;;  %v191_v35 = vpop.f32.mrf.mxu1 }
  0xd1   :  { %251 = vst.msk [vmem:[%s534_s4] sm:$0xff] %vm97_vm0, %v235_v29  ;;  %259 = vst.msk [vmem:[%s534_s4 + $0x40] sm:$0xff] %vm97_vm0, %v243_v30  ;;  %v238_v37 = vadd.f32 %v222_v26, %v168_v31  ;;  %v160_v39 = vadd.f32 %v400_v10, %v159_v33  ;;  %v192_v40 = vadd.f32 %v400_v10, %v191_v35 }
  0xd2   :  { %v246_v38 = vadd.f32 %v230_v28, %v200_v32  ;;  %v310_v41 = vpop.f32.mrf.mxu0  ;;  %v318_v43 = vpop.f32.mrf.mxu1 }
  0xd3   :  { %254 = vst.msk [vmem:[%s534_s4 + $0x18] sm:$0xff] %vm97_vm0, %v238_v37  ;;  %v236_v45 = vadd.f32 %v220_v34, %v160_v39  ;;  %v244_v46 = vadd.f32 %v228_v36, %v192_v40  ;;  %v181_v47 = vadd.f32 %v310_v41, %v400_v10  ;;  %v213_v48 = vadd.f32 %v318_v43, %v400_v10 }
  0xd4   :  { %262 = vst.msk [vmem:[%s534_s4 + $0x58] sm:$0xff] %vm97_vm0, %v246_v38  ;;  %v172_v49 = vpop.f32.mrf.mxu0  ;;  %v204_v51 = vpop.f32.mrf.mxu1 }
  0xd5   :  { %252 = vst.msk [vmem:[%s534_s4 + $0x8] sm:$0xff] %vm97_vm0, %v236_v45  ;;  %260 = vst.msk [vmem:[%s534_s4 + $0x48] sm:$0xff] %vm97_vm0, %v244_v46  ;;  %v241_v53 = vadd.f32 %v225_v42, %v181_v47  ;;  %v249_v54 = vadd.f32 %v233_v44, %v213_v48  ;;  %v173_v55 = vadd.f32 %v400_v10, %v172_v49 }
  0xd6   :  { %v205_v56 = vadd.f32 %v400_v10, %v204_v51  ;;  %v311_v57 = vpop.f32.mrf.mxu0  ;;  %v319_v59 = vpop.f32.mrf.mxu1 }
  0xd7   :  { %257 = vst.msk [vmem:[%s534_s4 + $0x30] sm:$0xff] %vm97_vm0, %v241_v53  ;;  %265 = vst.msk [vmem:[%s534_s4 + $0x70] sm:$0xff] %vm97_vm0, %v249_v54  ;;  %v239_v61 = vadd.f32 %v223_v50, %v173_v55  ;;  %v184_v63 = vadd.f32 %v311_v57, %v400_v10  ;;  %v216_v0 = vadd.f32 %v319_v59, %v400_v10 }
  0xd8   :  { %v247_v62 = vadd.f32 %v231_v52, %v205_v56  ;;  %v175_v1 = vpop.f32.mrf.mxu0  ;;  %v207_v3 = vpop.f32.mrf.mxu1 }
  0xd9   :  { %255 = vst.msk [vmem:[%s534_s4 + $0x20] sm:$0xff] %vm97_vm0, %v239_v61  ;;  %v242_v5 = vadd.f32 %v226_v58, %v184_v63  ;;  %v250_v6 = vadd.f32 %v234_v60, %v216_v0  ;;  %v176_v7 = vadd.f32 %v400_v10, %v175_v1  ;;  %v208_v8 = vadd.f32 %v400_v10, %v207_v3 }
  0xda   :  { %263 = vst.msk [vmem:[%s534_s4 + $0x60] sm:$0xff] %vm97_vm0, %v247_v62 }
  0xdb   :  { %258 = vst.msk [vmem:[%s534_s4 + $0x38] sm:$0xff] %vm97_vm0, %v242_v5  ;;  %266 = vst.msk [vmem:[%s534_s4 + $0x78] sm:$0xff] %vm97_vm0, %v250_v6  ;;  %v240_v9 = vadd.f32 %v224_v2, %v176_v7  ;;  %v248_v11 = vadd.f32 %v232_v4, %v208_v8 }
  0xdd   :  { %256 = vst.msk [vmem:[%s534_s4 + $0x28] sm:$0xff] %vm97_vm0, %v240_v9  ;;  %264 = vst.msk [vmem:[%s534_s4 + $0x68] sm:$0xff] %vm97_vm0, %v248_v11 }

// kernel: fwd.31
= control target key start
LH: loop header
LB: loop body
LE: loop exit
PB: predicated region body
PF: predicated region fallthrough
CT: control target
= control target key end

     0   :  { %vm318_vm0 = vcmask 261120   ;;  %s1022_s1 = inlined_call_operand.vmem [shape: bf16[288,32], index: 1, kind: input, shape index: {}]   ;;  %s1023_s0 = inlined_call_operand.vmem [shape: bf16[128,288], index: 0, kind: input, shape index: {}]   ;;  %s1024_s2 = inlined_call_operand.vmem [shape: f32[1,32], index: 2, kind: input, shape index: {}]   ;;  %s1025_s3 = inlined_call_operand.vmem [shape: f32[128,32], index: 3, kind: output, shape index: {}]  }
   0x1   :  { %v718_v0 = vld [vmem:[%s1022_s1 + $0x78] sm:$0xff]   ;;  %v720_v2 = vld [vmem:[%s1022_s1 + $0x70] sm:$0xff]   ;;  %v722_v4 = vld [vmem:[%s1022_s1 + $0x68] sm:$0xff]  }
   0x2   :  { %v719_v1 = vld [vmem:[%s1022_s1 + $0x38] sm:$0xff]   ;;  %608 = vmatprep.subr.bf16.mxu0 %v718_v0  ;;  %702 = vmatprep.subr.bf16.mxu1 %v718_v0  ;;  %v721_v3 = vld [vmem:[%s1022_s1 + $0x30] sm:$0xff]   ;;  %v723_v5 = vld [vmem:[%s1022_s1 + $0x28] sm:$0xff]  }
   0x3   :  { %609 = vmatpush3.bf16.msra.mxu0 %v719_v1  ;;  %710 = vmatpush3.bf16.msra.mxu1 %v719_v1  ;;  %v724_v6 = vld [vmem:[%s1022_s1 + $0x60] sm:$0xff]   ;;  %v726_v8 = vld [vmem:[%s1022_s1 + $0x58] sm:$0xff]   ;;  %v728_v10 = vld [vmem:[%s1022_s1 + $0x50] sm:$0xff]  }
   0x4   :  { %610 = vmatprep.subr.bf16.mxu0 %v720_v2  ;;  %703 = vmatprep.subr.bf16.mxu1 %v720_v2  ;;  %v725_v7 = vld [vmem:[%s1022_s1 + $0x20] sm:$0xff]   ;;  %v727_v9 = vld [vmem:[%s1022_s1 + $0x18] sm:$0xff]   ;;  %v729_v13 = vld [vmem:[%s1022_s1 + $0x10] sm:$0xff]  }
   0x5   :  { %v736_v11 = vld [vmem:[%s1023_s0 + $0x4] ss:$12 sps:$4 sm:$0xff]   ;;  %v739_v12 = vld [vmem:[%s1023_s0 + $0x94] ss:$12 sps:$4 sm:$0xff]   ;;  %v730_v14 = vld [vmem:[%s1022_s1 + $0x48] sm:$0xff]  }
   0x6   :  { %375 = vmatprep.mubr.bf16.mxu0 %v736_v11  ;;  %423 = vmatprep.mubr.bf16.mxu1 %v739_v12  ;;  %v731_v15 = vld [vmem:[%s1022_s1 + $0x8] sm:$0xff]   ;;  %v732_v16 = vld [vmem:[%s1022_s1 + $0x40] sm:$0xff]   ;;  %v737_v20 = vld [vmem:[%s1023_s0 + $0x90] ss:$12 sps:$4 sm:$0xff]  }
   0x7   :  { %611 = vmatpush3.bf16.msra.mxu0 %v721_v3  ;;  %711 = vmatpush3.bf16.msra.mxu1 %v721_v3  ;;  %v733_v17 = vld [vmem:[%s1022_s1] sm:$0xff]   ;;  %v740_v19 = vld [vmem:[%s1022_s1 + $0x88] sm:$0xff]   ;;  %v751_v28 = vld [vmem:[%s1023_s0 + $0x30] ss:$12 sps:$4 sm:$0xff]  }
   0x8   :  { %612 = vmatprep.subr.bf16.mxu0 %v722_v4  ;;  %704 = vmatprep.subr.bf16.mxu1 %v722_v4  ;;  %v734_v18 = vld [vmem:[%s1023_s0] ss:$12 sps:$4 sm:$0xff]   ;;  %v741_v21 = vld [vmem:[%s1023_s0 + $0x1c] ss:$12 sps:$4 sm:$0xff]   ;;  %v745_v24 = vld [vmem:[%s1023_s0 + $0x18] ss:$12 sps:$4 sm:$0xff]  }
   0x9   :  { %v743_v22 = vld [vmem:[%s1023_s0 + $0xac] ss:$12 sps:$4 sm:$0xff]   ;;  %v747_v23 = vld [vmem:[%s1022_s1 + $0x80] sm:$0xff]   ;;  %v746_v25 = vld [vmem:[%s1023_s0 + $0xa8] ss:$12 sps:$4 sm:$0xff]  }
   0xa   :  { %v748_v26 = vld [vmem:[%s1023_s0 + $0x34] ss:$12 sps:$4 sm:$0xff]   ;;  %v753_v30 = vld [vmem:[%s1023_s0 + $0x4c] ss:$12 sps:$4 sm:$0xff]   ;;  %v757_v33 = vld [vmem:[%s1023_s0 + $0x50] ss:$12 sps:$4 sm:$0xff]  }
   0xb   :  { %613 = vmatpush3.bf16.msra.mxu0 %v723_v5  ;;  %712 = vmatpush3.bf16.msra.mxu1 %v723_v5  ;;  %v750_v27 = vld [vmem:[%s1023_s0 + $0x8] ss:$12 sps:$4 sm:$0xff]   ;;  %v752_v29 = vld [vmem:[%s1023_s0 + $0x20] ss:$12 sps:$4 sm:$0xff]   ;;  %v755_v31 = vld [vmem:[%s1023_s0 + $0x38] ss:$12 sps:$4 sm:$0xff]  }
   0xc   :  { %614 = vmatprep.subr.bf16.mxu0 %v724_v6  ;;  %705 = vmatprep.subr.bf16.mxu1 %v724_v6  ;;  %v756_v32 = vld [vmem:[%s1023_s0 + $0x48] ss:$12 sps:$4 sm:$0xff]   ;;  %v758_v34 = vld [vmem:[%s1023_s0 + $0x64] ss:$12 sps:$4 sm:$0xff]   ;;  %v761_v36 = vld [vmem:[%s1023_s0 + $0x60] ss:$12 sps:$4 sm:$0xff]  }
   0xd   :  { %v760_v35 = vld [vmem:[%s1023_s0 + $0x68] ss:$12 sps:$4 sm:$0xff]   ;;  %v762_v37 = vld [vmem:[%s1023_s0 + $0x80] ss:$12 sps:$4 sm:$0xff]   ;;  %v765_v39 = vld [vmem:[%s1023_s0 + $0x98] ss:$12 sps:$4 sm:$0xff]  }
   0xe   :  { %v763_v38 = vld [vmem:[%s1023_s0 + $0x7c] ss:$12 sps:$4 sm:$0xff]   ;;  %v766_v40 = vld [vmem:[%s1023_s0 + $0x78] ss:$12 sps:$4 sm:$0xff]   ;;  %v935_v60 = vld [vmem:[%s1024_s2] ss:$0 sm:$0xff] }
   0xf   :  { %615 = vmatpush3.bf16.msra.mxu0 %v725_v7  ;;  %713 = vmatpush3.bf16.msra.mxu1 %v725_v7  ;;  %v767_v41 = vld [vmem:[%s1023_s0 + $0xb0] ss:$12 sps:$4 sm:$0xff]  }
  0x10   :  { %616 = vmatprep.subr.bf16.mxu0 %v726_v8  ;;  %706 = vmatprep.subr.bf16.mxu1 %v726_v8 }
  0x13   :  { %617 = vmatpush3.bf16.msra.mxu0 %v727_v9  ;;  %714 = vmatpush3.bf16.msra.mxu1 %v727_v9 }
  0x14   :  { %618 = vmatprep.subr.bf16.mxu0 %v728_v10  ;;  %707 = vmatprep.subr.bf16.mxu1 %v728_v10 }
  0x17   :  { %619 = vmatpush3.bf16.msra.mxu0 %v729_v13  ;;  %715 = vmatpush3.bf16.msra.mxu1 %v729_v13 }
  0x18   :  { %620 = vmatprep.subr.bf16.mxu0 %v730_v14  ;;  %708 = vmatprep.subr.bf16.mxu1 %v730_v14 }
  0x1b   :  { %621 = vmatpush3.bf16.msra.mxu0 %v731_v15  ;;  %716 = vmatpush3.bf16.msra.mxu1 %v731_v15 }
  0x1c   :  { %622 = vmatprep.subr.bf16.mxu0 %v732_v16  ;;  %709 = vmatprep.subr.bf16.mxu1 %v732_v16 }
  0x1f   :  { %623 = vmatpush3.bf16.msra.mxu0 %v733_v17  ;;  %717 = vmatpush3.bf16.msra.mxu1 %v733_v17 }
  0x20   :  { %682 = vmatprep.subr.bf16.mxu1 %v740_v19 }
  0x22   :  { %376 = vmatmul.mubr.bf16.vlgmr.msra.gmra.mxu0 %v734_v18  ;;  %424 = vmatmul.mubr.bf16.vlgmr.msra.gmra.mxu1 %v737_v20 }
  0x23   :  { %683 = vmatpush3.bf16.msra.mxu1 %v740_v19  ;;  %383 = vmatprep.mubr.bf16.mxu0 %v741_v21 }
  0x24   :  { %431 = vmatprep.mubr.bf16.mxu1 %v743_v22  ;;  %684 = vmatprep.subr.bf16.mxu1 %v747_v23 }
  0x27   :  { %685 = vmatpush3.bf16.msra.mxu1 %v747_v23 }
  0x2a   :  { %384 = vmatmul.mubr.bf16.gmra.mxu0 %v745_v24  ;;  %432 = vmatmul.mubr.bf16.gmra.mxu1 %v746_v25 }
  0x2b   :  { %391 = vmatprep.mubr.bf16.mxu0 %v748_v26  ;;  %686 = vmatprep.mubr.msk.bf16.mxu1 %vm318_vm0, %v750_v27 }
  0x32   :  { %392 = vmatmul.mubr.bf16.gmra.mxu0 %v751_v28  ;;  %687 = vmatmul.mubr.msk.bf16.vlgmr.msra.gmra.mxu1 %vm318_vm0, %v752_v29 }
  0x33   :  { %399 = vmatprep.mubr.bf16.mxu0 %v753_v30  ;;  %690 = vmatprep.mubr.msk.bf16.mxu1 %vm318_vm0, %v755_v31 }
  0x3a   :  { %400 = vmatmul.mubr.bf16.gmra.mxu0 %v756_v32  ;;  %691 = vmatmul.mubr.msk.bf16.gmra.mxu1 %vm318_vm0, %v757_v33 }
  0x3b   :  { %407 = vmatprep.mubr.bf16.mxu0 %v758_v34  ;;  %694 = vmatprep.mubr.msk.bf16.mxu1 %vm318_vm0, %v760_v35 }
  0x42   :  { %408 = vmatmul.mubr.bf16.gmra.mxu0 %v761_v36  ;;  %695 = vmatmul.mubr.msk.bf16.gmra.mxu1 %vm318_vm0, %v762_v37 }
  0x43   :  { %415 = vmatprep.mubr.bf16.mxu0 %v763_v38  ;;  %698 = vmatprep.mubr.msk.bf16.mxu1 %vm318_vm0, %v765_v39 }
  0x4a   :  { %416 = vmatmul.mubr.bf16.gmra.mxu0 %v766_v40  ;;  %699 = vmatmul.mubr.msk.bf16.gmra.mxu1 %vm318_vm0, %v767_v41 }
  0xe2   :  { %v624_v42 = vpop.f32.mrf.mxu0  ;;  %v922_v43 = vpop.f32.mrf.mxu1 }
  0xe4   :  { %v625_v44 = vpop.f32.mrf.mxu0  ;;  %v924_v45 = vpop.f32.mrf.mxu1 }
  0xe5   :  { %v626_v57 = vadd.f32 %v625_v44, %v624_v42  ;;  %v662_v44 = vadd.f32 %v924_v45, %v922_v43 }
  0xe6   :  { %v627_v46 = vpop.f32.mrf.mxu0  ;;  %v926_v47 = vpop.f32.mrf.mxu1 }
  0xe7   :  { %v378_v3 = vadd.f32 %v626_v57, %v935_v60 }
  0xe8   :  { %v628_v48 = vpop.f32.mrf.mxu0  ;;  %v928_v49 = vpop.f32.mrf.mxu1 }
  0xe9   :  { %v629_v1 = vadd.f32 %v628_v48, %v627_v46  ;;  %v665_v43 = vadd.f32 %v928_v49, %v926_v47 }
  0xea   :  { %v630_v50 = vpop.f32.mrf.mxu0  ;;  %v666_v51 = vpop.f32.mrf.mxu1 }
  0xeb   :  { %v381_v12 = vadd.f32 %v629_v1, %v935_v60 }
  0xec   :  { %v631_v52 = vpop.f32.mrf.mxu0  ;;  %v667_v53 = vpop.f32.mrf.mxu1 }
  0xed   :  { %v632_v54 = vadd.f32 %v631_v52, %v630_v50  ;;  %v668_v38 = vadd.f32 %v667_v53, %v666_v51 }
  0xee   :  { %v633_v55 = vpop.f32.mrf.mxu0  ;;  %v930_v56 = vpop.f32.mrf.mxu1 }
  0xef   :  { %v386_v62 = vadd.f32 %v632_v54, %v935_v60  ;;  %v434_v53 = vadd.f32 %v668_v38, %v935_v60 }
  0xf0   :  { %v634_v58 = vpop.f32.mrf.mxu0  ;;  %v670_v59 = vpop.f32.mrf.mxu1 }
  0xf1   :  { %v635_v61 = vadd.f32 %v634_v58, %v633_v55  ;;  %v671_v52 = vadd.f32 %v670_v59, %v930_v56 }
  0xf2   :  { %v636_v63 = vpop.f32.mrf.mxu0  ;;  %v688_v0 = vpop.f32.mrf.mxu1 }
  0xf3   :  { %v483_v2 = vadd.f32 %v688_v0, %v386_v62  ;;  %v389_v7 = vadd.f32 %v635_v61, %v935_v60  ;;  %v426_v61 = vadd.f32 %v662_v44, %v935_v60  ;;  %v437_v49 = vadd.f32 %v671_v52, %v935_v60 }
  0xf4   :  { %v637_v4 = vpop.f32.mrf.mxu0  ;;  %v474_v5 = vpop.f32.mrf.mxu1 }
  0xf5   :  { %539 = vst.msk [vmem:[%s1025_s3 + $0x10] sm:$0xff] %vm318_vm0, %v483_v2  ;;  %v475_v6 = vadd.f32 %v474_v5, %v378_v3  ;;  %v638_v10 = vadd.f32 %v637_v4, %v636_v63  ;;  %v429_v4 = vadd.f32 %v665_v43, %v935_v60 }
  0xf6   :  { %v639_v8 = vpop.f32.mrf.mxu0  ;;  %v689_v9 = vpop.f32.mrf.mxu1 }
  0xf7   :  { %537 = vst.msk [vmem:[%s1025_s3] sm:$0xff] %vm318_vm0, %v475_v6  ;;  %v486_v11 = vadd.f32 %v689_v9, %v389_v7  ;;  %v394_v19 = vadd.f32 %v638_v10, %v935_v60 }
  0xf8   :  { %v640_v13 = vpop.f32.mrf.mxu0  ;;  %v477_v14 = vpop.f32.mrf.mxu1 }
  0xf9   :  { %540 = vst.msk [vmem:[%s1025_s3 + $0x18] sm:$0xff] %vm318_vm0, %v486_v11  ;;  %v478_v15 = vadd.f32 %v477_v14, %v381_v12  ;;  %v641_v18 = vadd.f32 %v640_v13, %v639_v8 }
  0xfa   :  { %v642_v16 = vpop.f32.mrf.mxu0  ;;  %v692_v17 = vpop.f32.mrf.mxu1 }
  0xfb   :  { %538 = vst.msk [vmem:[%s1025_s3 + $0x8] sm:$0xff] %vm318_vm0, %v478_v15  ;;  %v397_v27 = vadd.f32 %v641_v18, %v935_v60 }
  0xfc   :  { %v643_v20 = vpop.f32.mrf.mxu0  ;;  %v490_v21 = vpop.f32.mrf.mxu1 }
  0xfd   :  { %v644_v22 = vadd.f32 %v643_v20, %v642_v16  ;;  %v491_v23 = vadd.f32 %v490_v21, %v394_v19 }
  0xfe   :  { %v645_v24 = vpop.f32.mrf.mxu0  ;;  %v693_v25 = vpop.f32.mrf.mxu1 }
  0xff   :  { %v402_v26 = vadd.f32 %v644_v22, %v935_v60  ;;  %541 = vst.msk [vmem:[%s1025_s3 + $0x20] sm:$0xff] %vm318_vm0, %v491_v23 }
 0x100   :  { %v646_v28 = vpop.f32.mrf.mxu0  ;;  %v493_v29 = vpop.f32.mrf.mxu1 }
 0x101   :  { %v499_v30 = vadd.f32 %v692_v17, %v402_v26  ;;  %v647_v31 = vadd.f32 %v646_v28, %v645_v24  ;;  %v494_v32 = vadd.f32 %v493_v29, %v397_v27 }
 0x102   :  { %v648_v33 = vpop.f32.mrf.mxu0  ;;  %v696_v34 = vpop.f32.mrf.mxu1 }
 0x103   :  { %543 = vst.msk [vmem:[%s1025_s3 + $0x30] sm:$0xff] %vm318_vm0, %v499_v30  ;;  %v405_v35 = vadd.f32 %v647_v31, %v935_v60  ;;  %542 = vst.msk [vmem:[%s1025_s3 + $0x28] sm:$0xff] %vm318_vm0, %v494_v32 }
 0x104   :  { %v649_v36 = vpop.f32.mrf.mxu0  ;;  %v506_v37 = vpop.f32.mrf.mxu1 }
 0x105   :  { %v502_v39 = vadd.f32 %v693_v25, %v405_v35  ;;  %v650_v40 = vadd.f32 %v649_v36, %v648_v33 }
 0x106   :  { %v651_v41 = vpop.f32.mrf.mxu0  ;;  %v697_v42 = vpop.f32.mrf.mxu1 }
 0x107   :  { %544 = vst.msk [vmem:[%s1025_s3 + $0x38] sm:$0xff] %vm318_vm0, %v502_v39  ;;  %v410_v46 = vadd.f32 %v650_v40, %v935_v60 }
 0x108   :  { %v652_v48 = vpop.f32.mrf.mxu0  ;;  %v509_v50 = vpop.f32.mrf.mxu1 }
 0x109   :  { %v507_v54 = vadd.f32 %v506_v37, %v410_v46  ;;  %v653_v51 = vadd.f32 %v652_v48, %v651_v41 }
 0x10a   :  { %v654_v55 = vpop.f32.mrf.mxu0  ;;  %v700_v57 = vpop.f32.mrf.mxu1 }
 0x10b   :  { %545 = vst.msk [vmem:[%s1025_s3 + $0x40] sm:$0xff] %vm318_vm0, %v507_v54  ;;  %v413_v45 = vadd.f32 %v653_v51, %v935_v60  ;;  %v531_v58 = vadd.f32 %v700_v57, %v434_v53 }
 0x10c   :  { %v655_v56 = vpop.f32.mrf.mxu0  ;;  %v522_v59 = vpop.f32.mrf.mxu1 }
 0x10d   :  { %v510_v62 = vadd.f32 %v509_v50, %v413_v45  ;;  %551 = vst.msk [vmem:[%s1025_s3 + $0x70] sm:$0xff] %vm318_vm0, %v531_v58  ;;  %v656_v63 = vadd.f32 %v655_v56, %v654_v55  ;;  %v523_v47 = vadd.f32 %v522_v59, %v426_v61 }
 0x10e   :  { %v657_v0 = vpop.f32.mrf.mxu0  ;;  %v701_v1 = vpop.f32.mrf.mxu1 }
 0x10f   :  { %546 = vst.msk [vmem:[%s1025_s3 + $0x48] sm:$0xff] %vm318_vm0, %v510_v62  ;;  %v418_v2 = vadd.f32 %v656_v63, %v935_v60  ;;  %549 = vst.msk [vmem:[%s1025_s3 + $0x60] sm:$0xff] %vm318_vm0, %v523_v47  ;;  %v534_v3 = vadd.f32 %v701_v1, %v437_v49 }
 0x110   :  { %v658_v5 = vpop.f32.mrf.mxu0  ;;  %v525_v6 = vpop.f32.mrf.mxu1 }
 0x111   :  { %v515_v7 = vadd.f32 %v696_v34, %v418_v2  ;;  %552 = vst.msk [vmem:[%s1025_s3 + $0x78] sm:$0xff] %vm318_vm0, %v534_v3  ;;  %v659_v8 = vadd.f32 %v658_v5, %v657_v0  ;;  %v526_v9 = vadd.f32 %v525_v6, %v429_v4 }
 0x113   :  { %547 = vst.msk [vmem:[%s1025_s3 + $0x50] sm:$0xff] %vm318_vm0, %v515_v7  ;;  %v421_v10 = vadd.f32 %v659_v8, %v935_v60  ;;  %550 = vst.msk [vmem:[%s1025_s3 + $0x68] sm:$0xff] %vm318_vm0, %v526_v9 }
 0x115   :  { %v518_v11 = vadd.f32 %v697_v42, %v421_v10 }
 0x117   :  { %548 = vst.msk [vmem:[%s1025_s3 + $0x58] sm:$0xff] %vm318_vm0, %v518_v11 }

// kernel: fwd.29
= control target key start
LH: loop header
LB: loop body
LE: loop exit
PB: predicated region body
PF: predicated region fallthrough
CT: control target
= control target key end

     0   :  { %s884_s15 = smov 0   ;;  %s1082_s0 = inlined_call_operand.vmem [shape: bf16[512,16], index: 0, kind: input, shape index: {}]   ;;  %s1083_s1 = inlined_call_operand.vmem [shape: bf16[16,32], index: 1, kind: input, shape index: {}]   ;;  %s1084_s2 = inlined_call_operand.vmem [shape: f32[1,32], index: 2, kind: input, shape index: {}]   ;;  %s1085_s3 = inlined_call_operand.vmem [shape: f32[512,32], index: 3, kind: input, shape index: {}]   ;;  %s1086_s4 = inlined_call_operand.vmem [shape: f32[512,32], index: 4, kind: output, shape index: {}]  }
   0x1 LB: > { %s726_s16 = sadd.s32 4294967295, %s857_s15   ;;  %p730_p0 = scmp.ge.s32.totalorder %s857_s15, 1  ;;  %s857_s15 = sphi %s884_s15, %s14_s15  }
   0x2   : > { %p174_p1 = scmp.lt.s32.totalorder %s857_s15, 3 }
   0x4   : > { %p175_p2 = pnand %p730_p0, %p174_p1 }
   0x5   : > { %s731_s19 = sshll.u32 (!%p175_p2), %s726_s16, 5 }
   0x6   : > { %178 = sbr.rel (%p175_p2) target bundleno = 245 (0xf5), region = 36  ;;  %p206_p3 = scmp.lt.s32.totalorder (!%p175_p2), %s731_s19, 63 }
   0xb   : > { %v834_v0 = vld [vmem:[%s1083_s1] sm:$0xff]   ;;  %s1088_s19 = smov (!%p206_p3, %s731_s19), 63  ;;  %vm351_vm0 = vcmask 130048   ;;  %vm625_vm1 = vcmask 261120  }
   0xc   : > { %790 = vmatprep.subr.bf16.mxu0 %v834_v0  ;;  %824 = vmatprep.subr.bf16.mxu1 %v834_v0  ;;  %s732_s20 = sshll.u32 %s1088_s19, 2  ;;  %s734_s24 = sshll.u32 %s1088_s19, 3  ;;  %v944_v17 = vld [vmem:[%s1084_s2] ss:$0 sm:$0xff] }
   0xd   : > { %791 = vmatpush3.bf16.msra.mxu0 %v834_v0  ;;  %825 = vmatpush3.bf16.msra.mxu1 %v834_v0  ;;  %s901_s23 = scalar_lea.vmem %s1082_s0, %s732_s20  ;;  %s939_s27 = scalar_lea.vmem %s1085_s3, %s734_s24 }
   0xe   : > { %v835_v1 = vld [vmem:[%s901_s23] sm:$0xff]   ;;  %v837_v3 = vld [vmem:[%s901_s23 + $0x8] sm:$0xff]   ;;  %v839_v5 = vld [vmem:[%s901_s23 + $0x10] sm:$0xff]   ;;  %s952_s6 = scalar_lea.vmem %s1086_s4, %s734_s24 }
   0xf   : > { %v836_v2 = vld [vmem:[%s901_s23 + $0x40] sm:$0xff]   ;;  %792 = vmatprep.mubr.msk.bf16.mxu0 %vm351_vm0, %v835_v1  ;;  %v838_v4 = vld [vmem:[%s901_s23 + $0x48] sm:$0xff]   ;;  %v840_v6 = vld [vmem:[%s901_s23 + $0x50] sm:$0xff]  }
  0x10   : > { %808 = vmatprep.mubr.msk.bf16.mxu1 %vm351_vm0, %v836_v2  ;;  %793 = vmatmul.mubr.msk.bf16.vlgmr.msra.gmra.mxu0 %vm351_vm0, %v837_v3  ;;  %v841_v7 = vld [vmem:[%s901_s23 + $0x18] sm:$0xff]   ;;  %v843_v9 = vld [vmem:[%s901_s23 + $0x20] sm:$0xff]   ;;  %v845_v11 = vld [vmem:[%s901_s23 + $0x28] sm:$0xff]  }
  0x11   : > { %809 = vmatmul.mubr.msk.bf16.vlgmr.msra.gmra.mxu1 %vm351_vm0, %v838_v4  ;;  %796 = vmatprep.mubr.msk.bf16.mxu0 %vm351_vm0, %v839_v5  ;;  %v842_v8 = vld [vmem:[%s901_s23 + $0x58] sm:$0xff]   ;;  %v844_v10 = vld [vmem:[%s901_s23 + $0x60] sm:$0xff]   ;;  %v846_v12 = vld [vmem:[%s901_s23 + $0x68] sm:$0xff]  }
  0x12   : > { %812 = vmatprep.mubr.msk.bf16.mxu1 %vm351_vm0, %v840_v6  ;;  %v847_v13 = vld [vmem:[%s901_s23 + $0x30] sm:$0xff]   ;;  %v849_v15 = vld [vmem:[%s901_s23 + $0x38] sm:$0xff]   ;;  %v561_v25 = vld [vmem:[%s939_s27] sm:$0xff] }
  0x13   : > { %v848_v14 = vld [vmem:[%s901_s23 + $0x70] sm:$0xff]   ;;  %v850_v16 = vld [vmem:[%s901_s23 + $0x78] sm:$0xff]   ;;  %v577_v29 = vld [vmem:[%s939_s27 + $0x80] sm:$0xff] }
  0x14   : > { %v563_v19 = vld [vmem:[%s939_s27 + $0x10] sm:$0xff]  ;;  %v564_v33 = vld [vmem:[%s939_s27 + $0x18] sm:$0xff]  ;;  %v562_v41 = vld [vmem:[%s939_s27 + $0x8] sm:$0xff] }
  0x15   : > { %v579_v22 = vld [vmem:[%s939_s27 + $0x90] sm:$0xff]  ;;  %v580_v37 = vld [vmem:[%s939_s27 + $0x98] sm:$0xff]  ;;  %v578_v45 = vld [vmem:[%s939_s27 + $0x88] sm:$0xff] }
  0x16   : > { %v567_v49 = vld [vmem:[%s939_s27 + $0x30] sm:$0xff]  ;;  %v565_v57 = vld [vmem:[%s939_s27 + $0x20] sm:$0xff]  ;;  %v568_v1 = vld [vmem:[%s939_s27 + $0x38] sm:$0xff] }
  0x17   : > { %v583_v53 = vld [vmem:[%s939_s27 + $0xb0] sm:$0xff]  ;;  %v581_v61 = vld [vmem:[%s939_s27 + $0xa0] sm:$0xff]  ;;  %v584_v5 = vld [vmem:[%s939_s27 + $0xb8] sm:$0xff] }
  0x18   : > { %797 = vmatmul.mubr.msk.bf16.gmra.mxu0 %vm351_vm0, %v841_v7 }
  0x19   : > { %813 = vmatmul.mubr.msk.bf16.gmra.mxu1 %vm351_vm0, %v842_v8  ;;  %800 = vmatprep.mubr.msk.bf16.mxu0 %vm351_vm0, %v843_v9  ;;  %v566_v9 = vld [vmem:[%s939_s27 + $0x28] sm:$0xff] }
  0x1a   : > { %816 = vmatprep.mubr.msk.bf16.mxu1 %vm351_vm0, %v844_v10 }
  0x20   : > { %801 = vmatmul.mubr.msk.bf16.gmra.mxu0 %vm351_vm0, %v845_v11 }
  0x21   : > { %817 = vmatmul.mubr.msk.bf16.gmra.mxu1 %vm351_vm0, %v846_v12  ;;  %804 = vmatprep.mubr.msk.bf16.mxu0 %vm351_vm0, %v847_v13  ;;  %v582_v13 = vld [vmem:[%s939_s27 + $0xa8] sm:$0xff] }
  0x22   : > { %820 = vmatprep.mubr.msk.bf16.mxu1 %vm351_vm0, %v848_v14 }
  0x28   : > { %805 = vmatmul.mubr.msk.bf16.gmra.mxu0 %vm351_vm0, %v849_v15 }
  0x29   : > { %821 = vmatmul.mubr.msk.bf16.gmra.mxu1 %vm351_vm0, %v850_v16 }
  0xd0   : > { %v794_v18 = vpop.f32.mrf.mxu0 }
  0xd1   : > { %v443_v20 = vadd.f32 %v794_v18, %v944_v17  ;;  %v810_v21 = vpop.f32.mrf.mxu1  ;;  %v571_v18 = vld [vmem:[%s939_s27 + $0x50] sm:$0xff] }
  0xd2   : > { %v507_v23 = vadd.f32 %v810_v21, %v944_v17  ;;  %v434_v24 = vpop.f32.mrf.mxu0 }
  0xd3   : > { %v595_v26 = vadd.f32 %v563_v19, %v443_v20  ;;  %v435_v27 = vadd.f32 %v944_v17, %v434_v24  ;;  %v498_v28 = vpop.f32.mrf.mxu1 }
  0xd4   : > { %v611_v30 = vadd.f32 %v579_v22, %v507_v23  ;;  %v499_v31 = vadd.f32 %v944_v17, %v498_v28  ;;  %v795_v32 = vpop.f32.mrf.mxu0  ;;  %v587_v22 = vld [vmem:[%s939_s27 + $0xd0] sm:$0xff] }
  0xd5   : > { %628 = vst.msk [vmem:[%s952_s6 + $0x10] sm:$0xff] %vm625_vm1, %v595_v26  ;;  %v593_v34 = vadd.f32 %v561_v25, %v435_v27  ;;  %v446_v35 = vadd.f32 %v795_v32, %v944_v17  ;;  %v811_v36 = vpop.f32.mrf.mxu1  ;;  %v569_v26 = vld [vmem:[%s939_s27 + $0x40] sm:$0xff] }
  0xd6   : > { %644 = vst.msk [vmem:[%s952_s6 + $0x90] sm:$0xff] %vm625_vm1, %v611_v30  ;;  %v609_v38 = vadd.f32 %v577_v29, %v499_v31  ;;  %v510_v39 = vadd.f32 %v811_v36, %v944_v17  ;;  %v437_v40 = vpop.f32.mrf.mxu0  ;;  %v585_v30 = vld [vmem:[%s939_s27 + $0xc0] sm:$0xff] }
  0xd7   : > { %626 = vst.msk [vmem:[%s952_s6] sm:$0xff] %vm625_vm1, %v593_v34  ;;  %v596_v42 = vadd.f32 %v564_v33, %v446_v35  ;;  %v438_v43 = vadd.f32 %v944_v17, %v437_v40  ;;  %v501_v44 = vpop.f32.mrf.mxu1  ;;  %v572_v34 = vld [vmem:[%s939_s27 + $0x58] sm:$0xff] }
  0xd8   : > { %642 = vst.msk [vmem:[%s952_s6 + $0x80] sm:$0xff] %vm625_vm1, %v609_v38  ;;  %v612_v46 = vadd.f32 %v580_v37, %v510_v39  ;;  %v502_v47 = vadd.f32 %v944_v17, %v501_v44  ;;  %v798_v48 = vpop.f32.mrf.mxu0  ;;  %v588_v38 = vld [vmem:[%s939_s27 + $0xd8] sm:$0xff] }
  0xd9   : > { %629 = vst.msk [vmem:[%s952_s6 + $0x18] sm:$0xff] %vm625_vm1, %v596_v42  ;;  %v594_v50 = vadd.f32 %v562_v41, %v438_v43  ;;  %v459_v51 = vadd.f32 %v798_v48, %v944_v17  ;;  %v814_v52 = vpop.f32.mrf.mxu1  ;;  %v570_v42 = vld [vmem:[%s939_s27 + $0x48] sm:$0xff] }
  0xda   : > { %645 = vst.msk [vmem:[%s952_s6 + $0x98] sm:$0xff] %vm625_vm1, %v612_v46  ;;  %v610_v54 = vadd.f32 %v578_v45, %v502_v47  ;;  %v523_v55 = vadd.f32 %v814_v52, %v944_v17  ;;  %v450_v56 = vpop.f32.mrf.mxu0  ;;  %v586_v46 = vld [vmem:[%s939_s27 + $0xc8] sm:$0xff] }
  0xdb   : > { %627 = vst.msk [vmem:[%s952_s6 + $0x8] sm:$0xff] %vm625_vm1, %v594_v50  ;;  %v599_v58 = vadd.f32 %v567_v49, %v459_v51  ;;  %v451_v59 = vadd.f32 %v944_v17, %v450_v56  ;;  %v514_v60 = vpop.f32.mrf.mxu1  ;;  %v575_v50 = vld [vmem:[%s939_s27 + $0x70] sm:$0xff] }
  0xdc   : > { %643 = vst.msk [vmem:[%s952_s6 + $0x88] sm:$0xff] %vm625_vm1, %v610_v54  ;;  %v615_v62 = vadd.f32 %v583_v53, %v523_v55  ;;  %v515_v63 = vadd.f32 %v944_v17, %v514_v60  ;;  %v799_v0 = vpop.f32.mrf.mxu0  ;;  %v591_v54 = vld [vmem:[%s939_s27 + $0xf0] sm:$0xff] }
  0xdd   : > { %632 = vst.msk [vmem:[%s952_s6 + $0x30] sm:$0xff] %vm625_vm1, %v599_v58  ;;  %v597_v2 = vadd.f32 %v565_v57, %v451_v59  ;;  %v462_v3 = vadd.f32 %v799_v0, %v944_v17  ;;  %v815_v4 = vpop.f32.mrf.mxu1  ;;  %v573_v58 = vld [vmem:[%s939_s27 + $0x60] sm:$0xff] }
  0xde   : > { %648 = vst.msk [vmem:[%s952_s6 + $0xb0] sm:$0xff] %vm625_vm1, %v615_v62  ;;  %v613_v6 = vadd.f32 %v581_v61, %v515_v63  ;;  %v526_v7 = vadd.f32 %v815_v4, %v944_v17  ;;  %v453_v8 = vpop.f32.mrf.mxu0  ;;  %v589_v62 = vld [vmem:[%s939_s27 + $0xe0] sm:$0xff] }
  0xdf   : > { %630 = vst.msk [vmem:[%s952_s6 + $0x20] sm:$0xff] %vm625_vm1, %v597_v2  ;;  %v600_v10 = vadd.f32 %v568_v1, %v462_v3  ;;  %v454_v11 = vadd.f32 %v944_v17, %v453_v8  ;;  %v517_v12 = vpop.f32.mrf.mxu1  ;;  %v576_v2 = vld [vmem:[%s939_s27 + $0x78] sm:$0xff] }
  0xe0   : > { %646 = vst.msk [vmem:[%s952_s6 + $0xa0] sm:$0xff] %vm625_vm1, %v613_v6  ;;  %v616_v14 = vadd.f32 %v584_v5, %v526_v7  ;;  %v518_v15 = vadd.f32 %v944_v17, %v517_v12  ;;  %v802_v16 = vpop.f32.mrf.mxu0  ;;  %v592_v6 = vld [vmem:[%s939_s27 + $0xf8] sm:$0xff] }
  0xe1   : > { %633 = vst.msk [vmem:[%s952_s6 + $0x38] sm:$0xff] %vm625_vm1, %v600_v10  ;;  %v598_v19 = vadd.f32 %v566_v9, %v454_v11  ;;  %v475_v20 = vadd.f32 %v802_v16, %v944_v17  ;;  %v818_v21 = vpop.f32.mrf.mxu1  ;;  %v574_v10 = vld [vmem:[%s939_s27 + $0x68] sm:$0xff] }
  0xe2   : > { %649 = vst.msk [vmem:[%s952_s6 + $0xb8] sm:$0xff] %vm625_vm1, %v616_v14  ;;  %v614_v23 = vadd.f32 %v582_v13, %v518_v15  ;;  %v539_v24 = vadd.f32 %v818_v21, %v944_v17  ;;  %v466_v25 = vpop.f32.mrf.mxu0  ;;  %v590_v14 = vld [vmem:[%s939_s27 + $0xe8] sm:$0xff] }
  0xe3   : > { %631 = vst.msk [vmem:[%s952_s6 + $0x28] sm:$0xff] %vm625_vm1, %v598_v19  ;;  %v603_v27 = vadd.f32 %v571_v18, %v475_v20  ;;  %v467_v28 = vadd.f32 %v944_v17, %v466_v25  ;;  %v530_v29 = vpop.f32.mrf.mxu1 }
  0xe4   : > { %647 = vst.msk [vmem:[%s952_s6 + $0xa8] sm:$0xff] %vm625_vm1, %v614_v23  ;;  %v619_v31 = vadd.f32 %v587_v22, %v539_v24  ;;  %v531_v32 = vadd.f32 %v944_v17, %v530_v29  ;;  %v803_v33 = vpop.f32.mrf.mxu0 }
  0xe5   : > { %636 = vst.msk [vmem:[%s952_s6 + $0x50] sm:$0xff] %vm625_vm1, %v603_v27  ;;  %v601_v35 = vadd.f32 %v569_v26, %v467_v28  ;;  %v478_v36 = vadd.f32 %v803_v33, %v944_v17  ;;  %v819_v37 = vpop.f32.mrf.mxu1 }
  0xe6   : > { %652 = vst.msk [vmem:[%s952_s6 + $0xd0] sm:$0xff] %vm625_vm1, %v619_v31  ;;  %v617_v39 = vadd.f32 %v585_v30, %v531_v32  ;;  %v542_v40 = vadd.f32 %v819_v37, %v944_v17  ;;  %v469_v41 = vpop.f32.mrf.mxu0 }
  0xe7   : > { %634 = vst.msk [vmem:[%s952_s6 + $0x40] sm:$0xff] %vm625_vm1, %v601_v35  ;;  %v604_v43 = vadd.f32 %v572_v34, %v478_v36  ;;  %v470_v44 = vadd.f32 %v944_v17, %v469_v41  ;;  %v533_v45 = vpop.f32.mrf.mxu1 }
  0xe8   : > { %650 = vst.msk [vmem:[%s952_s6 + $0xc0] sm:$0xff] %vm625_vm1, %v617_v39  ;;  %v620_v47 = vadd.f32 %v588_v38, %v542_v40  ;;  %v534_v48 = vadd.f32 %v944_v17, %v533_v45  ;;  %v806_v49 = vpop.f32.mrf.mxu0 }
  0xe9   : > { %637 = vst.msk [vmem:[%s952_s6 + $0x58] sm:$0xff] %vm625_vm1, %v604_v43  ;;  %v602_v51 = vadd.f32 %v570_v42, %v470_v44  ;;  %v491_v52 = vadd.f32 %v806_v49, %v944_v17  ;;  %v822_v53 = vpop.f32.mrf.mxu1 }
  0xea   : > { %653 = vst.msk [vmem:[%s952_s6 + $0xd8] sm:$0xff] %vm625_vm1, %v620_v47  ;;  %v618_v55 = vadd.f32 %v586_v46, %v534_v48  ;;  %v555_v56 = vadd.f32 %v822_v53, %v944_v17  ;;  %v482_v57 = vpop.f32.mrf.mxu0 }
  0xeb   : > { %635 = vst.msk [vmem:[%s952_s6 + $0x48] sm:$0xff] %vm625_vm1, %v602_v51  ;;  %v607_v59 = vadd.f32 %v575_v50, %v491_v52  ;;  %v483_v60 = vadd.f32 %v944_v17, %v482_v57  ;;  %v546_v61 = vpop.f32.mrf.mxu1 }
  0xec   : > { %651 = vst.msk [vmem:[%s952_s6 + $0xc8] sm:$0xff] %vm625_vm1, %v618_v55  ;;  %v623_v63 = vadd.f32 %v591_v54, %v555_v56  ;;  %v547_v0 = vadd.f32 %v944_v17, %v546_v61  ;;  %v807_v1 = vpop.f32.mrf.mxu0 }
  0xed   : > { %640 = vst.msk [vmem:[%s952_s6 + $0x70] sm:$0xff] %vm625_vm1, %v607_v59  ;;  %v605_v3 = vadd.f32 %v573_v58, %v483_v60  ;;  %v494_v4 = vadd.f32 %v807_v1, %v944_v17  ;;  %v823_v5 = vpop.f32.mrf.mxu1 }
  0xee   : > { %656 = vst.msk [vmem:[%s952_s6 + $0xf0] sm:$0xff] %vm625_vm1, %v623_v63  ;;  %v621_v7 = vadd.f32 %v589_v62, %v547_v0  ;;  %v558_v8 = vadd.f32 %v823_v5, %v944_v17  ;;  %v485_v9 = vpop.f32.mrf.mxu0 }
  0xef   : > { %638 = vst.msk [vmem:[%s952_s6 + $0x60] sm:$0xff] %vm625_vm1, %v605_v3  ;;  %v608_v11 = vadd.f32 %v576_v2, %v494_v4  ;;  %v486_v12 = vadd.f32 %v944_v17, %v485_v9  ;;  %v549_v13 = vpop.f32.mrf.mxu1 }
  0xf0   : > { %654 = vst.msk [vmem:[%s952_s6 + $0xe0] sm:$0xff] %vm625_vm1, %v621_v7  ;;  %v624_v15 = vadd.f32 %v592_v6, %v558_v8  ;;  %v550_v16 = vadd.f32 %v944_v17, %v549_v13 }
  0xf1   : > { %641 = vst.msk [vmem:[%s952_s6 + $0x78] sm:$0xff] %vm625_vm1, %v608_v11  ;;  %v606_v18 = vadd.f32 %v574_v10, %v486_v12 }
  0xf2   : > { %657 = vst.msk [vmem:[%s952_s6 + $0xf8] sm:$0xff] %vm625_vm1, %v624_v15  ;;  %v622_v19 = vadd.f32 %v590_v14, %v550_v16 }
  0xf3   : > { %639 = vst.msk [vmem:[%s952_s6 + $0x68] sm:$0xff] %vm625_vm1, %v606_v18 }
  0xf4   : > { %655 = vst.msk [vmem:[%s952_s6 + $0xe8] sm:$0xff] %vm625_vm1, %v622_v19 }
  0xf5 PF: > { %s14_s15 = sadd.s32 1, %s857_s15  }
  0xf6   : > { %p11_p4 = scmp.ge.s32.totalorder %s14_s15, 4  }
  0xf8   :  { %13 = sbr.rel (!%p11_p4) target bundleno = 1 (0x1), region = 69 }

// kernel: fwd.33
= control target key start
LH: loop header
LB: loop body
LE: loop exit
PB: predicated region body
PF: predicated region fallthrough
CT: control target
= control target key end

     0   :  { %s1487_s12 = smov 0   ;;  %s1767_s0 = inlined_call_operand.vmem [shape: bf16[512,288], index: 0, kind: input, shape index: {}]   ;;  %s1768_s1 = inlined_call_operand.vmem [shape: bf16[288,32], index: 1, kind: input, shape index: {}]   ;;  %s1769_s2 = inlined_call_operand.vmem [shape: f32[1,32], index: 2, kind: input, shape index: {}]   ;;  %s1770_s3 = inlined_call_operand.vmem [shape: f32[512,32], index: 3, kind: output, shape index: {}]  }
   0x1 LB: > { %s1092_s13 = sadd.s32 4294967295, %s1465_s12   ;;  %p1096_p0 = scmp.ge.s32.totalorder %s1465_s12, 1  ;;  %s1465_s12 = sphi %s1487_s12, %s13_s12  }
   0x2   : > { %p139_p1 = scmp.lt.s32.totalorder %s1465_s12, 3 }
   0x4   : > { %p140_p2 = pnand %p1096_p0, %p139_p1 }
   0x5   : > { %s1097_s16 = sshll.u32 (!%p140_p2), %s1092_s13, 5 }
   0x6   : > { %143 = sbr.rel (%p140_p2) target bundleno = 338 (0x152), region = 32  ;;  %p165_p3 = scmp.lt.s32.totalorder (!%p140_p2), %s1097_s16, 63 }
   0xb   : > { %v1377_v0 = vld [vmem:[%s1768_s1 + $0x78] sm:$0xff]   ;;  %v1379_v2 = vld [vmem:[%s1768_s1 + $0x70] sm:$0xff]   ;;  %v1381_v4 = vld [vmem:[%s1768_s1 + $0x68] sm:$0xff]   ;;  %s1772_s16 = smov (!%p165_p3, %s1097_s16), 63  ;;  %vm633_vm0 = vcmask 261120  }
   0xc   : > { %v1378_v1 = vld [vmem:[%s1768_s1 + $0x38] sm:$0xff]   ;;  %1186 = vmatprep.subr.bf16.mxu0 %v1377_v0  ;;  %1352 = vmatprep.subr.bf16.mxu1 %v1377_v0  ;;  %v1380_v3 = vld [vmem:[%s1768_s1 + $0x30] sm:$0xff]   ;;  %v1382_v5 = vld [vmem:[%s1768_s1 + $0x28] sm:$0xff]   ;;  %s1368_s29 = smul.u32 12, %s1772_s16  ;;  %s1100_s30 = sshll.u32 %s1772_s16, 3 }
   0xd   : > { %1187 = vmatpush3.bf16.msra.mxu0 %v1378_v1  ;;  %1360 = vmatpush3.bf16.msra.mxu1 %v1378_v1  ;;  %v1383_v6 = vld [vmem:[%s1768_s1 + $0x60] sm:$0xff]   ;;  %v1385_v8 = vld [vmem:[%s1768_s1 + $0x58] sm:$0xff]   ;;  %v1387_v10 = vld [vmem:[%s1768_s1 + $0x50] sm:$0xff]   ;;  %s1651_s8 = scalar_lea.vmem %s1770_s3, %s1100_s30 }
   0xe   : > { %1188 = vmatprep.subr.bf16.mxu0 %v1379_v2  ;;  %1353 = vmatprep.subr.bf16.mxu1 %v1379_v2  ;;  %v1384_v7 = vld [vmem:[%s1768_s1 + $0x20] sm:$0xff]   ;;  %s1528_s9 = scalar_lea.vmem %s1767_s0, %s1368_s29  ;;  %v1386_v9 = vld [vmem:[%s1768_s1 + $0x18] sm:$0xff]   ;;  %v1388_v13 = vld [vmem:[%s1768_s1 + $0x10] sm:$0xff]  }
   0xf   : > { %v1395_v11 = vld [vmem:[%s1528_s9 + $0x4] ss:$12 sps:$4 sm:$0xff]   ;;  %v1389_v14 = vld [vmem:[%s1768_s1 + $0x48] sm:$0xff]   ;;  %v1406_v26 = vld [vmem:[%s1528_s9 + $0x34] ss:$12 sps:$4 sm:$0xff]  }
  0x10   : > { %v1398_v12 = vld [vmem:[%s1528_s9 + $0x124] ss:$12 sps:$4 sm:$0xff]   ;;  %714 = vmatprep.mubr.bf16.mxu0 %v1395_v11  ;;  %v1390_v15 = vld [vmem:[%s1768_s1 + $0x8] sm:$0xff]   ;;  %v1408_v27 = vld [vmem:[%s1528_s9 + $0x154] ss:$12 sps:$4 sm:$0xff]  }
  0x11   : > { %1189 = vmatpush3.bf16.msra.mxu0 %v1380_v3  ;;  %1361 = vmatpush3.bf16.msra.mxu1 %v1380_v3  ;;  %v1391_v16 = vld [vmem:[%s1768_s1 + $0x40] sm:$0xff]   ;;  %v1399_v18 = vld [vmem:[%s1768_s1 + $0x88] sm:$0xff]   ;;  %v1410_v28 = vld [vmem:[%s1528_s9 + $0x30] ss:$12 sps:$4 sm:$0xff]  }
  0x12   : > { %1190 = vmatprep.subr.bf16.mxu0 %v1381_v4  ;;  %1354 = vmatprep.subr.bf16.mxu1 %v1381_v4  ;;  %v1392_v17 = vld [vmem:[%s1768_s1] sm:$0xff]   ;;  %v1400_v21 = vld [vmem:[%s1528_s9 + $0x1c] ss:$12 sps:$4 sm:$0xff]   ;;  %v1413_v30 = vld [vmem:[%s1528_s9 + $0x4c] ss:$12 sps:$4 sm:$0xff]  }
  0x13   : > { %810 = vmatprep.mubr.bf16.mxu1 %v1398_v12  ;;  %v1393_v19 = vld [vmem:[%s1528_s9] ss:$12 sps:$4 sm:$0xff]   ;;  %v1402_v22 = vld [vmem:[%s1528_s9 + $0x13c] ss:$12 sps:$4 sm:$0xff]   ;;  %v1404_v24 = vld [vmem:[%s1528_s9 + $0x18] ss:$12 sps:$4 sm:$0xff]  }
  0x14   : > { %v1396_v20 = vld [vmem:[%s1528_s9 + $0x120] ss:$12 sps:$4 sm:$0xff]   ;;  %v1405_v25 = vld [vmem:[%s1528_s9 + $0x138] ss:$12 sps:$4 sm:$0xff]   ;;  %v1411_v29 = vld [vmem:[%s1528_s9 + $0x150] ss:$12 sps:$4 sm:$0xff]  }
  0x15   : > { %1191 = vmatpush3.bf16.msra.mxu0 %v1382_v5  ;;  %1362 = vmatpush3.bf16.msra.mxu1 %v1382_v5  ;;  %v1412_v23 = vld [vmem:[%s1768_s1 + $0x80] sm:$0xff]   ;;  %v1415_v31 = vld [vmem:[%s1528_s9 + $0x16c] ss:$12 sps:$4 sm:$0xff]   ;;  %v1417_v32 = vld [vmem:[%s1528_s9 + $0x48] ss:$12 sps:$4 sm:$0xff]  }
  0x16   : > { %1192 = vmatprep.subr.bf16.mxu0 %v1383_v6  ;;  %1355 = vmatprep.subr.bf16.mxu1 %v1383_v6  ;;  %v1418_v33 = vld [vmem:[%s1528_s9 + $0x168] ss:$12 sps:$4 sm:$0xff]   ;;  %v1419_v34 = vld [vmem:[%s1528_s9 + $0x64] ss:$12 sps:$4 sm:$0xff]   ;;  %v1422_v36 = vld [vmem:[%s1528_s9 + $0x60] ss:$12 sps:$4 sm:$0xff]  }
  0x17   : > { %v1421_v35 = vld [vmem:[%s1528_s9 + $0x8] ss:$12 sps:$4 sm:$0xff]   ;;  %v1423_v37 = vld [vmem:[%s1528_s9 + $0x20] ss:$12 sps:$4 sm:$0xff]   ;;  %v1426_v39 = vld [vmem:[%s1528_s9 + $0x38] ss:$12 sps:$4 sm:$0xff]  }
  0x18   : > { %v1424_v38 = vld [vmem:[%s1528_s9 + $0x7c] ss:$12 sps:$4 sm:$0xff]   ;;  %v1427_v40 = vld [vmem:[%s1528_s9 + $0x78] ss:$12 sps:$4 sm:$0xff]   ;;  %v1429_v42 = vld [vmem:[%s1528_s9 + $0x94] ss:$12 sps:$4 sm:$0xff]  }
  0x19   : > { %1193 = vmatpush3.bf16.msra.mxu0 %v1384_v7  ;;  %1363 = vmatpush3.bf16.msra.mxu1 %v1384_v7  ;;  %v1428_v41 = vld [vmem:[%s1528_s9 + $0x50] ss:$12 sps:$4 sm:$0xff]   ;;  %v1431_v43 = vld [vmem:[%s1528_s9 + $0x68] ss:$12 sps:$4 sm:$0xff]   ;;  %v1433_v45 = vld [vmem:[%s1528_s9 + $0x80] ss:$12 sps:$4 sm:$0xff]  }
  0x1a   : > { %1194 = vmatprep.subr.bf16.mxu0 %v1385_v8  ;;  %1356 = vmatprep.subr.bf16.mxu1 %v1385_v8  ;;  %v1432_v44 = vld [vmem:[%s1528_s9 + $0x90] ss:$12 sps:$4 sm:$0xff]   ;;  %v1434_v46 = vld [vmem:[%s1528_s9 + $0xac] ss:$12 sps:$4 sm:$0xff]   ;;  %v1437_v48 = vld [vmem:[%s1528_s9 + $0xa8] ss:$12 sps:$4 sm:$0xff]  }
  0x1b   : > { %v1436_v47 = vld [vmem:[%s1528_s9 + $0x98] ss:$12 sps:$4 sm:$0xff]   ;;  %v1438_v49 = vld [vmem:[%s1528_s9 + $0xb0] ss:$12 sps:$4 sm:$0xff]   ;;  %v1441_v51 = vld [vmem:[%s1528_s9 + $0xc8] ss:$12 sps:$4 sm:$0xff]  }
  0x1c   : > { %v1439_v50 = vld [vmem:[%s1528_s9 + $0xc4] ss:$12 sps:$4 sm:$0xff]   ;;  %v1442_v52 = vld [vmem:[%s1528_s9 + $0xc0] ss:$12 sps:$4 sm:$0xff]   ;;  %v1444_v54 = vld [vmem:[%s1528_s9 + $0xdc] ss:$12 sps:$4 sm:$0xff]  }
  0x1d   : > { %1195 = vmatpush3.bf16.msra.mxu0 %v1386_v9  ;;  %1364 = vmatpush3.bf16.msra.mxu1 %v1386_v9  ;;  %v1443_v53 = vld [vmem:[%s1528_s9 + $0xe0] ss:$12 sps:$4 sm:$0xff]   ;;  %v1446_v55 = vld [vmem:[%s1528_s9 + $0xf8] ss:$12 sps:$4 sm:$0xff]   ;;  %v1448_v57 = vld [vmem:[%s1528_s9 + $0x110] ss:$12 sps:$4 sm:$0xff]  }
  0x1e   : > { %1196 = vmatprep.subr.bf16.mxu0 %v1387_v10  ;;  %1357 = vmatprep.subr.bf16.mxu1 %v1387_v10  ;;  %v1447_v56 = vld [vmem:[%s1528_s9 + $0xd8] ss:$12 sps:$4 sm:$0xff]   ;;  %v1449_v58 = vld [vmem:[%s1528_s9 + $0xf4] ss:$12 sps:$4 sm:$0xff]   ;;  %v1452_v60 = vld [vmem:[%s1528_s9 + $0xf0] ss:$12 sps:$4 sm:$0xff]  }
  0x1f   : > { %v1451_v59 = vld [vmem:[%s1528_s9 + $0x128] ss:$12 sps:$4 sm:$0xff]   ;;  %v1453_v61 = vld [vmem:[%s1528_s9 + $0x140] ss:$12 sps:$4 sm:$0xff]   ;;  %v1456_v63 = vld [vmem:[%s1528_s9 + $0x158] ss:$12 sps:$4 sm:$0xff]  }
  0x20   : > { %v1454_v62 = vld [vmem:[%s1528_s9 + $0x10c] ss:$12 sps:$4 sm:$0xff]   ;;  %v1457_v0 = vld [vmem:[%s1528_s9 + $0x108] ss:$12 sps:$4 sm:$0xff]   ;;  %v1458_v1 = vld [vmem:[%s1528_s9 + $0x170] ss:$12 sps:$4 sm:$0xff]  }
  0x21   : > { %1197 = vmatpush3.bf16.msra.mxu0 %v1388_v13  ;;  %1365 = vmatpush3.bf16.msra.mxu1 %v1388_v13 }
  0x22   : > { %1198 = vmatprep.subr.bf16.mxu0 %v1389_v14  ;;  %1358 = vmatprep.subr.bf16.mxu1 %v1389_v14 }
  0x25   : > { %1199 = vmatpush3.bf16.msra.mxu0 %v1390_v15  ;;  %1366 = vmatpush3.bf16.msra.mxu1 %v1390_v15 }
  0x26   : > { %1200 = vmatprep.subr.bf16.mxu0 %v1391_v16  ;;  %1359 = vmatprep.subr.bf16.mxu1 %v1391_v16 }
  0x29   : > { %1201 = vmatpush3.bf16.msra.mxu0 %v1392_v17  ;;  %1367 = vmatpush3.bf16.msra.mxu1 %v1392_v17 }
  0x2a   : > { %1316 = vmatprep.subr.bf16.mxu1 %v1399_v18 }
  0x2c   : > { %715 = vmatmul.mubr.bf16.vlgmr.msra.gmra.mxu0 %v1393_v19  ;;  %811 = vmatmul.mubr.bf16.vlgmr.msra.gmra.mxu1 %v1396_v20 }
  0x2d   : > { %1317 = vmatpush3.bf16.msra.mxu1 %v1399_v18  ;;  %722 = vmatprep.mubr.bf16.mxu0 %v1400_v21 }
  0x2e   : > { %818 = vmatprep.mubr.bf16.mxu1 %v1402_v22  ;;  %1318 = vmatprep.subr.bf16.mxu1 %v1412_v23 }
  0x31   : > { %1319 = vmatpush3.bf16.msra.mxu1 %v1412_v23 }
  0x34   : > { %723 = vmatmul.mubr.bf16.gmra.mxu0 %v1404_v24  ;;  %819 = vmatmul.mubr.bf16.gmra.mxu1 %v1405_v25 }
  0x35   : > { %730 = vmatprep.mubr.bf16.mxu0 %v1406_v26  ;;  %826 = vmatprep.mubr.bf16.mxu1 %v1408_v27 }
  0x3c   : > { %731 = vmatmul.mubr.bf16.gmra.mxu0 %v1410_v28  ;;  %827 = vmatmul.mubr.bf16.gmra.mxu1 %v1411_v29 }
  0x3d   : > { %738 = vmatprep.mubr.bf16.mxu0 %v1413_v30  ;;  %834 = vmatprep.mubr.bf16.mxu1 %v1415_v31 }
  0x44   : > { %739 = vmatmul.mubr.bf16.gmra.mxu0 %v1417_v32  ;;  %835 = vmatmul.mubr.bf16.gmra.mxu1 %v1418_v33 }
  0x45   : > { %746 = vmatprep.mubr.bf16.mxu0 %v1419_v34  ;;  %1320 = vmatprep.mubr.msk.bf16.mxu1 %vm633_vm0, %v1421_v35 }
  0x4c   : > { %747 = vmatmul.mubr.bf16.gmra.mxu0 %v1422_v36  ;;  %1321 = vmatmul.mubr.msk.bf16.vlgmr.msra.gmra.mxu1 %vm633_vm0, %v1423_v37 }
  0x4d   : > { %754 = vmatprep.mubr.bf16.mxu0 %v1424_v38  ;;  %1324 = vmatprep.mubr.msk.bf16.mxu1 %vm633_vm0, %v1426_v39 }
  0x54   : > { %755 = vmatmul.mubr.bf16.gmra.mxu0 %v1427_v40  ;;  %1325 = vmatmul.mubr.msk.bf16.gmra.mxu1 %vm633_vm0, %v1428_v41 }
  0x55   : > { %762 = vmatprep.mubr.bf16.mxu0 %v1429_v42  ;;  %1328 = vmatprep.mubr.msk.bf16.mxu1 %vm633_vm0, %v1431_v43  ;;  %v1645_v42 = vld [vmem:[%s1769_s2] ss:$0 sm:$0xff] }
  0x5c   : > { %763 = vmatmul.mubr.bf16.gmra.mxu0 %v1432_v44  ;;  %1329 = vmatmul.mubr.msk.bf16.gmra.mxu1 %vm633_vm0, %v1433_v45 }
  0x5d   : > { %770 = vmatprep.mubr.bf16.mxu0 %v1434_v46  ;;  %1332 = vmatprep.mubr.msk.bf16.mxu1 %vm633_vm0, %v1436_v47 }
  0x64   : > { %771 = vmatmul.mubr.bf16.gmra.mxu0 %v1437_v48  ;;  %1333 = vmatmul.mubr.msk.bf16.gmra.mxu1 %vm633_vm0, %v1438_v49 }
  0x65   : > { %778 = vmatprep.mubr.bf16.mxu0 %v1439_v50  ;;  %1336 = vmatprep.mubr.msk.bf16.mxu1 %vm633_vm0, %v1441_v51 }
  0x6c   : > { %779 = vmatmul.mubr.bf16.gmra.mxu0 %v1442_v52  ;;  %1337 = vmatmul.mubr.msk.bf16.gmra.mxu1 %vm633_vm0, %v1443_v53 }
  0x6d   : > { %786 = vmatprep.mubr.bf16.mxu0 %v1444_v54  ;;  %1340 = vmatprep.mubr.msk.bf16.mxu1 %vm633_vm0, %v1446_v55 }
  0x74   : > { %787 = vmatmul.mubr.bf16.gmra.mxu0 %v1447_v56  ;;  %1341 = vmatmul.mubr.msk.bf16.gmra.mxu1 %vm633_vm0, %v1448_v57 }
  0x75   : > { %794 = vmatprep.mubr.bf16.mxu0 %v1449_v58  ;;  %1344 = vmatprep.mubr.msk.bf16.mxu1 %vm633_vm0, %v1451_v59 }
  0x7c   : > { %795 = vmatmul.mubr.bf16.gmra.mxu0 %v1452_v60  ;;  %1345 = vmatmul.mubr.msk.bf16.gmra.mxu1 %vm633_vm0, %v1453_v61 }
  0x7d   : > { %802 = vmatprep.mubr.bf16.mxu0 %v1454_v62  ;;  %1348 = vmatprep.mubr.msk.bf16.mxu1 %vm633_vm0, %v1456_v63 }
  0x84   : > { %803 = vmatmul.mubr.bf16.gmra.mxu0 %v1457_v0  ;;  %1349 = vmatmul.mubr.msk.bf16.gmra.mxu1 %vm633_vm0, %v1458_v1 }
  0xec   : > { %v1202_v2 = vpop.f32.mrf.mxu0  ;;  %v1274_v3 = vpop.f32.mrf.mxu1 }
  0xee   : > { %v1203_v4 = vpop.f32.mrf.mxu0  ;;  %v1275_v5 = vpop.f32.mrf.mxu1 }
  0xef   : > { %v1621_v6 = vadd.f32 %v1275_v5, %v1274_v3  ;;  %v1204_v39 = vadd.f32 %v1203_v4, %v1202_v2 }
  0xf0   : > { %v1205_v7 = vpop.f32.mrf.mxu0  ;;  %v1277_v8 = vpop.f32.mrf.mxu1 }
  0xf1   : > { %v717_v49 = vadd.f32 %v1204_v39, %v1645_v42 }
  0xf2   : > { %v1206_v9 = vpop.f32.mrf.mxu0  ;;  %v1278_v10 = vpop.f32.mrf.mxu1 }
  0xf3   : > { %v1623_v11 = vadd.f32 %v1278_v10, %v1277_v8  ;;  %v1207_v47 = vadd.f32 %v1206_v9, %v1205_v7 }
  0xf4   : > { %v1208_v12 = vpop.f32.mrf.mxu0  ;;  %v1280_v13 = vpop.f32.mrf.mxu1 }
  0xf5   : > { %v720_v59 = vadd.f32 %v1207_v47, %v1645_v42 }
  0xf6   : > { %v1209_v14 = vpop.f32.mrf.mxu0  ;;  %v1281_v15 = vpop.f32.mrf.mxu1 }
  0xf7   : > { %v1625_v16 = vadd.f32 %v1281_v15, %v1280_v13  ;;  %v1210_v36 = vadd.f32 %v1209_v14, %v1208_v12 }
  0xf8   : > { %v1211_v17 = vpop.f32.mrf.mxu0  ;;  %v1283_v18 = vpop.f32.mrf.mxu1 }
  0xf9   : > { %v725_v44 = vadd.f32 %v1210_v36, %v1645_v42 }
  0xfa   : > { %v1212_v19 = vpop.f32.mrf.mxu0  ;;  %v1284_v20 = vpop.f32.mrf.mxu1 }
  0xfb   : > { %v1627_v21 = vadd.f32 %v1284_v20, %v1283_v18  ;;  %v1213_v43 = vadd.f32 %v1212_v19, %v1211_v17 }
  0xfc   : > { %v1214_v22 = vpop.f32.mrf.mxu0  ;;  %v1286_v23 = vpop.f32.mrf.mxu1 }
  0xfd   : > { %v728_v54 = vadd.f32 %v1213_v43, %v1645_v42 }
  0xfe   : > { %v1215_v24 = vpop.f32.mrf.mxu0  ;;  %v1287_v25 = vpop.f32.mrf.mxu1 }
  0xff   : > { %v1629_v26 = vadd.f32 %v1287_v25, %v1286_v23  ;;  %v1216_v57 = vadd.f32 %v1215_v24, %v1214_v22 }
 0x100   : > { %v1217_v27 = vpop.f32.mrf.mxu0  ;;  %v1289_v28 = vpop.f32.mrf.mxu1 }
 0x101   : > { %v733_v5 = vadd.f32 %v1216_v57, %v1645_v42 }
 0x102   : > { %v1218_v29 = vpop.f32.mrf.mxu0  ;;  %v1290_v30 = vpop.f32.mrf.mxu1 }
 0x103   : > { %v1631_v31 = vadd.f32 %v1290_v30, %v1289_v28  ;;  %v1219_v3 = vadd.f32 %v1218_v29, %v1217_v27 }
 0x104   : > { %v1220_v32 = vpop.f32.mrf.mxu0  ;;  %v1633_v33 = vpop.f32.mrf.mxu1 }
 0x105   : > { %v736_v18 = vadd.f32 %v1219_v3, %v1645_v42 }
 0x106   : > { %v1221_v34 = vpop.f32.mrf.mxu0  ;;  %v1635_v35 = vpop.f32.mrf.mxu1 }
 0x107   : > { %v1222_v52 = vadd.f32 %v1221_v34, %v1220_v32 }
 0x108   : > { %v1223_v37 = vpop.f32.mrf.mxu0  ;;  %v1637_v38 = vpop.f32.mrf.mxu1 }
 0x109   : > { %v741_v0 = vadd.f32 %v1222_v52, %v1645_v42 }
 0x10a   : > { %v1224_v40 = vpop.f32.mrf.mxu0  ;;  %v1640_v41 = vpop.f32.mrf.mxu1 }
 0x10b   : > { %v1225_v62 = vadd.f32 %v1224_v40, %v1223_v37 }
 0x10c   : > { %v1226_v45 = vpop.f32.mrf.mxu0  ;;  %v1322_v46 = vpop.f32.mrf.mxu1 }
 0x10d   : > { %v886_v48 = vadd.f32 %v1322_v46, %v725_v44  ;;  %v744_v12 = vadd.f32 %v1225_v62, %v1645_v42 }
 0x10e   : > { %v1227_v50 = vpop.f32.mrf.mxu0  ;;  %v877_v51 = vpop.f32.mrf.mxu1 }
 0x10f   : > { %1006 = vst.msk [vmem:[%s1651_s8 + $0x10] sm:$0xff] %vm633_vm0, %v886_v48  ;;  %v878_v53 = vadd.f32 %v877_v51, %v717_v49  ;;  %v1228_v15 = vadd.f32 %v1227_v50, %v1226_v45 }
 0x110   : > { %v1229_v55 = vpop.f32.mrf.mxu0  ;;  %v1323_v56 = vpop.f32.mrf.mxu1 }
 0x111   : > { %1004 = vst.msk [vmem:[%s1651_s8] sm:$0xff] %vm633_vm0, %v878_v53  ;;  %v889_v58 = vadd.f32 %v1323_v56, %v728_v54  ;;  %v749_v30 = vadd.f32 %v1228_v15, %v1645_v42 }
 0x112   : > { %v1230_v60 = vpop.f32.mrf.mxu0  ;;  %v880_v61 = vpop.f32.mrf.mxu1 }
 0x113   : > { %1007 = vst.msk [vmem:[%s1651_s8 + $0x18] sm:$0xff] %vm633_vm0, %v889_v58  ;;  %v881_v63 = vadd.f32 %v880_v61, %v720_v59  ;;  %v1231_v28 = vadd.f32 %v1230_v60, %v1229_v55 }
 0x114   : > { %v1232_v1 = vpop.f32.mrf.mxu0  ;;  %v1326_v2 = vpop.f32.mrf.mxu1 }
 0x115   : > { %1005 = vst.msk [vmem:[%s1651_s8 + $0x8] sm:$0xff] %vm633_vm0, %v881_v63  ;;  %v902_v4 = vadd.f32 %v1326_v2, %v741_v0  ;;  %v752_v45 = vadd.f32 %v1231_v28, %v1645_v42 }
 0x116   : > { %v1233_v7 = vpop.f32.mrf.mxu0  ;;  %v893_v8 = vpop.f32.mrf.mxu1 }
 0x117   : > { %1010 = vst.msk [vmem:[%s1651_s8 + $0x30] sm:$0xff] %vm633_vm0, %v902_v4  ;;  %v1234_v9 = vadd.f32 %v1233_v7, %v1232_v1  ;;  %v894_v10 = vadd.f32 %v893_v8, %v733_v5 }
 0x118   : > { %v1235_v13 = vpop.f32.mrf.mxu0  ;;  %v1327_v14 = vpop.f32.mrf.mxu1 }
 0x119   : > { %1008 = vst.msk [vmem:[%s1651_s8 + $0x20] sm:$0xff] %vm633_vm0, %v894_v10  ;;  %v905_v17 = vadd.f32 %v1327_v14, %v744_v12  ;;  %v757_v24 = vadd.f32 %v1234_v9, %v1645_v42 }
 0x11a   : > { %v1236_v19 = vpop.f32.mrf.mxu0  ;;  %v896_v20 = vpop.f32.mrf.mxu1 }
 0x11b   : > { %1011 = vst.msk [vmem:[%s1651_s8 + $0x38] sm:$0xff] %vm633_vm0, %v905_v17  ;;  %v1237_v22 = vadd.f32 %v1236_v19, %v1235_v13  ;;  %v897_v23 = vadd.f32 %v896_v20, %v736_v18 }
 0x11c   : > { %v1238_v25 = vpop.f32.mrf.mxu0  ;;  %v1330_v27 = vpop.f32.mrf.mxu1 }
 0x11d   : > { %1009 = vst.msk [vmem:[%s1651_s8 + $0x28] sm:$0xff] %vm633_vm0, %v897_v23  ;;  %v918_v29 = vadd.f32 %v1330_v27, %v757_v24  ;;  %v760_v37 = vadd.f32 %v1237_v22, %v1645_v42 }
 0x11e   : > { %v1239_v32 = vpop.f32.mrf.mxu0  ;;  %v909_v34 = vpop.f32.mrf.mxu1 }
 0x11f   : > { %1014 = vst.msk [vmem:[%s1651_s8 + $0x50] sm:$0xff] %vm633_vm0, %v918_v29  ;;  %v910_v36 = vadd.f32 %v909_v34, %v749_v30  ;;  %v1240_v43 = vadd.f32 %v1239_v32, %v1238_v25 }
 0x120   : > { %v1241_v39 = vpop.f32.mrf.mxu0  ;;  %v1331_v40 = vpop.f32.mrf.mxu1 }
 0x121   : > { %1012 = vst.msk [vmem:[%s1651_s8 + $0x40] sm:$0xff] %vm633_vm0, %v910_v36  ;;  %v921_v44 = vadd.f32 %v1331_v40, %v760_v37  ;;  %v765_v52 = vadd.f32 %v1240_v43, %v1645_v42 }
 0x122   : > { %v1242_v46 = vpop.f32.mrf.mxu0  ;;  %v912_v47 = vpop.f32.mrf.mxu1 }
 0x123   : > { %1015 = vst.msk [vmem:[%s1651_s8 + $0x58] sm:$0xff] %vm633_vm0, %v921_v44  ;;  %v913_v48 = vadd.f32 %v912_v47, %v752_v45  ;;  %v1243_v51 = vadd.f32 %v1242_v46, %v1241_v39  ;;  %v821_v39 = vadd.f32 %v1625_v16, %v1645_v42  ;;  %v813_v46 = vadd.f32 %v1621_v6, %v1645_v42 }
 0x124   : > { %v1244_v49 = vpop.f32.mrf.mxu0  ;;  %v1334_v50 = vpop.f32.mrf.mxu1  ;;  %v1294_v47 = vadd.f32 %v1635_v35, %v1633_v33  ;;  %v816_v35 = vadd.f32 %v1623_v11, %v1645_v42 }
 0x125   : > { %1013 = vst.msk [vmem:[%s1651_s8 + $0x48] sm:$0xff] %vm633_vm0, %v913_v48  ;;  %v768_v60 = vadd.f32 %v1243_v51, %v1645_v42 }
 0x126   : > { %v1245_v53 = vpop.f32.mrf.mxu0  ;;  %v925_v54 = vpop.f32.mrf.mxu1 }
 0x127   : > { %v1246_v55 = vadd.f32 %v1245_v53, %v1244_v49  ;;  %v926_v56 = vadd.f32 %v925_v54, %v765_v52  ;;  %v824_v52 = vadd.f32 %v1627_v21, %v1645_v42  ;;  %v1297_v21 = vadd.f32 %v1640_v41, %v1637_v38 }
 0x128   : > { %v1247_v57 = vpop.f32.mrf.mxu0  ;;  %v1335_v58 = vpop.f32.mrf.mxu1 }
 0x129   : > { %v773_v59 = vadd.f32 %v1246_v55, %v1645_v42  ;;  %1016 = vst.msk [vmem:[%s1651_s8 + $0x60] sm:$0xff] %vm633_vm0, %v926_v56 }
 0x12a   : > { %v1248_v61 = vpop.f32.mrf.mxu0  ;;  %v928_v62 = vpop.f32.mrf.mxu1 }
 0x12b   : > { %v934_v63 = vadd.f32 %v1334_v50, %v773_v59  ;;  %v1249_v0 = vadd.f32 %v1248_v61, %v1247_v57  ;;  %v929_v1 = vadd.f32 %v928_v62, %v768_v60  ;;  %v837_v57 = vadd.f32 %v1294_v47, %v1645_v42 }
 0x12c   : > { %v1250_v2 = vpop.f32.mrf.mxu0  ;;  %v1338_v3 = vpop.f32.mrf.mxu1 }
 0x12d   : > { %1018 = vst.msk [vmem:[%s1651_s8 + $0x70] sm:$0xff] %vm633_vm0, %v934_v63  ;;  %v776_v4 = vadd.f32 %v1249_v0, %v1645_v42  ;;  %1017 = vst.msk [vmem:[%s1651_s8 + $0x68] sm:$0xff] %vm633_vm0, %v929_v1  ;;  %v829_v0 = vadd.f32 %v1629_v26, %v1645_v42 }
 0x12e   : > { %v1251_v5 = vpop.f32.mrf.mxu0  ;;  %v941_v7 = vpop.f32.mrf.mxu1 }
 0x12f   : > { %v937_v8 = vadd.f32 %v1335_v58, %v776_v4  ;;  %v1252_v9 = vadd.f32 %v1251_v5, %v1250_v2  ;;  %v840_v4 = vadd.f32 %v1297_v21, %v1645_v42 }
 0x130   : > { %v1253_v10 = vpop.f32.mrf.mxu0  ;;  %v1339_v12 = vpop.f32.mrf.mxu1 }
 0x131   : > { %1019 = vst.msk [vmem:[%s1651_s8 + $0x78] sm:$0xff] %vm633_vm0, %v937_v8  ;;  %v781_v13 = vadd.f32 %v1252_v9, %v1645_v42  ;;  %v832_v9 = vadd.f32 %v1631_v31, %v1645_v42 }
 0x132   : > { %v1254_v14 = vpop.f32.mrf.mxu0  ;;  %v944_v15 = vpop.f32.mrf.mxu1 }
 0x133   : > { %v942_v17 = vadd.f32 %v941_v7, %v781_v13  ;;  %v1255_v18 = vadd.f32 %v1254_v14, %v1253_v10 }
 0x134   : > { %v1256_v19 = vpop.f32.mrf.mxu0  ;;  %v1701_v20 = vpop.f32.mrf.mxu1 }
 0x135   : > { %1020 = vst.msk [vmem:[%s1651_s8 + $0x80] sm:$0xff] %vm633_vm0, %v942_v17  ;;  %v784_v22 = vadd.f32 %v1255_v18, %v1645_v42 }
 0x136   : > { %v1257_v23 = vpop.f32.mrf.mxu0  ;;  %v957_v24 = vpop.f32.mrf.mxu1 }
 0x137   : > { %v945_v25 = vadd.f32 %v944_v15, %v784_v22  ;;  %v1258_v27 = vadd.f32 %v1257_v23, %v1256_v19 }
 0x138   : > { %v1259_v28 = vpop.f32.mrf.mxu0  ;;  %v1706_v29 = vpop.f32.mrf.mxu1 }
 0x139   : > { %1021 = vst.msk [vmem:[%s1651_s8 + $0x88] sm:$0xff] %vm633_vm0, %v945_v25  ;;  %v789_v30 = vadd.f32 %v1258_v27, %v1645_v42 }
 0x13a   : > { %v1260_v32 = vpop.f32.mrf.mxu0  ;;  %v960_v34 = vpop.f32.mrf.mxu1 }
 0x13b   : > { %v950_v36 = vadd.f32 %v1338_v3, %v789_v30  ;;  %v1261_v37 = vadd.f32 %v1260_v32, %v1259_v28 }
 0x13c   : > { %v1262_v40 = vpop.f32.mrf.mxu0  ;;  %v1346_v43 = vpop.f32.mrf.mxu1 }
 0x13d   : > { %1022 = vst.msk [vmem:[%s1651_s8 + $0x90] sm:$0xff] %vm633_vm0, %v950_v36  ;;  %v792_v44 = vadd.f32 %v1261_v37, %v1645_v42  ;;  %v982_v45 = vadd.f32 %v1346_v43, %v821_v39 }
 0x13e   : > { %v1263_v48 = vpop.f32.mrf.mxu0  ;;  %v973_v49 = vpop.f32.mrf.mxu1 }
 0x13f   : > { %v953_v50 = vadd.f32 %v1339_v12, %v792_v44  ;;  %1030 = vst.msk [vmem:[%s1651_s8 + $0xd0] sm:$0xff] %vm633_vm0, %v982_v45  ;;  %v1264_v16 = vadd.f32 %v1263_v48, %v1262_v40  ;;  %v974_v51 = vadd.f32 %v973_v49, %v813_v46 }
 0x140   : > { %v1265_v53 = vpop.f32.mrf.mxu0  ;;  %v1347_v54 = vpop.f32.mrf.mxu1 }
 0x141   : > { %1023 = vst.msk [vmem:[%s1651_s8 + $0x98] sm:$0xff] %vm633_vm0, %v953_v50  ;;  %v797_v6 = vadd.f32 %v1264_v16, %v1645_v42  ;;  %1028 = vst.msk [vmem:[%s1651_s8 + $0xc0] sm:$0xff] %vm633_vm0, %v974_v51  ;;  %v985_v33 = vadd.f32 %v1347_v54, %v824_v52 }
 0x142   : > { %v1266_v55 = vpop.f32.mrf.mxu0  ;;  %v976_v56 = vpop.f32.mrf.mxu1 }
 0x143   : > { %v958_v58 = vadd.f32 %v957_v24, %v797_v6  ;;  %1031 = vst.msk [vmem:[%s1651_s8 + $0xd8] sm:$0xff] %vm633_vm0, %v985_v33  ;;  %v1267_v59 = vadd.f32 %v1266_v55, %v1265_v53  ;;  %v977_v60 = vadd.f32 %v976_v56, %v816_v35 }
 0x144   : > { %v1268_v61 = vpop.f32.mrf.mxu0  ;;  %v1350_v62 = vpop.f32.mrf.mxu1 }
 0x145   : > { %1024 = vst.msk [vmem:[%s1651_s8 + $0xa0] sm:$0xff] %vm633_vm0, %v958_v58  ;;  %v800_v11 = vadd.f32 %v1267_v59, %v1645_v42  ;;  %1029 = vst.msk [vmem:[%s1651_s8 + $0xc8] sm:$0xff] %vm633_vm0, %v977_v60  ;;  %v998_v63 = vadd.f32 %v1350_v62, %v837_v57 }
 0x146   : > { %v1269_v38 = vpop.f32.mrf.mxu0  ;;  %v989_v41 = vpop.f32.mrf.mxu1 }
 0x147   : > { %v961_v1 = vadd.f32 %v960_v34, %v800_v11  ;;  %1034 = vst.msk [vmem:[%s1651_s8 + $0xf0] sm:$0xff] %vm633_vm0, %v998_v63  ;;  %v1270_v2 = vadd.f32 %v1269_v38, %v1268_v61  ;;  %v990_v3 = vadd.f32 %v989_v41, %v829_v0 }
 0x148   : > { %v1271_v5 = vpop.f32.mrf.mxu0  ;;  %v1351_v7 = vpop.f32.mrf.mxu1 }
 0x149   : > { %1025 = vst.msk [vmem:[%s1651_s8 + $0xa8] sm:$0xff] %vm633_vm0, %v961_v1  ;;  %v805_v8 = vadd.f32 %v1270_v2, %v1645_v42  ;;  %1032 = vst.msk [vmem:[%s1651_s8 + $0xe0] sm:$0xff] %vm633_vm0, %v990_v3  ;;  %v1001_v26 = vadd.f32 %v1351_v7, %v840_v4 }
 0x14a   : > { %v1272_v10 = vpop.f32.mrf.mxu0  ;;  %v992_v12 = vpop.f32.mrf.mxu1 }
 0x14b   : > { %v966_v13 = vadd.f32 %v1701_v20, %v805_v8  ;;  %1035 = vst.msk [vmem:[%s1651_s8 + $0xf8] sm:$0xff] %vm633_vm0, %v1001_v26  ;;  %v1273_v14 = vadd.f32 %v1272_v10, %v1271_v5  ;;  %v993_v15 = vadd.f32 %v992_v12, %v832_v9 }
 0x14d   : > { %1026 = vst.msk [vmem:[%s1651_s8 + $0xb0] sm:$0xff] %vm633_vm0, %v966_v13  ;;  %v808_v17 = vadd.f32 %v1273_v14, %v1645_v42  ;;  %1033 = vst.msk [vmem:[%s1651_s8 + $0xe8] sm:$0xff] %vm633_vm0, %v993_v15 }
 0x14f   : > { %v969_v18 = vadd.f32 %v1706_v29, %v808_v17 }
 0x151   : > { %1027 = vst.msk [vmem:[%s1651_s8 + $0xb8] sm:$0xff] %vm633_vm0, %v969_v18 }
 0x152 PF: > { %s13_s12 = sadd.s32 1, %s1465_s12  }
 0x153   : > { %p10_p4 = scmp.ge.s32.totalorder %s13_s12, 4  }
 0x155   :  { %12 = sbr.rel (!%p10_p4) target bundleno = 1 (0x1), region = 62 }

// kernel: fwd.34
= control target key start
LH: loop header
LB: loop body
LE: loop exit
PB: predicated region body
PF: predicated region fallthrough
CT: control target
= control target key end

     0   :  { %s1519_s12 = smov 0   ;;  %s1799_s0 = inlined_call_operand.vmem [shape: bf16[512,288], index: 0, kind: input, shape index: {}]   ;;  %s1800_s1 = inlined_call_operand.vmem [shape: bf16[288,32], index: 1, kind: input, shape index: {}]   ;;  %s1801_s2 = inlined_call_operand.vmem [shape: f32[1,32], index: 2, kind: input, shape index: {}]   ;;  %s1802_s3 = inlined_call_operand.vmem [shape: f32[512,32], index: 3, kind: output, shape index: {}]  }
   0x1 LB: > { %s1124_s13 = sadd.s32 4294967295, %s1497_s12   ;;  %p1128_p0 = scmp.ge.s32.totalorder %s1497_s12, 1  ;;  %s1497_s12 = sphi %s1519_s12, %s13_s12  }
   0x2   : > { %p139_p1 = scmp.lt.s32.totalorder %s1497_s12, 3 }
   0x4   : > { %p140_p2 = pnand %p1128_p0, %p139_p1 }
   0x5   : > { %s1129_s16 = sshll.u32 (!%p140_p2), %s1124_s13, 5 }
   0x6   : > { %143 = sbr.rel (%p140_p2) target bundleno = 340 (0x154), region = 32  ;;  %p165_p3 = scmp.lt.s32.totalorder (!%p140_p2), %s1129_s16, 63 }
   0xb   : > { %v1409_v0 = vld [vmem:[%s1800_s1 + $0x78] sm:$0xff]   ;;  %v1411_v2 = vld [vmem:[%s1800_s1 + $0x70] sm:$0xff]   ;;  %v1413_v4 = vld [vmem:[%s1800_s1 + $0x68] sm:$0xff]   ;;  %s1804_s16 = smov (!%p165_p3, %s1129_s16), 63  ;;  %vm633_vm0 = vcmask 261120  }
   0xc   : > { %v1410_v1 = vld [vmem:[%s1800_s1 + $0x38] sm:$0xff]   ;;  %1218 = vmatprep.subr.bf16.mxu0 %v1409_v0  ;;  %1384 = vmatprep.subr.bf16.mxu1 %v1409_v0  ;;  %v1412_v3 = vld [vmem:[%s1800_s1 + $0x30] sm:$0xff]   ;;  %v1414_v5 = vld [vmem:[%s1800_s1 + $0x28] sm:$0xff]   ;;  %s1400_s29 = smul.u32 12, %s1804_s16  ;;  %s1132_s5 = sshll.u32 %s1804_s16, 3 }
   0xd   : > { %1219 = vmatpush3.bf16.msra.mxu0 %v1410_v1  ;;  %1392 = vmatpush3.bf16.msra.mxu1 %v1410_v1  ;;  %v1415_v6 = vld [vmem:[%s1800_s1 + $0x60] sm:$0xff]   ;;  %v1417_v8 = vld [vmem:[%s1800_s1 + $0x58] sm:$0xff]   ;;  %v1419_v10 = vld [vmem:[%s1800_s1 + $0x50] sm:$0xff]   ;;  %s1684_s8 = scalar_lea.vmem %s1802_s3, %s1132_s5 }
   0xe   : > { %1220 = vmatprep.subr.bf16.mxu0 %v1411_v2  ;;  %1385 = vmatprep.subr.bf16.mxu1 %v1411_v2  ;;  %v1416_v7 = vld [vmem:[%s1800_s1 + $0x20] sm:$0xff]   ;;  %s1560_s9 = scalar_lea.vmem %s1799_s0, %s1400_s29  ;;  %v1418_v9 = vld [vmem:[%s1800_s1 + $0x18] sm:$0xff]   ;;  %v1420_v13 = vld [vmem:[%s1800_s1 + $0x10] sm:$0xff]  }
   0xf   : > { %v1427_v11 = vld [vmem:[%s1560_s9 + $0x4] ss:$12 sps:$4 sm:$0xff]   ;;  %v1421_v14 = vld [vmem:[%s1800_s1 + $0x48] sm:$0xff]   ;;  %v1438_v26 = vld [vmem:[%s1560_s9 + $0x34] ss:$12 sps:$4 sm:$0xff]  }
  0x10   : > { %v1430_v12 = vld [vmem:[%s1560_s9 + $0x124] ss:$12 sps:$4 sm:$0xff]   ;;  %714 = vmatprep.mubr.bf16.mxu0 %v1427_v11  ;;  %v1422_v15 = vld [vmem:[%s1800_s1 + $0x8] sm:$0xff]   ;;  %v1440_v27 = vld [vmem:[%s1560_s9 + $0x154] ss:$12 sps:$4 sm:$0xff]  }
  0x11   : > { %1221 = vmatpush3.bf16.msra.mxu0 %v1412_v3  ;;  %1393 = vmatpush3.bf16.msra.mxu1 %v1412_v3  ;;  %v1423_v16 = vld [vmem:[%s1800_s1 + $0x40] sm:$0xff]   ;;  %v1431_v18 = vld [vmem:[%s1800_s1 + $0x88] sm:$0xff]   ;;  %v1442_v28 = vld [vmem:[%s1560_s9 + $0x30] ss:$12 sps:$4 sm:$0xff]  }
  0x12   : > { %1222 = vmatprep.subr.bf16.mxu0 %v1413_v4  ;;  %1386 = vmatprep.subr.bf16.mxu1 %v1413_v4  ;;  %v1424_v17 = vld [vmem:[%s1800_s1] sm:$0xff]   ;;  %v1432_v21 = vld [vmem:[%s1560_s9 + $0x1c] ss:$12 sps:$4 sm:$0xff]   ;;  %v1445_v30 = vld [vmem:[%s1560_s9 + $0x4c] ss:$12 sps:$4 sm:$0xff]  }
  0x13   : > { %810 = vmatprep.mubr.bf16.mxu1 %v1430_v12  ;;  %v1425_v19 = vld [vmem:[%s1560_s9] ss:$12 sps:$4 sm:$0xff]   ;;  %v1434_v22 = vld [vmem:[%s1560_s9 + $0x13c] ss:$12 sps:$4 sm:$0xff]   ;;  %v1436_v24 = vld [vmem:[%s1560_s9 + $0x18] ss:$12 sps:$4 sm:$0xff]  }
  0x14   : > { %v1428_v20 = vld [vmem:[%s1560_s9 + $0x120] ss:$12 sps:$4 sm:$0xff]   ;;  %v1437_v25 = vld [vmem:[%s1560_s9 + $0x138] ss:$12 sps:$4 sm:$0xff]   ;;  %v1443_v29 = vld [vmem:[%s1560_s9 + $0x150] ss:$12 sps:$4 sm:$0xff]  }
  0x15   : > { %1223 = vmatpush3.bf16.msra.mxu0 %v1414_v5  ;;  %1394 = vmatpush3.bf16.msra.mxu1 %v1414_v5  ;;  %v1444_v23 = vld [vmem:[%s1800_s1 + $0x80] sm:$0xff]   ;;  %v1447_v31 = vld [vmem:[%s1560_s9 + $0x16c] ss:$12 sps:$4 sm:$0xff]   ;;  %v1449_v32 = vld [vmem:[%s1560_s9 + $0x48] ss:$12 sps:$4 sm:$0xff]  }
  0x16   : > { %1224 = vmatprep.subr.bf16.mxu0 %v1415_v6  ;;  %1387 = vmatprep.subr.bf16.mxu1 %v1415_v6  ;;  %v1450_v33 = vld [vmem:[%s1560_s9 + $0x168] ss:$12 sps:$4 sm:$0xff]   ;;  %v1451_v34 = vld [vmem:[%s1560_s9 + $0x64] ss:$12 sps:$4 sm:$0xff]   ;;  %v1454_v36 = vld [vmem:[%s1560_s9 + $0x60] ss:$12 sps:$4 sm:$0xff]  }
  0x17   : > { %v1453_v35 = vld [vmem:[%s1560_s9 + $0x8] ss:$12 sps:$4 sm:$0xff]   ;;  %v1455_v37 = vld [vmem:[%s1560_s9 + $0x20] ss:$12 sps:$4 sm:$0xff]   ;;  %v1458_v39 = vld [vmem:[%s1560_s9 + $0x38] ss:$12 sps:$4 sm:$0xff]  }
  0x18   : > { %v1456_v38 = vld [vmem:[%s1560_s9 + $0x7c] ss:$12 sps:$4 sm:$0xff]   ;;  %v1459_v40 = vld [vmem:[%s1560_s9 + $0x78] ss:$12 sps:$4 sm:$0xff]   ;;  %v1461_v42 = vld [vmem:[%s1560_s9 + $0x94] ss:$12 sps:$4 sm:$0xff]  }
  0x19   : > { %1225 = vmatpush3.bf16.msra.mxu0 %v1416_v7  ;;  %1395 = vmatpush3.bf16.msra.mxu1 %v1416_v7  ;;  %v1460_v41 = vld [vmem:[%s1560_s9 + $0x50] ss:$12 sps:$4 sm:$0xff]   ;;  %v1463_v43 = vld [vmem:[%s1560_s9 + $0x68] ss:$12 sps:$4 sm:$0xff]   ;;  %v1465_v45 = vld [vmem:[%s1560_s9 + $0x80] ss:$12 sps:$4 sm:$0xff]  }
  0x1a   : > { %1226 = vmatprep.subr.bf16.mxu0 %v1417_v8  ;;  %1388 = vmatprep.subr.bf16.mxu1 %v1417_v8  ;;  %v1464_v44 = vld [vmem:[%s1560_s9 + $0x90] ss:$12 sps:$4 sm:$0xff]   ;;  %v1466_v46 = vld [vmem:[%s1560_s9 + $0xac] ss:$12 sps:$4 sm:$0xff]   ;;  %v1469_v48 = vld [vmem:[%s1560_s9 + $0xa8] ss:$12 sps:$4 sm:$0xff]  }
  0x1b   : > { %v1468_v47 = vld [vmem:[%s1560_s9 + $0x98] ss:$12 sps:$4 sm:$0xff]   ;;  %v1470_v49 = vld [vmem:[%s1560_s9 + $0xb0] ss:$12 sps:$4 sm:$0xff]   ;;  %v1473_v51 = vld [vmem:[%s1560_s9 + $0xc8] ss:$12 sps:$4 sm:$0xff]  }
  0x1c   : > { %v1471_v50 = vld [vmem:[%s1560_s9 + $0xc4] ss:$12 sps:$4 sm:$0xff]   ;;  %v1474_v52 = vld [vmem:[%s1560_s9 + $0xc0] ss:$12 sps:$4 sm:$0xff]   ;;  %v1476_v54 = vld [vmem:[%s1560_s9 + $0xdc] ss:$12 sps:$4 sm:$0xff]  }
  0x1d   : > { %1227 = vmatpush3.bf16.msra.mxu0 %v1418_v9  ;;  %1396 = vmatpush3.bf16.msra.mxu1 %v1418_v9  ;;  %v1475_v53 = vld [vmem:[%s1560_s9 + $0xe0] ss:$12 sps:$4 sm:$0xff]   ;;  %v1478_v55 = vld [vmem:[%s1560_s9 + $0xf8] ss:$12 sps:$4 sm:$0xff]   ;;  %v1480_v57 = vld [vmem:[%s1560_s9 + $0x110] ss:$12 sps:$4 sm:$0xff]  }
  0x1e   : > { %1228 = vmatprep.subr.bf16.mxu0 %v1419_v10  ;;  %1389 = vmatprep.subr.bf16.mxu1 %v1419_v10  ;;  %v1479_v56 = vld [vmem:[%s1560_s9 + $0xd8] ss:$12 sps:$4 sm:$0xff]   ;;  %v1481_v58 = vld [vmem:[%s1560_s9 + $0xf4] ss:$12 sps:$4 sm:$0xff]   ;;  %v1484_v60 = vld [vmem:[%s1560_s9 + $0xf0] ss:$12 sps:$4 sm:$0xff]  }
  0x1f   : > { %v1483_v59 = vld [vmem:[%s1560_s9 + $0x128] ss:$12 sps:$4 sm:$0xff]   ;;  %v1485_v61 = vld [vmem:[%s1560_s9 + $0x140] ss:$12 sps:$4 sm:$0xff]   ;;  %v1488_v63 = vld [vmem:[%s1560_s9 + $0x158] ss:$12 sps:$4 sm:$0xff]  }
  0x20   : > { %v1486_v62 = vld [vmem:[%s1560_s9 + $0x10c] ss:$12 sps:$4 sm:$0xff]   ;;  %v1489_v0 = vld [vmem:[%s1560_s9 + $0x108] ss:$12 sps:$4 sm:$0xff]   ;;  %v1490_v1 = vld [vmem:[%s1560_s9 + $0x170] ss:$12 sps:$4 sm:$0xff]  }
  0x21   : > { %1229 = vmatpush3.bf16.msra.mxu0 %v1420_v13  ;;  %1397 = vmatpush3.bf16.msra.mxu1 %v1420_v13 }
  0x22   : > { %1230 = vmatprep.subr.bf16.mxu0 %v1421_v14  ;;  %1390 = vmatprep.subr.bf16.mxu1 %v1421_v14 }
  0x25   : > { %1231 = vmatpush3.bf16.msra.mxu0 %v1422_v15  ;;  %1398 = vmatpush3.bf16.msra.mxu1 %v1422_v15 }
  0x26   : > { %1232 = vmatprep.subr.bf16.mxu0 %v1423_v16  ;;  %1391 = vmatprep.subr.bf16.mxu1 %v1423_v16 }
  0x29   : > { %1233 = vmatpush3.bf16.msra.mxu0 %v1424_v17  ;;  %1399 = vmatpush3.bf16.msra.mxu1 %v1424_v17 }
  0x2a   : > { %1348 = vmatprep.subr.bf16.mxu1 %v1431_v18 }
  0x2c   : > { %715 = vmatmul.mubr.bf16.vlgmr.msra.gmra.mxu0 %v1425_v19  ;;  %811 = vmatmul.mubr.bf16.vlgmr.msra.gmra.mxu1 %v1428_v20 }
  0x2d   : > { %1349 = vmatpush3.bf16.msra.mxu1 %v1431_v18  ;;  %722 = vmatprep.mubr.bf16.mxu0 %v1432_v21 }
  0x2e   : > { %818 = vmatprep.mubr.bf16.mxu1 %v1434_v22  ;;  %1350 = vmatprep.subr.bf16.mxu1 %v1444_v23 }
  0x31   : > { %1351 = vmatpush3.bf16.msra.mxu1 %v1444_v23 }
  0x34   : > { %723 = vmatmul.mubr.bf16.gmra.mxu0 %v1436_v24  ;;  %819 = vmatmul.mubr.bf16.gmra.mxu1 %v1437_v25 }
  0x35   : > { %730 = vmatprep.mubr.bf16.mxu0 %v1438_v26  ;;  %826 = vmatprep.mubr.bf16.mxu1 %v1440_v27 }
  0x3c   : > { %731 = vmatmul.mubr.bf16.gmra.mxu0 %v1442_v28  ;;  %827 = vmatmul.mubr.bf16.gmra.mxu1 %v1443_v29 }
  0x3d   : > { %738 = vmatprep.mubr.bf16.mxu0 %v1445_v30  ;;  %834 = vmatprep.mubr.bf16.mxu1 %v1447_v31 }
  0x44   : > { %739 = vmatmul.mubr.bf16.gmra.mxu0 %v1449_v32  ;;  %835 = vmatmul.mubr.bf16.gmra.mxu1 %v1450_v33 }
  0x45   : > { %746 = vmatprep.mubr.bf16.mxu0 %v1451_v34  ;;  %1352 = vmatprep.mubr.msk.bf16.mxu1 %vm633_vm0, %v1453_v35 }
  0x4c   : > { %747 = vmatmul.mubr.bf16.gmra.mxu0 %v1454_v36  ;;  %1353 = vmatmul.mubr.msk.bf16.vlgmr.msra.gmra.mxu1 %vm633_vm0, %v1455_v37 }
  0x4d   : > { %754 = vmatprep.mubr.bf16.mxu0 %v1456_v38  ;;  %1356 = vmatprep.mubr.msk.bf16.mxu1 %vm633_vm0, %v1458_v39 }
  0x54   : > { %755 = vmatmul.mubr.bf16.gmra.mxu0 %v1459_v40  ;;  %1357 = vmatmul.mubr.msk.bf16.gmra.mxu1 %vm633_vm0, %v1460_v41 }
  0x55   : > { %762 = vmatprep.mubr.bf16.mxu0 %v1461_v42  ;;  %1360 = vmatprep.mubr.msk.bf16.mxu1 %vm633_vm0, %v1463_v43  ;;  %v1676_v42 = vld [vmem:[%s1801_s2] ss:$0 sm:$0xff] }
  0x5c   : > { %763 = vmatmul.mubr.bf16.gmra.mxu0 %v1464_v44  ;;  %1361 = vmatmul.mubr.msk.bf16.gmra.mxu1 %vm633_vm0, %v1465_v45 }
  0x5d   : > { %770 = vmatprep.mubr.bf16.mxu0 %v1466_v46  ;;  %1364 = vmatprep.mubr.msk.bf16.mxu1 %vm633_vm0, %v1468_v47 }
  0x64   : > { %771 = vmatmul.mubr.bf16.gmra.mxu0 %v1469_v48  ;;  %1365 = vmatmul.mubr.msk.bf16.gmra.mxu1 %vm633_vm0, %v1470_v49 }
  0x65   : > { %778 = vmatprep.mubr.bf16.mxu0 %v1471_v50  ;;  %1368 = vmatprep.mubr.msk.bf16.mxu1 %vm633_vm0, %v1473_v51 }
  0x6c   : > { %779 = vmatmul.mubr.bf16.gmra.mxu0 %v1474_v52  ;;  %1369 = vmatmul.mubr.msk.bf16.gmra.mxu1 %vm633_vm0, %v1475_v53 }
  0x6d   : > { %786 = vmatprep.mubr.bf16.mxu0 %v1476_v54  ;;  %1372 = vmatprep.mubr.msk.bf16.mxu1 %vm633_vm0, %v1478_v55 }
  0x74   : > { %787 = vmatmul.mubr.bf16.gmra.mxu0 %v1479_v56  ;;  %1373 = vmatmul.mubr.msk.bf16.gmra.mxu1 %vm633_vm0, %v1480_v57 }
  0x75   : > { %794 = vmatprep.mubr.bf16.mxu0 %v1481_v58  ;;  %1376 = vmatprep.mubr.msk.bf16.mxu1 %vm633_vm0, %v1483_v59 }
  0x7c   : > { %795 = vmatmul.mubr.bf16.gmra.mxu0 %v1484_v60  ;;  %1377 = vmatmul.mubr.msk.bf16.gmra.mxu1 %vm633_vm0, %v1485_v61 }
  0x7d   : > { %802 = vmatprep.mubr.bf16.mxu0 %v1486_v62  ;;  %1380 = vmatprep.mubr.msk.bf16.mxu1 %vm633_vm0, %v1488_v63 }
  0x84   : > { %803 = vmatmul.mubr.bf16.gmra.mxu0 %v1489_v0  ;;  %1381 = vmatmul.mubr.msk.bf16.gmra.mxu1 %vm633_vm0, %v1490_v1 }
  0xec   : > { %v1234_v2 = vpop.f32.mrf.mxu0  ;;  %v1306_v3 = vpop.f32.mrf.mxu1 }
  0xee   : > { %v1235_v4 = vpop.f32.mrf.mxu0  ;;  %v1307_v5 = vpop.f32.mrf.mxu1 }
  0xef   : > { %v1653_v6 = vadd.f32 %v1307_v5, %v1306_v3  ;;  %v1236_v39 = vadd.f32 %v1235_v4, %v1234_v2 }
  0xf0   : > { %v1237_v7 = vpop.f32.mrf.mxu0  ;;  %v1309_v8 = vpop.f32.mrf.mxu1 }
  0xf1   : > { %v717_v49 = vadd.f32 %v1236_v39, %v1676_v42 }
  0xf2   : > { %v1238_v9 = vpop.f32.mrf.mxu0  ;;  %v1310_v10 = vpop.f32.mrf.mxu1 }
  0xf3   : > { %v1655_v11 = vadd.f32 %v1310_v10, %v1309_v8  ;;  %v1239_v47 = vadd.f32 %v1238_v9, %v1237_v7 }
  0xf4   : > { %v1240_v12 = vpop.f32.mrf.mxu0  ;;  %v1312_v13 = vpop.f32.mrf.mxu1 }
  0xf5   : > { %v720_v61 = vadd.f32 %v1239_v47, %v1676_v42 }
  0xf6   : > { %v1241_v14 = vpop.f32.mrf.mxu0  ;;  %v1313_v15 = vpop.f32.mrf.mxu1 }
  0xf7   : > { %v1657_v16 = vadd.f32 %v1313_v15, %v1312_v13  ;;  %v1242_v36 = vadd.f32 %v1241_v14, %v1240_v12 }
  0xf8   : > { %v1243_v17 = vpop.f32.mrf.mxu0  ;;  %v1315_v18 = vpop.f32.mrf.mxu1 }
  0xf9   : > { %v725_v44 = vadd.f32 %v1242_v36, %v1676_v42 }
  0xfa   : > { %v1244_v19 = vpop.f32.mrf.mxu0  ;;  %v1316_v20 = vpop.f32.mrf.mxu1 }
  0xfb   : > { %v1659_v21 = vadd.f32 %v1316_v20, %v1315_v18  ;;  %v1245_v43 = vadd.f32 %v1244_v19, %v1243_v17 }
  0xfc   : > { %v1246_v22 = vpop.f32.mrf.mxu0  ;;  %v1318_v23 = vpop.f32.mrf.mxu1 }
  0xfd   : > { %v728_v55 = vadd.f32 %v1245_v43, %v1676_v42 }
  0xfe   : > { %v1247_v24 = vpop.f32.mrf.mxu0  ;;  %v1319_v25 = vpop.f32.mrf.mxu1 }
  0xff   : > { %v1661_v26 = vadd.f32 %v1319_v25, %v1318_v23  ;;  %v1248_v58 = vadd.f32 %v1247_v24, %v1246_v22 }
 0x100   : > { %v1249_v27 = vpop.f32.mrf.mxu0  ;;  %v1321_v28 = vpop.f32.mrf.mxu1 }
 0x101   : > { %v733_v10 = vadd.f32 %v1248_v58, %v1676_v42 }
 0x102   : > { %v1250_v29 = vpop.f32.mrf.mxu0  ;;  %v1322_v30 = vpop.f32.mrf.mxu1 }
 0x103   : > { %v1663_v31 = vadd.f32 %v1322_v30, %v1321_v28  ;;  %v1251_v7 = vadd.f32 %v1250_v29, %v1249_v27 }
 0x104   : > { %v1252_v32 = vpop.f32.mrf.mxu0  ;;  %v1665_v33 = vpop.f32.mrf.mxu1 }
 0x105   : > { %v736_v25 = vadd.f32 %v1251_v7, %v1676_v42 }
 0x106   : > { %v1253_v34 = vpop.f32.mrf.mxu0  ;;  %v1667_v35 = vpop.f32.mrf.mxu1 }
 0x107   : > { %v1254_v52 = vadd.f32 %v1253_v34, %v1252_v32 }
 0x108   : > { %v1255_v37 = vpop.f32.mrf.mxu0  ;;  %v1669_v38 = vpop.f32.mrf.mxu1 }
 0x109   : > { %v741_v3 = vadd.f32 %v1254_v52, %v1676_v42 }
 0x10a   : > { %v1256_v40 = vpop.f32.mrf.mxu0  ;;  %v1671_v41 = vpop.f32.mrf.mxu1 }
 0x10b   : > { %v1257_v0 = vadd.f32 %v1256_v40, %v1255_v37 }
 0x10c   : > { %v1258_v45 = vpop.f32.mrf.mxu0  ;;  %v1354_v46 = vpop.f32.mrf.mxu1 }
 0x10d   : > { %v886_v48 = vadd.f32 %v1354_v46, %v725_v44  ;;  %v744_v18 = vadd.f32 %v1257_v0, %v1676_v42 }
 0x10e   : > { %v1259_v50 = vpop.f32.mrf.mxu0  ;;  %v877_v51 = vpop.f32.mrf.mxu1 }
 0x10f   : > { %v1006_v53 = vmax.f32 %v886_v48, 0.0  ;;  %v878_v54 = vadd.f32 %v877_v51, %v717_v49  ;;  %v1260_v22 = vadd.f32 %v1259_v50, %v1258_v45 }
 0x110   : > { %v1261_v56 = vpop.f32.mrf.mxu0  ;;  %v1355_v57 = vpop.f32.mrf.mxu1 }
 0x111   : > { %1038 = vst.msk [vmem:[%s1684_s8 + $0x10] sm:$0xff] %vm633_vm0, %v1006_v53  ;;  %v1004_v59 = vmax.f32 %v878_v54, 0.0  ;;  %v889_v60 = vadd.f32 %v1355_v57, %v728_v55  ;;  %v749_v44 = vadd.f32 %v1260_v22, %v1676_v42 }
 0x112   : > { %v1262_v62 = vpop.f32.mrf.mxu0  ;;  %v880_v63 = vpop.f32.mrf.mxu1 }
 0x113   : > { %1036 = vst.msk [vmem:[%s1684_s8] sm:$0xff] %vm633_vm0, %v1004_v59  ;;  %v1007_v1 = vmax.f32 %v889_v60, 0.0  ;;  %v881_v2 = vadd.f32 %v880_v63, %v720_v61  ;;  %v1263_v39 = vadd.f32 %v1262_v62, %v1261_v56 }
 0x114   : > { %v1264_v4 = vpop.f32.mrf.mxu0  ;;  %v1358_v5 = vpop.f32.mrf.mxu1 }
 0x115   : > { %1039 = vst.msk [vmem:[%s1684_s8 + $0x18] sm:$0xff] %vm633_vm0, %v1007_v1  ;;  %v1005_v8 = vmax.f32 %v881_v2, 0.0  ;;  %v902_v9 = vadd.f32 %v1358_v5, %v741_v3  ;;  %v752_v55 = vadd.f32 %v1263_v39, %v1676_v42 }
 0x116   : > { %v1265_v12 = vpop.f32.mrf.mxu0  ;;  %v893_v13 = vpop.f32.mrf.mxu1 }
 0x117   : > { %1037 = vst.msk [vmem:[%s1684_s8 + $0x8] sm:$0xff] %vm633_vm0, %v1005_v8  ;;  %v1010_v14 = vmax.f32 %v902_v9, 0.0  ;;  %v1266_v15 = vadd.f32 %v1265_v12, %v1264_v4  ;;  %v894_v17 = vadd.f32 %v893_v13, %v733_v10 }
 0x118   : > { %v1267_v19 = vpop.f32.mrf.mxu0  ;;  %v1359_v20 = vpop.f32.mrf.mxu1 }
 0x119   : > { %1042 = vst.msk [vmem:[%s1684_s8 + $0x30] sm:$0xff] %vm633_vm0, %v1010_v14  ;;  %v1008_v23 = vmax.f32 %v894_v17, 0.0  ;;  %v905_v24 = vadd.f32 %v1359_v20, %v744_v18  ;;  %v757_v34 = vadd.f32 %v1266_v15, %v1676_v42 }
 0x11a   : > { %v1268_v27 = vpop.f32.mrf.mxu0  ;;  %v896_v28 = vpop.f32.mrf.mxu1 }
 0x11b   : > { %1040 = vst.msk [vmem:[%s1684_s8 + $0x20] sm:$0xff] %vm633_vm0, %v1008_v23  ;;  %v1011_v29 = vmax.f32 %v905_v24, 0.0  ;;  %v1269_v30 = vadd.f32 %v1268_v27, %v1267_v19  ;;  %v897_v32 = vadd.f32 %v896_v28, %v736_v25 }
 0x11c   : > { %v1270_v36 = vpop.f32.mrf.mxu0  ;;  %v1362_v37 = vpop.f32.mrf.mxu1 }
 0x11d   : > { %1043 = vst.msk [vmem:[%s1684_s8 + $0x38] sm:$0xff] %vm633_vm0, %v1011_v29  ;;  %v1009_v40 = vmax.f32 %v897_v32, 0.0  ;;  %v918_v43 = vadd.f32 %v1362_v37, %v757_v34  ;;  %v760_v49 = vadd.f32 %v1269_v30, %v1676_v42 }
 0x11e   : > { %v1271_v45 = vpop.f32.mrf.mxu0  ;;  %v909_v46 = vpop.f32.mrf.mxu1 }
 0x11f   : > { %1041 = vst.msk [vmem:[%s1684_s8 + $0x28] sm:$0xff] %vm633_vm0, %v1009_v40  ;;  %v1014_v47 = vmax.f32 %v918_v43, 0.0  ;;  %v910_v48 = vadd.f32 %v909_v46, %v749_v44  ;;  %v1272_v52 = vadd.f32 %v1271_v45, %v1270_v36 }
 0x120   : > { %v1273_v50 = vpop.f32.mrf.mxu0  ;;  %v1363_v51 = vpop.f32.mrf.mxu1 }
 0x121   : > { %1046 = vst.msk [vmem:[%s1684_s8 + $0x50] sm:$0xff] %vm633_vm0, %v1014_v47  ;;  %v1012_v53 = vmax.f32 %v910_v48, 0.0  ;;  %v921_v54 = vadd.f32 %v1363_v51, %v760_v49  ;;  %v765_v0 = vadd.f32 %v1272_v52, %v1676_v42 }
 0x122   : > { %v1274_v56 = vpop.f32.mrf.mxu0  ;;  %v912_v57 = vpop.f32.mrf.mxu1 }
 0x123   : > { %1044 = vst.msk [vmem:[%s1684_s8 + $0x40] sm:$0xff] %vm633_vm0, %v1012_v53  ;;  %v1015_v58 = vmax.f32 %v921_v54, 0.0  ;;  %v913_v59 = vadd.f32 %v912_v57, %v752_v55  ;;  %v1275_v62 = vadd.f32 %v1274_v56, %v1273_v50 }
 0x124   : > { %v1276_v60 = vpop.f32.mrf.mxu0  ;;  %v1366_v61 = vpop.f32.mrf.mxu1 }
 0x125   : > { %1047 = vst.msk [vmem:[%s1684_s8 + $0x58] sm:$0xff] %vm633_vm0, %v1015_v58  ;;  %v1013_v63 = vmax.f32 %v913_v59, 0.0  ;;  %v768_v10 = vadd.f32 %v1275_v62, %v1676_v42  ;;  %v821_v59 = vadd.f32 %v1657_v16, %v1676_v42 }
 0x126   : > { %v1277_v1 = vpop.f32.mrf.mxu0  ;;  %v925_v2 = vpop.f32.mrf.mxu1 }
 0x127   : > { %1045 = vst.msk [vmem:[%s1684_s8 + $0x48] sm:$0xff] %vm633_vm0, %v1013_v63  ;;  %v1278_v3 = vadd.f32 %v1277_v1, %v1276_v60  ;;  %v926_v4 = vadd.f32 %v925_v2, %v765_v0  ;;  %v813_v1 = vadd.f32 %v1653_v6, %v1676_v42  ;;  %v1326_v2 = vadd.f32 %v1667_v35, %v1665_v33 }
 0x128   : > { %v1279_v5 = vpop.f32.mrf.mxu0  ;;  %v1367_v7 = vpop.f32.mrf.mxu1  ;;  %v816_v6 = vadd.f32 %v1655_v11, %v1676_v42 }
 0x129   : > { %v773_v8 = vadd.f32 %v1278_v3, %v1676_v42  ;;  %v1016_v9 = vmax.f32 %v926_v4, 0.0 }
 0x12a   : > { %v1280_v12 = vpop.f32.mrf.mxu0  ;;  %v928_v13 = vpop.f32.mrf.mxu1 }
 0x12b   : > { %v934_v14 = vadd.f32 %v1366_v61, %v773_v8  ;;  %1048 = vst.msk [vmem:[%s1684_s8 + $0x60] sm:$0xff] %vm633_vm0, %v1016_v9  ;;  %v1281_v15 = vadd.f32 %v1280_v12, %v1279_v5  ;;  %v929_v17 = vadd.f32 %v928_v13, %v768_v10  ;;  %v824_v5 = vadd.f32 %v1659_v21, %v1676_v42 }
 0x12c   : > { %v1282_v18 = vpop.f32.mrf.mxu0  ;;  %v1370_v19 = vpop.f32.mrf.mxu1 }
 0x12d   : > { %v1018_v20 = vmax.f32 %v934_v14, 0.0  ;;  %v776_v22 = vadd.f32 %v1281_v15, %v1676_v42  ;;  %v1017_v23 = vmax.f32 %v929_v17, 0.0  ;;  %v1329_v14 = vadd.f32 %v1671_v41, %v1669_v38 }
 0x12e   : > { %v1283_v24 = vpop.f32.mrf.mxu0  ;;  %v941_v25 = vpop.f32.mrf.mxu1 }
 0x12f   : > { %1050 = vst.msk [vmem:[%s1684_s8 + $0x70] sm:$0xff] %vm633_vm0, %v1018_v20  ;;  %v937_v27 = vadd.f32 %v1367_v7, %v776_v22  ;;  %1049 = vst.msk [vmem:[%s1684_s8 + $0x68] sm:$0xff] %vm633_vm0, %v1017_v23  ;;  %v1284_v28 = vadd.f32 %v1283_v24, %v1282_v18  ;;  %v837_v18 = vadd.f32 %v1326_v2, %v1676_v42 }
 0x130   : > { %v1285_v29 = vpop.f32.mrf.mxu0  ;;  %v1371_v30 = vpop.f32.mrf.mxu1 }
 0x131   : > { %v1019_v32 = vmax.f32 %v937_v27, 0.0  ;;  %v781_v34 = vadd.f32 %v1284_v28, %v1676_v42 }
 0x132   : > { %v1286_v36 = vpop.f32.mrf.mxu0  ;;  %v944_v37 = vpop.f32.mrf.mxu1 }
 0x133   : > { %1051 = vst.msk [vmem:[%s1684_s8 + $0x78] sm:$0xff] %vm633_vm0, %v1019_v32  ;;  %v942_v39 = vadd.f32 %v941_v25, %v781_v34  ;;  %v1287_v40 = vadd.f32 %v1286_v36, %v1285_v29  ;;  %v829_v25 = vadd.f32 %v1661_v26, %v1676_v42  ;;  %v840_v32 = vadd.f32 %v1329_v14, %v1676_v42 }
 0x134   : > { %v1288_v43 = vpop.f32.mrf.mxu0  ;;  %v1733_v44 = vpop.f32.mrf.mxu1 }
 0x135   : > { %v1020_v45 = vmax.f32 %v942_v39, 0.0  ;;  %v784_v46 = vadd.f32 %v1287_v40, %v1676_v42 }
 0x136   : > { %v1289_v47 = vpop.f32.mrf.mxu0  ;;  %v957_v48 = vpop.f32.mrf.mxu1 }
 0x137   : > { %1052 = vst.msk [vmem:[%s1684_s8 + $0x80] sm:$0xff] %vm633_vm0, %v1020_v45  ;;  %v945_v49 = vadd.f32 %v944_v37, %v784_v46  ;;  %v1290_v50 = vadd.f32 %v1289_v47, %v1288_v43  ;;  %v832_v43 = vadd.f32 %v1663_v31, %v1676_v42 }
 0x138   : > { %v1291_v51 = vpop.f32.mrf.mxu0  ;;  %v1738_v52 = vpop.f32.mrf.mxu1 }
 0x139   : > { %v1021_v53 = vmax.f32 %v945_v49, 0.0  ;;  %v789_v54 = vadd.f32 %v1290_v50, %v1676_v42 }
 0x13a   : > { %v1292_v55 = vpop.f32.mrf.mxu0  ;;  %v960_v56 = vpop.f32.mrf.mxu1 }
 0x13b   : > { %1053 = vst.msk [vmem:[%s1684_s8 + $0x88] sm:$0xff] %vm633_vm0, %v1021_v53  ;;  %v950_v57 = vadd.f32 %v1370_v19, %v789_v54  ;;  %v1293_v58 = vadd.f32 %v1292_v55, %v1291_v51 }
 0x13c   : > { %v1294_v60 = vpop.f32.mrf.mxu0  ;;  %v1378_v61 = vpop.f32.mrf.mxu1 }
 0x13d   : > { %v1022_v62 = vmax.f32 %v950_v57, 0.0  ;;  %v792_v63 = vadd.f32 %v1293_v58, %v1676_v42  ;;  %v982_v0 = vadd.f32 %v1378_v61, %v821_v59 }
 0x13e   : > { %v1295_v3 = vpop.f32.mrf.mxu0  ;;  %v973_v4 = vpop.f32.mrf.mxu1 }
 0x13f   : > { %1054 = vst.msk [vmem:[%s1684_s8 + $0x90] sm:$0xff] %vm633_vm0, %v1022_v62  ;;  %v953_v16 = vadd.f32 %v1371_v30, %v792_v63  ;;  %v1030_v7 = vmax.f32 %v982_v0, 0.0  ;;  %v1296_v8 = vadd.f32 %v1295_v3, %v1294_v60  ;;  %v974_v9 = vadd.f32 %v973_v4, %v813_v1 }
 0x140   : > { %v1297_v10 = vpop.f32.mrf.mxu0  ;;  %v1379_v12 = vpop.f32.mrf.mxu1 }
 0x141   : > { %v1023_v13 = vmax.f32 %v953_v16, 0.0  ;;  %1062 = vst.msk [vmem:[%s1684_s8 + $0xd0] sm:$0xff] %vm633_vm0, %v1030_v7  ;;  %v797_v33 = vadd.f32 %v1296_v8, %v1676_v42  ;;  %v1028_v35 = vmax.f32 %v974_v9, 0.0  ;;  %v985_v21 = vadd.f32 %v1379_v12, %v824_v5 }
 0x142   : > { %v1298_v15 = vpop.f32.mrf.mxu0  ;;  %v976_v17 = vpop.f32.mrf.mxu1 }
 0x143   : > { %1055 = vst.msk [vmem:[%s1684_s8 + $0x98] sm:$0xff] %vm633_vm0, %v1023_v13  ;;  %v958_v19 = vadd.f32 %v957_v48, %v797_v33  ;;  %1060 = vst.msk [vmem:[%s1684_s8 + $0xc0] sm:$0xff] %vm633_vm0, %v1028_v35  ;;  %v1031_v11 = vmax.f32 %v985_v21, 0.0  ;;  %v1299_v20 = vadd.f32 %v1298_v15, %v1297_v10  ;;  %v977_v22 = vadd.f32 %v976_v17, %v816_v6 }
 0x144   : > { %v1300_v23 = vpop.f32.mrf.mxu0  ;;  %v1382_v24 = vpop.f32.mrf.mxu1 }
 0x145   : > { %v1024_v38 = vmax.f32 %v958_v19, 0.0  ;;  %1063 = vst.msk [vmem:[%s1684_s8 + $0xd8] sm:$0xff] %vm633_vm0, %v1031_v11  ;;  %v800_v41 = vadd.f32 %v1299_v20, %v1676_v42  ;;  %v1029_v27 = vmax.f32 %v977_v22, 0.0  ;;  %v998_v28 = vadd.f32 %v1382_v24, %v837_v18 }
 0x146   : > { %v1301_v29 = vpop.f32.mrf.mxu0  ;;  %v989_v30 = vpop.f32.mrf.mxu1 }
 0x147   : > { %1056 = vst.msk [vmem:[%s1684_s8 + $0xa0] sm:$0xff] %vm633_vm0, %v1024_v38  ;;  %v961_v34 = vadd.f32 %v960_v56, %v800_v41  ;;  %1061 = vst.msk [vmem:[%s1684_s8 + $0xc8] sm:$0xff] %vm633_vm0, %v1029_v27  ;;  %v1034_v26 = vmax.f32 %v998_v28, 0.0  ;;  %v1302_v36 = vadd.f32 %v1301_v29, %v1300_v23  ;;  %v990_v37 = vadd.f32 %v989_v30, %v829_v25 }
 0x148   : > { %v1303_v39 = vpop.f32.mrf.mxu0  ;;  %v1383_v40 = vpop.f32.mrf.mxu1 }
 0x149   : > { %v1025_v45 = vmax.f32 %v961_v34, 0.0  ;;  %1066 = vst.msk [vmem:[%s1684_s8 + $0xf0] sm:$0xff] %vm633_vm0, %v1034_v26  ;;  %v805_v46 = vadd.f32 %v1302_v36, %v1676_v42  ;;  %v1032_v47 = vmax.f32 %v990_v37, 0.0  ;;  %v1001_v48 = vadd.f32 %v1383_v40, %v840_v32 }
 0x14a   : > { %v1304_v49 = vpop.f32.mrf.mxu0  ;;  %v992_v50 = vpop.f32.mrf.mxu1 }
 0x14b   : > { %1057 = vst.msk [vmem:[%s1684_s8 + $0xa8] sm:$0xff] %vm633_vm0, %v1025_v45  ;;  %v966_v51 = vadd.f32 %v1733_v44, %v805_v46  ;;  %1064 = vst.msk [vmem:[%s1684_s8 + $0xe0] sm:$0xff] %vm633_vm0, %v1032_v47  ;;  %v1035_v53 = vmax.f32 %v1001_v48, 0.0  ;;  %v1305_v31 = vadd.f32 %v1304_v49, %v1303_v39  ;;  %v993_v54 = vadd.f32 %v992_v50, %v832_v43 }
 0x14d   : > { %v1026_v55 = vmax.f32 %v966_v51, 0.0  ;;  %1067 = vst.msk [vmem:[%s1684_s8 + $0xf8] sm:$0xff] %vm633_vm0, %v1035_v53  ;;  %v808_v56 = vadd.f32 %v1305_v31, %v1676_v42  ;;  %v1033_v57 = vmax.f32 %v993_v54, 0.0 }
 0x14f   : > { %1058 = vst.msk [vmem:[%s1684_s8 + $0xb0] sm:$0xff] %vm633_vm0, %v1026_v55  ;;  %v969_v58 = vadd.f32 %v1738_v52, %v808_v56  ;;  %1065 = vst.msk [vmem:[%s1684_s8 + $0xe8] sm:$0xff] %vm633_vm0, %v1033_v57 }
 0x151   : > { %v1027_v59 = vmax.f32 %v969_v58, 0.0 }
 0x153   : > { %1059 = vst.msk [vmem:[%s1684_s8 + $0xb8] sm:$0xff] %vm633_vm0, %v1027_v59 }
 0x154 PF: > { %s13_s12 = sadd.s32 1, %s1497_s12  }
 0x155   : > { %p10_p4 = scmp.ge.s32.totalorder %s13_s12, 4  }
 0x157   :  { %12 = sbr.rel (!%p10_p4) target bundleno = 1 (0x1), region = 62 }

// kernel: fwd.38
= control target key start
LH: loop header
LB: loop body
LE: loop exit
PB: predicated region body
PF: predicated region fallthrough
CT: control target
= control target key end

     0   :  { %s798_s12 = smov 0   ;;  %s930_s0 = inlined_call_operand.vmem [shape: bf16[512,32], index: 0, kind: input, shape index: {}]   ;;  %s931_s1 = inlined_call_operand.vmem [shape: bf16[32,128], index: 1, kind: input, shape index: {}]   ;;  %s932_s2 = inlined_call_operand.vmem [shape: f32[1,128], index: 2, kind: input, shape index: {}]   ;;  %s933_s3 = inlined_call_operand.vmem [shape: f32[512,128], index: 3, kind: output, shape index: {}]  }
   0x1 LB: > { %s640_s13 = sadd.s32 4294967295, %s776_s12   ;;  %p644_p0 = scmp.ge.s32.totalorder %s776_s12, 1  ;;  %s776_s12 = sphi %s798_s12, %s13_s12  }
   0x2   : > { %p138_p1 = scmp.lt.s32.totalorder %s776_s12, 3 }
   0x4   : > { %p139_p2 = pnand %p644_p0, %p138_p1 }
   0x5   : > { %s645_s16 = sshll.u32 (!%p139_p2), %s640_s13, 5 }
   0x6   : > { %142 = sbr.rel (%p139_p2) target bundleno = 248 (0xf8), region = 32  ;;  %p163_p3 = scmp.lt.s32.totalorder (!%p139_p2), %s645_s16, 63 }
   0xb   : > { %v752_v0 = vld [vmem:[%s931_s1 + $0x8] sm:$0xff]   ;;  %v753_v1 = vld [vmem:[%s931_s1] sm:$0xff]   ;;  %s935_s16 = smov (!%p163_p3, %s645_s16), 63  ;;  %vm310_vm0 = vcmask 261120  }
   0xc   : > { %704 = vmatprep.subr.bf16.mxu0 %v752_v0  ;;  %740 = vmatprep.subr.bf16.mxu1 %v752_v0  ;;  %s646_s19 = sshll.u32 %s935_s16, 2  ;;  %v855_v18 = vld [vmem:[%s932_s2] ss:$0 sm:$0xff]  ;;  %s648_s25 = sshll.u32 %s935_s16, 3 }
   0xd   : > { %705 = vmatpush3.bf16.msra.mxu0 %v752_v0  ;;  %742 = vmatpush3.bf16.msra.mxu1 %v752_v0  ;;  %s818_s22 = scalar_lea.vmem %s930_s0, %s646_s19  ;;  %s862_s28 = scalar_lea.vmem %s933_s3, %s648_s25 }
   0xe   : > { %706 = vmatprep.subr.bf16.mxu0 %v753_v1  ;;  %741 = vmatprep.subr.bf16.mxu1 %v753_v1  ;;  %v754_v2 = vld [vmem:[%s818_s22] sm:$0xff]   ;;  %v756_v4 = vld [vmem:[%s818_s22 + $0x8] sm:$0xff]   ;;  %v758_v6 = vld [vmem:[%s818_s22 + $0x10] sm:$0xff]  }
   0xf   : > { %v755_v3 = vld [vmem:[%s818_s22 + $0x40] sm:$0xff]   ;;  %708 = vmatprep.mubr.msk.bf16.mxu0 %vm310_vm0, %v754_v2  ;;  %v757_v5 = vld [vmem:[%s818_s22 + $0x48] sm:$0xff]   ;;  %v759_v7 = vld [vmem:[%s818_s22 + $0x50] sm:$0xff]  }
  0x10   : > { %724 = vmatprep.mubr.msk.bf16.mxu1 %vm310_vm0, %v755_v3  ;;  %v760_v8 = vld [vmem:[%s818_s22 + $0x18] sm:$0xff]   ;;  %v762_v10 = vld [vmem:[%s818_s22 + $0x20] sm:$0xff]   ;;  %v764_v12 = vld [vmem:[%s818_s22 + $0x28] sm:$0xff]  }
  0x11   : > { %707 = vmatpush3.bf16.msra.mxu0 %v753_v1  ;;  %743 = vmatpush3.bf16.msra.mxu1 %v753_v1  ;;  %v761_v9 = vld [vmem:[%s818_s22 + $0x58] sm:$0xff]   ;;  %v763_v11 = vld [vmem:[%s818_s22 + $0x60] sm:$0xff]   ;;  %v765_v13 = vld [vmem:[%s818_s22 + $0x68] sm:$0xff]  }
  0x12   : > { %v766_v14 = vld [vmem:[%s818_s22 + $0x30] sm:$0xff]   ;;  %v768_v16 = vld [vmem:[%s818_s22 + $0x38] sm:$0xff]  }
  0x13   : > { %v767_v15 = vld [vmem:[%s818_s22 + $0x70] sm:$0xff]   ;;  %v769_v17 = vld [vmem:[%s818_s22 + $0x78] sm:$0xff]  }
  0x14   : > { %709 = vmatmul.mubr.msk.bf16.vlgmr.msra.gmra.mxu0 %vm310_vm0, %v756_v4  ;;  %725 = vmatmul.mubr.msk.bf16.vlgmr.msra.gmra.mxu1 %vm310_vm0, %v757_v5 }
  0x15   : > { %712 = vmatprep.mubr.msk.bf16.mxu0 %vm310_vm0, %v758_v6  ;;  %728 = vmatprep.mubr.msk.bf16.mxu1 %vm310_vm0, %v759_v7 }
  0x1c   : > { %713 = vmatmul.mubr.msk.bf16.gmra.mxu0 %vm310_vm0, %v760_v8  ;;  %729 = vmatmul.mubr.msk.bf16.gmra.mxu1 %vm310_vm0, %v761_v9 }
  0x1d   : > { %716 = vmatprep.mubr.msk.bf16.mxu0 %vm310_vm0, %v762_v10  ;;  %732 = vmatprep.mubr.msk.bf16.mxu1 %vm310_vm0, %v763_v11 }
  0x24   : > { %717 = vmatmul.mubr.msk.bf16.gmra.mxu0 %vm310_vm0, %v764_v12  ;;  %733 = vmatmul.mubr.msk.bf16.gmra.mxu1 %vm310_vm0, %v765_v13 }
  0x25   : > { %720 = vmatprep.mubr.msk.bf16.mxu0 %vm310_vm0, %v766_v14  ;;  %736 = vmatprep.mubr.msk.bf16.mxu1 %vm310_vm0, %v767_v15 }
  0x2c   : > { %721 = vmatmul.mubr.msk.bf16.gmra.mxu0 %vm310_vm0, %v768_v16  ;;  %737 = vmatmul.mubr.msk.bf16.gmra.mxu1 %vm310_vm0, %v769_v17 }
  0xd4   : > { %v710_v19 = vpop.f32.mrf.mxu0  ;;  %v726_v21 = vpop.f32.mrf.mxu1 }
  0xd5   : > { %v402_v20 = vadd.f32 %v710_v19, %v855_v18  ;;  %v466_v22 = vadd.f32 %v726_v21, %v855_v18 }
  0xd6   : > { %v393_v23 = vpop.f32.mrf.mxu0  ;;  %v457_v26 = vpop.f32.mrf.mxu1 }
  0xd7   : > { %v522_v24 = vmax.f32 %v402_v20, 0.0  ;;  %v394_v25 = vadd.f32 %v855_v18, %v393_v23  ;;  %v538_v27 = vmax.f32 %v466_v22, 0.0  ;;  %v458_v28 = vadd.f32 %v855_v18, %v457_v26 }
  0xd8   : > { %v711_v29 = vpop.f32.mrf.mxu0  ;;  %v727_v32 = vpop.f32.mrf.mxu1 }
  0xd9   : > { %554 = vst [vmem:[%s862_s28 + $0x10] sm:$0xff] %v522_v24  ;;  %v520_v30 = vmax.f32 %v394_v25, 0.0  ;;  %v405_v31 = vadd.f32 %v711_v29, %v855_v18  ;;  %570 = vst [vmem:[%s862_s28 + $0x90] sm:$0xff] %v538_v27  ;;  %v536_v33 = vmax.f32 %v458_v28, 0.0  ;;  %v469_v34 = vadd.f32 %v727_v32, %v855_v18 }
  0xda   : > { %v396_v35 = vpop.f32.mrf.mxu0  ;;  %v460_v38 = vpop.f32.mrf.mxu1 }
  0xdb   : > { %552 = vst [vmem:[%s862_s28] sm:$0xff] %v520_v30  ;;  %v523_v36 = vmax.f32 %v405_v31, 0.0  ;;  %v397_v37 = vadd.f32 %v855_v18, %v396_v35  ;;  %568 = vst [vmem:[%s862_s28 + $0x80] sm:$0xff] %v536_v33  ;;  %v539_v39 = vmax.f32 %v469_v34, 0.0  ;;  %v461_v40 = vadd.f32 %v855_v18, %v460_v38 }
  0xdc   : > { %v714_v41 = vpop.f32.mrf.mxu0  ;;  %v730_v44 = vpop.f32.mrf.mxu1 }
  0xdd   : > { %555 = vst [vmem:[%s862_s28 + $0x18] sm:$0xff] %v523_v36  ;;  %v521_v42 = vmax.f32 %v397_v37, 0.0  ;;  %v418_v43 = vadd.f32 %v714_v41, %v855_v18  ;;  %571 = vst [vmem:[%s862_s28 + $0x98] sm:$0xff] %v539_v39  ;;  %v537_v45 = vmax.f32 %v461_v40, 0.0  ;;  %v482_v46 = vadd.f32 %v730_v44, %v855_v18 }
  0xde   : > { %v409_v47 = vpop.f32.mrf.mxu0  ;;  %v473_v50 = vpop.f32.mrf.mxu1 }
  0xdf   : > { %553 = vst [vmem:[%s862_s28 + $0x8] sm:$0xff] %v521_v42  ;;  %v526_v48 = vmax.f32 %v418_v43, 0.0  ;;  %v410_v49 = vadd.f32 %v855_v18, %v409_v47  ;;  %569 = vst [vmem:[%s862_s28 + $0x88] sm:$0xff] %v537_v45  ;;  %v542_v51 = vmax.f32 %v482_v46, 0.0  ;;  %v474_v52 = vadd.f32 %v855_v18, %v473_v50 }
  0xe0   : > { %v715_v53 = vpop.f32.mrf.mxu0  ;;  %v731_v56 = vpop.f32.mrf.mxu1 }
  0xe1   : > { %558 = vst [vmem:[%s862_s28 + $0x30] sm:$0xff] %v526_v48  ;;  %v524_v54 = vmax.f32 %v410_v49, 0.0  ;;  %v421_v55 = vadd.f32 %v715_v53, %v855_v18  ;;  %574 = vst [vmem:[%s862_s28 + $0xb0] sm:$0xff] %v542_v51  ;;  %v540_v57 = vmax.f32 %v474_v52, 0.0  ;;  %v485_v58 = vadd.f32 %v731_v56, %v855_v18 }
  0xe2   : > { %v412_v59 = vpop.f32.mrf.mxu0  ;;  %v476_v62 = vpop.f32.mrf.mxu1 }
  0xe3   : > { %556 = vst [vmem:[%s862_s28 + $0x20] sm:$0xff] %v524_v54  ;;  %v527_v60 = vmax.f32 %v421_v55, 0.0  ;;  %v413_v61 = vadd.f32 %v855_v18, %v412_v59  ;;  %572 = vst [vmem:[%s862_s28 + $0xa0] sm:$0xff] %v540_v57  ;;  %v543_v63 = vmax.f32 %v485_v58, 0.0  ;;  %v477_v0 = vadd.f32 %v855_v18, %v476_v62 }
  0xe4   : > { %v718_v1 = vpop.f32.mrf.mxu0  ;;  %v734_v4 = vpop.f32.mrf.mxu1 }
  0xe5   : > { %559 = vst [vmem:[%s862_s28 + $0x38] sm:$0xff] %v527_v60  ;;  %v525_v2 = vmax.f32 %v413_v61, 0.0  ;;  %v434_v3 = vadd.f32 %v718_v1, %v855_v18  ;;  %575 = vst [vmem:[%s862_s28 + $0xb8] sm:$0xff] %v543_v63  ;;  %v541_v5 = vmax.f32 %v477_v0, 0.0  ;;  %v498_v6 = vadd.f32 %v734_v4, %v855_v18 }
  0xe6   : > { %v425_v7 = vpop.f32.mrf.mxu0  ;;  %v489_v10 = vpop.f32.mrf.mxu1 }
  0xe7   : > { %557 = vst [vmem:[%s862_s28 + $0x28] sm:$0xff] %v525_v2  ;;  %v530_v8 = vmax.f32 %v434_v3, 0.0  ;;  %v426_v9 = vadd.f32 %v855_v18, %v425_v7  ;;  %573 = vst [vmem:[%s862_s28 + $0xa8] sm:$0xff] %v541_v5  ;;  %v546_v11 = vmax.f32 %v498_v6, 0.0  ;;  %v490_v12 = vadd.f32 %v855_v18, %v489_v10 }
  0xe8   : > { %v719_v13 = vpop.f32.mrf.mxu0  ;;  %v735_v16 = vpop.f32.mrf.mxu1 }
  0xe9   : > { %562 = vst [vmem:[%s862_s28 + $0x50] sm:$0xff] %v530_v8  ;;  %v528_v14 = vmax.f32 %v426_v9, 0.0  ;;  %v437_v15 = vadd.f32 %v719_v13, %v855_v18  ;;  %578 = vst [vmem:[%s862_s28 + $0xd0] sm:$0xff] %v546_v11  ;;  %v544_v17 = vmax.f32 %v490_v12, 0.0  ;;  %v501_v19 = vadd.f32 %v735_v16, %v855_v18 }
  0xea   : > { %v428_v20 = vpop.f32.mrf.mxu0  ;;  %v492_v23 = vpop.f32.mrf.mxu1 }
  0xeb   : > { %560 = vst [vmem:[%s862_s28 + $0x40] sm:$0xff] %v528_v14  ;;  %v531_v21 = vmax.f32 %v437_v15, 0.0  ;;  %v429_v22 = vadd.f32 %v855_v18, %v428_v20  ;;  %576 = vst [vmem:[%s862_s28 + $0xc0] sm:$0xff] %v544_v17  ;;  %v547_v24 = vmax.f32 %v501_v19, 0.0  ;;  %v493_v25 = vadd.f32 %v855_v18, %v492_v23 }
  0xec   : > { %v722_v26 = vpop.f32.mrf.mxu0  ;;  %v738_v29 = vpop.f32.mrf.mxu1 }
  0xed   : > { %563 = vst [vmem:[%s862_s28 + $0x58] sm:$0xff] %v531_v21  ;;  %v529_v27 = vmax.f32 %v429_v22, 0.0  ;;  %v450_v28 = vadd.f32 %v722_v26, %v855_v18  ;;  %579 = vst [vmem:[%s862_s28 + $0xd8] sm:$0xff] %v547_v24  ;;  %v545_v30 = vmax.f32 %v493_v25, 0.0  ;;  %v514_v31 = vadd.f32 %v738_v29, %v855_v18 }
  0xee   : > { %v441_v32 = vpop.f32.mrf.mxu0  ;;  %v505_v35 = vpop.f32.mrf.mxu1 }
  0xef   : > { %561 = vst [vmem:[%s862_s28 + $0x48] sm:$0xff] %v529_v27  ;;  %v534_v33 = vmax.f32 %v450_v28, 0.0  ;;  %v442_v34 = vadd.f32 %v855_v18, %v441_v32  ;;  %577 = vst [vmem:[%s862_s28 + $0xc8] sm:$0xff] %v545_v30  ;;  %v550_v36 = vmax.f32 %v514_v31, 0.0  ;;  %v506_v37 = vadd.f32 %v855_v18, %v505_v35 }
  0xf0   : > { %v723_v38 = vpop.f32.mrf.mxu0  ;;  %v739_v41 = vpop.f32.mrf.mxu1 }
  0xf1   : > { %566 = vst [vmem:[%s862_s28 + $0x70] sm:$0xff] %v534_v33  ;;  %v532_v39 = vmax.f32 %v442_v34, 0.0  ;;  %v453_v40 = vadd.f32 %v723_v38, %v855_v18  ;;  %582 = vst [vmem:[%s862_s28 + $0xf0] sm:$0xff] %v550_v36  ;;  %v548_v42 = vmax.f32 %v506_v37, 0.0  ;;  %v517_v43 = vadd.f32 %v739_v41, %v855_v18 }
  0xf2   : > { %v444_v44 = vpop.f32.mrf.mxu0  ;;  %v508_v47 = vpop.f32.mrf.mxu1 }
  0xf3   : > { %564 = vst [vmem:[%s862_s28 + $0x60] sm:$0xff] %v532_v39  ;;  %v535_v45 = vmax.f32 %v453_v40, 0.0  ;;  %v445_v46 = vadd.f32 %v855_v18, %v444_v44  ;;  %580 = vst [vmem:[%s862_s28 + $0xe0] sm:$0xff] %v548_v42  ;;  %v551_v48 = vmax.f32 %v517_v43, 0.0  ;;  %v509_v49 = vadd.f32 %v855_v18, %v508_v47 }
  0xf5   : > { %567 = vst [vmem:[%s862_s28 + $0x78] sm:$0xff] %v535_v45  ;;  %v533_v50 = vmax.f32 %v445_v46, 0.0  ;;  %583 = vst [vmem:[%s862_s28 + $0xf8] sm:$0xff] %v551_v48  ;;  %v549_v51 = vmax.f32 %v509_v49, 0.0 }
  0xf7   : > { %565 = vst [vmem:[%s862_s28 + $0x68] sm:$0xff] %v533_v50  ;;  %581 = vst [vmem:[%s862_s28 + $0xe8] sm:$0xff] %v549_v51 }
  0xf8 PF: > { %s13_s12 = sadd.s32 1, %s776_s12  }
  0xf9   : > { %p10_p4 = scmp.ge.s32.totalorder %s13_s12, 4  }
  0xfb   :  { %12 = sbr.rel (!%p10_p4) target bundleno = 1 (0x1), region = 62 }

// kernel: fwd.39
= control target key start
LH: loop header
LB: loop body
LE: loop exit
PB: predicated region body
PF: predicated region fallthrough
CT: control target
= control target key end

     0   :  { %s1183_s12 = smov 0   ;;  %s1475_s0 = inlined_call_operand.vmem [shape: bf16[1536,32], index: 0, kind: input, shape index: {}]   ;;  %s1476_s1 = inlined_call_operand.vmem [shape: bf16[32,2], index: 1, kind: input, shape index: {}]   ;;  %s1477_s2 = inlined_call_operand.vmem [shape: f32[1,2], index: 2, kind: input, shape index: {}]   ;;  %s1478_s3 = inlined_call_operand.vmem [shape: f32[1536,2], index: 3, kind: output, shape index: {}]  }
   0x1 LB: > { %s929_s13 = sadd.s32 4294967295, %s1161_s12   ;;  %p933_p0 = scmp.ge.s32.totalorder %s1161_s12, 1  ;;  %s1161_s12 = sphi %s1183_s12, %s13_s12  }
   0x2   : > { %p138_p1 = scmp.lt.s32.totalorder %s1161_s12, 4 }
   0x4   : > { %p139_p2 = pnand %p933_p0, %p138_p1 }
   0x5   : > { %s934_s16 = sshll.u32 (!%p139_p2), %s929_s13, 6 }
   0x6   : > { %142 = sbr.rel (%p139_p2) target bundleno = 278 (0x116), region = 32  ;;  %p163_p3 = scmp.lt.s32.totalorder (!%p139_p2), %s934_s16, 191 }
   0xb   : > { %v1121_v0 = vld [vmem:[%s1476_s1 + $0x8] sm:$0xff]   ;;  %v1122_v1 = vld [vmem:[%s1476_s1] sm:$0xff]   ;;  %s1480_s16 = smov (!%p163_p3, %s934_s16), 191  ;;  %vm422_vm0 = vcmask 261120   ;;  %vm808_vm1 = vcmask 15360  }
   0xc   : > { %1041 = vmatprep.subr.bf16.mxu0 %v1121_v0  ;;  %1109 = vmatprep.subr.bf16.mxu1 %v1121_v0  ;;  %s935_s19 = sshll.u32 %s1480_s16, 2  ;;  %s937_s23 = sshll.u32 %s1480_s16, 3  ;;  %v1273_v34 = vld [vmem:[%s1477_s2] ss:$0 sm:$0xff] }
   0xd   : > { %1042 = vmatpush3.bf16.msra.mxu0 %v1121_v0  ;;  %1111 = vmatpush3.bf16.msra.mxu1 %v1121_v0  ;;  %s1203_s22 = scalar_lea.vmem %s1475_s0, %s935_s19  ;;  %s1278_s28 = scalar_lea.vmem %s1478_s3, %s937_s23 }
   0xe   : > { %1043 = vmatprep.subr.bf16.mxu0 %v1122_v1  ;;  %1110 = vmatprep.subr.bf16.mxu1 %v1122_v1  ;;  %v1123_v2 = vld [vmem:[%s1203_s22] sm:$0xff]   ;;  %v1125_v4 = vld [vmem:[%s1203_s22 + $0x8] sm:$0xff]   ;;  %v1127_v6 = vld [vmem:[%s1203_s22 + $0x10] sm:$0xff]  }
   0xf   : > { %v1124_v3 = vld [vmem:[%s1203_s22 + $0x80] sm:$0xff]   ;;  %1045 = vmatprep.mubr.msk.bf16.mxu0 %vm422_vm0, %v1123_v2  ;;  %v1126_v5 = vld [vmem:[%s1203_s22 + $0x88] sm:$0xff]   ;;  %v1128_v7 = vld [vmem:[%s1203_s22 + $0x90] sm:$0xff]  }
  0x10   : > { %1077 = vmatprep.mubr.msk.bf16.mxu1 %vm422_vm0, %v1124_v3  ;;  %v1129_v8 = vld [vmem:[%s1203_s22 + $0x18] sm:$0xff]   ;;  %v1131_v10 = vld [vmem:[%s1203_s22 + $0x20] sm:$0xff]   ;;  %v1133_v12 = vld [vmem:[%s1203_s22 + $0x28] sm:$0xff]  }
  0x11   : > { %1044 = vmatpush3.bf16.msra.mxu0 %v1122_v1  ;;  %1112 = vmatpush3.bf16.msra.mxu1 %v1122_v1  ;;  %v1130_v9 = vld [vmem:[%s1203_s22 + $0x98] sm:$0xff]   ;;  %v1132_v11 = vld [vmem:[%s1203_s22 + $0xa0] sm:$0xff]   ;;  %v1134_v13 = vld [vmem:[%s1203_s22 + $0xa8] sm:$0xff]  }
  0x12   : > { %v1135_v14 = vld [vmem:[%s1203_s22 + $0x30] sm:$0xff]   ;;  %v1137_v16 = vld [vmem:[%s1203_s22 + $0x38] sm:$0xff]   ;;  %v1139_v18 = vld [vmem:[%s1203_s22 + $0x40] sm:$0xff]  }
  0x13   : > { %v1136_v15 = vld [vmem:[%s1203_s22 + $0xb0] sm:$0xff]   ;;  %v1138_v17 = vld [vmem:[%s1203_s22 + $0xb8] sm:$0xff]   ;;  %v1140_v19 = vld [vmem:[%s1203_s22 + $0xc0] sm:$0xff]  }
  0x14   : > { %1046 = vmatmul.mubr.msk.bf16.vlgmr.msra.gmra.mxu0 %vm422_vm0, %v1125_v4  ;;  %1078 = vmatmul.mubr.msk.bf16.vlgmr.msra.gmra.mxu1 %vm422_vm0, %v1126_v5  ;;  %v1141_v20 = vld [vmem:[%s1203_s22 + $0x48] sm:$0xff]   ;;  %v1143_v22 = vld [vmem:[%s1203_s22 + $0x50] sm:$0xff]   ;;  %v1145_v24 = vld [vmem:[%s1203_s22 + $0x58] sm:$0xff]  }
  0x15   : > { %1049 = vmatprep.mubr.msk.bf16.mxu0 %vm422_vm0, %v1127_v6  ;;  %1081 = vmatprep.mubr.msk.bf16.mxu1 %vm422_vm0, %v1128_v7  ;;  %v1142_v21 = vld [vmem:[%s1203_s22 + $0xc8] sm:$0xff]   ;;  %v1144_v23 = vld [vmem:[%s1203_s22 + $0xd0] sm:$0xff]   ;;  %v1146_v25 = vld [vmem:[%s1203_s22 + $0xd8] sm:$0xff]  }
  0x16   : > { %v1147_v26 = vld [vmem:[%s1203_s22 + $0x60] sm:$0xff]   ;;  %v1149_v28 = vld [vmem:[%s1203_s22 + $0x68] sm:$0xff]   ;;  %v1151_v30 = vld [vmem:[%s1203_s22 + $0x70] sm:$0xff]  }
  0x17   : > { %v1148_v27 = vld [vmem:[%s1203_s22 + $0xe0] sm:$0xff]   ;;  %v1150_v29 = vld [vmem:[%s1203_s22 + $0xe8] sm:$0xff]   ;;  %v1152_v31 = vld [vmem:[%s1203_s22 + $0xf0] sm:$0xff]  }
  0x18   : > { %v1153_v32 = vld [vmem:[%s1203_s22 + $0x78] sm:$0xff]  }
  0x19   : > { %v1154_v33 = vld [vmem:[%s1203_s22 + $0xf8] sm:$0xff]  }
  0x1c   : > { %1050 = vmatmul.mubr.msk.bf16.gmra.mxu0 %vm422_vm0, %v1129_v8  ;;  %1082 = vmatmul.mubr.msk.bf16.gmra.mxu1 %vm422_vm0, %v1130_v9 }
  0x1d   : > { %1053 = vmatprep.mubr.msk.bf16.mxu0 %vm422_vm0, %v1131_v10  ;;  %1085 = vmatprep.mubr.msk.bf16.mxu1 %vm422_vm0, %v1132_v11 }
  0x24   : > { %1054 = vmatmul.mubr.msk.bf16.gmra.mxu0 %vm422_vm0, %v1133_v12  ;;  %1086 = vmatmul.mubr.msk.bf16.gmra.mxu1 %vm422_vm0, %v1134_v13 }
  0x25   : > { %1057 = vmatprep.mubr.msk.bf16.mxu0 %vm422_vm0, %v1135_v14  ;;  %1089 = vmatprep.mubr.msk.bf16.mxu1 %vm422_vm0, %v1136_v15 }
  0x2c   : > { %1058 = vmatmul.mubr.msk.bf16.gmra.mxu0 %vm422_vm0, %v1137_v16  ;;  %1090 = vmatmul.mubr.msk.bf16.gmra.mxu1 %vm422_vm0, %v1138_v17 }
  0x2d   : > { %1061 = vmatprep.mubr.msk.bf16.mxu0 %vm422_vm0, %v1139_v18  ;;  %1093 = vmatprep.mubr.msk.bf16.mxu1 %vm422_vm0, %v1140_v19 }
  0x34   : > { %1062 = vmatmul.mubr.msk.bf16.gmra.mxu0 %vm422_vm0, %v1141_v20  ;;  %1094 = vmatmul.mubr.msk.bf16.gmra.mxu1 %vm422_vm0, %v1142_v21 }
  0x35   : > { %1065 = vmatprep.mubr.msk.bf16.mxu0 %vm422_vm0, %v1143_v22  ;;  %1097 = vmatprep.mubr.msk.bf16.mxu1 %vm422_vm0, %v1144_v23 }
  0x3c   : > { %1066 = vmatmul.mubr.msk.bf16.gmra.mxu0 %vm422_vm0, %v1145_v24  ;;  %1098 = vmatmul.mubr.msk.bf16.gmra.mxu1 %vm422_vm0, %v1146_v25 }
  0x3d   : > { %1069 = vmatprep.mubr.msk.bf16.mxu0 %vm422_vm0, %v1147_v26  ;;  %1101 = vmatprep.mubr.msk.bf16.mxu1 %vm422_vm0, %v1148_v27 }
  0x44   : > { %1070 = vmatmul.mubr.msk.bf16.gmra.mxu0 %vm422_vm0, %v1149_v28  ;;  %1102 = vmatmul.mubr.msk.bf16.gmra.mxu1 %vm422_vm0, %v1150_v29 }
  0x45   : > { %1073 = vmatprep.mubr.msk.bf16.mxu0 %vm422_vm0, %v1151_v30  ;;  %1105 = vmatprep.mubr.msk.bf16.mxu1 %vm422_vm0, %v1152_v31 }
  0x4c   : > { %1074 = vmatmul.mubr.msk.bf16.gmra.mxu0 %vm422_vm0, %v1153_v32  ;;  %1106 = vmatmul.mubr.msk.bf16.gmra.mxu1 %vm422_vm0, %v1154_v33 }
  0xd4   : > { %v1047_v35 = vpop.f32.mrf.mxu0  ;;  %v1079_v37 = vpop.f32.mrf.mxu1 }
  0xd5   : > { %v562_v36 = vadd.f32 %v1047_v35, %v1273_v34  ;;  %v690_v38 = vadd.f32 %v1079_v37, %v1273_v34 }
  0xd6   : > { %v553_v39 = vpop.f32.mrf.mxu0  ;;  %v681_v41 = vpop.f32.mrf.mxu1 }
  0xd7   : > { %811 = vst.msk [vmem:[%s1278_s28 + $0x10] sm:$0xff] %vm808_vm1, %v562_v36  ;;  %v554_v40 = vadd.f32 %v1273_v34, %v553_v39  ;;  %843 = vst.msk [vmem:[%s1278_s28 + $0x110] sm:$0xff] %vm808_vm1, %v690_v38  ;;  %v682_v42 = vadd.f32 %v1273_v34, %v681_v41 }
  0xd8   : > { %v1048_v43 = vpop.f32.mrf.mxu0  ;;  %v1080_v45 = vpop.f32.mrf.mxu1 }
  0xd9   : > { %809 = vst.msk [vmem:[%s1278_s28] sm:$0xff] %vm808_vm1, %v554_v40  ;;  %v565_v44 = vadd.f32 %v1048_v43, %v1273_v34  ;;  %841 = vst.msk [vmem:[%s1278_s28 + $0x100] sm:$0xff] %vm808_vm1, %v682_v42  ;;  %v693_v46 = vadd.f32 %v1080_v45, %v1273_v34 }
  0xda   : > { %v556_v47 = vpop.f32.mrf.mxu0  ;;  %v684_v49 = vpop.f32.mrf.mxu1 }
  0xdb   : > { %812 = vst.msk [vmem:[%s1278_s28 + $0x18] sm:$0xff] %vm808_vm1, %v565_v44  ;;  %v557_v48 = vadd.f32 %v1273_v34, %v556_v47  ;;  %844 = vst.msk [vmem:[%s1278_s28 + $0x118] sm:$0xff] %vm808_vm1, %v693_v46  ;;  %v685_v50 = vadd.f32 %v1273_v34, %v684_v49 }
  0xdc   : > { %v1051_v51 = vpop.f32.mrf.mxu0  ;;  %v1083_v53 = vpop.f32.mrf.mxu1 }
  0xdd   : > { %810 = vst.msk [vmem:[%s1278_s28 + $0x8] sm:$0xff] %vm808_vm1, %v557_v48  ;;  %v578_v52 = vadd.f32 %v1051_v51, %v1273_v34  ;;  %842 = vst.msk [vmem:[%s1278_s28 + $0x108] sm:$0xff] %vm808_vm1, %v685_v50  ;;  %v706_v54 = vadd.f32 %v1083_v53, %v1273_v34 }
  0xde   : > { %v569_v55 = vpop.f32.mrf.mxu0  ;;  %v697_v57 = vpop.f32.mrf.mxu1 }
  0xdf   : > { %815 = vst.msk [vmem:[%s1278_s28 + $0x30] sm:$0xff] %vm808_vm1, %v578_v52  ;;  %v570_v56 = vadd.f32 %v1273_v34, %v569_v55  ;;  %847 = vst.msk [vmem:[%s1278_s28 + $0x130] sm:$0xff] %vm808_vm1, %v706_v54  ;;  %v698_v58 = vadd.f32 %v1273_v34, %v697_v57 }
  0xe0   : > { %v1052_v59 = vpop.f32.mrf.mxu0  ;;  %v1084_v61 = vpop.f32.mrf.mxu1 }
  0xe1   : > { %813 = vst.msk [vmem:[%s1278_s28 + $0x20] sm:$0xff] %vm808_vm1, %v570_v56  ;;  %v581_v60 = vadd.f32 %v1052_v59, %v1273_v34  ;;  %845 = vst.msk [vmem:[%s1278_s28 + $0x120] sm:$0xff] %vm808_vm1, %v698_v58  ;;  %v709_v62 = vadd.f32 %v1084_v61, %v1273_v34 }
  0xe2   : > { %v572_v63 = vpop.f32.mrf.mxu0  ;;  %v700_v1 = vpop.f32.mrf.mxu1 }
  0xe3   : > { %816 = vst.msk [vmem:[%s1278_s28 + $0x38] sm:$0xff] %vm808_vm1, %v581_v60  ;;  %v573_v0 = vadd.f32 %v1273_v34, %v572_v63  ;;  %848 = vst.msk [vmem:[%s1278_s28 + $0x138] sm:$0xff] %vm808_vm1, %v709_v62  ;;  %v701_v2 = vadd.f32 %v1273_v34, %v700_v1 }
  0xe4   : > { %v1055_v3 = vpop.f32.mrf.mxu0  ;;  %v1087_v5 = vpop.f32.mrf.mxu1 }
  0xe5   : > { %814 = vst.msk [vmem:[%s1278_s28 + $0x28] sm:$0xff] %vm808_vm1, %v573_v0  ;;  %v594_v4 = vadd.f32 %v1055_v3, %v1273_v34  ;;  %846 = vst.msk [vmem:[%s1278_s28 + $0x128] sm:$0xff] %vm808_vm1, %v701_v2  ;;  %v722_v6 = vadd.f32 %v1087_v5, %v1273_v34 }
  0xe6   : > { %v585_v7 = vpop.f32.mrf.mxu0  ;;  %v713_v9 = vpop.f32.mrf.mxu1 }
  0xe7   : > { %819 = vst.msk [vmem:[%s1278_s28 + $0x50] sm:$0xff] %vm808_vm1, %v594_v4  ;;  %v586_v8 = vadd.f32 %v1273_v34, %v585_v7  ;;  %851 = vst.msk [vmem:[%s1278_s28 + $0x150] sm:$0xff] %vm808_vm1, %v722_v6  ;;  %v714_v10 = vadd.f32 %v1273_v34, %v713_v9 }
  0xe8   : > { %v1056_v11 = vpop.f32.mrf.mxu0  ;;  %v1088_v13 = vpop.f32.mrf.mxu1 }
  0xe9   : > { %817 = vst.msk [vmem:[%s1278_s28 + $0x40] sm:$0xff] %vm808_vm1, %v586_v8  ;;  %v597_v12 = vadd.f32 %v1056_v11, %v1273_v34  ;;  %849 = vst.msk [vmem:[%s1278_s28 + $0x140] sm:$0xff] %vm808_vm1, %v714_v10  ;;  %v725_v14 = vadd.f32 %v1088_v13, %v1273_v34 }
  0xea   : > { %v588_v15 = vpop.f32.mrf.mxu0  ;;  %v716_v17 = vpop.f32.mrf.mxu1 }
  0xeb   : > { %820 = vst.msk [vmem:[%s1278_s28 + $0x58] sm:$0xff] %vm808_vm1, %v597_v12  ;;  %v589_v16 = vadd.f32 %v1273_v34, %v588_v15  ;;  %852 = vst.msk [vmem:[%s1278_s28 + $0x158] sm:$0xff] %vm808_vm1, %v725_v14  ;;  %v717_v18 = vadd.f32 %v1273_v34, %v716_v17 }
  0xec   : > { %v1059_v19 = vpop.f32.mrf.mxu0  ;;  %v1091_v21 = vpop.f32.mrf.mxu1 }
  0xed   : > { %818 = vst.msk [vmem:[%s1278_s28 + $0x48] sm:$0xff] %vm808_vm1, %v589_v16  ;;  %v610_v20 = vadd.f32 %v1059_v19, %v1273_v34  ;;  %850 = vst.msk [vmem:[%s1278_s28 + $0x148] sm:$0xff] %vm808_vm1, %v717_v18  ;;  %v738_v22 = vadd.f32 %v1091_v21, %v1273_v34 }
  0xee   : > { %v601_v23 = vpop.f32.mrf.mxu0  ;;  %v729_v25 = vpop.f32.mrf.mxu1 }
  0xef   : > { %823 = vst.msk [vmem:[%s1278_s28 + $0x70] sm:$0xff] %vm808_vm1, %v610_v20  ;;  %v602_v24 = vadd.f32 %v1273_v34, %v601_v23  ;;  %855 = vst.msk [vmem:[%s1278_s28 + $0x170] sm:$0xff] %vm808_vm1, %v738_v22  ;;  %v730_v26 = vadd.f32 %v1273_v34, %v729_v25 }
  0xf0   : > { %v1060_v27 = vpop.f32.mrf.mxu0  ;;  %v1092_v29 = vpop.f32.mrf.mxu1 }
  0xf1   : > { %821 = vst.msk [vmem:[%s1278_s28 + $0x60] sm:$0xff] %vm808_vm1, %v602_v24  ;;  %v613_v28 = vadd.f32 %v1060_v27, %v1273_v34  ;;  %853 = vst.msk [vmem:[%s1278_s28 + $0x160] sm:$0xff] %vm808_vm1, %v730_v26  ;;  %v741_v30 = vadd.f32 %v1092_v29, %v1273_v34 }
  0xf2   : > { %v604_v31 = vpop.f32.mrf.mxu0  ;;  %v732_v33 = vpop.f32.mrf.mxu1 }
  0xf3   : > { %824 = vst.msk [vmem:[%s1278_s28 + $0x78] sm:$0xff] %vm808_vm1, %v613_v28  ;;  %v605_v32 = vadd.f32 %v1273_v34, %v604_v31  ;;  %856 = vst.msk [vmem:[%s1278_s28 + $0x178] sm:$0xff] %vm808_vm1, %v741_v30  ;;  %v733_v35 = vadd.f32 %v1273_v34, %v732_v33 }
  0xf4   : > { %v1063_v36 = vpop.f32.mrf.mxu0  ;;  %v1095_v38 = vpop.f32.mrf.mxu1 }
  0xf5   : > { %822 = vst.msk [vmem:[%s1278_s28 + $0x68] sm:$0xff] %vm808_vm1, %v605_v32  ;;  %v626_v37 = vadd.f32 %v1063_v36, %v1273_v34  ;;  %854 = vst.msk [vmem:[%s1278_s28 + $0x168] sm:$0xff] %vm808_vm1, %v733_v35  ;;  %v754_v39 = vadd.f32 %v1095_v38, %v1273_v34 }
  0xf6   : > { %v617_v40 = vpop.f32.mrf.mxu0  ;;  %v745_v42 = vpop.f32.mrf.mxu1 }
  0xf7   : > { %827 = vst.msk [vmem:[%s1278_s28 + $0x90] sm:$0xff] %vm808_vm1, %v626_v37  ;;  %v618_v41 = vadd.f32 %v1273_v34, %v617_v40  ;;  %859 = vst.msk [vmem:[%s1278_s28 + $0x190] sm:$0xff] %vm808_vm1, %v754_v39  ;;  %v746_v43 = vadd.f32 %v1273_v34, %v745_v42 }
  0xf8   : > { %v1064_v44 = vpop.f32.mrf.mxu0  ;;  %v1096_v46 = vpop.f32.mrf.mxu1 }
  0xf9   : > { %825 = vst.msk [vmem:[%s1278_s28 + $0x80] sm:$0xff] %vm808_vm1, %v618_v41  ;;  %v629_v45 = vadd.f32 %v1064_v44, %v1273_v34  ;;  %857 = vst.msk [vmem:[%s1278_s28 + $0x180] sm:$0xff] %vm808_vm1, %v746_v43  ;;  %v757_v47 = vadd.f32 %v1096_v46, %v1273_v34 }
  0xfa   : > { %v620_v48 = vpop.f32.mrf.mxu0  ;;  %v748_v50 = vpop.f32.mrf.mxu1 }
  0xfb   : > { %828 = vst.msk [vmem:[%s1278_s28 + $0x98] sm:$0xff] %vm808_vm1, %v629_v45  ;;  %v621_v49 = vadd.f32 %v1273_v34, %v620_v48  ;;  %860 = vst.msk [vmem:[%s1278_s28 + $0x198] sm:$0xff] %vm808_vm1, %v757_v47  ;;  %v749_v51 = vadd.f32 %v1273_v34, %v748_v50 }
  0xfc   : > { %v1067_v52 = vpop.f32.mrf.mxu0  ;;  %v1099_v54 = vpop.f32.mrf.mxu1 }
  0xfd   : > { %826 = vst.msk [vmem:[%s1278_s28 + $0x88] sm:$0xff] %vm808_vm1, %v621_v49  ;;  %v642_v53 = vadd.f32 %v1067_v52, %v1273_v34  ;;  %858 = vst.msk [vmem:[%s1278_s28 + $0x188] sm:$0xff] %vm808_vm1, %v749_v51  ;;  %v770_v55 = vadd.f32 %v1099_v54, %v1273_v34 }
  0xfe   : > { %v633_v56 = vpop.f32.mrf.mxu0  ;;  %v761_v58 = vpop.f32.mrf.mxu1 }
  0xff   : > { %831 = vst.msk [vmem:[%s1278_s28 + $0xb0] sm:$0xff] %vm808_vm1, %v642_v53  ;;  %v634_v57 = vadd.f32 %v1273_v34, %v633_v56  ;;  %863 = vst.msk [vmem:[%s1278_s28 + $0x1b0] sm:$0xff] %vm808_vm1, %v770_v55  ;;  %v762_v59 = vadd.f32 %v1273_v34, %v761_v58 }
 0x100   : > { %v1068_v60 = vpop.f32.mrf.mxu0  ;;  %v1100_v62 = vpop.f32.mrf.mxu1 }
 0x101   : > { %829 = vst.msk [vmem:[%s1278_s28 + $0xa0] sm:$0xff] %vm808_vm1, %v634_v57  ;;  %v645_v61 = vadd.f32 %v1068_v60, %v1273_v34  ;;  %861 = vst.msk [vmem:[%s1278_s28 + $0x1a0] sm:$0xff] %vm808_vm1, %v762_v59  ;;  %v773_v63 = vadd.f32 %v1100_v62, %v1273_v34 }
 0x102   : > { %v636_v0 = vpop.f32.mrf.mxu0  ;;  %v764_v2 = vpop.f32.mrf.mxu1 }
 0x103   : > { %832 = vst.msk [vmem:[%s1278_s28 + $0xb8] sm:$0xff] %vm808_vm1, %v645_v61  ;;  %v637_v1 = vadd.f32 %v1273_v34, %v636_v0  ;;  %864 = vst.msk [vmem:[%s1278_s28 + $0x1b8] sm:$0xff] %vm808_vm1, %v773_v63  ;;  %v765_v3 = vadd.f32 %v1273_v34, %v764_v2 }
 0x104   : > { %v1071_v4 = vpop.f32.mrf.mxu0  ;;  %v1103_v6 = vpop.f32.mrf.mxu1 }
 0x105   : > { %830 = vst.msk [vmem:[%s1278_s28 + $0xa8] sm:$0xff] %vm808_vm1, %v637_v1  ;;  %v658_v5 = vadd.f32 %v1071_v4, %v1273_v34  ;;  %862 = vst.msk [vmem:[%s1278_s28 + $0x1a8] sm:$0xff] %vm808_vm1, %v765_v3  ;;  %v786_v7 = vadd.f32 %v1103_v6, %v1273_v34 }
 0x106   : > { %v649_v8 = vpop.f32.mrf.mxu0  ;;  %v777_v10 = vpop.f32.mrf.mxu1 }
 0x107   : > { %835 = vst.msk [vmem:[%s1278_s28 + $0xd0] sm:$0xff] %vm808_vm1, %v658_v5  ;;  %v650_v9 = vadd.f32 %v1273_v34, %v649_v8  ;;  %867 = vst.msk [vmem:[%s1278_s28 + $0x1d0] sm:$0xff] %vm808_vm1, %v786_v7  ;;  %v778_v11 = vadd.f32 %v1273_v34, %v777_v10 }
 0x108   : > { %v1072_v12 = vpop.f32.mrf.mxu0  ;;  %v1104_v14 = vpop.f32.mrf.mxu1 }
 0x109   : > { %833 = vst.msk [vmem:[%s1278_s28 + $0xc0] sm:$0xff] %vm808_vm1, %v650_v9  ;;  %v661_v13 = vadd.f32 %v1072_v12, %v1273_v34  ;;  %865 = vst.msk [vmem:[%s1278_s28 + $0x1c0] sm:$0xff] %vm808_vm1, %v778_v11  ;;  %v789_v15 = vadd.f32 %v1104_v14, %v1273_v34 }
 0x10a   : > { %v652_v16 = vpop.f32.mrf.mxu0  ;;  %v780_v18 = vpop.f32.mrf.mxu1 }
 0x10b   : > { %836 = vst.msk [vmem:[%s1278_s28 + $0xd8] sm:$0xff] %vm808_vm1, %v661_v13  ;;  %v653_v17 = vadd.f32 %v1273_v34, %v652_v16  ;;  %868 = vst.msk [vmem:[%s1278_s28 + $0x1d8] sm:$0xff] %vm808_vm1, %v789_v15  ;;  %v781_v19 = vadd.f32 %v1273_v34, %v780_v18 }
 0x10c   : > { %v1075_v20 = vpop.f32.mrf.mxu0  ;;  %v1107_v22 = vpop.f32.mrf.mxu1 }
 0x10d   : > { %834 = vst.msk [vmem:[%s1278_s28 + $0xc8] sm:$0xff] %vm808_vm1, %v653_v17  ;;  %v674_v21 = vadd.f32 %v1075_v20, %v1273_v34  ;;  %866 = vst.msk [vmem:[%s1278_s28 + $0x1c8] sm:$0xff] %vm808_vm1, %v781_v19  ;;  %v802_v23 = vadd.f32 %v1107_v22, %v1273_v34 }
 0x10e   : > { %v665_v24 = vpop.f32.mrf.mxu0  ;;  %v793_v26 = vpop.f32.mrf.mxu1 }
 0x10f   : > { %839 = vst.msk [vmem:[%s1278_s28 + $0xf0] sm:$0xff] %vm808_vm1, %v674_v21  ;;  %v666_v25 = vadd.f32 %v1273_v34, %v665_v24  ;;  %871 = vst.msk [vmem:[%s1278_s28 + $0x1f0] sm:$0xff] %vm808_vm1, %v802_v23  ;;  %v794_v27 = vadd.f32 %v1273_v34, %v793_v26 }
 0x110   : > { %v1076_v28 = vpop.f32.mrf.mxu0  ;;  %v1108_v30 = vpop.f32.mrf.mxu1 }
 0x111   : > { %837 = vst.msk [vmem:[%s1278_s28 + $0xe0] sm:$0xff] %vm808_vm1, %v666_v25  ;;  %v677_v29 = vadd.f32 %v1076_v28, %v1273_v34  ;;  %869 = vst.msk [vmem:[%s1278_s28 + $0x1e0] sm:$0xff] %vm808_vm1, %v794_v27  ;;  %v805_v31 = vadd.f32 %v1108_v30, %v1273_v34 }
 0x112   : > { %v668_v32 = vpop.f32.mrf.mxu0  ;;  %v796_v35 = vpop.f32.mrf.mxu1 }
 0x113   : > { %840 = vst.msk [vmem:[%s1278_s28 + $0xf8] sm:$0xff] %vm808_vm1, %v677_v29  ;;  %v669_v33 = vadd.f32 %v1273_v34, %v668_v32  ;;  %872 = vst.msk [vmem:[%s1278_s28 + $0x1f8] sm:$0xff] %vm808_vm1, %v805_v31  ;;  %v797_v36 = vadd.f32 %v1273_v34, %v796_v35 }
 0x115   : > { %838 = vst.msk [vmem:[%s1278_s28 + $0xe8] sm:$0xff] %vm808_vm1, %v669_v33  ;;  %870 = vst.msk [vmem:[%s1278_s28 + $0x1e8] sm:$0xff] %vm808_vm1, %v797_v36 }
 0x116 PF: > { %s13_s12 = sadd.s32 1, %s1161_s12  }
 0x117   : > { %p10_p4 = scmp.ge.s32.totalorder %s13_s12, 5  }
 0x119   :  { %12 = sbr.rel (!%p10_p4) target bundleno = 1 (0x1), region = 62 }

</bundles_post_ra>
